<compile_context>
chip_gen: v7x
topology: tpu7x:2x2x1
jax: 0.10.0
libtpu: 0.0.40
codegen_flags: <defaults>
</compile_context>

<pallas_src>
import functools
import math

import jax
import jax.numpy as jnp
from jax import lax
from jax.experimental import pallas as pl
from jax.experimental.pallas import tpu as pltpu


def _attention_kernel(x_ref, g_ref, wqkv_ref, wout_ref, bout_ref, o_ref,
                      oh_scr, *, heads, dim_head):
    """Grid = (batch,).  One full batch element (all heads) per grid step.

    x_ref    : (1, N, C)          f32   input (channels-last, spatial flattened)
    g_ref    : (1, C)             f32   RMSNorm gain, pre-multiplied by sqrt(C)
    wqkv_ref : (C, 3*hidden)      bf16  fused qkv weight, columns [q_all | k_all | v_all],
                                        q columns pre-scaled by dim_head**-0.5
    wout_ref : (hidden, C)        bf16  output projection weight (rows match head-concat order)
    bout_ref : (1, C)             f32   output projection bias
    o_ref    : (1, N, C)                output
    oh_scr   : (N, hidden)        bf16  scratch: per-head outputs concatenated along lanes
    """
    dh = dim_head
    hidden = heads * dim_head

    # ---- RMSNorm over channels (sqrt(C) folded into g): rsqrt + multiply ----
    x = x_ref[0]                                               # (N, C) f32
    ss = jnp.sum(x * x, axis=-1, keepdims=True)
    xn = x * lax.rsqrt(jnp.maximum(ss, 1e-24)) * g_ref[...]    # g already * sqrt(C)
    xn_b = xn.astype(jnp.bfloat16)

    # ---- fused qkv projection for ALL heads: (N, C) @ (C, 3*hidden), lane-dense ----
    qkv = jnp.dot(xn_b, wqkv_ref[...],
                  preferred_element_type=jnp.float32)          # (N, 3*hidden) f32
    q_all = qkv[:, 0 * hidden:1 * hidden]                      # tile-aligned splits
    k_all = qkv[:, 1 * hidden:2 * hidden]
    v_all = qkv[:, 2 * hidden:3 * hidden]

    # ---- per-head softmax attention (short static loop, unrolled) ----
    for h in range(heads):
        q = q_all[:, h * dh:(h + 1) * dh].astype(jnp.bfloat16)  # scale folded into weights
        k = k_all[:, h * dh:(h + 1) * dh].astype(jnp.bfloat16)
        v = v_all[:, h * dh:(h + 1) * dh].astype(jnp.bfloat16)

        sim = lax.dot_general(q, k, (((1,), (1,)), ((), ())),    # == q @ k.T, no explicit .T
                              preferred_element_type=jnp.float32)  # (N, N) f32
        sim = sim - jnp.max(sim, axis=-1, keepdims=True)
        p = jnp.exp(sim)                                         # f32 (v5e-safe)
        denom = jnp.sum(p, axis=-1, keepdims=True)

        # deferred normalization: scale the (N, dh) result, not the (N, N) probabilities
        oh = jnp.dot(p.astype(jnp.bfloat16), v,
                     preferred_element_type=jnp.float32)         # (N, dh) f32
        oh = oh * pl.reciprocal(denom, approx=True)
        oh_scr[:, h * dh:(h + 1) * dh] = oh.astype(jnp.bfloat16)

    # ---- single K=hidden output projection + bias ----
    out = jnp.dot(oh_scr[...], wout_ref[...],
                  preferred_element_type=jnp.float32)            # (N, C) f32
    o_ref[0] = (out + bout_ref[...]).astype(o_ref.dtype)


def attention_forward(x, g, w_qkv, w_out, b_out, *, heads, dim_head):
    """x: (B, C, H, W) NCHW float32 — mirrors the PyTorch module's forward."""
    B, C, H, W = x.shape
    N = H * W
    dh = dim_head
    hidden = heads * dh
    scale = dh ** -0.5

    # TODO(synk): layout plumbing — accept/emit NHWC upstream to drop these HBM transposes.
    xs = jnp.transpose(x, (0, 2, 3, 1)).reshape(B, N, C).astype(jnp.float32)

    # fold sqrt(C) into the RMSNorm gain
    g2 = (g.reshape(1, C) * (C ** 0.5)).astype(jnp.float32)

    # fused qkv weight (3*hidden, C, 1, 1) -> (C, 3*hidden), columns [q_all | k_all | v_all]
    # so the q/k/v split is 128-lane aligned; q columns pre-scaled by dim_head**-0.5;
    # pre-transposed so the kernel does xn @ W with no in-kernel transpose.
    w = w_qkv.reshape(3, hidden, C)                  # [s(q/k/v), h*dh+d, in_ch]
    w = w.at[0].multiply(scale)
    wqkv2 = jnp.transpose(w, (2, 0, 1)).reshape(C, 3 * hidden).astype(jnp.bfloat16)

    # output projection (C, hidden, 1, 1) -> (hidden, C); row order h*dh+d matches the
    # head-concat layout of the oh buffer.
    wout2 = jnp.transpose(w_out.reshape(C, hidden)).astype(jnp.bfloat16)

    bout2 = b_out.reshape(1, C).astype(jnp.float32)

    kernel = functools.partial(_attention_kernel, heads=heads, dim_head=dh)

    y = pl.pallas_call(
        kernel,
        out_shape=jax.ShapeDtypeStruct((B, N, C), x.dtype),
        grid_spec=pltpu.PrefetchScalarGridSpec(
            num_scalar_prefetch=0,
            grid=(B,),
            in_specs=[
                pl.BlockSpec((1, N, C), lambda b: (b, 0, 0)),          # x
                pl.BlockSpec((1, C), lambda b: (0, 0)),                # g * sqrt(C)
                pl.BlockSpec((C, 3 * hidden), lambda b: (0, 0)),       # fused qkv weight (grid-resident)
                pl.BlockSpec((hidden, C), lambda b: (0, 0)),           # out weight (grid-resident)
                pl.BlockSpec((1, C), lambda b: (0, 0)),                # out bias
            ],
            out_specs=pl.BlockSpec((1, N, C), lambda b: (b, 0, 0)),
            scratch_shapes=[
                pltpu.VMEM((N, hidden), jnp.bfloat16),   # head-concat buffer
            ],
        ),
        compiler_params=pltpu.CompilerParams(
            dimension_semantics=("parallel",),
            vmem_limit_bytes=32 * 1024 * 1024,
        ),
    )(xs, g2, wqkv2, wout2, bout2)

    return jnp.transpose(y.reshape(B, H, W, C), (0, 3, 1, 2))   # back to NCHW


def attention_reference(x, g, w_qkv, w_out, b_out, *, heads, dim_head):
    """Pure-JAX f32 reference of the PyTorch forward (for a sanity check)."""
    B, C, H, W = x.shape
    hidden = heads * dim_head
    scale = dim_head ** -0.5

    l2 = jnp.sqrt(jnp.sum(x * x, axis=1, keepdims=True))
    xn = x / jnp.maximum(l2, 1e-12) * g * (C ** 0.5)

    xn_f = jnp.transpose(xn, (0, 2, 3, 1)).reshape(B, H * W, C)
    qkv = xn_f @ w_qkv.reshape(3 * hidden, C).T                      # (B, N, 3*hidden)
    q, k, v = jnp.split(qkv, 3, axis=-1)

    def heads_split(t):  # (B, N, hidden) -> (B, heads, N, dh)
        return jnp.transpose(t.reshape(B, H * W, heads, dim_head), (0, 2, 1, 3))

    q, k, v = map(heads_split, (q, k, v))
    sim = jnp.einsum('bhid,bhjd->bhij', q, k) * scale
    attn = jax.nn.softmax(sim, axis=-1)
    out = jnp.einsum('bhij,bhjd->bhid', attn, v)                     # (B, heads, N, dh)
    out = jnp.transpose(out, (0, 2, 1, 3)).reshape(B, H * W, hidden)
    y = out @ w_out.reshape(C, hidden).T + b_out.reshape(1, 1, C)
    return jnp.transpose(y.reshape(B, H, W, C), (0, 3, 1, 2))


if __name__ == "__main__":
    # Module hyperparameters (consistent with the PyTorch __init__ defaults)
    dim = 32
    heads = 4
    dim_head = 32
    hidden = heads * dim_head
    B, H, W = 2, 16, 16

    key = jax.random.PRNGKey(0)
    k_x, k_qkv, k_out, k_bias = jax.random.split(key, 4)

    x = jax.random.normal(k_x, (B, dim, H, W), dtype=jnp.float32)

    # Deterministic parameter init (shapes follow nn.Conv2d / RMSNorm in __init__)
    g = jnp.ones((1, dim, 1, 1), dtype=jnp.float32)                        # RMSNorm.g
    w_qkv = jax.random.normal(k_qkv, (3 * hidden, dim, 1, 1), jnp.float32) * (1.0 / math.sqrt(dim))
    w_out = jax.random.normal(k_out, (dim, hidden, 1, 1), jnp.float32) * (1.0 / math.sqrt(hidden))
    b_out = jax.random.normal(k_bias, (dim,), jnp.float32) * 0.01

    out = attention_forward(x, g, w_qkv, w_out, b_out, heads=heads, dim_head=dim_head)
    out = jax.block_until_ready(out)

    ref = attention_reference(x, g, w_qkv, w_out, b_out, heads=heads, dim_head=dim_head)
    assert out.shape == (B, dim, H, W)
    max_err = float(jnp.max(jnp.abs(out - ref)))
    # bf16 MXU operands + approx reciprocal -> relaxed tolerance vs the f32 reference
    assert jnp.allclose(out, ref, atol=5e-2, rtol=5e-2), f"Pallas kernel mismatch, max abs err={max_err}"

    print("KERNEL_OK")
</pallas_src>

<mosaic_0001>
module attributes {stable_mosaic.version = 11 : i64} {
  func.func @_attention_kernel(%arg0: i32, %arg1: memref<1x256x32xf32, #tpu.memory_space<vmem>>, %arg2: memref<1x32xf32, #tpu.memory_space<vmem>>, %arg3: memref<32x384xbf16, #tpu.memory_space<vmem>>, %arg4: memref<128x32xbf16, #tpu.memory_space<vmem>>, %arg5: memref<1x32xf32, #tpu.memory_space<vmem>>, %arg6: memref<1x256x32xf32, #tpu.memory_space<vmem>>, %arg7: memref<256x128xbf16, #tpu.memory_space<vmem>>) attributes {dimension_semantics = [#tpu.dimension_semantics<parallel>], iteration_bounds = array<i64: 2>, scalar_prefetch = 0 : i64, scratch_operands = 1 : i64, tpu.core_type = #tpu.core_type<tc>, window_params = [{transform_indices = @transform_0, window_bounds = array<i64: 1, 256, 32>}, {pipeline_mode = #tpu.pipeline_mode<synchronous>, transform_indices = @transform_1, window_bounds = array<i64: 1, 32>}, {pipeline_mode = #tpu.pipeline_mode<synchronous>, transform_indices = @transform_2, window_bounds = array<i64: 32, 384>}, {pipeline_mode = #tpu.pipeline_mode<synchronous>, transform_indices = @transform_3, window_bounds = array<i64: 128, 32>}, {pipeline_mode = #tpu.pipeline_mode<synchronous>, transform_indices = @transform_4, window_bounds = array<i64: 1, 32>}, {transform_indices = @transform_5, window_bounds = array<i64: 1, 256, 32>}]} {
    %c0 = arith.constant 0 : index
    %c0_0 = arith.constant 0 : index
    %c0_1 = arith.constant 0 : index
    %0 = vector.load %arg1[%c0, %c0_0, %c0_1] : memref<1x256x32xf32, #tpu.memory_space<vmem>>, vector<1x256x32xf32>
    %1 = vector.shape_cast %0 : vector<1x256x32xf32> to vector<256x32xf32>
    %2 = arith.mulf %1, %1 : vector<256x32xf32>
    %cst = arith.constant dense<0.000000e+00> : vector<256xf32>
    %3 = vector.multi_reduction <add>, %2, %cst [1] : vector<256x32xf32> to vector<256xf32>
    %4 = vector.shape_cast %3 : vector<256xf32> to vector<256x1xf32>
    %cst_2 = arith.constant 1.000000e-24 : f32
    %5 = vector.broadcast %cst_2 : f32 to vector<256x1xf32>
    %6 = arith.maximumf %4, %5 : vector<256x1xf32>
    %7 = math.rsqrt %6 : vector<256x1xf32>
    %8 = vector.broadcast %7 : vector<256x1xf32> to vector<256x32xf32>
    %9 = arith.mulf %1, %8 : vector<256x32xf32>
    %c0_3 = arith.constant 0 : index
    %c0_4 = arith.constant 0 : index
    %10 = vector.load %arg2[%c0_3, %c0_4] : memref<1x32xf32, #tpu.memory_space<vmem>>, vector<1x32xf32>
    %11 = vector.broadcast %10 : vector<1x32xf32> to vector<256x32xf32>
    %12 = arith.mulf %9, %11 : vector<256x32xf32>
    %13 = arith.truncf %12 : vector<256x32xf32> to vector<256x32xbf16>
    %c0_5 = arith.constant 0 : index
    %c0_6 = arith.constant 0 : index
    %14 = vector.load %arg3[%c0_5, %c0_6] : memref<32x384xbf16, #tpu.memory_space<vmem>>, vector<32x384xbf16>
    %cst_7 = arith.constant dense<0.000000e+00> : vector<256x384xf32>
    %15 = tpu.matmul %13, %14, %cst_7 {dimension_numbers = #tpu.dot_dimension_numbers<[1], [0], [0], [1], [0, 0, 1, 1], [], []>} : vector<256x32xbf16>, vector<32x384xbf16>, vector<256x384xf32> -> vector<256x384xf32>
    %16 = vector.extract_strided_slice %15 {offsets = [0, 0], sizes = [256, 128], strides = [1, 1]} : vector<256x384xf32> to vector<256x128xf32>
    %17 = vector.extract_strided_slice %15 {offsets = [0, 128], sizes = [256, 128], strides = [1, 1]} : vector<256x384xf32> to vector<256x128xf32>
    %18 = vector.extract_strided_slice %15 {offsets = [0, 256], sizes = [256, 128], strides = [1, 1]} : vector<256x384xf32> to vector<256x128xf32>
    %19 = vector.extract_strided_slice %16 {offsets = [0, 0], sizes = [256, 32], strides = [1, 1]} : vector<256x128xf32> to vector<256x32xf32>
    %20 = arith.truncf %19 : vector<256x32xf32> to vector<256x32xbf16>
    %21 = vector.extract_strided_slice %17 {offsets = [0, 0], sizes = [256, 32], strides = [1, 1]} : vector<256x128xf32> to vector<256x32xf32>
    %22 = arith.truncf %21 : vector<256x32xf32> to vector<256x32xbf16>
    %23 = vector.extract_strided_slice %18 {offsets = [0, 0], sizes = [256, 32], strides = [1, 1]} : vector<256x128xf32> to vector<256x32xf32>
    %24 = arith.truncf %23 : vector<256x32xf32> to vector<256x32xbf16>
    %cst_8 = arith.constant dense<0.000000e+00> : vector<256x256xf32>
    %25 = tpu.matmul %20, %22, %cst_8 {dimension_numbers = #tpu.dot_dimension_numbers<[1], [1], [0], [0], [0, 0, 1, 0], [], []>} : vector<256x32xbf16>, vector<256x32xbf16>, vector<256x256xf32> -> vector<256x256xf32>
    %cst_9 = arith.constant dense<0xFF800000> : vector<256xf32>
    %26 = vector.multi_reduction <maximumf>, %25, %cst_9 [1] : vector<256x256xf32> to vector<256xf32>
    %27 = vector.shape_cast %26 : vector<256xf32> to vector<256x1xf32>
    %28 = vector.broadcast %27 : vector<256x1xf32> to vector<256x256xf32>
    %29 = arith.subf %25, %28 : vector<256x256xf32>
    %30 = math.exp %29 : vector<256x256xf32>
    %cst_10 = arith.constant dense<0.000000e+00> : vector<256xf32>
    %31 = vector.multi_reduction <add>, %30, %cst_10 [1] : vector<256x256xf32> to vector<256xf32>
    %32 = vector.shape_cast %31 : vector<256xf32> to vector<256x1xf32>
    %33 = arith.truncf %30 : vector<256x256xf32> to vector<256x256xbf16>
    %cst_11 = arith.constant dense<0.000000e+00> : vector<256x32xf32>
    %34 = tpu.matmul %33, %24, %cst_11 {dimension_numbers = #tpu.dot_dimension_numbers<[1], [0], [0], [1], [0, 0, 1, 1], [], []>} : vector<256x256xbf16>, vector<256x32xbf16>, vector<256x32xf32> -> vector<256x32xf32>
    %35 = tpu.reciprocal %32 {approx = true} : vector<256x1xf32> -> vector<256x1xf32>
    %36 = vector.broadcast %35 : vector<256x1xf32> to vector<256x32xf32>
    %37 = arith.mulf %34, %36 : vector<256x32xf32>
    %38 = arith.truncf %37 : vector<256x32xf32> to vector<256x32xbf16>
    %c0_12 = arith.constant 0 : index
    %c0_13 = arith.constant 0 : index
    %39 = vector.load %arg7[%c0_12, %c0_13] : memref<256x128xbf16, #tpu.memory_space<vmem>>, vector<256x32xbf16>
    tpu.vector_store %arg7[%c0_12, %c0_13], %38 {strides = array<i32>} : memref<256x128xbf16, #tpu.memory_space<vmem>>, vector<256x32xbf16>,
    %40 = vector.extract_strided_slice %16 {offsets = [0, 32], sizes = [256, 32], strides = [1, 1]} : vector<256x128xf32> to vector<256x32xf32>
    %41 = arith.truncf %40 : vector<256x32xf32> to vector<256x32xbf16>
    %42 = vector.extract_strided_slice %17 {offsets = [0, 32], sizes = [256, 32], strides = [1, 1]} : vector<256x128xf32> to vector<256x32xf32>
    %43 = arith.truncf %42 : vector<256x32xf32> to vector<256x32xbf16>
    %44 = vector.extract_strided_slice %18 {offsets = [0, 32], sizes = [256, 32], strides = [1, 1]} : vector<256x128xf32> to vector<256x32xf32>
    %45 = arith.truncf %44 : vector<256x32xf32> to vector<256x32xbf16>
    %cst_14 = arith.constant dense<0.000000e+00> : vector<256x256xf32>
    %46 = tpu.matmul %41, %43, %cst_14 {dimension_numbers = #tpu.dot_dimension_numbers<[1], [1], [0], [0], [0, 0, 1, 0], [], []>} : vector<256x32xbf16>, vector<256x32xbf16>, vector<256x256xf32> -> vector<256x256xf32>
    %cst_15 = arith.constant dense<0xFF800000> : vector<256xf32>
    %47 = vector.multi_reduction <maximumf>, %46, %cst_15 [1] : vector<256x256xf32> to vector<256xf32>
    %48 = vector.shape_cast %47 : vector<256xf32> to vector<256x1xf32>
    %49 = vector.broadcast %48 : vector<256x1xf32> to vector<256x256xf32>
    %50 = arith.subf %46, %49 : vector<256x256xf32>
    %51 = math.exp %50 : vector<256x256xf32>
    %cst_16 = arith.constant dense<0.000000e+00> : vector<256xf32>
    %52 = vector.multi_reduction <add>, %51, %cst_16 [1] : vector<256x256xf32> to vector<256xf32>
    %53 = vector.shape_cast %52 : vector<256xf32> to vector<256x1xf32>
    %54 = arith.truncf %51 : vector<256x256xf32> to vector<256x256xbf16>
    %cst_17 = arith.constant dense<0.000000e+00> : vector<256x32xf32>
    %55 = tpu.matmul %54, %45, %cst_17 {dimension_numbers = #tpu.dot_dimension_numbers<[1], [0], [0], [1], [0, 0, 1, 1], [], []>} : vector<256x256xbf16>, vector<256x32xbf16>, vector<256x32xf32> -> vector<256x32xf32>
    %56 = tpu.reciprocal %53 {approx = true} : vector<256x1xf32> -> vector<256x1xf32>
    %57 = vector.broadcast %56 : vector<256x1xf32> to vector<256x32xf32>
    %58 = arith.mulf %55, %57 : vector<256x32xf32>
    %59 = arith.truncf %58 : vector<256x32xf32> to vector<256x32xbf16>
    %c0_18 = arith.constant 0 : index
    %c32 = arith.constant 32 : index
    %60 = vector.load %arg7[%c0_18, %c32] : memref<256x128xbf16, #tpu.memory_space<vmem>>, vector<256x32xbf16>
    tpu.vector_store %arg7[%c0_18, %c32], %59 {strides = array<i32>} : memref<256x128xbf16, #tpu.memory_space<vmem>>, vector<256x32xbf16>,
    %61 = vector.extract_strided_slice %16 {offsets = [0, 64], sizes = [256, 32], strides = [1, 1]} : vector<256x128xf32> to vector<256x32xf32>
    %62 = arith.truncf %61 : vector<256x32xf32> to vector<256x32xbf16>
    %63 = vector.extract_strided_slice %17 {offsets = [0, 64], sizes = [256, 32], strides = [1, 1]} : vector<256x128xf32> to vector<256x32xf32>
    %64 = arith.truncf %63 : vector<256x32xf32> to vector<256x32xbf16>
    %65 = vector.extract_strided_slice %18 {offsets = [0, 64], sizes = [256, 32], strides = [1, 1]} : vector<256x128xf32> to vector<256x32xf32>
    %66 = arith.truncf %65 : vector<256x32xf32> to vector<256x32xbf16>
    %cst_19 = arith.constant dense<0.000000e+00> : vector<256x256xf32>
    %67 = tpu.matmul %62, %64, %cst_19 {dimension_numbers = #tpu.dot_dimension_numbers<[1], [1], [0], [0], [0, 0, 1, 0], [], []>} : vector<256x32xbf16>, vector<256x32xbf16>, vector<256x256xf32> -> vector<256x256xf32>
    %cst_20 = arith.constant dense<0xFF800000> : vector<256xf32>
    %68 = vector.multi_reduction <maximumf>, %67, %cst_20 [1] : vector<256x256xf32> to vector<256xf32>
    %69 = vector.shape_cast %68 : vector<256xf32> to vector<256x1xf32>
    %70 = vector.broadcast %69 : vector<256x1xf32> to vector<256x256xf32>
    %71 = arith.subf %67, %70 : vector<256x256xf32>
    %72 = math.exp %71 : vector<256x256xf32>
    %cst_21 = arith.constant dense<0.000000e+00> : vector<256xf32>
    %73 = vector.multi_reduction <add>, %72, %cst_21 [1] : vector<256x256xf32> to vector<256xf32>
    %74 = vector.shape_cast %73 : vector<256xf32> to vector<256x1xf32>
    %75 = arith.truncf %72 : vector<256x256xf32> to vector<256x256xbf16>
    %cst_22 = arith.constant dense<0.000000e+00> : vector<256x32xf32>
    %76 = tpu.matmul %75, %66, %cst_22 {dimension_numbers = #tpu.dot_dimension_numbers<[1], [0], [0], [1], [0, 0, 1, 1], [], []>} : vector<256x256xbf16>, vector<256x32xbf16>, vector<256x32xf32> -> vector<256x32xf32>
    %77 = tpu.reciprocal %74 {approx = true} : vector<256x1xf32> -> vector<256x1xf32>
    %78 = vector.broadcast %77 : vector<256x1xf32> to vector<256x32xf32>
    %79 = arith.mulf %76, %78 : vector<256x32xf32>
    %80 = arith.truncf %79 : vector<256x32xf32> to vector<256x32xbf16>
    %c0_23 = arith.constant 0 : index
    %c64 = arith.constant 64 : index
    %81 = vector.load %arg7[%c0_23, %c64] : memref<256x128xbf16, #tpu.memory_space<vmem>>, vector<256x32xbf16>
    tpu.vector_store %arg7[%c0_23, %c64], %80 {strides = array<i32>} : memref<256x128xbf16, #tpu.memory_space<vmem>>, vector<256x32xbf16>,
    %82 = vector.extract_strided_slice %16 {offsets = [0, 96], sizes = [256, 32], strides = [1, 1]} : vector<256x128xf32> to vector<256x32xf32>
    %83 = arith.truncf %82 : vector<256x32xf32> to vector<256x32xbf16>
    %84 = vector.extract_strided_slice %17 {offsets = [0, 96], sizes = [256, 32], strides = [1, 1]} : vector<256x128xf32> to vector<256x32xf32>
    %85 = arith.truncf %84 : vector<256x32xf32> to vector<256x32xbf16>
    %86 = vector.extract_strided_slice %18 {offsets = [0, 96], sizes = [256, 32], strides = [1, 1]} : vector<256x128xf32> to vector<256x32xf32>
    %87 = arith.truncf %86 : vector<256x32xf32> to vector<256x32xbf16>
    %cst_24 = arith.constant dense<0.000000e+00> : vector<256x256xf32>
    %88 = tpu.matmul %83, %85, %cst_24 {dimension_numbers = #tpu.dot_dimension_numbers<[1], [1], [0], [0], [0, 0, 1, 0], [], []>} : vector<256x32xbf16>, vector<256x32xbf16>, vector<256x256xf32> -> vector<256x256xf32>
    %cst_25 = arith.constant dense<0xFF800000> : vector<256xf32>
    %89 = vector.multi_reduction <maximumf>, %88, %cst_25 [1] : vector<256x256xf32> to vector<256xf32>
    %90 = vector.shape_cast %89 : vector<256xf32> to vector<256x1xf32>
    %91 = vector.broadcast %90 : vector<256x1xf32> to vector<256x256xf32>
    %92 = arith.subf %88, %91 : vector<256x256xf32>
    %93 = math.exp %92 : vector<256x256xf32>
    %cst_26 = arith.constant dense<0.000000e+00> : vector<256xf32>
    %94 = vector.multi_reduction <add>, %93, %cst_26 [1] : vector<256x256xf32> to vector<256xf32>
    %95 = vector.shape_cast %94 : vector<256xf32> to vector<256x1xf32>
    %96 = arith.truncf %93 : vector<256x256xf32> to vector<256x256xbf16>
    %cst_27 = arith.constant dense<0.000000e+00> : vector<256x32xf32>
    %97 = tpu.matmul %96, %87, %cst_27 {dimension_numbers = #tpu.dot_dimension_numbers<[1], [0], [0], [1], [0, 0, 1, 1], [], []>} : vector<256x256xbf16>, vector<256x32xbf16>, vector<256x32xf32> -> vector<256x32xf32>
    %98 = tpu.reciprocal %95 {approx = true} : vector<256x1xf32> -> vector<256x1xf32>
    %99 = vector.broadcast %98 : vector<256x1xf32> to vector<256x32xf32>
    %100 = arith.mulf %97, %99 : vector<256x32xf32>
    %101 = arith.truncf %100 : vector<256x32xf32> to vector<256x32xbf16>
    %c0_28 = arith.constant 0 : index
    %c96 = arith.constant 96 : index
    %102 = vector.load %arg7[%c0_28, %c96] : memref<256x128xbf16, #tpu.memory_space<vmem>>, vector<256x32xbf16>
    tpu.vector_store %arg7[%c0_28, %c96], %101 {strides = array<i32>} : memref<256x128xbf16, #tpu.memory_space<vmem>>, vector<256x32xbf16>,
    %c0_29 = arith.constant 0 : index
    %c0_30 = arith.constant 0 : index
    %103 = vector.load %arg7[%c0_29, %c0_30] : memref<256x128xbf16, #tpu.memory_space<vmem>>, vector<256x128xbf16>
    %c0_31 = arith.constant 0 : index
    %c0_32 = arith.constant 0 : index
    %104 = vector.load %arg4[%c0_31, %c0_32] : memref<128x32xbf16, #tpu.memory_space<vmem>>, vector<128x32xbf16>
    %cst_33 = arith.constant dense<0.000000e+00> : vector<256x32xf32>
    %105 = tpu.matmul %103, %104, %cst_33 {dimension_numbers = #tpu.dot_dimension_numbers<[1], [0], [0], [1], [0, 0, 1, 1], [], []>} : vector<256x128xbf16>, vector<128x32xbf16>, vector<256x32xf32> -> vector<256x32xf32>
    %c0_34 = arith.constant 0 : index
    %c0_35 = arith.constant 0 : index
    %106 = vector.load %arg5[%c0_34, %c0_35] : memref<1x32xf32, #tpu.memory_space<vmem>>, vector<1x32xf32>
    %107 = vector.broadcast %106 : vector<1x32xf32> to vector<256x32xf32>
    %108 = arith.addf %105, %107 : vector<256x32xf32>
    %c0_36 = arith.constant 0 : index
    %c0_37 = arith.constant 0 : index
    %c0_38 = arith.constant 0 : index
    %109 = vector.load %arg6[%c0_36, %c0_37, %c0_38] : memref<1x256x32xf32, #tpu.memory_space<vmem>>, vector<1x256x32xf32>
    %110 = vector.shape_cast %109 : vector<1x256x32xf32> to vector<256x32xf32>
    %111 = vector.shape_cast %108 : vector<256x32xf32> to vector<1x256x32xf32>
    tpu.vector_store %arg6[%c0_36, %c0_37, %c0_38], %111 {strides = array<i32>} : memref<1x256x32xf32, #tpu.memory_space<vmem>>, vector<1x256x32xf32>,
    return
  }
  func.func @transform_0(%arg0: i32) -> (i32, i32, i32) {
    %c0_i32 = arith.constant 0 : i32
    %c0_i32_0 = arith.constant 0 : i32
    %c0_i32_1 = arith.constant 0 : i32
    return %arg0, %c0_i32, %c0_i32_0 : i32, i32, i32
  }
  func.func @transform_1(%arg0: i32) -> (i32, i32) {
    %c0_i32 = arith.constant 0 : i32
    %c0_i32_0 = arith.constant 0 : i32
    %c0_i32_1 = arith.constant 0 : i32
    return %c0_i32, %c0_i32_0 : i32, i32
  }
  func.func @transform_2(%arg0: i32) -> (i32, i32) {
    %c0_i32 = arith.constant 0 : i32
    %c0_i32_0 = arith.constant 0 : i32
    %c0_i32_1 = arith.constant 0 : i32
    return %c0_i32, %c0_i32_0 : i32, i32
  }
  func.func @transform_3(%arg0: i32) -> (i32, i32) {
    %c0_i32 = arith.constant 0 : i32
    %c0_i32_0 = arith.constant 0 : i32
    %c0_i32_1 = arith.constant 0 : i32
    return %c0_i32, %c0_i32_0 : i32, i32
  }
  func.func @transform_4(%arg0: i32) -> (i32, i32) {
    %c0_i32 = arith.constant 0 : i32
    %c0_i32_0 = arith.constant 0 : i32
    %c0_i32_1 = arith.constant 0 : i32
    return %c0_i32, %c0_i32_0 : i32, i32
  }
  func.func @transform_5(%arg0: i32) -> (i32, i32, i32) {
    %c0_i32 = arith.constant 0 : i32
    %c0_i32_0 = arith.constant 0 : i32
    %c0_i32_1 = arith.constant 0 : i32
    return %arg0, %c0_i32, %c0_i32_0 : i32, i32, i32
  }
}

</mosaic_0001>

<bundles_post_ra>
// kernel: tpu_custom_call.1
= control target key start
LH: loop header
LB: loop body
LE: loop exit
PB: predicated region body
PF: predicated region fallthrough
CT: control target
= control target key end

     0   :  { %s7615_s18 = smov 0   ;;  %s12143_s0 = inlined_call_operand.vmem [shape: f32[2,256,32], index: 0, kind: input, shape index: {}]   ;;  %s12144_s1 = inlined_call_operand.vmem [shape: f32[1,32], index: 1, kind: input, shape index: {}]   ;;  %s12145_s2 = inlined_call_operand.vmem [shape: bf16[32,384], index: 2, kind: input, shape index: {}]   ;;  %s12146_s3 = inlined_call_operand.vmem [shape: bf16[128,32], index: 3, kind: input, shape index: {}]   ;;  %s12147_s4 = inlined_call_operand.vmem [shape: f32[1,32], index: 4, kind: input, shape index: {}]   ;;  %s12148_s5 = inlined_call_operand.vmem [shape: f32[2,256,32], index: 5, kind: output, shape index: {}]  }
   0x1 LB: > { %s5790_s19 = sadd.s32 4294967295, %s7579_s18   ;;  %p5794_p0 = scmp.ge.s32.totalorder %s7579_s18, 1  ;;  %s7579_s18 = sphi %s7615_s18, %s15_s18  }
   0x2   : > { %p187_p1 = scmp.lt.s32.totalorder %s7579_s18, 3 }
   0x4   : > { %p188_p2 = pnand %p5794_p0, %p187_p1 }
   0x6   : > { %191 = sbr.rel (%p188_p2) target bundleno = 2963 (0xb93), region = 40 }
   0xd   : > { %p215_p3 = scmp.lt.s32.totalorder %s5790_s19, 1  ;;  %vm290_vm0 = vcmask 261120   ;;  %v6725_v54 = vld [vmem:[%s12145_s2 + $0x4] ss:$12 sps:$4 sm:$0xff]   ;;  %v6727_v55 = vld [vmem:[%s12145_s2] ss:$12 sps:$4 sm:$0xff]  }
   0xe   : > { %v6728_v56 = vld [vmem:[%s12145_s2 + $0x8] ss:$12 sps:$4 sm:$0xff]   ;;  %626 = vmatprep.subr.bf16.mxu0 %v6725_v54  ;;  %s7582_s13 = smov 32   ;;  %s7583_s14 = smov 96   ;;  %vm3160_vm1 = vcmask 523520   ;;  %vm4299_vm2 = vcmask 785920  }
   0xf   : > { %s13550_s19 = smov (!%p215_p3, %s5790_s19), 1  ;;  %627 = vmatpush1.bf16.msra.mxu0 %v6727_v55  ;;  %6597 = vmatprep.subr.bf16.mxu1 %v6728_v56  ;;  %v6729_v63 = vld [vmem:[%s12145_s2 + $0x1c] ss:$12 sps:$4 sm:$0xff]   ;;  %s7584_s15 = smov 64   ;;  %vm5438_vm3 = vcmask 1048320  }
  0x10   : > { %s5913_s20 = sshll.u32 %s13550_s19, 8  ;;  %6598 = vmatpush3.bf16.msra.mxu1 %v6728_v56  ;;  %628 = vmatprep.subr.bf16.mxu0 %v6729_v63 }
  0x11   : > { %s7631_s23 = scalar_lea.vmem %s12143_s0, %s5913_s20  ;;  %s11934_s17 = scalar_lea.vmem %s12148_s5, %s5913_s20 }
  0x12   : > { %v7634_v0 = vld [vmem:[%s7631_s23] sm:$0xff]  ;;  %v7637_v1 = vld [vmem:[%s7631_s23 + $0x10] sm:$0xff]  ;;  %v7640_v2 = vld [vmem:[%s7631_s23 + $0x8] sm:$0xff] }
  0x13   : > { %v258_v3 = vmul.f32 %v7634_v0, %v7634_v0  ;;  %v260_v4 = vmul.f32 %v7637_v1, %v7637_v1  ;;  %v259_v5 = vmul.f32 %v7640_v2, %v7640_v2  ;;  %v7649_v6 = vld [vmem:[%s7631_s23 + $0x18] sm:$0xff]  ;;  %v7654_v8 = vld [vmem:[%s7631_s23 + $0x28] sm:$0xff]  ;;  %v7657_v9 = vld [vmem:[%s7631_s23 + $0x20] sm:$0xff] }
  0x14   : > { %v261_v7 = vmul.f32 %v7649_v6, %v7649_v6  ;;  %v263_v14 = vmul.f32 %v7654_v8, %v7654_v8  ;;  %v262_v15 = vmul.f32 %v7657_v9, %v7657_v9  ;;  %v7668_v16 = vld [vmem:[%s7631_s23 + $0x38] sm:$0xff]  ;;  %v7671_v17 = vld [vmem:[%s7631_s23 + $0x30] sm:$0xff]  ;;  %v7680_v22 = vld [vmem:[%s7631_s23 + $0x48] sm:$0xff] }
  0x15   : > { %v291_v10 = vsel %vm290_vm0, %v258_v3, 0.0  ;;  %v297_v11 = vsel %vm290_vm0, %v260_v4, 0.0  ;;  %v294_v12 = vsel %vm290_vm0, %v259_v5, 0.0  ;;  %v265_v20 = vmul.f32 %v7668_v16, %v7668_v16  ;;  %v7683_v23 = vld [vmem:[%s7631_s23 + $0x40] sm:$0xff]  ;;  %v7686_v24 = vld [vmem:[%s7631_s23 + $0x58] sm:$0xff]  ;;  %v7695_v29 = vld [vmem:[%s7631_s23 + $0x50] sm:$0xff] }
  0x16   : > { %292 = vadd.xlane.f32.xlu0 %v291_v10  ;;  %298 = vadd.xlane.f32.xlu1 %v297_v11  ;;  %v300_v13 = vsel %vm290_vm0, %v261_v7, 0.0  ;;  %v306_v18 = vsel %vm290_vm0, %v263_v14, 0.0  ;;  %v303_v19 = vsel %vm290_vm0, %v262_v15, 0.0  ;;  %v264_v21 = vmul.f32 %v7671_v17, %v7671_v17  ;;  %v7704_v34 = vld [vmem:[%s7631_s23 + $0x68] sm:$0xff]  ;;  %v7707_v35 = vld [vmem:[%s7631_s23 + $0x60] sm:$0xff]  ;;  %v7716_v40 = vld [vmem:[%s7631_s23 + $0x78] sm:$0xff] }
  0x17   : > { %v312_v25 = vsel %vm290_vm0, %v265_v20, 0.0  ;;  %v267_v27 = vmul.f32 %v7680_v22, %v7680_v22  ;;  %v266_v28 = vmul.f32 %v7683_v23, %v7683_v23  ;;  %v269_v32 = vmul.f32 %v7686_v24, %v7686_v24  ;;  %v7719_v41 = vld [vmem:[%s7631_s23 + $0x70] sm:$0xff]  ;;  %v7728_v46 = vld [vmem:[%s7631_s23 + $0x88] sm:$0xff]  ;;  %v7731_v47 = vld [vmem:[%s7631_s23 + $0x80] sm:$0xff] }
  0x18   : > { %v309_v26 = vsel %vm290_vm0, %v264_v21, 0.0  ;;  %v268_v33 = vmul.f32 %v7695_v29, %v7695_v29  ;;  %v271_v38 = vmul.f32 %v7704_v34, %v7704_v34  ;;  %v270_v39 = vmul.f32 %v7707_v35, %v7707_v35  ;;  %v7740_v52 = vld [vmem:[%s7631_s23 + $0x98] sm:$0xff]  ;;  %v7743_v53 = vld [vmem:[%s7631_s23 + $0x90] sm:$0xff]  ;;  %v7761_v61 = vld [vmem:[%s7631_s23 + $0xa8] sm:$0xff] }
  0x19   : > { %v318_v30 = vsel %vm290_vm0, %v267_v27, 0.0  ;;  %v315_v31 = vsel %vm290_vm0, %v266_v28, 0.0  ;;  %v324_v36 = vsel %vm290_vm0, %v269_v32, 0.0  ;;  %v273_v44 = vmul.f32 %v7716_v40, %v7716_v40  ;;  %v7764_v62 = vld [vmem:[%s7631_s23 + $0xa0] sm:$0xff]  ;;  %v7795_v21 = vld [vmem:[%s7631_s23 + $0xc8] sm:$0xff]  ;;  %v7810_v32 = vld [vmem:[%s7631_s23 + $0xd0] sm:$0xff] }
  0x1a   : > { %295 = vadd.xlane.f32.xlu0 %v294_v12  ;;  %301 = vadd.xlane.f32.xlu1 %v300_v13  ;;  %v321_v37 = vsel %vm290_vm0, %v268_v33, 0.0  ;;  %v330_v42 = vsel %vm290_vm0, %v271_v38, 0.0  ;;  %v327_v43 = vsel %vm290_vm0, %v270_v39, 0.0  ;;  %v272_v45 = vmul.f32 %v7719_v41, %v7719_v41  ;;  %v6731_v3 = vld [vmem:[%s12145_s2 + $0x18] ss:$12 sps:$4 sm:$0xff]   ;;  %v7785_v13 = vld [vmem:[%s7631_s23 + $0xb0] sm:$0xff] }
  0x1b   : > { %v336_v48 = vsel %vm290_vm0, %v273_v44, 0.0  ;;  %v275_v50 = vmul.f32 %v7728_v46, %v7728_v46  ;;  %v274_v51 = vmul.f32 %v7731_v47, %v7731_v47  ;;  %v277_v59 = vmul.f32 %v7740_v52, %v7740_v52  ;;  %v6732_v4 = vld [vmem:[%s12145_s2 + $0x20] ss:$12 sps:$4 sm:$0xff]   ;;  %v7782_v12 = vld [vmem:[%s7631_s23 + $0xb8] sm:$0xff]  ;;  %629 = vmatpush1.bf16.msra.mxu0 %v6731_v3 }
  0x1c   : > { %v333_v49 = vsel %vm290_vm0, %v272_v45, 0.0  ;;  %v276_v60 = vmul.f32 %v7743_v53, %v7743_v53  ;;  %v279_v10 = vmul.f32 %v7761_v61, %v7761_v61  ;;  %v278_v11 = vmul.f32 %v7764_v62, %v7764_v62  ;;  %6599 = vmatprep.subr.bf16.mxu1 %v6732_v4  ;;  %v7819_v39 = vld [vmem:[%s7631_s23 + $0xe8] sm:$0xff] }
  0x1d   : > { %v342_v57 = vsel %vm290_vm0, %v275_v50, 0.0  ;;  %v339_v58 = vsel %vm290_vm0, %v274_v51, 0.0  ;;  %v348_v5 = vsel %vm290_vm0, %v277_v59, 0.0  ;;  %6600 = vmatpush3.bf16.msra.mxu1 %v6732_v4  ;;  %v7581_v20 = vmov 0   ;;  %v7834_v50 = vld [vmem:[%s7631_s23 + $0xf0] sm:$0xff] }
  0x1e   : > { %307 = vadd.xlane.f32.xlu1 %v306_v18  ;;  %304 = vadd.xlane.f32.xlu0 %v303_v19  ;;  %v345_v7 = vsel %vm290_vm0, %v276_v60, 0.0  ;;  %v354_v14 = vsel %vm290_vm0, %v279_v10, 0.0  ;;  %v351_v15 = vsel %vm290_vm0, %v278_v11, 0.0  ;;  %v281_v18 = vmul.f32 %v7782_v12, %v7782_v12 }
  0x1f   : > { %v280_v19 = vmul.f32 %v7785_v13, %v7785_v13  ;;  %658 = vmatprep.mubr.bf16.mxu0 %v7581_v20  ;;  %v283_v28 = vmul.f32 %v7795_v21, %v7795_v21  ;;  %v284_v38 = vmul.f32 %v7810_v32, %v7810_v32  ;;  %v287_v45 = vmul.f32 %v7819_v39, %v7819_v39 }
  0x20   : > { %v288_v56 = vmul.f32 %v7834_v50, %v7834_v50 }
  0x21   : > { %v357_v27 = vsel %vm290_vm0, %v280_v19, 0.0  ;;  %v366_v33 = vsel %vm290_vm0, %v283_v28, 0.0  ;;  %v369_v44 = vsel %vm290_vm0, %v284_v38, 0.0  ;;  %v378_v51 = vsel %vm290_vm0, %v287_v45, 0.0 }
  0x22   : > { %313 = vadd.xlane.f32.xlu1 %v312_v25  ;;  %310 = vadd.xlane.f32.xlu0 %v309_v26  ;;  %v7798_v25 = vld [vmem:[%s7631_s23 + $0xc0] sm:$0xff]  ;;  %v360_v26 = vsel %vm290_vm0, %v281_v18, 0.0 }
  0x26   : > { %319 = vadd.xlane.f32.xlu1 %v318_v30  ;;  %316 = vadd.xlane.f32.xlu0 %v315_v31  ;;  %v282_v30 = vmul.f32 %v7798_v25, %v7798_v25  ;;  %v7807_v31 = vld [vmem:[%s7631_s23 + $0xd8] sm:$0xff] }
  0x2a   : > { %325 = vadd.xlane.f32.xlu1 %v324_v36  ;;  %322 = vadd.xlane.f32.xlu0 %v321_v37  ;;  %v363_v36 = vsel %vm290_vm0, %v282_v30, 0.0  ;;  %v285_v37 = vmul.f32 %v7807_v31, %v7807_v31 }
  0x2e   : > { %331 = vadd.xlane.f32.xlu1 %v330_v42  ;;  %328 = vadd.xlane.f32.xlu0 %v327_v43  ;;  %v7822_v42 = vld [vmem:[%s7631_s23 + $0xe0] sm:$0xff]  ;;  %v372_v43 = vsel %vm290_vm0, %v285_v37, 0.0 }
  0x32   : > { %337 = vadd.xlane.f32.xlu1 %v336_v48  ;;  %334 = vadd.xlane.f32.xlu0 %v333_v49  ;;  %v286_v48 = vmul.f32 %v7822_v42, %v7822_v42  ;;  %v7831_v49 = vld [vmem:[%s7631_s23 + $0xf8] sm:$0xff] }
  0x33   : > { %v289_v55 = vmul.f32 %v7831_v49, %v7831_v49 }
  0x34   : > { %v375_v54 = vsel %vm290_vm0, %v286_v48, 0.0 }
  0x36   : > { %343 = vadd.xlane.f32.xlu1 %v342_v57  ;;  %340 = vadd.xlane.f32.xlu0 %v339_v58  ;;  %v384_v57 = vsel %vm290_vm0, %v289_v55, 0.0  ;;  %v381_v58 = vsel %vm290_vm0, %v288_v56, 0.0 }
  0x3a   : > { %349 = vadd.xlane.f32.xlu1 %v348_v5  ;;  %346 = vadd.xlane.f32.xlu0 %v345_v7 }
  0x3e   : > { %355 = vadd.xlane.f32.xlu1 %v354_v14  ;;  %352 = vadd.xlane.f32.xlu0 %v351_v15 }
  0x42   : > { %361 = vadd.xlane.f32.xlu1 %v360_v26  ;;  %358 = vadd.xlane.f32.xlu0 %v357_v27 }
  0x46   : > { %367 = vadd.xlane.f32.xlu1 %v366_v33  ;;  %364 = vadd.xlane.f32.xlu0 %v363_v36 }
  0x4a   : > { %373 = vadd.xlane.f32.xlu1 %v372_v43  ;;  %370 = vadd.xlane.f32.xlu0 %v369_v44 }
  0x4e   : > { %379 = vadd.xlane.f32.xlu1 %v378_v51  ;;  %376 = vadd.xlane.f32.xlu0 %v375_v54  ;;  %v7849_v51 = vld [vmem:[%s12144_s1] ss:$0 sm:$0xff] }
  0x52   : > { %385 = vadd.xlane.f32.xlu1 %v384_v57  ;;  %382 = vadd.xlane.f32.xlu0 %v381_v58 }
  0xa3   : > { %v293_v59 = vpop.xlane.xlu0 %292  ;;  %v299_v60 = vpop.xlane.xlu1 %298 }
  0xa4   : > { %v387_v63 = vmax.f32 %v293_v59, 1e-24  ;;  %v389_v3 = vmax.f32 %v299_v60, 1e-24 }
  0xa6   : > { %6741 = vrsqrt.f32 %v387_v63 }
  0xa7   : > { %6743 = vrsqrt.f32 %v389_v3  ;;  %v296_v4 = vpop.xlane.xlu0 %295  ;;  %v302_v5 = vpop.xlane.xlu1 %301 }
  0xa8   : > { %v388_v7 = vmax.f32 %v296_v4, 1e-24  ;;  %v390_v10 = vmax.f32 %v302_v5, 1e-24 }
  0xaa   : > { %6745 = vrsqrt.f32 %v388_v7 }
  0xab   : > { %6747 = vrsqrt.f32 %v390_v10  ;;  %v308_v11 = vpop.xlane.xlu1 %307  ;;  %v305_v14 = vpop.xlane.xlu0 %304 }
  0xac   : > { %v392_v15 = vmax.f32 %v308_v11, 1e-24  ;;  %v391_v18 = vmax.f32 %v305_v14, 1e-24 }
  0xae   : > { %6749 = vrsqrt.f32 %v392_v15 }
  0xaf   : > { %6751 = vrsqrt.f32 %v391_v18  ;;  %v314_v19 = vpop.xlane.xlu1 %313  ;;  %v311_v26 = vpop.xlane.xlu0 %310 }
  0xb0   : > { %v6742_v27 = vpop.eup %6741  ;;  %v394_v28 = vmax.f32 %v314_v19, 1e-24  ;;  %v393_v30 = vmax.f32 %v311_v26, 1e-24 }
  0xb1   : > { %v6744_v33 = vpop.eup %6743  ;;  %v451_v43 = vmul.f32 %v6742_v27, %v7634_v0 }
  0xb2   : > { %6753 = vrsqrt.f32 %v394_v28  ;;  %v453_v36 = vmul.f32 %v6744_v33, %v7637_v1 }
  0xb3   : > { %6755 = vrsqrt.f32 %v393_v30  ;;  %v320_v37 = vpop.xlane.xlu1 %319  ;;  %v317_v38 = vpop.xlane.xlu0 %316  ;;  %v490_v0 = vmul.f32 %v7849_v51, %v451_v43 }
  0xb4   : > { %v6746_v44 = vpop.eup %6745  ;;  %v396_v45 = vmax.f32 %v320_v37, 1e-24  ;;  %v395_v48 = vmax.f32 %v317_v38, 1e-24  ;;  %v492_v1 = vmul.f32 %v7849_v51, %v453_v36 }
  0xb5   : > { %v6748_v54 = vpop.eup %6747  ;;  %v452_v55 = vmul.f32 %v6746_v44, %v7640_v2 }
  0xb6   : > { %6757 = vrsqrt.f32 %v396_v45  ;;  %v454_v56 = vmul.f32 %v6748_v54, %v7649_v6 }
  0xb7   : > { %6759 = vrsqrt.f32 %v395_v48  ;;  %v326_v57 = vpop.xlane.xlu1 %325  ;;  %v323_v58 = vpop.xlane.xlu0 %322  ;;  %v491_v59 = vmul.f32 %v7849_v51, %v452_v55 }
  0xb8   : > { %v6750_v60 = vpop.eup %6749  ;;  %v398_v63 = vmax.f32 %v326_v57, 1e-24  ;;  %v397_v3 = vmax.f32 %v323_v58, 1e-24  ;;  %v493_v4 = vmul.f32 %v7849_v51, %v454_v56 }
  0xb9   : > { %v6752_v5 = vpop.eup %6751  ;;  %v522_v7 = vpack.c.bf16 %v491_v59, %v490_v0  ;;  %v456_v2 = vmul.f32 %v6750_v60, %v7654_v8 }
  0xba   : > { %6761 = vrsqrt.f32 %v398_v63  ;;  %v523_v6 = vpack.c.bf16 %v493_v4, %v492_v1  ;;  %v455_v10 = vmul.f32 %v6752_v5, %v7657_v9 }
  0xbb   : > { %6763 = vrsqrt.f32 %v397_v3  ;;  %5806 = vmatmul.mubr.msk.bf16.vlgmr.msra.gmra.mrb[0].mxu0 %vm290_vm0, %v522_v7  ;;  %6601 = vmatprep.mubr.msk.bf16.mxu1 %vm290_vm0, %v522_v7  ;;  %v332_v11 = vpop.xlane.xlu1 %331  ;;  %v329_v14 = vpop.xlane.xlu0 %328  ;;  %v495_v15 = vmul.f32 %v7849_v51, %v456_v2 }
  0xbc   : > { %v6754_v18 = vpop.eup %6753  ;;  %v400_v19 = vmax.f32 %v332_v11, 1e-24  ;;  %6602 = vmatmul.mubr.msk.bf16.vlgmr.msra.gmra.mrb[0].mxu1 %vm290_vm0, %v523_v6  ;;  %v399_v26 = vmax.f32 %v329_v14, 1e-24  ;;  %668 = vmatprep.mubr.bf16.mxu0 %v7581_v20  ;;  %v494_v8 = vmul.f32 %v7849_v51, %v455_v10 }
  0xbd   : > { %v6756_v27 = vpop.eup %6755  ;;  %v458_v9 = vmul.f32 %v6754_v18, %v7668_v16 }
  0xbe   : > { %6765 = vrsqrt.f32 %v400_v19  ;;  %v524_v28 = vpack.c.bf16 %v495_v15, %v494_v8  ;;  %v457_v30 = vmul.f32 %v6756_v27, %v7671_v17 }
  0xbf   : > { %6767 = vrsqrt.f32 %v399_v26  ;;  %v338_v33 = vpop.xlane.xlu1 %337  ;;  %v335_v36 = vpop.xlane.xlu0 %334  ;;  %v497_v37 = vmul.f32 %v7849_v51, %v458_v9 }
  0xc0   : > { %v6758_v38 = vpop.eup %6757  ;;  %v402_v43 = vmax.f32 %v338_v33, 1e-24  ;;  %v401_v44 = vmax.f32 %v335_v36, 1e-24  ;;  %6605 = vmatprep.mubr.msk.bf16.mxu1 %vm290_vm0, %v524_v28  ;;  %v496_v45 = vmul.f32 %v7849_v51, %v457_v30 }
  0xc1   : > { %v6760_v48 = vpop.eup %6759  ;;  %v460_v54 = vmul.f32 %v6758_v38, %v7680_v22 }
  0xc2   : > { %6769 = vrsqrt.f32 %v402_v43  ;;  %v7871_v16 = vpack.c.bf16 %v497_v37, %v496_v45  ;;  %v459_v17 = vmul.f32 %v6760_v48, %v7683_v23 }
  0xc3   : > { %6771 = vrsqrt.f32 %v401_v44  ;;  %5807 = vmatmul.mubr.msk.bf16.gmra.mrb[4].mxu0 %vm290_vm0, %v523_v6  ;;  %v344_v55 = vpop.xlane.xlu1 %343  ;;  %v341_v56 = vpop.xlane.xlu0 %340  ;;  %v499_v1 = vmul.f32 %v7849_v51, %v460_v54 }
  0xc4   : > { %v6762_v57 = vpop.eup %6761  ;;  %v404_v58 = vmax.f32 %v344_v55, 1e-24  ;;  %6606 = vmatmul.mubr.msk.bf16.gmra.mrb[4].mxu1 %vm290_vm0, %v7871_v16  ;;  %v403_v0 = vmax.f32 %v341_v56, 1e-24  ;;  %678 = vmatprep.mubr.bf16.mxu0 %v7581_v20  ;;  %v498_v22 = vmul.f32 %v7849_v51, %v459_v17 }
  0xc5   : > { %v6764_v59 = vpop.eup %6763  ;;  %v462_v23 = vmul.f32 %v6762_v57, %v7686_v24 }
  0xc6   : > { %6773 = vrsqrt.f32 %v404_v58  ;;  %v7881_v60 = vpack.c.bf16 %v499_v1, %v498_v22  ;;  %v461_v63 = vmul.f32 %v6764_v59, %v7695_v29 }
  0xc7   : > { %6775 = vrsqrt.f32 %v403_v0  ;;  %v350_v3 = vpop.xlane.xlu1 %349  ;;  %v347_v4 = vpop.xlane.xlu0 %346  ;;  %v501_v5 = vmul.f32 %v7849_v51, %v462_v23 }
  0xc8   : > { %v6766_v7 = vpop.eup %6765  ;;  %v406_v2 = vmax.f32 %v350_v3, 1e-24  ;;  %v405_v6 = vmax.f32 %v347_v4, 1e-24  ;;  %6609 = vmatprep.mubr.msk.bf16.mxu1 %vm290_vm0, %v7881_v60  ;;  %v500_v10 = vmul.f32 %v7849_v51, %v461_v63 }
  0xc9   : > { %v6768_v11 = vpop.eup %6767  ;;  %v464_v24 = vmul.f32 %v6766_v7, %v7704_v34 }
  0xca   : > { %6777 = vrsqrt.f32 %v406_v2  ;;  %v7889_v14 = vpack.c.bf16 %v501_v5, %v500_v10  ;;  %v463_v29 = vmul.f32 %v6768_v11, %v7707_v35 }
  0xcb   : > { %6779 = vrsqrt.f32 %v405_v6  ;;  %5808 = vmatmul.mubr.msk.bf16.gmra.mrb[8].mxu0 %vm290_vm0, %v524_v28  ;;  %v356_v15 = vpop.xlane.xlu1 %355  ;;  %v353_v18 = vpop.xlane.xlu0 %352  ;;  %v503_v19 = vmul.f32 %v7849_v51, %v464_v24 }
  0xcc   : > { %v6770_v26 = vpop.eup %6769  ;;  %v408_v8 = vmax.f32 %v356_v15, 1e-24  ;;  %6610 = vmatmul.mubr.msk.bf16.gmra.mrb[8].mxu1 %vm290_vm0, %v7889_v14  ;;  %v407_v27 = vmax.f32 %v353_v18, 1e-24  ;;  %688 = vmatprep.mubr.bf16.mxu0 %v7581_v20  ;;  %v502_v34 = vmul.f32 %v7849_v51, %v463_v29 }
  0xcd   : > { %v6772_v9 = vpop.eup %6771  ;;  %v466_v35 = vmul.f32 %v6770_v26, %v7716_v40 }
  0xce   : > { %6781 = vrsqrt.f32 %v408_v8  ;;  %v7899_v30 = vpack.c.bf16 %v503_v19, %v502_v34  ;;  %v465_v28 = vmul.f32 %v6772_v9, %v7719_v41 }
  0xcf   : > { %6783 = vrsqrt.f32 %v407_v27  ;;  %v362_v33 = vpop.xlane.xlu1 %361  ;;  %v359_v36 = vpop.xlane.xlu0 %358  ;;  %v505_v37 = vmul.f32 %v7849_v51, %v466_v35 }
  0xd0   : > { %v6774_v38 = vpop.eup %6773  ;;  %v410_v43 = vmax.f32 %v362_v33, 1e-24  ;;  %v409_v44 = vmax.f32 %v359_v36, 1e-24  ;;  %6613 = vmatprep.mubr.msk.bf16.mxu1 %vm290_vm0, %v7899_v30  ;;  %v504_v45 = vmul.f32 %v7849_v51, %v465_v28 }
  0xd1   : > { %v6776_v48 = vpop.eup %6775  ;;  %v468_v40 = vmul.f32 %v6774_v38, %v7728_v46 }
  0xd2   : > { %6785 = vrsqrt.f32 %v410_v43  ;;  %v7907_v54 = vpack.c.bf16 %v505_v37, %v504_v45  ;;  %v467_v41 = vmul.f32 %v6776_v48, %v7731_v47 }
  0xd3   : > { %6787 = vrsqrt.f32 %v409_v44  ;;  %5809 = vmatmul.mubr.msk.bf16.gmra.mrb[12].mxu0 %vm290_vm0, %v7871_v16  ;;  %v368_v17 = vpop.xlane.xlu1 %367  ;;  %v365_v55 = vpop.xlane.xlu0 %364  ;;  %v507_v56 = vmul.f32 %v7849_v51, %v468_v40 }
  0xd4   : > { %v6778_v1 = vpop.eup %6777  ;;  %v412_v57 = vmax.f32 %v368_v17, 1e-24  ;;  %6614 = vmatmul.mubr.msk.bf16.gmra.mrb[12].mxu1 %vm290_vm0, %v7907_v54  ;;  %v411_v58 = vmax.f32 %v365_v55, 1e-24  ;;  %698 = vmatprep.mubr.bf16.mxu0 %v7581_v20  ;;  %v506_v46 = vmul.f32 %v7849_v51, %v467_v41 }
  0xd5   : > { %v6780_v0 = vpop.eup %6779  ;;  %v470_v47 = vmul.f32 %v6778_v1, %v7740_v52 }
  0xd6   : > { %6789 = vrsqrt.f32 %v412_v57  ;;  %v7918_v22 = vpack.c.bf16 %v507_v56, %v506_v46  ;;  %v469_v16 = vmul.f32 %v6780_v0, %v7743_v53 }
  0xd7   : > { %6791 = vrsqrt.f32 %v411_v58  ;;  %v374_v59 = vpop.xlane.xlu1 %373  ;;  %v371_v23 = vpop.xlane.xlu0 %370  ;;  %v509_v63 = vmul.f32 %v7849_v51, %v470_v47 }
  0xd8   : > { %v6782_v3 = vpop.eup %6781  ;;  %v414_v4 = vmax.f32 %v374_v59, 1e-24  ;;  %v413_v5 = vmax.f32 %v371_v23, 1e-24  ;;  %6617 = vmatprep.mubr.msk.bf16.mxu1 %vm290_vm0, %v7918_v22  ;;  %v508_v7 = vmul.f32 %v7849_v51, %v469_v16 }
  0xd9   : > { %v6784_v2 = vpop.eup %6783  ;;  %v472_v52 = vmul.f32 %v6782_v3, %v7761_v61 }
  0xda   : > { %6793 = vrsqrt.f32 %v414_v4  ;;  %v7926_v6 = vpack.c.bf16 %v509_v63, %v508_v7  ;;  %v471_v53 = vmul.f32 %v6784_v2, %v7764_v62 }
  0xdb   : > { %6795 = vrsqrt.f32 %v413_v5  ;;  %5810 = vmatmul.mubr.msk.bf16.gmra.mrb[16].mxu0 %vm290_vm0, %v7881_v60  ;;  %v380_v10 = vpop.xlane.xlu1 %379  ;;  %v377_v11 = vpop.xlane.xlu0 %376  ;;  %v511_v24 = vmul.f32 %v7849_v51, %v472_v52 }
  0xdc   : > { %v6786_v29 = vpop.eup %6785  ;;  %v416_v15 = vmax.f32 %v380_v10, 1e-24  ;;  %6618 = vmatmul.mubr.msk.bf16.gmra.mrb[16].mxu1 %vm290_vm0, %v7926_v6  ;;  %v415_v18 = vmax.f32 %v377_v11, 1e-24  ;;  %708 = vmatprep.mubr.bf16.mxu0 %v7581_v20  ;;  %v510_v61 = vmul.f32 %v7849_v51, %v471_v53 }
  0xdd   : > { %v6788_v19 = vpop.eup %6787  ;;  %v474_v62 = vmul.f32 %v6786_v29, %v7782_v12 }
  0xde   : > { %6797 = vrsqrt.f32 %v416_v15  ;;  %v532_v26 = vpack.c.bf16 %v511_v24, %v510_v61  ;;  %v473_v60 = vmul.f32 %v6788_v19, %v7785_v13 }
  0xdf   : > { %6799 = vrsqrt.f32 %v415_v18  ;;  %v386_v8 = vpop.xlane.xlu1 %385  ;;  %v383_v27 = vpop.xlane.xlu0 %382  ;;  %v513_v34 = vmul.f32 %v7849_v51, %v474_v62 }
  0xe0   : > { %v6790_v9 = vpop.eup %6789  ;;  %v418_v35 = vmax.f32 %v386_v8, 1e-24  ;;  %v417_v28 = vmax.f32 %v383_v27, 1e-24  ;;  %6621 = vmatprep.mubr.msk.bf16.mxu1 %vm290_vm0, %v532_v26  ;;  %v512_v33 = vmul.f32 %v7849_v51, %v473_v60 }
  0xe1   : > { %v6792_v36 = vpop.eup %6791  ;;  %v476_v37 = vmul.f32 %v6790_v9, %v7795_v21 }
  0xe2   : > { %6801 = vrsqrt.f32 %v418_v35  ;;  %v533_v12 = vpack.c.bf16 %v513_v34, %v512_v33  ;;  %v475_v38 = vmul.f32 %v6792_v36, %v7798_v25 }
  0xe3   : > { %6803 = vrsqrt.f32 %v417_v28  ;;  %5811 = vmatmul.mubr.msk.bf16.gmra.mrb[20].mxu0 %vm290_vm0, %v7889_v14  ;;  %v515_v13 = vmul.f32 %v7849_v51, %v476_v37 }
  0xe4   : > { %v6794_v43 = vpop.eup %6793  ;;  %6622 = vmatmul.mubr.msk.bf16.gmra.mrb[20].mxu1 %vm290_vm0, %v533_v12  ;;  %718 = vmatprep.mubr.bf16.mxu0 %v7581_v20  ;;  %v514_v44 = vmul.f32 %v7849_v51, %v475_v38 }
  0xe5   : > { %v6796_v45 = vpop.eup %6795  ;;  %v478_v21 = vmul.f32 %v6794_v43, %v7807_v31 }
  0xe6   : > { %v534_v48 = vpack.c.bf16 %v515_v13, %v514_v44  ;;  %v477_v40 = vmul.f32 %v6796_v45, %v7810_v32 }
  0xe7   : > { %v517_v25 = vmul.f32 %v7849_v51, %v478_v21 }
  0xe8   : > { %v6798_v41 = vpop.eup %6797  ;;  %6625 = vmatprep.mubr.msk.bf16.mxu1 %vm290_vm0, %v534_v48  ;;  %v516_v14 = vmul.f32 %v7849_v51, %v477_v40 }
  0xe9   : > { %v6800_v17 = vpop.eup %6799  ;;  %v480_v55 = vmul.f32 %v6798_v41, %v7819_v39 }
  0xea   : > { %v535_v56 = vpack.c.bf16 %v517_v25, %v516_v14  ;;  %v479_v1 = vmul.f32 %v6800_v17, %v7822_v42 }
  0xeb   : > { %5812 = vmatmul.mubr.msk.bf16.gmra.mrb[24].mxu0 %vm290_vm0, %v7899_v30  ;;  %v519_v31 = vmul.f32 %v7849_v51, %v480_v55 }
  0xec   : > { %v6802_v57 = vpop.eup %6801  ;;  %6626 = vmatmul.mubr.msk.bf16.gmra.mrb[24].mxu1 %vm290_vm0, %v535_v56  ;;  %728 = vmatprep.mubr.bf16.mxu0 %v7581_v20  ;;  %v518_v32 = vmul.f32 %v7849_v51, %v479_v1 }
  0xed   : > { %v6804_v58 = vpop.eup %6803  ;;  %v482_v46 = vmul.f32 %v6802_v57, %v7831_v49 }
  0xee   : > { %v536_v0 = vpack.c.bf16 %v519_v31, %v518_v32  ;;  %v481_v39 = vmul.f32 %v6804_v58, %v7834_v50 }
  0xef   : > { %v521_v42 = vmul.f32 %v7849_v51, %v482_v46 }
  0xf0   : > { %6629 = vmatprep.mubr.msk.bf16.mxu1 %vm290_vm0, %v536_v0  ;;  %v520_v30 = vmul.f32 %v7849_v51, %v481_v39 }
  0xf2   : > { %v537_v47 = vpack.c.bf16 %v521_v42, %v520_v30 }
  0xf3   : > { %5813 = vmatmul.mubr.msk.bf16.gmra.mrb[28].mxu0 %vm290_vm0, %v7907_v54 }
  0xf4   : > { %6630 = vmatmul.mubr.msk.bf16.gmra.mrb[28].mxu1 %vm290_vm0, %v537_v47  ;;  %738 = vmatprep.mubr.bf16.mxu0 %v7581_v20 }
  0xfb   : > { %5814 = vmatmul.mubr.msk.bf16.gmra.mrb[32].mxu0 %vm290_vm0, %v7918_v22 }
  0xfc   : > { %748 = vmatprep.mubr.bf16.mxu0 %v7581_v20 }
 0x103   : > { %5815 = vmatmul.mubr.msk.bf16.gmra.mrb[36].mxu0 %vm290_vm0, %v7926_v6 }
 0x104   : > { %758 = vmatprep.mubr.bf16.mxu0 %v7581_v20 }
 0x10b   : > { %5816 = vmatmul.mubr.msk.bf16.gmra.mrb[40].mxu0 %vm290_vm0, %v532_v26 }
 0x10c   : > { %768 = vmatprep.mubr.bf16.mxu0 %v7581_v20 }
 0x113   : > { %5817 = vmatmul.mubr.msk.bf16.gmra.mrb[44].mxu0 %vm290_vm0, %v533_v12 }
 0x114   : > { %778 = vmatprep.mubr.bf16.mxu0 %v7581_v20 }
 0x11b   : > { %5818 = vmatmul.mubr.msk.bf16.gmra.mrb[48].mxu0 %vm290_vm0, %v534_v48 }
 0x11c   : > { %788 = vmatprep.mubr.bf16.mxu0 %v7581_v20 }
 0x123   : > { %5819 = vmatmul.mubr.msk.bf16.gmra.mrb[52].mxu0 %vm290_vm0, %v535_v56 }
 0x124   : > { %798 = vmatprep.mubr.bf16.mxu0 %v7581_v20 }
 0x12b   : > { %5820 = vmatmul.mubr.msk.bf16.gmra.mrb[56].mxu0 %vm290_vm0, %v536_v0 }
 0x12c   : > { %808 = vmatprep.mubr.bf16.mxu0 %v7581_v20 }
 0x133   : > { %5821 = vmatmul.mubr.msk.bf16.gmra.mrb[60].mxu0 %vm290_vm0, %v537_v47 }
 0x18e   : > { %v660_v49 = vpop.f32.mrb[0].mxu0 }
 0x18f   : > { %v662_v50 = vpop.f32.mrb[1].mxu0  ;;  %v6603_v51 = vpop.f32.mrb[0].mxu1 }
 0x190   : > { %v664_v54 = vpop.f32.mrb[2].mxu0  ;;  %v853_v22 = vpop.f32.mrb[1].mxu1 }
 0x191   : > { %v7988_v16 = vpack.c.bf16 %v664_v54, %v660_v49  ;;  %v666_v59 = vpop.f32.mrb[3].mxu0  ;;  %v6604_v23 = vpop.f32.mrb[2].mxu1 }
 0x192   : > { %v7990_v63 = vpack.c.bf16 %v666_v59, %v662_v50  ;;  %v7992_v3 = vpack.c.bf16 %v6604_v23, %v6603_v51  ;;  %v856_v4 = vpop.f32.mrb[3].mxu1 }
 0x193   : > { %4316 = vrot.lane.b32.xlu1 %v7988_v16, %s7582_s13  ;;  %2006 = vrot.lane.b32.xlu0 %v7988_v16, %s7583_s14  ;;  %v7998_v20 = vpack.c.bf16 %v856_v4, %v853_v22 }
 0x194   : > { %12509 = vst [vmem:[#allocation3_spill] sm:$0xff] %v7992_v3  ;;  %5949 = vmatprep.mubr.msk.bf16.mxu1 %vm290_vm0, %v7988_v16 }
 0x195   : > { %12510 = vst [vmem:[#allocation4_spill] sm:$0xff] %v7998_v20 }
 0x196   : > { %v670_v5 = vpop.f32.mrb[4].mxu0 }
 0x197   : > { %3177 = vrot.lane.b32.xlu0 %v7988_v16, %s7584_s15  ;;  %3209 = vrot.lane.b32.xlu1 %v7990_v63, %s7584_s15  ;;  %v672_v7 = vpop.f32.mrb[5].mxu0  ;;  %v6607_v2 = vpop.f32.mrb[4].mxu1 }
 0x198   : > { %v674_v52 = vpop.f32.mrb[6].mxu0  ;;  %v869_v6 = vpop.f32.mrb[5].mxu1 }
 0x199   : > { %v8006_v53 = vpack.c.bf16 %v674_v52, %v670_v5  ;;  %v676_v10 = vpop.f32.mrb[7].mxu0  ;;  %v6608_v11 = vpop.f32.mrb[6].mxu1 }
 0x19a   : > { %v8008_v24 = vpack.c.bf16 %v676_v10, %v672_v7  ;;  %v8010_v29 = vpack.c.bf16 %v6608_v11, %v6607_v2  ;;  %v872_v15 = vpop.f32.mrb[7].mxu1 }
 0x19b   : > { %4348 = vrot.lane.b32.xlu1 %v7990_v63, %s7582_s13  ;;  %2054 = vrot.lane.b32.xlu0 %v7990_v63, %s7583_s14  ;;  %v8016_v18 = vpack.c.bf16 %v872_v15, %v869_v6 }
 0x19c   : > { %12511 = vst [vmem:[#allocation5_spill] sm:$0xff] %v8010_v29 }
 0x19d   : > { %12512 = vst [vmem:[#allocation6_spill] sm:$0xff] %v8016_v18 }
 0x19e   : > { %v680_v61 = vpop.f32.mrb[8].mxu0 }
 0x19f   : > { %2807 = vrot.lane.b32.xlu1 %v7998_v20, %s7583_s14  ;;  %2809 = vrot.lane.b32.xlu0 %v7992_v3, %s7583_s14  ;;  %v682_v19 = vpop.f32.mrb[9].mxu0  ;;  %v6611_v62 = vpop.f32.mrb[8].mxu1 }
 0x1a0   : > { %v684_v26 = vpop.f32.mrb[10].mxu0  ;;  %v885_v60 = vpop.f32.mrb[9].mxu1 }
 0x1a1   : > { %v8022_v8 = vpack.c.bf16 %v684_v26, %v680_v61  ;;  %v686_v27 = vpop.f32.mrb[11].mxu0  ;;  %v6612_v34 = vpop.f32.mrb[10].mxu1 }
 0x1a2   : > { %v8024_v9 = vpack.c.bf16 %v686_v27, %v682_v19  ;;  %v8026_v35 = vpack.c.bf16 %v6612_v34, %v6611_v62  ;;  %v888_v28 = vpop.f32.mrb[11].mxu1 }
 0x1a3   : > { %4318 = vrot.lane.b32.xlu0 %v8006_v53, %s7582_s13  ;;  %2008 = vrot.lane.b32.xlu1 %v8006_v53, %s7583_s14  ;;  %v8032_v33 = vpack.c.bf16 %v888_v28, %v885_v60 }
 0x1a4   : > { %12513 = vst [vmem:[#allocation7_spill] sm:$0xff] %v8026_v35 }
 0x1a5   : > { %12514 = vst [vmem:[#allocation8_spill] sm:$0xff] %v8032_v33 }
 0x1a6   : > { %v690_v36 = vpop.f32.mrb[12].mxu0 }
 0x1a7   : > { %3179 = vrot.lane.b32.xlu1 %v8006_v53, %s7584_s15  ;;  %3211 = vrot.lane.b32.xlu0 %v8008_v24, %s7584_s15  ;;  %v692_v37 = vpop.f32.mrb[13].mxu0  ;;  %v6615_v12 = vpop.f32.mrb[12].mxu1 }
 0x1a8   : > { %v694_v38 = vpop.f32.mrb[14].mxu0  ;;  %v901_v13 = vpop.f32.mrb[13].mxu1 }
 0x1a9   : > { %v8038_v43 = vpack.c.bf16 %v694_v38, %v690_v36  ;;  %v696_v44 = vpop.f32.mrb[15].mxu0  ;;  %v6616_v45 = vpop.f32.mrb[14].mxu1 }
 0x1aa   : > { %v8040_v21 = vpack.c.bf16 %v696_v44, %v692_v37  ;;  %v8042_v48 = vpack.c.bf16 %v6616_v45, %v6615_v12  ;;  %v904_v40 = vpop.f32.mrb[15].mxu1 }
 0x1ab   : > { %4350 = vrot.lane.b32.xlu0 %v8008_v24, %s7582_s13  ;;  %2056 = vrot.lane.b32.xlu1 %v8008_v24, %s7583_s14  ;;  %v8048_v25 = vpack.c.bf16 %v904_v40, %v901_v13 }
 0x1ac   : > { %12515 = vst [vmem:[#allocation9_spill] sm:$0xff] %v8042_v48 }
 0x1ad   : > { %12516 = vst [vmem:[#allocation10_spill] sm:$0xff] %v8048_v25 }
 0x1ae   : > { %v700_v41 = vpop.f32.mrb[16].mxu0 }
 0x1af   : > { %2813 = vrot.lane.b32.xlu0 %v8010_v29, %s7583_s14  ;;  %2811 = vrot.lane.b32.xlu1 %v8016_v18, %s7583_s14  ;;  %v6619_v14 = vpop.f32.mrb[16].mxu1  ;;  %v702_v17 = vpop.f32.mrb[17].mxu0 }
 0x1b0   : > { %v917_v55 = vpop.f32.mrb[17].mxu1  ;;  %v704_v56 = vpop.f32.mrb[18].mxu0 }
 0x1b1   : > { %v6620_v1 = vpop.f32.mrb[18].mxu1  ;;  %v8054_v31 = vpack.c.bf16 %v704_v56, %v700_v41  ;;  %v706_v57 = vpop.f32.mrb[19].mxu0 }
 0x1b2   : > { %v8056_v32 = vpack.c.bf16 %v6620_v1, %v6619_v14  ;;  %v920_v58 = vpop.f32.mrb[19].mxu1  ;;  %v8058_v46 = vpack.c.bf16 %v706_v57, %v702_v17  ;;  %v1077_v57 = vsel %vm290_vm0, %v7990_v63, 0  ;;  %v1080_v63 = vsel %vm290_vm0, %v8008_v24, 0 }
 0x1b3   : > { %v8060_v0 = vpack.c.bf16 %v920_v58, %v917_v55  ;;  %2010 = vrot.lane.b32.xlu0 %v8022_v8, %s7583_s14  ;;  %4320 = vrot.lane.b32.xlu1 %v8022_v8, %s7582_s13  ;;  %v1083_v24 = vsel %vm290_vm0, %v8024_v9, 0 }
 0x1b4   : > { %12517 = vst [vmem:[#allocation11_spill] sm:$0xff] %v8056_v32 }
 0x1b5   : > { %12518 = vst [vmem:[#allocation12_spill] sm:$0xff] %v8060_v0  ;;  %5981 = vmatprep.subr.bf16.mxu0 %v8060_v0 }
 0x1b6   : > { %5982 = vmatpush3.bf16.msra.mxu0 %v7998_v20  ;;  %v710_v39 = vpop.f32.mrb[20].mxu0 }
 0x1b7   : > { %3181 = vrot.lane.b32.xlu0 %v8022_v8, %s7584_s15  ;;  %3213 = vrot.lane.b32.xlu1 %v8024_v9, %s7584_s15  ;;  %v6623_v42 = vpop.f32.mrb[20].mxu1  ;;  %v712_v30 = vpop.f32.mrb[21].mxu0 }
 0x1b8   : > { %v933_v47 = vpop.f32.mrb[21].mxu1  ;;  %v714_v49 = vpop.f32.mrb[22].mxu0  ;;  %5983 = vmatprep.subr.bf16.mxu0 %v8056_v32 }
 0x1b9   : > { %v8073_v50 = vpack.c.bf16 %v714_v49, %v710_v39  ;;  %v6624_v51 = vpop.f32.mrb[22].mxu1  ;;  %v716_v54 = vpop.f32.mrb[23].mxu0 }
 0x1ba   : > { %v8075_v22 = vpack.c.bf16 %v6624_v51, %v6623_v42  ;;  %v8077_v59 = vpack.c.bf16 %v716_v54, %v712_v30  ;;  %v936_v23 = vpop.f32.mrb[23].mxu1  ;;  %5984 = vmatpush3.bf16.msra.mxu0 %v7992_v3 }
 0x1bb   : > { %v8080_v4 = vpack.c.bf16 %v936_v23, %v933_v47  ;;  %2058 = vrot.lane.b32.xlu0 %v8024_v9, %s7583_s14  ;;  %4352 = vrot.lane.b32.xlu1 %v8024_v9, %s7582_s13  ;;  %v1086_v9 = vsel %vm290_vm0, %v8040_v21, 0 }
 0x1bc   : > { %12519 = vst [vmem:[#allocation13_spill] sm:$0xff] %v8075_v22 }
 0x1bd   : > { %12520 = vst [vmem:[#allocation14_spill] sm:$0xff] %v8080_v4  ;;  %5985 = vmatprep.subr.bf16.mxu0 %v8080_v4 }
 0x1be   : > { %5986 = vmatpush3.bf16.msra.mxu0 %v8016_v18  ;;  %v720_v5 = vpop.f32.mrb[24].mxu0 }
 0x1bf   : > { %3183 = vrot.lane.b32.xlu0 %v8038_v43, %s7584_s15  ;;  %2817 = vrot.lane.b32.xlu1 %v8026_v35, %s7583_s14  ;;  %v6627_v7 = vpop.f32.mrb[24].mxu1  ;;  %v722_v2 = vpop.f32.mrb[25].mxu0 }
 0x1c0   : > { %v949_v52 = vpop.f32.mrb[25].mxu1  ;;  %5987 = vmatprep.subr.bf16.mxu0 %v8075_v22  ;;  %v724_v6 = vpop.f32.mrb[26].mxu0 }
 0x1c1   : > { %v6628_v10 = vpop.f32.mrb[26].mxu1  ;;  %v8093_v11 = vpack.c.bf16 %v724_v6, %v720_v5  ;;  %v726_v15 = vpop.f32.mrb[27].mxu0 }
 0x1c2   : > { %v8095_v61 = vpack.c.bf16 %v6628_v10, %v6627_v7  ;;  %v952_v19 = vpop.f32.mrb[27].mxu1  ;;  %5988 = vmatpush3.bf16.msra.mxu0 %v8010_v29  ;;  %v8098_v62 = vpack.c.bf16 %v726_v15, %v722_v2 }
 0x1c3   : > { %12521 = vst [vmem:[#allocation15_spill] sm:$0xff] %v8093_v11  ;;  %v8100_v26 = vpack.c.bf16 %v952_v19, %v949_v52  ;;  %4322 = vrot.lane.b32.xlu0 %v8038_v43, %s7582_s13  ;;  %2815 = vrot.lane.b32.xlu1 %v8032_v33, %s7583_s14 }
 0x1c4   : > { %12522 = vst [vmem:[#allocation16_spill] sm:$0xff] %v8095_v61 }
 0x1c5   : > { %12523 = vst [vmem:[#allocation17_spill] sm:$0xff] %v8100_v26  ;;  %5989 = vmatprep.subr.bf16.mxu0 %v8100_v26 }
 0x1c6   : > { %5990 = vmatpush3.bf16.msra.mxu0 %v8032_v33  ;;  %v730_v60 = vpop.f32.mrb[28].mxu0 }
 0x1c7   : > { %2060 = vrot.lane.b32.xlu0 %v8040_v21, %s7583_s14  ;;  %2012 = vrot.lane.b32.xlu1 %v8038_v43, %s7583_s14  ;;  %v6631_v27 = vpop.f32.mrb[28].mxu1  ;;  %v732_v34 = vpop.f32.mrb[29].mxu0 }
 0x1c8   : > { %v965_v28 = vpop.f32.mrb[29].mxu1  ;;  %5991 = vmatprep.subr.bf16.mxu0 %v8095_v61  ;;  %v734_v36 = vpop.f32.mrb[30].mxu0 }
 0x1c9   : > { %v6632_v37 = vpop.f32.mrb[30].mxu1  ;;  %v8113_v12 = vpack.c.bf16 %v734_v36, %v730_v60  ;;  %v736_v38 = vpop.f32.mrb[31].mxu0 }
 0x1ca   : > { %v8115_v13 = vpack.c.bf16 %v6632_v37, %v6631_v27  ;;  %v968_v44 = vpop.f32.mrb[31].mxu1  ;;  %5992 = vmatpush3.bf16.msra.mxu0 %v8026_v35  ;;  %v8118_v45 = vpack.c.bf16 %v736_v38, %v732_v34 }
 0x1cb   : > { %12524 = vst [vmem:[#allocation18_spill] sm:$0xff] %v8113_v12  ;;  %v8120_v40 = vpack.c.bf16 %v968_v44, %v965_v28  ;;  %3215 = vrot.lane.b32.xlu0 %v8040_v21, %s7584_s15  ;;  %3185 = vrot.lane.b32.xlu1 %v8054_v31, %s7584_s15 }
 0x1cc   : > { %12525 = vst [vmem:[#allocation19_spill] sm:$0xff] %v8115_v13 }
 0x1cd   : > { %12526 = vst [vmem:[#allocation20_spill] sm:$0xff] %v8120_v40  ;;  %5993 = vmatprep.subr.bf16.mxu0 %v8120_v40 }
 0x1ce   : > { %v740_v41 = vpop.f32.mrb[32].mxu0  ;;  %5994 = vmatpush3.bf16.msra.mxu0 %v8048_v25 }
 0x1cf   : > { %4354 = vrot.lane.b32.xlu0 %v8040_v21, %s7582_s13  ;;  %4324 = vrot.lane.b32.xlu1 %v8054_v31, %s7582_s13  ;;  %v742_v14 = vpop.f32.mrb[33].mxu0  ;;  %v1089_v21 = vsel %vm290_vm0, %v8058_v46, 0 }
 0x1d0   : > { %v744_v17 = vpop.f32.mrb[34].mxu0  ;;  %5995 = vmatprep.subr.bf16.mxu0 %v8115_v13 }
 0x1d1   : > { %v8133_v55 = vpack.c.bf16 %v744_v17, %v740_v41  ;;  %v746_v56 = vpop.f32.mrb[35].mxu0 }
 0x1d2   : > { %v8135_v1 = vpack.c.bf16 %v746_v56, %v742_v14  ;;  %5996 = vmatpush3.bf16.msra.mxu0 %v8042_v48 }
 0x1d3   : > { %12527 = vst [vmem:[#allocation21_spill] sm:$0xff] %v8133_v55  ;;  %2014 = vrot.lane.b32.xlu0 %v8054_v31, %s7583_s14  ;;  %3217 = vrot.lane.b32.xlu1 %v8058_v46, %s7584_s15 }
 0x1d4   : > { %6681 = vmatprep.subr.msk.bf16.mxu1 %vm290_vm0, %v8135_v1 }
 0x1d5   : > { %5934 = vmatpush3.bf16.xpose.msra.mxu1 %v1077_v57 }
 0x1d6   : > { %v750_v58 = vpop.f32.mrb[36].mxu0 }
 0x1d7   : > { %2062 = vrot.lane.b32.xlu0 %v8058_v46, %s7583_s14  ;;  %4356 = vrot.lane.b32.xlu1 %v8058_v46, %s7582_s13  ;;  %v752_v39 = vpop.f32.mrb[37].mxu0  ;;  %v1092_v46 = vsel %vm290_vm0, %v8077_v59, 0 }
 0x1d8   : > { %v754_v42 = vpop.f32.mrb[38].mxu0 }
 0x1d9   : > { %v8150_v30 = vpack.c.bf16 %v754_v42, %v750_v58  ;;  %v756_v47 = vpop.f32.mrb[39].mxu0 }
 0x1da   : > { %v8152_v49 = vpack.c.bf16 %v756_v47, %v752_v39 }
 0x1db   : > { %12528 = vst [vmem:[#allocation22_spill] sm:$0xff] %v8150_v30  ;;  %2016 = vrot.lane.b32.xlu1 %v8073_v50, %s7583_s14  ;;  %2825 = vrot.lane.b32.xlu0 %v8056_v32, %s7583_s14 }
 0x1dc   : > { %6682 = vmatprep.subr.msk.bf16.mxu1 %vm290_vm0, %v8152_v49 }
 0x1dd   : > { %5936 = vmatpush3.bf16.xpose.msra.mxu1 %v1080_v63 }
 0x1de   : > { %v760_v51 = vpop.f32.mrb[40].mxu0 }
 0x1df   : > { %3189 = vrot.lane.b32.xlu1 %v8093_v11, %s7584_s15  ;;  %2823 = vrot.lane.b32.xlu0 %v8060_v0, %s7583_s14  ;;  %v762_v54 = vpop.f32.mrb[41].mxu0 }
 0x1e0   : > { %v764_v23 = vpop.f32.mrb[42].mxu0 }
 0x1e1   : > { %v8166_v5 = vpack.c.bf16 %v764_v23, %v760_v51  ;;  %v766_v7 = vpop.f32.mrb[43].mxu0 }
 0x1e2   : > { %v8168_v2 = vpack.c.bf16 %v766_v7, %v762_v54 }
 0x1e3   : > { %12529 = vst [vmem:[#allocation23_spill] sm:$0xff] %v8166_v5  ;;  %3221 = vrot.lane.b32.xlu1 %v8098_v62, %s7584_s15  ;;  %3187 = vrot.lane.b32.xlu0 %v8073_v50, %s7584_s15 }
 0x1e4   : > { %6683 = vmatprep.subr.msk.bf16.mxu1 %vm290_vm0, %v8168_v2 }
 0x1e5   : > { %5938 = vmatpush3.bf16.xpose.msra.mxu1 %v1083_v24 }
 0x1e6   : > { %v770_v52 = vpop.f32.mrb[44].mxu0 }
 0x1e7   : > { %4360 = vrot.lane.b32.xlu1 %v8098_v62, %s7582_s13  ;;  %4326 = vrot.lane.b32.xlu0 %v8073_v50, %s7582_s13  ;;  %v772_v6 = vpop.f32.mrb[45].mxu0 }
 0x1e8   : > { %v774_v10 = vpop.f32.mrb[46].mxu0 }
 0x1e9   : > { %v8182_v15 = vpack.c.bf16 %v774_v10, %v770_v52  ;;  %v776_v19 = vpop.f32.mrb[47].mxu0 }
 0x1ea   : > { %v8184_v60 = vpack.c.bf16 %v776_v19, %v772_v6 }
 0x1eb   : > { %12530 = vst [vmem:[#allocation24_spill] sm:$0xff] %v8182_v15  ;;  %2064 = vrot.lane.b32.xlu0 %v8077_v59, %s7583_s14  ;;  %2833 = vrot.lane.b32.xlu1 %v8095_v61, %s7583_s14 }
 0x1ec   : > { %6684 = vmatprep.subr.msk.bf16.mxu1 %vm290_vm0, %v8184_v60 }
 0x1ed   : > { %5940 = vmatpush3.bf16.xpose.msra.mxu1 %v1086_v9 }
 0x1ee   : > { %v780_v27 = vpop.f32.mrb[48].mxu0 }
 0x1ef   : > { %3219 = vrot.lane.b32.xlu0 %v8077_v59, %s7584_s15  ;;  %v782_v34 = vpop.f32.mrb[49].mxu0  ;;  %2020 = vrot.lane.b32.xlu1 %v8113_v12, %s7583_s14 }
 0x1f0   : > { %v784_v28 = vpop.f32.mrb[50].mxu0 }
 0x1f1   : > { %v8198_v36 = vpack.c.bf16 %v784_v28, %v780_v27  ;;  %v786_v37 = vpop.f32.mrb[51].mxu0  ;;  %v1098_v27 = vsel %vm290_vm0, %v8118_v45, 0 }
 0x1f2   : > { %v8200_v38 = vpack.c.bf16 %v786_v37, %v782_v34 }
 0x1f3   : > { %12531 = vst [vmem:[#allocation25_spill] sm:$0xff] %v8198_v36  ;;  %4358 = vrot.lane.b32.xlu0 %v8077_v59, %s7582_s13  ;;  %3193 = vrot.lane.b32.xlu1 %v8133_v55, %s7584_s15  ;;  %v1095_v59 = vsel %vm290_vm0, %v8098_v62, 0 }
 0x1f4   : > { %6685 = vmatprep.subr.msk.bf16.mxu1 %vm290_vm0, %v8200_v38 }
 0x1f5   : > { %5942 = vmatpush3.bf16.xpose.msra.mxu1 %v1089_v21 }
 0x1f6   : > { %v790_v44 = vpop.f32.mrb[52].mxu0 }
 0x1f7   : > { %2829 = vrot.lane.b32.xlu0 %v8075_v22, %s7583_s14  ;;  %2070 = vrot.lane.b32.xlu1 %v8135_v1, %s7583_s14  ;;  %v792_v41 = vpop.f32.mrb[53].mxu0 }
 0x1f8   : > { %v794_v14 = vpop.f32.mrb[54].mxu0 }
 0x1f9   : > { %v8214_v17 = vpack.c.bf16 %v794_v14, %v790_v44  ;;  %v796_v56 = vpop.f32.mrb[55].mxu0 }
 0x1fa   : > { %v8216_v57 = vpack.c.bf16 %v796_v56, %v792_v41 }
 0x1fb   : > { %12532 = vst [vmem:[#allocation26_spill] sm:$0xff] %v8214_v17  ;;  %2827 = vrot.lane.b32.xlu0 %v8080_v4, %s7583_s14  ;;  %4364 = vrot.lane.b32.xlu1 %v8135_v1, %s7582_s13 }
 0x1fc   : > { %6686 = vmatprep.subr.msk.bf16.mxu1 %vm290_vm0, %v8216_v57 }
 0x1fd   : > { %5944 = vmatpush3.bf16.xpose.msra.mxu1 %v1092_v46 }
 0x1fe   : > { %v800_v58 = vpop.f32.mrb[56].mxu0 }
 0x1ff   : > { %2018 = vrot.lane.b32.xlu0 %v8093_v11, %s7583_s14  ;;  %2024 = vrot.lane.b32.xlu1 %v8150_v30, %s7583_s14  ;;  %v802_v39 = vpop.f32.mrb[57].mxu0 }
 0x200   : > { %v804_v42 = vpop.f32.mrb[58].mxu0 }
 0x201   : > { %v8230_v47 = vpack.c.bf16 %v804_v42, %v800_v58  ;;  %v806_v63 = vpop.f32.mrb[59].mxu0 }
 0x202   : > { %v8232_v51 = vpack.c.bf16 %v806_v63, %v802_v39 }
 0x203   : > { %12533 = vst [vmem:[#allocation27_spill] sm:$0xff] %v8230_v47  ;;  %2066 = vrot.lane.b32.xlu0 %v8098_v62, %s7583_s14  ;;  %2072 = vrot.lane.b32.xlu1 %v8152_v49, %s7583_s14 }
 0x204   : > { %6687 = vmatprep.subr.msk.bf16.mxu1 %vm290_vm0, %v8232_v51 }
 0x205   : > { %v8242_v54 = vpop.permute.xlu1 %4316  ;;  %5946 = vmatpush3.bf16.xpose.msra.mxu1 %v1095_v59  ;;  %v8244_v23 = vpop.permute.xlu0 %2006 }
 0x206   : > { %12534 = vst [vmem:[#allocation28_spill] sm:$0xff] %v8242_v54  ;;  %v810_v7 = vpop.f32.mrb[60].mxu0 }
 0x207   : > { %3227 = vrot.lane.b32.xlu1 %v8152_v49, %s7584_s15  ;;  %2831 = vrot.lane.b32.xlu0 %v8100_v26, %s7583_s14  ;;  %v812_v24 = vpop.f32.mrb[61].mxu0 }
 0x208   : > { %v814_v52 = vpop.f32.mrb[62].mxu0 }
 0x209   : > { %v8250_v6 = vpack.c.bf16 %v814_v52, %v810_v7  ;;  %v8252_v10 = vpop.permute.xlu1 %3209  ;;  %v816_v19 = vpop.f32.mrb[63].mxu0 }
 0x20a   : > { %v8254_v62 = vpack.c.bf16 %v816_v19, %v812_v24  ;;  %v8256_v9 = vpop.permute.xlu0 %3177 }
 0x20b   : > { %12535 = vst [vmem:[#allocation29_spill] sm:$0xff] %v8250_v6  ;;  %3197 = vrot.lane.b32.xlu1 %v8166_v5, %s7584_s15  ;;  %3191 = vrot.lane.b32.xlu0 %v8113_v12, %s7584_s15 }
 0x20c   : > { %6688 = vmatprep.subr.msk.bf16.mxu1 %vm290_vm0, %v8254_v62 }
 0x20d   : > { %v8266_v34 = vpop.permute.xlu1 %4348  ;;  %5948 = vmatpush3.bf16.xpose.msra.mxu1 %v1098_v27 }
 0x20e   : > { %v8268_v28 = vpop.permute.xlu0 %2054 }
 0x20f   : > { %2074 = vrot.lane.b32.xlu1 %v8168_v2, %s7583_s14  ;;  %2068 = vrot.lane.b32.xlu0 %v8118_v45, %s7583_s14 }
 0x211   : > { %v8274_v37 = vpop.permute.xlu1 %2807 }
 0x212   : > { %v8276_v21 = vpop.permute.xlu0 %2809 }
 0x213   : > { %4368 = vrot.lane.b32.xlu1 %v8168_v2, %s7582_s13  ;;  %3223 = vrot.lane.b32.xlu0 %v8118_v45, %s7584_s15 }
 0x214   : > { %5950 = vmatmul.mubr.msk.bf16.vlgmr.msra.gmra.mrb[32].mxu1 %vm290_vm0, %v7988_v16 }
 0x215   : > { %v8284_v44 = vpop.permute.xlu1 %2008  ;;  %5951 = vmatprep.mubr.msk.bf16.mxu1 %vm290_vm0, %v8006_v53 }
 0x216   : > { %v8288_v41 = vpop.permute.xlu0 %4318 }
 0x217   : > { %12536 = vst [vmem:[#allocation30_spill] sm:$0xff] %v8288_v41  ;;  %2028 = vrot.lane.b32.xlu1 %v8182_v15, %s7583_s14  ;;  %4362 = vrot.lane.b32.xlu0 %v8118_v45, %s7582_s13 }
 0x219   : > { %v8294_v14 = vpop.permute.xlu1 %3179 }
 0x21a   : > { %v8296_v56 = vpop.permute.xlu0 %3211 }
 0x21b   : > { %2076 = vrot.lane.b32.xlu1 %v8184_v60, %s7583_s14  ;;  %2022 = vrot.lane.b32.xlu0 %v8133_v55, %s7583_s14 }
 0x21c   : > { %5952 = vmatmul.mubr.msk.bf16.gmra.mrb[36].mxu1 %vm290_vm0, %v8006_v53 }
 0x21d   : > { %v8304_v16 = vpop.permute.xlu1 %2056  ;;  %5953 = vmatprep.mubr.msk.bf16.mxu1 %vm290_vm0, %v8022_v8 }
 0x21e   : > { %v8308_v46 = vpop.permute.xlu0 %4350 }
 0x21f   : > { %3231 = vrot.lane.b32.xlu1 %v8184_v60, %s7584_s15  ;;  %3225 = vrot.lane.b32.xlu0 %v8135_v1, %s7584_s15 }
 0x221   : > { %v8314_v45 = vpop.permute.xlu1 %2811 }
 0x222   : > { %v8316_v58 = vpop.permute.xlu0 %2813 }
 0x223   : > { %12537 = vst [vmem:[#allocation31_spill] sm:$0xff] %v8316_v58  ;;  %3201 = vrot.lane.b32.xlu1 %v8198_v36, %s7584_s15  ;;  %3195 = vrot.lane.b32.xlu0 %v8150_v30, %s7584_s15 }
 0x224   : > { %5954 = vmatmul.mubr.msk.bf16.gmra.mrb[40].mxu1 %vm290_vm0, %v8022_v8 }
 0x225   : > { %v8324_v53 = vpop.permute.xlu1 %4320  ;;  %5955 = vmatprep.mubr.msk.bf16.mxu1 %vm290_vm0, %v8038_v43 }
 0x226   : > { %12538 = vst [vmem:[#allocation32_spill] sm:$0xff] %v8324_v53  ;;  %v8328_v39 = vpop.permute.xlu0 %2010 }
 0x227   : > { %2078 = vrot.lane.b32.xlu1 %v8200_v38, %s7583_s14  ;;  %4366 = vrot.lane.b32.xlu0 %v8152_v49, %s7582_s13 }
 0x229   : > { %v8334_v1 = vpop.permute.xlu1 %3213 }
 0x22a   : > { %v8336_v42 = vpop.permute.xlu0 %3181 }
 0x22b   : > { %4372 = vrot.lane.b32.xlu1 %v8200_v38, %s7582_s13  ;;  %2026 = vrot.lane.b32.xlu0 %v8166_v5, %s7583_s14 }
 0x22c   : > { %5956 = vmatmul.mubr.msk.bf16.gmra.mrb[44].mxu1 %vm290_vm0, %v8038_v43 }
 0x22d   : > { %v8344_v8 = vpop.permute.xlu1 %4352  ;;  %5957 = vmatprep.mubr.msk.bf16.mxu1 %vm290_vm0, %v8054_v31 }
 0x22e   : > { %v8348_v63 = vpop.permute.xlu0 %2058 }
 0x22f   : > { %3229 = vrot.lane.b32.xlu0 %v8168_v2, %s7584_s15  ;;  %2032 = vrot.lane.b32.xlu1 %v8214_v17, %s7583_s14  ;;  %v2141_v48 = vsel %vm290_vm0, %v8348_v63, 0 }
 0x231   : > { %v8354_v49 = vpop.permute.xlu1 %2817 }
 0x232   : > { %12539 = vst [vmem:[#allocation33_spill] sm:$0xff] %v8354_v49  ;;  %v8356_v59 = vpop.permute.xlu0 %3183 }
 0x233   : > { %3199 = vrot.lane.b32.xlu0 %v8182_v15, %s7584_s15  ;;  %2080 = vrot.lane.b32.xlu1 %v8216_v57, %s7583_s14 }
 0x234   : > { %5958 = vmatmul.mubr.msk.bf16.gmra.mrb[48].mxu1 %vm290_vm0, %v8054_v31 }
 0x235   : > { %v8364_v43 = vpop.permute.xlu1 %2815  ;;  %5959 = vmatprep.mubr.msk.bf16.mxu1 %vm290_vm0, %v8073_v50 }
 0x236   : > { %12540 = vst [vmem:[#allocation34_spill] sm:$0xff] %v8364_v43  ;;  %v8368_v2 = vpop.permute.xlu0 %4322 }
 0x237   : > { %12541 = vst [vmem:[#allocation35_spill] sm:$0xff] %v8368_v2  ;;  %4370 = vrot.lane.b32.xlu0 %v8184_v60, %s7582_s13  ;;  %3235 = vrot.lane.b32.xlu1 %v8216_v57, %s7584_s15 }
 0x239   : > { %v8374_v7 = vpop.permute.xlu1 %2012 }
 0x23a   : > { %v8376_v24 = vpop.permute.xlu0 %2060 }
 0x23b   : > { %2030 = vrot.lane.b32.xlu0 %v8198_v36, %s7583_s14  ;;  %3205 = vrot.lane.b32.xlu1 %v8230_v47, %s7584_s15 }
 0x23c   : > { %5960 = vmatmul.mubr.msk.bf16.gmra.mrb[52].mxu1 %vm290_vm0, %v8073_v50 }
 0x23d   : > { %v8384_v31 = vpop.permute.xlu1 %3185  ;;  %5961 = vmatprep.mubr.msk.bf16.mxu1 %vm290_vm0, %v8093_v11 }
 0x23e   : > { %v8388_v60 = vpop.permute.xlu0 %3215 }
 0x23f   : > { %3233 = vrot.lane.b32.xlu0 %v8200_v38, %s7584_s15  ;;  %2082 = vrot.lane.b32.xlu1 %v8232_v51, %s7583_s14 }
 0x241   : > { %v8394_v52 = vpop.permute.xlu1 %4324 }
 0x242   : > { %12542 = vst [vmem:[#allocation36_spill] sm:$0xff] %v8394_v52  ;;  %v8396_v19 = vpop.permute.xlu0 %4354 }
 0x243   : > { %3203 = vrot.lane.b32.xlu0 %v8214_v17, %s7584_s15  ;;  %4376 = vrot.lane.b32.xlu1 %v8232_v51, %s7582_s13 }
 0x244   : > { %5962 = vmatmul.mubr.msk.bf16.gmra.mrb[56].mxu1 %vm290_vm0, %v8093_v11 }
 0x245   : > { %v8404_v50 = vpop.permute.xlu1 %3217  ;;  %5963 = vmatprep.mubr.msk.bf16.mxu1 %vm290_vm0, %v8113_v12 }
 0x246   : > { %v8408_v38 = vpop.permute.xlu0 %2014 }
 0x247   : > { %4374 = vrot.lane.b32.xlu0 %v8216_v57, %s7582_s13  ;;  %2036 = vrot.lane.b32.xlu1 %v8250_v6, %s7583_s14 }
 0x249   : > { %v8414_v27 = vpop.permute.xlu1 %4356 }
 0x24a   : > { %v8416_v35 = vpop.permute.xlu0 %2062 }
 0x24b   : > { %2084 = vrot.lane.b32.xlu1 %v8254_v62, %s7583_s14  ;;  %2034 = vrot.lane.b32.xlu0 %v8230_v47, %s7583_s14 }
 0x24c   : > { %5964 = vmatmul.mubr.msk.bf16.gmra.mrb[60].mxu1 %vm290_vm0, %v8113_v12 }
 0x24d   : > { %v8424_v26 = vpop.permute.xlu1 %2016  ;;  %5965 = vmatprep.mubr.msk.bf16.mxu1 %vm290_vm0, %v8133_v55 }
 0x24e   : > { %v8428_v57 = vpop.permute.xlu0 %2825 }
 0x24f   : > { %3237 = vrot.lane.b32.xlu0 %v8232_v51, %s7584_s15  ;;  %3239 = vrot.lane.b32.xlu1 %v8254_v62, %s7584_s15 }
 0x251   : > { %v8434_v61 = vpop.permute.xlu1 %3189 }
 0x252   : > { %v2824_v33 = vpop.permute.xlu0 %2823 }
 0x253   : > { %6141 = vmatprep.subr.bf16.mxu0 %v2824_v33  ;;  %3207 = vrot.lane.b32.xlu0 %v8250_v6, %s7584_s15 }
 0x254   : > { %5966 = vmatmul.mubr.msk.bf16.gmra.mrb[64].mxu1 %vm290_vm0, %v8133_v55 }
 0x255   : > { %v8440_v29 = vpop.permute.xlu1 %3221  ;;  %5967 = vmatprep.mubr.msk.bf16.mxu1 %vm290_vm0, %v8150_v30 }
 0x256   : > { %v8444_v4 = vpop.permute.xlu0 %3187 }
 0x257   : > { %4378 = vrot.lane.b32.xlu0 %v8254_v62, %s7582_s13 }
 0x259   : > { %v8448_v51 = vpop.permute.xlu1 %4360 }
 0x25a   : > { %v8450_v22 = vpop.permute.xlu0 %4326 }
 0x25b   : > { %12543 = vst [vmem:[#allocation37_spill] sm:$0xff] %v8450_v22 }
 0x25c   : > { %5968 = vmatmul.mubr.msk.bf16.gmra.mrb[68].mxu1 %vm290_vm0, %v8150_v30  ;;  %v2135_v30 = vsel %vm290_vm0, %v8268_v28, 0 }
 0x25d   : > { %v8454_v33 = vpop.permute.xlu1 %2833  ;;  %5969 = vmatprep.mubr.msk.bf16.mxu1 %vm290_vm0, %v8166_v5 }
 0x25e   : > { %12544 = vst [vmem:[#allocation38_spill] sm:$0xff] %v8454_v33  ;;  %v2065_v18 = vpop.permute.xlu0 %2064 }
 0x25f   : > { %v2150_v41 = vsel %vm290_vm0, %v2065_v18, 0 }
 0x261   : > { %v8458_v20 = vpop.permute.xlu1 %2020 }
 0x262   : > { %v8460_v3 = vpop.permute.xlu0 %3219 }
 0x264   : > { %5970 = vmatmul.mubr.msk.bf16.gmra.mrb[72].mxu1 %vm290_vm0, %v8166_v5 }
 0x265   : > { %v8464_v62 = vpop.permute.xlu1 %3193  ;;  %5971 = vmatprep.mubr.msk.bf16.mxu1 %vm290_vm0, %v8182_v15 }
 0x266   : > { %v8468_v32 = vpop.permute.xlu0 %4358 }
 0x269   : > { %v2071_v0 = vpop.permute.xlu1 %2070 }
 0x26a   : > { %6689 = vmatprep.subr.msk.bf16.mxu1 %vm290_vm0, %v2071_v0  ;;  %v8473_v55 = vpop.permute.xlu0 %2829  ;;  %v2138_v0 = vsel %vm290_vm0, %v8304_v16, 0 }
 0x26b   : > { %6094 = vmatpush3.bf16.xpose.msra.mxu1 %v2135_v30 }
 0x26c   : > { %5972 = vmatmul.mubr.msk.bf16.gmra.mrb[76].mxu1 %vm290_vm0, %v8182_v15 }
 0x26d   : > { %v8477_v5 = vpop.permute.xlu1 %4364  ;;  %5973 = vmatprep.mubr.msk.bf16.mxu1 %vm290_vm0, %v8198_v36 }
 0x26e   : > { %v8481_v12 = vpop.permute.xlu0 %2827 }
 0x271   : > { %v8483_v22 = vpop.permute.xlu1 %2024 }
 0x272   : > { %v8492_v30 = vpop.permute.xlu0 %2018 }
 0x274   : > { %5974 = vmatmul.mubr.msk.bf16.gmra.mrb[80].mxu1 %vm290_vm0, %v8198_v36 }
 0x275   : > { %v2073_v28 = vpop.permute.xlu1 %2072  ;;  %5975 = vmatprep.mubr.msk.bf16.mxu1 %vm290_vm0, %v8214_v17 }
 0x276   : > { %6690 = vmatprep.subr.msk.bf16.mxu1 %vm290_vm0, %v2073_v28  ;;  %v2067_v52 = vpop.permute.xlu0 %2066 }
 0x277   : > { %6096 = vmatpush3.bf16.xpose.msra.mxu1 %v2138_v0 }
 0x279   : > { %v3228_v15 = vpop.permute.xlu1 %3227 }
 0x27a   : > { %v8503_v16 = vpop.permute.xlu0 %2831 }
 0x27b   : > { %12545 = vst [vmem:[#allocation39_spill] sm:$0xff] %v8503_v16 }
 0x27c   : > { %5976 = vmatmul.mubr.msk.bf16.gmra.mrb[84].mxu1 %vm290_vm0, %v8214_v17 }
 0x27d   : > { %v8496_v2 = vpop.permute.xlu1 %3197  ;;  %5977 = vmatprep.mubr.msk.bf16.mxu1 %vm290_vm0, %v8230_v47 }
 0x27e   : > { %v8511_v0 = vpop.permute.xlu0 %3191 }
 0x281   : > { %v2075_v36 = vpop.permute.xlu1 %2074 }
 0x282   : > { %6691 = vmatprep.subr.msk.bf16.mxu1 %vm290_vm0, %v2075_v36  ;;  %v2069_v36 = vpop.permute.xlu0 %2068 }
 0x283   : > { %6098 = vmatpush3.bf16.xpose.msra.mxu1 %v2141_v48  ;;  %v2144_v48 = vsel %vm290_vm0, %v8376_v24, 0  ;;  %v2156_v16 = vsel %vm290_vm0, %v2069_v36, 0 }
 0x284   : > { %5978 = vmatmul.mubr.msk.bf16.gmra.mrb[88].mxu1 %vm290_vm0, %v8230_v47 }
 0x285   : > { %v8507_v28 = vpop.permute.xlu1 %4368  ;;  %5979 = vmatprep.mubr.msk.bf16.mxu1 %vm290_vm0, %v8250_v6 }
 0x286   : > { %v8522_v53 = vpop.permute.xlu0 %3223 }
 0x289   : > { %v8513_v17 = vpop.permute.xlu1 %2028 }
 0x28a   : > { %v8529_v40 = vpop.permute.xlu0 %4362 }
 0x28c   : > { %5980 = vmatmul.mubr.msk.bf16.gmra.mrb[92].mxu1 %vm290_vm0, %v8250_v6  ;;  %v2147_v6 = vsel %vm290_vm0, %v8416_v35, 0 }
 0x28d   : > { %v2077_v63 = vpop.permute.xlu1 %2076  ;;  %6109 = vmatprep.mubr.msk.bf16.mxu1 %vm290_vm0, %v8244_v23 }
 0x28e   : > { %6692 = vmatprep.subr.msk.bf16.mxu1 %vm290_vm0, %v2077_v63  ;;  %v8533_v24 = vpop.permute.xlu0 %2022 }
 0x28f   : > { %6100 = vmatpush3.bf16.xpose.msra.mxu1 %v2144_v48 }
 0x291   : > { %v3232_v47 = vpop.permute.xlu1 %3231 }
 0x292   : > { %v3226_v54 = vpop.permute.xlu0 %3225 }
 0x295   : > { %v8524_v13 = vpop.permute.xlu1 %3201 }
 0x296   : > { %12546 = vst [vmem:[#allocation40_spill] sm:$0xff] %v8524_v13  ;;  %v8539_v35 = vpop.permute.xlu0 %3195 }
 0x299   : > { %v2079_v11 = vpop.permute.xlu1 %2078 }
 0x29a   : > { %6693 = vmatprep.subr.msk.bf16.mxu1 %vm290_vm0, %v2079_v11  ;;  %v8545_v13 = vpop.permute.xlu0 %4366 }
 0x29b   : > { %6102 = vmatpush3.bf16.xpose.msra.mxu1 %v2147_v6  ;;  %v2153_v6 = vsel %vm290_vm0, %v2067_v52, 0 }
 0x29d   : > { %v8531_v25 = vpop.permute.xlu1 %4372 }
 0x29e   : > { %v8549_v18 = vpop.permute.xlu0 %2026 }
 0x2a1   : > { %v8535_v63 = vpop.permute.xlu1 %2032 }
 0x2a5   : > { %v2081_v48 = vpop.permute.xlu1 %2080 }
 0x2a6   : > { %6694 = vmatprep.subr.msk.bf16.mxu1 %vm290_vm0, %v2081_v48 }
 0x2a7   : > { %6104 = vmatpush3.bf16.xpose.msra.mxu1 %v2150_v41 }
 0x2a9   : > { %v3236_v49 = vpop.permute.xlu1 %3235 }
 0x2ad   : > { %v8541_v11 = vpop.permute.xlu1 %3205 }
 0x2ae   : > { %12547 = vst [vmem:[#allocation41_spill] sm:$0xff] %v8541_v11  ;;  %v3230_v11 = vpop.permute.xlu0 %3229 }
 0x2b1   : > { %v2083_v33 = vpop.permute.xlu1 %2082 }
 0x2b2   : > { %6695 = vmatprep.subr.msk.bf16.mxu1 %vm290_vm0, %v2083_v33  ;;  %v8556_v52 = vpop.permute.xlu0 %3199  ;;  %v3290_v33 = vsel %vm290_vm0, %v8252_v10, 0 }
 0x2b3   : > { %6106 = vmatpush3.bf16.xpose.msra.mxu1 %v2153_v6  ;;  %v3305_v6 = vsel %vm290_vm0, %v8460_v3, 0 }
 0x2b5   : > { %v8547_v43 = vpop.permute.xlu1 %4376 }
 0x2b6   : > { %v8565_v36 = vpop.permute.xlu0 %4370 }
 0x2b9   : > { %v8551_v48 = vpop.permute.xlu1 %2036 }
 0x2bd   : > { %v2085_v41 = vpop.permute.xlu1 %2084 }
 0x2be   : > { %6696 = vmatprep.subr.msk.bf16.mxu1 %vm290_vm0, %v2085_v41 }
 0x2bf   : > { %6108 = vmatpush3.bf16.xpose.msra.mxu1 %v2156_v16  ;;  %v3293_v16 = vsel %vm290_vm0, %v8296_v56, 0 }
 0x2c0   : > { %6697 = vmatprep.subr.msk.bf16.mxu1 %vm290_vm0, %v3226_v54  ;;  %v8574_v54 = vpop.permute.xlu0 %2030 }
 0x2c6   : > { %6110 = vmatmul.mubr.msk.bf16.vlgmr.msra.gmra.mrb[96].mxu1 %vm290_vm0, %v8244_v23  ;;  %v3296_v23 = vsel %vm290_vm0, %v8334_v1, 0 }
 0x2c7   : > { %6111 = vmatprep.mubr.msk.bf16.mxu1 %vm290_vm0, %v8284_v44  ;;  %6254 = vmatpush3.bf16.xpose.msra.mxu1 %v3290_v33 }
 0x2c8   : > { %6698 = vmatprep.subr.msk.bf16.mxu1 %vm290_vm0, %v3228_v15  ;;  %v3234_v15 = vpop.permute.xlu0 %3233 }
 0x2cc   : > { %v8583_v10 = vpop.permute.xlu0 %3203 }
 0x2cd   : > { %12548 = vst [vmem:[#allocation42_spill] sm:$0xff] %v8583_v10 }
 0x2ce   : > { %6112 = vmatmul.mubr.msk.bf16.gmra.mrb[100].mxu1 %vm290_vm0, %v8284_v44  ;;  %v3299_v44 = vsel %vm290_vm0, %v8388_v60, 0 }
 0x2cf   : > { %6113 = vmatprep.mubr.msk.bf16.mxu1 %vm290_vm0, %v8328_v39  ;;  %6256 = vmatpush3.bf16.xpose.msra.mxu1 %v3293_v16 }
 0x2d0   : > { %6699 = vmatprep.subr.msk.bf16.mxu1 %vm290_vm0, %v3230_v11  ;;  %v8592_v56 = vpop.permute.xlu0 %4374 }
 0x2d6   : > { %6114 = vmatmul.mubr.msk.bf16.gmra.mrb[104].mxu1 %vm290_vm0, %v8328_v39  ;;  %v3302_v39 = vsel %vm290_vm0, %v8404_v50, 0 }
 0x2d7   : > { %6115 = vmatprep.mubr.msk.bf16.mxu1 %vm290_vm0, %v8374_v7  ;;  %6258 = vmatpush3.bf16.xpose.msra.mxu1 %v3296_v23 }
 0x2d8   : > { %6700 = vmatprep.subr.msk.bf16.mxu1 %vm290_vm0, %v3232_v47 }
 0x2de   : > { %6116 = vmatmul.mubr.msk.bf16.gmra.mrb[108].mxu1 %vm290_vm0, %v8374_v7  ;;  %v8605_v7 = vpop.permute.xlu0 %2034 }
 0x2df   : > { %6117 = vmatprep.mubr.msk.bf16.mxu1 %vm290_vm0, %v8408_v38  ;;  %6260 = vmatpush3.bf16.xpose.msra.mxu1 %v3299_v44 }
 0x2e0   : > { %6701 = vmatprep.subr.msk.bf16.mxu1 %vm290_vm0, %v3234_v15  ;;  %v3308_v15 = vsel %vm290_vm0, %v8440_v29, 0 }
 0x2e6   : > { %6118 = vmatmul.mubr.msk.bf16.gmra.mrb[112].mxu1 %vm290_vm0, %v8408_v38 }
 0x2e7   : > { %v8598_v47 = vpop.f32.mrb[32].mxu1  ;;  %6119 = vmatprep.mubr.msk.bf16.mxu1 %vm290_vm0, %v8424_v26  ;;  %6262 = vmatpush3.bf16.xpose.msra.mxu1 %v3302_v39  ;;  %v3240_v39 = vpop.permute.xlu1 %3239 }
 0x2e8   : > { %v8602_v1 = vpop.f32.mrb[33].mxu1  ;;  %6702 = vmatprep.subr.msk.bf16.mxu1 %vm290_vm0, %v3236_v49  ;;  %v3238_v49 = vpop.permute.xlu0 %3237 }
 0x2e9   : > { %v8607_v60 = vpop.f32.mrb[34].mxu1  ;;  %v1317_v50 = vmax.f32 %v8598_v47, %v8602_v1 }
 0x2ea   : > { %v8611_v11 = vpop.f32.mrb[35].mxu1 }
 0x2eb   : > { %1318 = vmax.xlane.f32.xlu1 %v1317_v50  ;;  %v1320_v38 = vmax.f32 %v8607_v60, %v8611_v11 }
 0x2ed   : > { %1321 = vmax.xlane.f32.xlu0 %v1320_v38 }
 0x2ee   : > { %6120 = vmatmul.mubr.msk.bf16.gmra.mrb[116].mxu1 %vm290_vm0, %v8424_v26 }
 0x2ef   : > { %v8619_v41 = vpop.f32.mrb[36].mxu1  ;;  %6121 = vmatprep.mubr.msk.bf16.mxu1 %vm290_vm0, %v8492_v30  ;;  %6264 = vmatpush3.bf16.xpose.msra.mxu1 %v3305_v6 }
 0x2f0   : > { %v8623_v33 = vpop.f32.mrb[37].mxu1  ;;  %6703 = vmatprep.subr.msk.bf16.mxu1 %vm290_vm0, %v3238_v49  ;;  %v3311_v49 = vsel %vm290_vm0, %v8522_v53, 0 }
 0x2f1   : > { %v8626_v16 = vpop.f32.mrb[38].mxu1  ;;  %v1323_v23 = vmax.f32 %v8619_v41, %v8623_v33 }
 0x2f2   : > { %v8630_v3 = vpop.f32.mrb[39].mxu1 }
 0x2f3   : > { %1324 = vmax.xlane.f32.xlu1 %v1323_v23  ;;  %v1326_v26 = vmax.f32 %v8626_v16, %v8630_v3 }
 0x2f6   : > { %6122 = vmatmul.mubr.msk.bf16.gmra.mrb[120].mxu1 %vm290_vm0, %v8492_v30 }
 0x2f7   : > { %1327 = vmax.xlane.f32.xlu1 %v1326_v26  ;;  %v8638_v44 = vpop.f32.mrb[40].mxu1  ;;  %6123 = vmatprep.mubr.msk.bf16.mxu1 %vm290_vm0, %v8458_v20 }
 0x2f8   : > { %6266 = vmatpush3.bf16.xpose.msra.mxu1 %v3308_v15  ;;  %v8642_v50 = vpop.f32.mrb[41].mxu1 }
 0x2f9   : > { %6704 = vmatprep.subr.msk.bf16.mxu1 %vm290_vm0, %v3240_v39  ;;  %v8645_v38 = vpop.f32.mrb[42].mxu1  ;;  %v1329_v30 = vmax.f32 %v8638_v44, %v8642_v50 }
 0x2fa   : > { %v8649_v6 = vpop.f32.mrb[43].mxu1 }
 0x2fb   : > { %1330 = vmax.xlane.f32.xlu0 %v1329_v30  ;;  %v1332_v29 = vmax.f32 %v8645_v38, %v8649_v6 }
 0x2fd   : > { %1333 = vmax.xlane.f32.xlu1 %v1332_v29 }
 0x2fe   : > { %6124 = vmatmul.mubr.msk.bf16.gmra.mrb[124].mxu1 %vm290_vm0, %v8458_v20 }
 0x2ff   : > { %v8657_v23 = vpop.f32.mrb[44].mxu1  ;;  %6125 = vmatprep.mubr.msk.bf16.mxu1 %vm290_vm0, %v8533_v24 }
 0x300   : > { %6268 = vmatpush3.bf16.xpose.msra.mxu1 %v3311_v49  ;;  %v8661_v26 = vpop.f32.mrb[45].mxu1 }
 0x301   : > { %6705 = vmatprep.subr.msk.bf16.mxu1 %vm290_vm0, %v8477_v5  ;;  %v8665_v15 = vpop.f32.mrb[46].mxu1  ;;  %v1335_v39 = vmax.f32 %v8657_v23, %v8661_v26 }
 0x302   : > { %v8669_v20 = vpop.f32.mrb[47].mxu1 }
 0x303   : > { %1336 = vmax.xlane.f32.xlu1 %v1335_v39  ;;  %v1338_v53 = vmax.f32 %v8665_v15, %v8669_v20 }
 0x306   : > { %6126 = vmatmul.mubr.msk.bf16.gmra.mrb[128].mxu1 %vm290_vm0, %v8533_v24 }
 0x307   : > { %1339 = vmax.xlane.f32.xlu1 %v1338_v53  ;;  %v8675_v30 = vpop.f32.mrb[48].mxu1  ;;  %6127 = vmatprep.mubr.msk.bf16.mxu1 %vm290_vm0, %v8483_v22 }
 0x308   : > { %v8679_v5 = vpop.f32.mrb[49].mxu1 }
 0x309   : > { %12549 = vst [vmem:[#allocation43_spill] sm:$0xff] %v8679_v5  ;;  %v8681_v29 = vpop.f32.mrb[50].mxu1  ;;  %v1341_v49 = vmax.f32 %v8675_v30, %v8679_v5 }
 0x30a   : > { %12550 = vst [vmem:[#allocation44_spill] sm:$0xff] %v8681_v29  ;;  %v8685_v39 = vpop.f32.mrb[51].mxu1 }
 0x30b   : > { %12551 = vst [vmem:[#allocation45_spill] sm:$0xff] %v8685_v39  ;;  %1342 = vmax.xlane.f32.xlu0 %v1341_v49  ;;  %v1344_v10 = vmax.f32 %v8681_v29, %v8685_v39 }
 0x30d   : > { %1345 = vmax.xlane.f32.xlu1 %v1344_v10 }
 0x30e   : > { %6128 = vmatmul.mubr.msk.bf16.gmra.mrb[132].mxu1 %vm290_vm0, %v8483_v22 }
 0x30f   : > { %v8691_v24 = vpop.f32.mrb[52].mxu1  ;;  %6129 = vmatprep.mubr.msk.bf16.mxu1 %vm290_vm0, %v8549_v18 }
 0x310   : > { %v8695_v53 = vpop.f32.mrb[53].mxu1 }
 0x311   : > { %12552 = vst [vmem:[#allocation46_spill] sm:$0xff] %v8695_v53  ;;  %v8697_v58 = vpop.f32.mrb[54].mxu1  ;;  %v1347_v5 = vmax.f32 %v8691_v24, %v8695_v53 }
 0x312   : > { %12553 = vst [vmem:[#allocation47_spill] sm:$0xff] %v8697_v58  ;;  %v8701_v49 = vpop.f32.mrb[55].mxu1 }
 0x313   : > { %12554 = vst [vmem:[#allocation48_spill] sm:$0xff] %v8701_v49  ;;  %1348 = vmax.xlane.f32.xlu1 %v1347_v5  ;;  %v1350_v10 = vmax.f32 %v8697_v58, %v8701_v49 }
 0x315   : > { %1351 = vmax.xlane.f32.xlu0 %v1350_v10 }
 0x316   : > { %6130 = vmatmul.mubr.msk.bf16.gmra.mrb[136].mxu1 %vm290_vm0, %v8549_v18 }
 0x317   : > { %v8707_v22 = vpop.f32.mrb[56].mxu1  ;;  %6131 = vmatprep.mubr.msk.bf16.mxu1 %vm290_vm0, %v8513_v17 }
 0x318   : > { %v8711_v39 = vpop.f32.mrb[57].mxu1 }
 0x319   : > { %12555 = vst [vmem:[#allocation49_spill] sm:$0xff] %v8711_v39  ;;  %v8713_v29 = vpop.f32.mrb[58].mxu1  ;;  %v1353_v53 = vmax.f32 %v8707_v22, %v8711_v39 }
 0x31a   : > { %v8717_v5 = vpop.f32.mrb[59].mxu1 }
 0x31b   : > { %12556 = vst [vmem:[#allocation50_spill] sm:$0xff] %v8717_v5  ;;  %1354 = vmax.xlane.f32.xlu1 %v1353_v53  ;;  %v1356_v10 = vmax.f32 %v8713_v29, %v8717_v5 }
 0x31d   : > { %1357 = vmax.xlane.f32.xlu0 %v1356_v10 }
 0x31e   : > { %6132 = vmatmul.mubr.msk.bf16.gmra.mrb[140].mxu1 %vm290_vm0, %v8513_v17 }
 0x31f   : > { %v8723_v18 = vpop.f32.mrb[60].mxu1  ;;  %6133 = vmatprep.mubr.msk.bf16.mxu1 %vm290_vm0, %v8574_v54 }
 0x320   : > { %12557 = vst [vmem:[#allocation51_spill] sm:$0xff] %v8723_v18  ;;  %v8727_v49 = vpop.f32.mrb[61].mxu1 }
 0x321   : > { %12558 = vst [vmem:[#allocation52_spill] sm:$0xff] %v8727_v49  ;;  %v8729_v58 = vpop.f32.mrb[62].mxu1  ;;  %v1359_v39 = vmax.f32 %v8723_v18, %v8727_v49 }
 0x322   : > { %12559 = vst [vmem:[#allocation53_spill] sm:$0xff] %v8729_v58  ;;  %v8733_v53 = vpop.f32.mrb[63].mxu1 }
 0x323   : > { %12560 = vst [vmem:[#allocation54_spill] sm:$0xff] %v8733_v53  ;;  %1360 = vmax.xlane.f32.xlu1 %v1359_v39  ;;  %v1362_v10 = vmax.f32 %v8729_v58, %v8733_v53 }
 0x325   : > { %1363 = vmax.xlane.f32.xlu0 %v1362_v10 }
 0x326   : > { %6134 = vmatmul.mubr.msk.bf16.gmra.mrb[144].mxu1 %vm290_vm0, %v8574_v54 }
 0x327   : > { %v8739_v17 = vpop.f32.mrb[64].mxu1  ;;  %6135 = vmatprep.mubr.msk.bf16.mxu1 %vm290_vm0, %v8535_v63 }
 0x328   : > { %12561 = vst [vmem:[#allocation55_spill] sm:$0xff] %v8739_v17  ;;  %v8743_v5 = vpop.f32.mrb[65].mxu1 }
 0x329   : > { %12562 = vst [vmem:[#allocation56_spill] sm:$0xff] %v8743_v5  ;;  %v1365_v49 = vmax.f32 %v8739_v17, %v8743_v5  ;;  %v8747_v18 = vpop.f32.mrb[66].mxu1 }
 0x32a   : > { %v8749_v39 = vpop.f32.mrb[67].mxu1 }
 0x32b   : > { %12563 = vst [vmem:[#allocation57_spill] sm:$0xff] %v8749_v39  ;;  %v1368_v10 = vmax.f32 %v8747_v18, %v8749_v39  ;;  %1366 = vmax.xlane.f32.xlu1 %v1365_v49 }
 0x32d   : > { %1369 = vmax.xlane.f32.xlu0 %v1368_v10 }
 0x32e   : > { %6136 = vmatmul.mubr.msk.bf16.gmra.mrb[148].mxu1 %vm290_vm0, %v8535_v63 }
 0x32f   : > { %v8755_v54 = vpop.f32.mrb[68].mxu1  ;;  %6137 = vmatprep.mubr.msk.bf16.mxu1 %vm290_vm0, %v8605_v7 }
 0x330   : > { %12564 = vst [vmem:[#allocation58_spill] sm:$0xff] %v8755_v54  ;;  %v8759_v53 = vpop.f32.mrb[69].mxu1 }
 0x331   : > { %12565 = vst [vmem:[#allocation59_spill] sm:$0xff] %v8759_v53  ;;  %v1371_v5 = vmax.f32 %v8755_v54, %v8759_v53  ;;  %v8763_v17 = vpop.f32.mrb[70].mxu1 }
 0x332   : > { %v8765_v58 = vpop.f32.mrb[71].mxu1 }
 0x333   : > { %12566 = vst [vmem:[#allocation60_spill] sm:$0xff] %v8765_v58  ;;  %v1374_v49 = vmax.f32 %v8763_v17, %v8765_v58  ;;  %1372 = vmax.xlane.f32.xlu1 %v1371_v5 }
 0x335   : > { %1375 = vmax.xlane.f32.xlu0 %v1374_v49 }
 0x336   : > { %6138 = vmatmul.mubr.msk.bf16.gmra.mrb[152].mxu1 %vm290_vm0, %v8605_v7 }
 0x337   : > { %v8771_v63 = vpop.f32.mrb[72].mxu1  ;;  %6139 = vmatprep.mubr.msk.bf16.mxu1 %vm290_vm0, %v8551_v48 }
 0x338   : > { %12567 = vst [vmem:[#allocation61_spill] sm:$0xff] %v8771_v63  ;;  %v8775_v10 = vpop.f32.mrb[73].mxu1 }
 0x339   : > { %12568 = vst [vmem:[#allocation62_spill] sm:$0xff] %v8775_v10  ;;  %v1377_v53 = vmax.f32 %v8771_v63, %v8775_v10  ;;  %v8779_v54 = vpop.f32.mrb[74].mxu1 }
 0x33a   : > { %v8781_v39 = vpop.f32.mrb[75].mxu1 }
 0x33b   : > { %v1380_v5 = vmax.f32 %v8779_v54, %v8781_v39  ;;  %1378 = vmax.xlane.f32.xlu1 %v1377_v53 }
 0x33d   : > { %1381 = vmax.xlane.f32.xlu0 %v1380_v5 }
 0x33e   : > { %6140 = vmatmul.mubr.msk.bf16.gmra.mrb[156].mxu1 %vm290_vm0, %v8551_v48  ;;  %v4429_v48 = vsel %vm290_vm0, %v8266_v34, 0 }
 0x33f   : > { %v8787_v7 = vpop.f32.mrb[76].mxu1  ;;  %6269 = vmatprep.mubr.msk.bf16.mxu1 %vm290_vm0, %v8256_v9 }
 0x340   : > { %v8791_v49 = vpop.f32.mrb[77].mxu1 }
 0x341   : > { %12569 = vst [vmem:[#allocation63_spill] sm:$0xff] %v8791_v49  ;;  %v1383_v10 = vmax.f32 %v8787_v7, %v8791_v49  ;;  %v8795_v63 = vpop.f32.mrb[78].mxu1 }
 0x342   : > { %v8797_v58 = vpop.f32.mrb[79].mxu1 }
 0x343   : > { %v1386_v53 = vmax.f32 %v8795_v63, %v8797_v58  ;;  %1384 = vmax.xlane.f32.xlu1 %v1383_v10 }
 0x345   : > { %1387 = vmax.xlane.f32.xlu0 %v1386_v53 }
 0x346   : > { %6270 = vmatmul.mubr.msk.bf16.vlgmr.msra.gmra.mrb[160].mxu1 %vm290_vm0, %v8256_v9 }
 0x347   : > { %6414 = vmatpush3.bf16.xpose.msra.mxu1 %v4429_v48  ;;  %v8805_v5 = vpop.f32.mrb[80].mxu1  ;;  %6271 = vmatprep.mubr.msk.bf16.mxu1 %vm290_vm0, %v8294_v14  ;;  %v4432_v48 = vsel %vm290_vm0, %v8308_v46, 0 }
 0x348   : > { %6706 = vmatprep.subr.msk.bf16.mxu1 %vm290_vm0, %v8545_v13  ;;  %v8811_v49 = vpop.f32.mrb[81].mxu1 }
 0x349   : > { %12570 = vst [vmem:[#allocation64_spill] sm:$0xff] %v8811_v49  ;;  %v1389_v10 = vmax.f32 %v8805_v5, %v8811_v49  ;;  %v8815_v53 = vpop.f32.mrb[82].mxu1 }
 0x34a   : > { %v8817_v34 = vpop.f32.mrb[83].mxu1 }
 0x34b   : > { %v1392_v9 = vmax.f32 %v8815_v53, %v8817_v34  ;;  %1390 = vmax.xlane.f32.xlu1 %v1389_v10 }
 0x34d   : > { %1393 = vmax.xlane.f32.xlu0 %v1392_v9 }
 0x34e   : > { %6272 = vmatmul.mubr.msk.bf16.gmra.mrb[164].mxu1 %vm290_vm0, %v8294_v14 }
 0x34f   : > { %6416 = vmatpush3.bf16.xpose.msra.mxu1 %v4432_v48  ;;  %v8825_v13 = vpop.f32.mrb[84].mxu1  ;;  %6273 = vmatprep.mubr.msk.bf16.mxu1 %vm290_vm0, %v8336_v42  ;;  %v4435_v48 = vsel %vm290_vm0, %v8344_v8, 0 }
 0x350   : > { %6707 = vmatprep.subr.msk.bf16.mxu1 %vm290_vm0, %v8507_v28  ;;  %v8831_v49 = vpop.f32.mrb[85].mxu1 }
 0x351   : > { %12571 = vst [vmem:[#allocation65_spill] sm:$0xff] %v8831_v49  ;;  %v1395_v10 = vmax.f32 %v8825_v13, %v8831_v49  ;;  %v8835_v9 = vpop.f32.mrb[86].mxu1 }
 0x352   : > { %v8837_v46 = vpop.f32.mrb[87].mxu1 }
 0x353   : > { %v1398_v14 = vmax.f32 %v8835_v9, %v8837_v46  ;;  %1396 = vmax.xlane.f32.xlu1 %v1395_v10 }
 0x355   : > { %1399 = vmax.xlane.f32.xlu0 %v1398_v14 }
 0x356   : > { %6274 = vmatmul.mubr.msk.bf16.gmra.mrb[168].mxu1 %vm290_vm0, %v8336_v42 }
 0x357   : > { %6418 = vmatpush3.bf16.xpose.msra.mxu1 %v4435_v48  ;;  %v8845_v28 = vpop.f32.mrb[88].mxu1  ;;  %6275 = vmatprep.mubr.msk.bf16.mxu1 %vm290_vm0, %v8356_v59  ;;  %v4438_v48 = vsel %vm290_vm0, %v8396_v19, 0 }
 0x358   : > { %6708 = vmatprep.subr.msk.bf16.mxu1 %vm290_vm0, %v8565_v36  ;;  %v8851_v49 = vpop.f32.mrb[89].mxu1 }
 0x359   : > { %12572 = vst [vmem:[#allocation66_spill] sm:$0xff] %v8851_v49  ;;  %v1401_v10 = vmax.f32 %v8845_v28, %v8851_v49  ;;  %v8855_v14 = vpop.f32.mrb[90].mxu1 }
 0x35a   : > { %v8857_v8 = vpop.f32.mrb[91].mxu1 }
 0x35b   : > { %v1404_v42 = vmax.f32 %v8855_v14, %v8857_v8  ;;  %1402 = vmax.xlane.f32.xlu1 %v1401_v10 }
 0x35d   : > { %1405 = vmax.xlane.f32.xlu0 %v1404_v42 }
 0x35e   : > { %6276 = vmatmul.mubr.msk.bf16.gmra.mrb[172].mxu1 %vm290_vm0, %v8356_v59 }
 0x35f   : > { %6420 = vmatpush3.bf16.xpose.msra.mxu1 %v4438_v48  ;;  %v8865_v36 = vpop.f32.mrb[92].mxu1  ;;  %6277 = vmatprep.mubr.msk.bf16.mxu1 %vm290_vm0, %v8384_v31  ;;  %v4441_v48 = vsel %vm290_vm0, %v8414_v27, 0  ;;  %v8895_v27 = vpop.permute.xlu0 %3207 }
 0x360   : > { %6709 = vmatprep.subr.msk.bf16.mxu1 %vm290_vm0, %v8531_v25  ;;  %v8871_v49 = vpop.f32.mrb[93].mxu1  ;;  %v4444_v25 = vsel %vm290_vm0, %v8468_v32, 0 }
 0x361   : > { %v1407_v10 = vmax.f32 %v8865_v36, %v8871_v49  ;;  %v8875_v42 = vpop.f32.mrb[94].mxu1 }
 0x362   : > { %v8877_v19 = vpop.f32.mrb[95].mxu1 }
 0x363   : > { %12573 = vst [vmem:[#allocation67_spill] sm:$0xff] %v8877_v19  ;;  %v1410_v59 = vmax.f32 %v8875_v42, %v8877_v19  ;;  %1408 = vmax.xlane.f32.xlu1 %v1407_v10  ;;  %v4379_v10 = vpop.permute.xlu0 %4378  ;;  %v4450_v19 = vsel %vm290_vm0, %v8529_v40, 0 }
 0x365   : > { %1411 = vmax.xlane.f32.xlu0 %v1410_v59 }
 0x366   : > { %6278 = vmatmul.mubr.msk.bf16.gmra.mrb[176].mxu1 %vm290_vm0, %v8384_v31  ;;  %v4447_v31 = vsel %vm290_vm0, %v8448_v51, 0 }
 0x367   : > { %6422 = vmatpush3.bf16.xpose.msra.mxu1 %v4441_v48  ;;  %6279 = vmatprep.mubr.msk.bf16.mxu1 %vm290_vm0, %v8444_v4 }
 0x368   : > { %6710 = vmatprep.subr.msk.bf16.mxu1 %vm290_vm0, %v8592_v56 }
 0x36e   : > { %6280 = vmatmul.mubr.msk.bf16.gmra.mrb[180].mxu1 %vm290_vm0, %v8444_v4 }
 0x36f   : > { %6424 = vmatpush3.bf16.xpose.msra.mxu1 %v4444_v25  ;;  %6281 = vmatprep.mubr.msk.bf16.mxu1 %vm290_vm0, %v8434_v61 }
 0x370   : > { %6711 = vmatprep.subr.msk.bf16.mxu1 %vm290_vm0, %v8547_v43 }
 0x376   : > { %6282 = vmatmul.mubr.msk.bf16.gmra.mrb[184].mxu1 %vm290_vm0, %v8434_v61 }
 0x377   : > { %6426 = vmatpush3.bf16.xpose.msra.mxu1 %v4447_v31  ;;  %6283 = vmatprep.mubr.msk.bf16.mxu1 %vm290_vm0, %v8511_v0 }
 0x378   : > { %6712 = vmatprep.subr.msk.bf16.mxu1 %vm290_vm0, %v4379_v10  ;;  %v1319_v32 = vpop.xlane.xlu1 %1318 }
 0x379   : > { %v1413_v4 = vsub.f32 %v8598_v47, %v1319_v32  ;;  %v1414_v56 = vsub.f32 %v8602_v1, %v1319_v32 }
 0x37a   : > { %v1322_v59 = vpop.xlane.xlu0 %1321 }
 0x37b   : > { %v1477_v43 = vmul.f32 1.442695, %v1413_v4  ;;  %v1479_v48 = vmul.f32 1.442695, %v1414_v56  ;;  %v1415_v51 = vsub.f32 %v8607_v60, %v1322_v59  ;;  %v1416_v25 = vsub.f32 %v8611_v11, %v1322_v59 }
 0x37d   : > { %6805 = vpow2.f32 %v1477_v43  ;;  %v1481_v61 = vmul.f32 1.442695, %v1415_v51  ;;  %v1483_v31 = vmul.f32 1.442695, %v1416_v25 }
 0x37e   : > { %6807 = vpow2.f32 %v1479_v48  ;;  %6284 = vmatmul.mubr.msk.bf16.gmra.mrb[188].mxu1 %vm290_vm0, %v8511_v0 }
 0x37f   : > { %6809 = vpow2.f32 %v1481_v61  ;;  %6428 = vmatpush3.bf16.xpose.msra.mxu1 %v4450_v19  ;;  %6285 = vmatprep.mubr.msk.bf16.mxu1 %vm290_vm0, %v8464_v62 }
 0x380   : > { %6811 = vpow2.f32 %v1483_v31  ;;  %v1325_v47 = vpop.xlane.xlu1 %1324 }
 0x381   : > { %v1417_v1 = vsub.f32 %v8619_v41, %v1325_v47  ;;  %v1418_v60 = vsub.f32 %v8623_v33, %v1325_v47 }
 0x383   : > { %v1485_v11 = vmul.f32 1.442695, %v1417_v1  ;;  %v1487_v10 = vmul.f32 1.442695, %v1418_v60 }
 0x384   : > { %v1328_v32 = vpop.xlane.xlu1 %1327 }
 0x385   : > { %6813 = vpow2.f32 %v1485_v11  ;;  %v1419_v40 = vsub.f32 %v8626_v16, %v1328_v32  ;;  %v1420_v4 = vsub.f32 %v8630_v3, %v1328_v32 }
 0x386   : > { %6815 = vpow2.f32 %v1487_v10  ;;  %6286 = vmatmul.mubr.msk.bf16.gmra.mrb[192].mxu1 %vm290_vm0, %v8464_v62 }
 0x387   : > { %v6806_v0 = vpop.eup %6805  ;;  %v1489_v19 = vmul.f32 1.442695, %v1419_v40  ;;  %v1491_v56 = vmul.f32 1.442695, %v1420_v4  ;;  %6287 = vmatprep.mubr.msk.bf16.mxu1 %vm290_vm0, %v8539_v35 }
 0x388   : > { %v6808_v41 = vpop.eup %6807  ;;  %v1331_v33 = vpop.xlane.xlu0 %1330 }
 0x389   : > { %v6810_v59 = vpop.eup %6809  ;;  %6817 = vpow2.f32 %v1489_v19  ;;  %v1421_v43 = vsub.f32 %v8638_v44, %v1331_v33  ;;  %v1422_v16 = vsub.f32 %v8642_v50, %v1331_v33  ;;  %v8926_v48 = vadd.f32 %v6808_v41, %v6806_v0 }
 0x38a   : > { %v6812_v3 = vpop.eup %6811  ;;  %6819 = vpow2.f32 %v1491_v56  ;;  %v1334_v51 = vpop.xlane.xlu1 %1333  ;;  %v1701_v62 = vpack.c.bf16 %v6810_v59, %v6806_v0 }
 0x38b   : > { %12574 = vst [vmem:[#allocation68_spill] sm:$0xff] %v8926_v48  ;;  %v1493_v25 = vmul.f32 1.442695, %v1421_v43  ;;  %v1495_v61 = vmul.f32 1.442695, %v1422_v16  ;;  %v1423_v31 = vsub.f32 %v8645_v38, %v1334_v51  ;;  %v1424_v47 = vsub.f32 %v8649_v6, %v1334_v51 }
 0x38c   : > { %v1702_v1 = vpack.c.bf16 %v6812_v3, %v6808_v41  ;;  %v8930_v60 = vadd.f32 %v6812_v3, %v6810_v59 }
 0x38d   : > { %6821 = vpow2.f32 %v1493_v25  ;;  %v1497_v11 = vmul.f32 1.442695, %v1423_v31  ;;  %v1499_v44 = vmul.f32 1.442695, %v1424_v47 }
 0x38e   : > { %12575 = vst [vmem:[#allocation69_spill] sm:$0xff] %v8930_v60  ;;  %6823 = vpow2.f32 %v1495_v61  ;;  %1765 = vmatprep.mubr.bf16.mxu0 %v1702_v1  ;;  %6288 = vmatmul.mubr.msk.bf16.gmra.mrb[196].mxu1 %vm290_vm0, %v8539_v35  ;;  %v12580_v1 = vld [vmem:[#allocation44_spill] sm:$0xff] }
 0x38f   : > { %v6814_v50 = vpop.eup %6813  ;;  %6825 = vpow2.f32 %v1497_v11  ;;  %1766 = vmatmul.mubr.bf16.vlgmr.msra.gmra.mrb[64].mxu0 %v1701_v62  ;;  %6289 = vmatprep.mubr.msk.bf16.mxu1 %vm290_vm0, %v8496_v2 }
 0x390   : > { %v6816_v38 = vpop.eup %6815  ;;  %6827 = vpow2.f32 %v1499_v44  ;;  %6142 = vmatpush3.bf16.msra.mxu0 %v8274_v37  ;;  %v1337_v6 = vpop.xlane.xlu1 %1336 }
 0x391   : > { %6143 = vmatprep.subr.bf16.mxu0 %v8428_v57  ;;  %v1425_v10 = vsub.f32 %v8657_v23, %v1337_v6  ;;  %v1426_v32 = vsub.f32 %v8661_v26, %v1337_v6  ;;  %v8940_v40 = vadd.f32 %v6816_v38, %v6814_v50 }
 0x393   : > { %12576 = vst [vmem:[#allocation70_spill] sm:$0xff] %v8940_v40  ;;  %v6818_v35 = vpop.eup %6817  ;;  %v1501_v4 = vmul.f32 1.442695, %v1425_v10  ;;  %v1503_v0 = vmul.f32 1.442695, %v1426_v32 }
 0x394   : > { %v6820_v19 = vpop.eup %6819  ;;  %6144 = vmatpush3.bf16.msra.mxu0 %v8276_v21  ;;  %v1340_v56 = vpop.xlane.xlu1 %1339  ;;  %v1703_v41 = vpack.c.bf16 %v6818_v35, %v6814_v50 }
 0x395   : > { %6829 = vpow2.f32 %v1501_v4  ;;  %6145 = vmatprep.subr.bf16.mxu0 %v8481_v12  ;;  %v1427_v37 = vsub.f32 %v8665_v15, %v1340_v56  ;;  %v1428_v57 = vsub.f32 %v8669_v20, %v1340_v56  ;;  %v1704_v23 = vpack.c.bf16 %v6820_v19, %v6816_v38  ;;  %v12578_v20 = vld [vmem:[#allocation43_spill] sm:$0xff] }
 0x396   : > { %6831 = vpow2.f32 %v1503_v0  ;;  %6290 = vmatmul.mubr.msk.bf16.gmra.mrb[200].mxu1 %vm290_vm0, %v8496_v2  ;;  %v8948_v26 = vadd.f32 %v6820_v19, %v6818_v35  ;;  %v12584_v0 = vld [vmem:[#allocation39_spill] sm:$0xff] }
 0x397   : > { %v6822_v33 = vpop.eup %6821  ;;  %v1505_v59 = vmul.f32 1.442695, %v1427_v37  ;;  %v1507_v43 = vmul.f32 1.442695, %v1428_v57  ;;  %1773 = vmatprep.mubr.bf16.mxu0 %v1704_v23  ;;  %6291 = vmatprep.mubr.msk.bf16.mxu1 %vm290_vm0, %v8556_v52  ;;  %v12585_v37 = vld [vmem:[#allocation34_spill] sm:$0xff]  ;;  %v12586_v57 = vld [vmem:[#allocation40_spill] sm:$0xff] }
 0x398   : > { %12577 = vst [vmem:[#allocation71_spill] sm:$0xff] %v8948_v26  ;;  %v6824_v21 = vpop.eup %6823  ;;  %6146 = vmatpush3.bf16.msra.mxu0 %v8314_v45  ;;  %v1343_v12 = vpop.xlane.xlu0 %1342 }
 0x399   : > { %v6826_v15 = vpop.eup %6825  ;;  %6833 = vpow2.f32 %v1505_v59  ;;  %6147 = vmatprep.subr.bf16.mxu0 %v8473_v55  ;;  %1774 = vmatmul.mubr.bf16.gmra.mrb[68].mxu0 %v1703_v41  ;;  %v1429_v2 = vsub.f32 %v8675_v30, %v1343_v12  ;;  %v1430_v16 = vsub.f32 %v12578_v20, %v1343_v12  ;;  %v8956_v3 = vpop.f32.mrb[96].mxu1  ;;  %v8958_v51 = vadd.f32 %v6824_v21, %v6822_v33  ;;  %v12581_v55 = vld [vmem:[#allocation45_spill] sm:$0xff]  ;;  %v12582_v30 = vld [vmem:[#allocation31_spill] sm:$0xff] }
 0x39a   : > { %v6828_v62 = vpop.eup %6827  ;;  %6835 = vpow2.f32 %v1507_v43  ;;  %v1346_v25 = vpop.xlane.xlu1 %1345  ;;  %v1705_v45 = vpack.c.bf16 %v6826_v15, %v6822_v33  ;;  %v12587_v33 = vld [vmem:[#allocation38_spill] sm:$0xff] }
 0x39b   : > { %12579 = vst [vmem:[#allocation43_spill] sm:$0xff] %v8958_v51  ;;  %v8960_v61 = vpop.f32.mrb[97].mxu1  ;;  %v1509_v31 = vmul.f32 1.442695, %v1429_v2  ;;  %v1511_v47 = vmul.f32 1.442695, %v1430_v16  ;;  %v1431_v11 = vsub.f32 %v12580_v1, %v1346_v25  ;;  %v1432_v44 = vsub.f32 %v12581_v55, %v1346_v25 }
 0x39c   : > { %v8964_v50 = vpop.f32.mrb[98].mxu1  ;;  %6148 = vmatpush3.bf16.msra.mxu0 %v12582_v30  ;;  %v2375_v38 = vmax.f32 %v8956_v3, %v8960_v61  ;;  %v1706_v6 = vpack.c.bf16 %v6828_v62, %v6824_v21  ;;  %v8971_v32 = vadd.f32 %v6828_v62, %v6826_v15  ;;  %v12588_v43 = vld [vmem:[#allocation46_spill] sm:$0xff]  ;;  %v12591_v1 = vld [vmem:[#allocation33_spill] sm:$0xff] }
 0x39d   : > { %v8969_v10 = vpop.f32.mrb[99].mxu1  ;;  %6837 = vpow2.f32 %v1509_v31  ;;  %v1513_v35 = vmul.f32 1.442695, %v1431_v11  ;;  %v1515_v4 = vmul.f32 1.442695, %v1432_v44  ;;  %6149 = vmatprep.subr.bf16.mxu0 %v12584_v0  ;;  %v12590_v31 = vld [vmem:[#allocation47_spill] sm:$0xff] }
 0x39e   : > { %12583 = vst [vmem:[#allocation44_spill] sm:$0xff] %v8971_v32  ;;  %v2378_v19 = vmax.f32 %v8964_v50, %v8969_v10  ;;  %6839 = vpow2.f32 %v1511_v47  ;;  %1781 = vmatprep.mubr.bf16.mxu0 %v1706_v6  ;;  %2376 = vmax.xlane.f32.xlu1 %v2375_v38  ;;  %v12592_v11 = vld [vmem:[#allocation48_spill] sm:$0xff] }
 0x39f   : > { %v6830_v56 = vpop.eup %6829  ;;  %6841 = vpow2.f32 %v1513_v35  ;;  %6292 = vmatmul.mubr.msk.bf16.gmra.mrb[204].mxu1 %vm290_vm0, %v8556_v52 }
 0x3a0   : > { %2379 = vmax.xlane.f32.xlu0 %v2378_v19  ;;  %v6832_v41 = vpop.eup %6831  ;;  %6843 = vpow2.f32 %v1515_v4  ;;  %6150 = vmatpush3.bf16.msra.mxu0 %v12585_v37  ;;  %v1349_v23 = vpop.xlane.xlu1 %1348 }
 0x3a1   : > { %6293 = vmatprep.mubr.msk.bf16.mxu1 %vm290_vm0, %v12586_v57  ;;  %6151 = vmatprep.subr.bf16.mxu0 %v12587_v33  ;;  %v1433_v59 = vsub.f32 %v8691_v24, %v1349_v23  ;;  %v1434_v21 = vsub.f32 %v12588_v43, %v1349_v23  ;;  %v8984_v12 = vpop.f32.mrb[100].mxu1  ;;  %v8986_v15 = vadd.f32 %v6832_v41, %v6830_v56 }
 0x3a2   : > { %1782 = vmatmul.mubr.bf16.gmra.mrb[72].mxu0 %v1705_v45  ;;  %v8988_v52 = vpop.f32.mrb[101].mxu1  ;;  %v1352_v2 = vpop.xlane.xlu0 %1351 }
 0x3a3   : > { %12589 = vst [vmem:[#allocation45_spill] sm:$0xff] %v8986_v15  ;;  %v6834_v20 = vpop.eup %6833  ;;  %v1517_v16 = vmul.f32 1.442695, %v1433_v59  ;;  %v1519_v62 = vmul.f32 1.442695, %v1434_v21  ;;  %v2381_v25 = vmax.f32 %v8984_v12, %v8988_v52  ;;  %v1435_v47 = vsub.f32 %v12590_v31, %v1352_v2  ;;  %v8993_v45 = vpop.f32.mrb[102].mxu1 }
 0x3a4   : > { %v6836_v24 = vpop.eup %6835  ;;  %6152 = vmatpush3.bf16.msra.mxu0 %v12591_v1  ;;  %v1436_v55 = vsub.f32 %v12592_v11, %v1352_v2  ;;  %v8997_v44 = vpop.f32.mrb[103].mxu1  ;;  %v1707_v30 = vpack.c.bf16 %v6834_v20, %v6830_v56  ;;  %v12594_v56 = vld [vmem:[#allocation42_spill] sm:$0xff]  ;;  %v12595_v59 = vld [vmem:[#allocation49_spill] sm:$0xff] }
 0x3a5   : > { %6845 = vpow2.f32 %v1517_v16  ;;  %v1521_v38 = vmul.f32 1.442695, %v1435_v47  ;;  %v2384_v6 = vmax.f32 %v8993_v45, %v8997_v44  ;;  %2382 = vmax.xlane.f32.xlu0 %v2381_v25  ;;  %v1708_v35 = vpack.c.bf16 %v6836_v24, %v6832_v41 }
 0x3a6   : > { %6847 = vpow2.f32 %v1519_v62  ;;  %v1523_v4 = vmul.f32 1.442695, %v1436_v55  ;;  %v9001_v0 = vadd.f32 %v6836_v24, %v6834_v20 }
 0x3a7   : > { %v6838_v19 = vpop.eup %6837  ;;  %6849 = vpow2.f32 %v1521_v38  ;;  %1789 = vmatprep.mubr.bf16.mxu0 %v1708_v35  ;;  %6294 = vmatmul.mubr.msk.bf16.gmra.mrb[208].mxu1 %vm290_vm0, %v12586_v57 }
 0x3a8   : > { %12593 = vst [vmem:[#allocation31_spill] sm:$0xff] %v9001_v0  ;;  %v6840_v37 = vpop.eup %6839  ;;  %6851 = vpow2.f32 %v1523_v4  ;;  %2385 = vmax.xlane.f32.xlu1 %v2384_v6  ;;  %6295 = vmatprep.mubr.msk.bf16.mxu1 %vm290_vm0, %v12594_v56  ;;  %v1355_v23 = vpop.xlane.xlu1 %1354 }
 0x3a9   : > { %v6842_v33 = vpop.eup %6841  ;;  %v1437_v41 = vsub.f32 %v8707_v22, %v1355_v23  ;;  %v1438_v43 = vsub.f32 %v12595_v59, %v1355_v23  ;;  %v9009_v21 = vpop.f32.mrb[104].mxu1  ;;  %v9011_v2 = vadd.f32 %v6840_v37, %v6838_v19  ;;  %v12597_v22 = vld [vmem:[#allocation50_spill] sm:$0xff] }
 0x3aa   : > { %1790 = vmatmul.mubr.bf16.gmra.mrb[76].mxu0 %v1707_v30  ;;  %v6844_v20 = vpop.eup %6843  ;;  %v9013_v16 = vpop.f32.mrb[105].mxu1  ;;  %v1709_v62 = vpack.c.bf16 %v6842_v33, %v6838_v19 }
 0x3ab   : > { %12596 = vst [vmem:[#allocation39_spill] sm:$0xff] %v9011_v2  ;;  %v1358_v57 = vpop.xlane.xlu0 %1357  ;;  %v1525_v25 = vmul.f32 1.442695, %v1437_v41  ;;  %v1527_v31 = vmul.f32 1.442695, %v1438_v43  ;;  %v2387_v47 = vmax.f32 %v9009_v21, %v9013_v16  ;;  %v9018_v1 = vpop.f32.mrb[106].mxu1  ;;  %v1710_v55 = vpack.c.bf16 %v6844_v20, %v6840_v37 }
 0x3ac   : > { %v1439_v24 = vsub.f32 %v8713_v29, %v1358_v57  ;;  %v1440_v11 = vsub.f32 %v12597_v22, %v1358_v57  ;;  %v9021_v30 = vpop.f32.mrb[107].mxu1  ;;  %v9023_v38 = vadd.f32 %v6844_v20, %v6842_v33  ;;  %v12599_v37 = vld [vmem:[#allocation41_spill] sm:$0xff]  ;;  %v12600_v41 = vld [vmem:[#allocation51_spill] sm:$0xff]  ;;  %v12601_v43 = vld [vmem:[#allocation52_spill] sm:$0xff] }
 0x3ad   : > { %6853 = vpow2.f32 %v1525_v25  ;;  %v2390_v35 = vmax.f32 %v9018_v1, %v9021_v30  ;;  %2388 = vmax.xlane.f32.xlu1 %v2387_v47  ;;  %1797 = vmatprep.mubr.bf16.mxu0 %v1710_v55 }
 0x3ae   : > { %12598 = vst [vmem:[#allocation34_spill] sm:$0xff] %v9023_v38  ;;  %v1529_v6 = vmul.f32 1.442695, %v1439_v24  ;;  %6855 = vpow2.f32 %v1527_v31  ;;  %v1531_v4 = vmul.f32 1.442695, %v1440_v11 }
 0x3af   : > { %v6846_v19 = vpop.eup %6845  ;;  %6296 = vmatmul.mubr.msk.bf16.gmra.mrb[212].mxu1 %vm290_vm0, %v12594_v56  ;;  %2391 = vmax.xlane.f32.xlu0 %v2390_v35 }
 0x3b0   : > { %6857 = vpow2.f32 %v1529_v6  ;;  %v6848_v29 = vpop.eup %6847  ;;  %6297 = vmatprep.mubr.msk.bf16.mxu1 %vm290_vm0, %v12599_v37  ;;  %v1361_v23 = vpop.xlane.xlu1 %1360  ;;  %v12603_v6 = vld [vmem:[#allocation53_spill] sm:$0xff] }
 0x3b1   : > { %6859 = vpow2.f32 %v1531_v4  ;;  %v6850_v33 = vpop.eup %6849  ;;  %v1441_v59 = vsub.f32 %v12600_v41, %v1361_v23  ;;  %v1442_v20 = vsub.f32 %v12601_v43, %v1361_v23  ;;  %v9033_v57 = vpop.f32.mrb[108].mxu1  ;;  %v9035_v25 = vadd.f32 %v6848_v29, %v6846_v19  ;;  %v12604_v4 = vld [vmem:[#allocation54_spill] sm:$0xff] }
 0x3b2   : > { %1798 = vmatmul.mubr.bf16.gmra.mrb[80].mxu0 %v1709_v62  ;;  %v6852_v31 = vpop.eup %6851  ;;  %v9037_v47 = vpop.f32.mrb[109].mxu1  ;;  %v1711_v24 = vpack.c.bf16 %v6850_v33, %v6846_v19 }
 0x3b3   : > { %12602 = vst [vmem:[#allocation40_spill] sm:$0xff] %v9035_v25  ;;  %v1364_v56 = vpop.xlane.xlu0 %1363  ;;  %v1533_v22 = vmul.f32 1.442695, %v1441_v59  ;;  %v1535_v11 = vmul.f32 1.442695, %v1442_v20  ;;  %v2393_v55 = vmax.f32 %v9033_v57, %v9037_v47  ;;  %v9042_v35 = vpop.f32.mrb[110].mxu1  ;;  %v1712_v41 = vpack.c.bf16 %v6852_v31, %v6848_v29 }
 0x3b4   : > { %v1443_v62 = vsub.f32 %v12603_v6, %v1364_v56  ;;  %v1444_v23 = vsub.f32 %v12604_v4, %v1364_v56  ;;  %v9045_v43 = vpop.f32.mrb[111].mxu1  ;;  %v9047_v25 = vadd.f32 %v6852_v31, %v6850_v33  ;;  %v12606_v56 = vld [vmem:[#allocation55_spill] sm:$0xff] }
 0x3b5   : > { %6861 = vpow2.f32 %v1533_v22  ;;  %v2396_v19 = vmax.f32 %v9042_v35, %v9045_v43  ;;  %2394 = vmax.xlane.f32.xlu0 %v2393_v55  ;;  %1805 = vmatprep.mubr.bf16.mxu0 %v1712_v41  ;;  %v12607_v55 = vld [vmem:[#allocation56_spill] sm:$0xff] }
 0x3b6   : > { %12605 = vst [vmem:[#allocation38_spill] sm:$0xff] %v9047_v25  ;;  %v1537_v2 = vmul.f32 1.442695, %v1443_v62  ;;  %6863 = vpow2.f32 %v1535_v11  ;;  %v1539_v59 = vmul.f32 1.442695, %v1444_v23 }
 0x3b7   : > { %v6854_v20 = vpop.eup %6853  ;;  %6298 = vmatmul.mubr.msk.bf16.gmra.mrb[216].mxu1 %vm290_vm0, %v12599_v37  ;;  %2397 = vmax.xlane.f32.xlu1 %v2396_v19 }
 0x3b8   : > { %6865 = vpow2.f32 %v1537_v2  ;;  %v6856_v29 = vpop.eup %6855  ;;  %6299 = vmatprep.mubr.msk.bf16.mxu1 %vm290_vm0, %v8895_v27  ;;  %v1367_v33 = vpop.xlane.xlu1 %1366 }
 0x3b9   : > { %6867 = vpow2.f32 %v1539_v59  ;;  %v1445_v22 = vsub.f32 %v12606_v56, %v1367_v33  ;;  %v1446_v11 = vsub.f32 %v12607_v55, %v1367_v33  ;;  %v9057_v6 = vpop.f32.mrb[112].mxu1  ;;  %v9059_v62 = vadd.f32 %v6856_v29, %v6854_v20  ;;  %v12609_v56 = vld [vmem:[#allocation57_spill] sm:$0xff] }
 0x3ba   : > { %v6858_v31 = vpop.eup %6857  ;;  %1806 = vmatmul.mubr.bf16.gmra.mrb[84].mxu0 %v1711_v24  ;;  %v9061_v4 = vpop.f32.mrb[113].mxu1 }
 0x3bb   : > { %12608 = vst [vmem:[#allocation46_spill] sm:$0xff] %v9059_v62  ;;  %v6860_v2 = vpop.eup %6859  ;;  %v1370_v37 = vpop.xlane.xlu0 %1369  ;;  %v1713_v23 = vpack.c.bf16 %v6858_v31, %v6854_v20  ;;  %v1541_v41 = vmul.f32 1.442695, %v1445_v22  ;;  %v1543_v19 = vmul.f32 1.442695, %v1446_v11 }
 0x3bc   : > { %v1447_v24 = vsub.f32 %v8747_v18, %v1370_v37  ;;  %v9066_v25 = vpop.f32.mrb[114].mxu1  ;;  %v1448_v33 = vsub.f32 %v12609_v56, %v1370_v37  ;;  %v1714_v55 = vpack.c.bf16 %v6860_v2, %v6856_v29  ;;  %v9071_v62 = vadd.f32 %v6860_v2, %v6858_v31  ;;  %v12611_v29 = vld [vmem:[#allocation28_spill] sm:$0xff]  ;;  %v12612_v37 = vld [vmem:[#allocation58_spill] sm:$0xff] }
 0x3bd   : > { %v9069_v38 = vpop.f32.mrb[115].mxu1  ;;  %6869 = vpow2.f32 %v1541_v41 }
 0x3be   : > { %12610 = vst [vmem:[#allocation47_spill] sm:$0xff] %v9071_v62  ;;  %v1545_v15 = vmul.f32 1.442695, %v1447_v24  ;;  %6871 = vpow2.f32 %v1543_v19  ;;  %v1547_v22 = vmul.f32 1.442695, %v1448_v33  ;;  %1813 = vmatprep.mubr.bf16.mxu0 %v1714_v55  ;;  %v12613_v24 = vld [vmem:[#allocation59_spill] sm:$0xff] }
 0x3bf   : > { %v6862_v11 = vpop.eup %6861  ;;  %6300 = vmatmul.mubr.msk.bf16.gmra.mrb[220].mxu1 %vm290_vm0, %v8895_v27 }
 0x3c0   : > { %6873 = vpow2.f32 %v1545_v15  ;;  %v6864_v18 = vpop.eup %6863  ;;  %6429 = vmatprep.mubr.msk.bf16.mxu1 %vm290_vm0, %v12611_v29  ;;  %v1373_v31 = vpop.xlane.xlu1 %1372 }
 0x3c1   : > { %6875 = vpow2.f32 %v1547_v22  ;;  %v1449_v41 = vsub.f32 %v12612_v37, %v1373_v31  ;;  %v1450_v56 = vsub.f32 %v12613_v24, %v1373_v31  ;;  %v9081_v19 = vpop.f32.mrb[116].mxu1  ;;  %v9083_v33 = vadd.f32 %v6864_v18, %v6862_v11  ;;  %v12615_v37 = vld [vmem:[#allocation60_spill] sm:$0xff] }
 0x3c2   : > { %v6866_v2 = vpop.eup %6865  ;;  %1814 = vmatmul.mubr.bf16.gmra.mrb[88].mxu0 %v1713_v23  ;;  %v9085_v55 = vpop.f32.mrb[117].mxu1 }
 0x3c3   : > { %12614 = vst [vmem:[#allocation33_spill] sm:$0xff] %v9083_v33  ;;  %v6868_v15 = vpop.eup %6867  ;;  %v1376_v27 = vpop.xlane.xlu0 %1375  ;;  %v1715_v20 = vpack.c.bf16 %v6866_v2, %v6862_v11  ;;  %v1549_v22 = vmul.f32 1.442695, %v1449_v41  ;;  %v1551_v59 = vmul.f32 1.442695, %v1450_v56 }
 0x3c4   : > { %v1451_v23 = vsub.f32 %v8763_v17, %v1376_v27  ;;  %v9090_v0 = vpop.f32.mrb[118].mxu1  ;;  %v1452_v31 = vsub.f32 %v12615_v37, %v1376_v27  ;;  %v1716_v24 = vpack.c.bf16 %v6868_v15, %v6864_v18  ;;  %v9095_v33 = vadd.f32 %v6868_v15, %v6866_v2  ;;  %v12617_v18 = vld [vmem:[#allocation30_spill] sm:$0xff] }
 0x3c5   : > { %v9093_v51 = vpop.f32.mrb[119].mxu1  ;;  %6877 = vpow2.f32 %v1549_v22  ;;  %v12618_v15 = vld [vmem:[#allocation10_spill] sm:$0xff]  ;;  %v12619_v22 = vld [vmem:[#allocation61_spill] sm:$0xff] }
 0x3c6   : > { %12616 = vst [vmem:[#allocation48_spill] sm:$0xff] %v9095_v33  ;;  %v1553_v32 = vmul.f32 1.442695, %v1451_v23  ;;  %6879 = vpow2.f32 %v1551_v59  ;;  %v1555_v41 = vmul.f32 1.442695, %v1452_v31  ;;  %1821 = vmatprep.mubr.bf16.mxu0 %v1716_v24  ;;  %v12620_v23 = vld [vmem:[#allocation62_spill] sm:$0xff] }
 0x3c7   : > { %v6870_v56 = vpop.eup %6869  ;;  %6430 = vmatmul.mubr.msk.bf16.vlgmr.msra.gmra.mrb[224].mxu1 %vm290_vm0, %v12611_v29 }
 0x3c8   : > { %6881 = vpow2.f32 %v1553_v32  ;;  %v6872_v17 = vpop.eup %6871  ;;  %6431 = vmatprep.mubr.msk.bf16.mxu1 %vm290_vm0, %v12617_v18  ;;  %v1379_v2 = vpop.xlane.xlu1 %1378  ;;  %2819 = vrot.lane.b32.xlu1 %v12618_v15, %s7583_s14 }
 0x3c9   : > { %6883 = vpow2.f32 %v1555_v41  ;;  %v1453_v59 = vsub.f32 %v12619_v22, %v1379_v2  ;;  %v1454_v37 = vsub.f32 %v12620_v23, %v1379_v2  ;;  %v9107_v31 = vpop.f32.mrb[120].mxu1  ;;  %v9109_v32 = vadd.f32 %v6872_v17, %v6870_v56  ;;  %v12622_v22 = vld [vmem:[#allocation20_spill] sm:$0xff] }
 0x3ca   : > { %v6874_v27 = vpop.eup %6873  ;;  %1822 = vmatmul.mubr.bf16.gmra.mrb[92].mxu0 %v1715_v20  ;;  %v9111_v24 = vpop.f32.mrb[121].mxu1 }
 0x3cb   : > { %12621 = vst [vmem:[#allocation42_spill] sm:$0xff] %v9109_v32  ;;  %v6876_v29 = vpop.eup %6875  ;;  %v1382_v41 = vpop.xlane.xlu0 %1381  ;;  %v1717_v11 = vpack.c.bf16 %v6874_v27, %v6870_v56  ;;  %v1557_v62 = vmul.f32 1.442695, %v1453_v59  ;;  %v1559_v33 = vmul.f32 1.442695, %v1454_v37  ;;  %2835 = vrot.lane.b32.xlu0 %v12622_v22, %s7583_s14  ;;  %v12623_v32 = vld [vmem:[#allocation15_spill] sm:$0xff] }
 0x3cc   : > { %v1455_v20 = vsub.f32 %v8779_v54, %v1382_v41  ;;  %v9118_v2 = vpop.f32.mrb[122].mxu1  ;;  %v1456_v23 = vsub.f32 %v8781_v39, %v1382_v41  ;;  %4328 = vrot.lane.b32.xlu1 %v12623_v32, %s7582_s13  ;;  %v1718_v26 = vpack.c.bf16 %v6876_v29, %v6872_v17  ;;  %v9125_v56 = vadd.f32 %v6876_v29, %v6874_v27  ;;  %v12625_v39 = vld [vmem:[#allocation19_spill] sm:$0xff]  ;;  %v12626_v27 = vld [vmem:[#allocation32_spill] sm:$0xff] }
 0x3cd   : > { %v9123_v48 = vpop.f32.mrb[123].mxu1  ;;  %6885 = vpow2.f32 %v1557_v62  ;;  %v12627_v29 = vld [vmem:[#allocation63_spill] sm:$0xff] }
 0x3ce   : > { %12624 = vst [vmem:[#allocation49_spill] sm:$0xff] %v9125_v56  ;;  %v1561_v59 = vmul.f32 1.442695, %v1455_v20  ;;  %6887 = vpow2.f32 %v1559_v33  ;;  %v1563_v37 = vmul.f32 1.442695, %v1456_v23  ;;  %1829 = vmatprep.mubr.bf16.mxu0 %v1718_v26 }
 0x3cf   : > { %v6878_v40 = vpop.eup %6877  ;;  %6432 = vmatmul.mubr.msk.bf16.gmra.mrb[228].mxu1 %vm290_vm0, %v12617_v18  ;;  %2837 = vrot.lane.b32.xlu0 %v12625_v39, %s7583_s14 }
 0x3d0   : > { %6889 = vpow2.f32 %v1561_v59  ;;  %v6880_v17 = vpop.eup %6879  ;;  %6433 = vmatprep.mubr.msk.bf16.mxu1 %vm290_vm0, %v12626_v27  ;;  %v1385_v62 = vpop.xlane.xlu1 %1384 }
 0x3d1   : > { %6891 = vpow2.f32 %v1563_v37  ;;  %v1457_v33 = vsub.f32 %v8787_v7, %v1385_v62  ;;  %v1458_v26 = vsub.f32 %v12627_v29, %v1385_v62  ;;  %v9137_v41 = vpop.f32.mrb[124].mxu1  ;;  %v9139_v20 = vadd.f32 %v6880_v17, %v6878_v40  ;;  %v12629_v7 = vld [vmem:[#allocation9_spill] sm:$0xff] }
 0x3d2   : > { %v6882_v32 = vpop.eup %6881  ;;  %1830 = vmatmul.mubr.bf16.gmra.mrb[96].mxu0 %v1717_v11  ;;  %v9141_v23 = vpop.f32.mrb[125].mxu1 }
 0x3d3   : > { %12628 = vst [vmem:[#allocation50_spill] sm:$0xff] %v9139_v20  ;;  %v6884_v18 = vpop.eup %6883  ;;  %v1388_v59 = vpop.xlane.xlu0 %1387  ;;  %v1719_v54 = vpack.c.bf16 %v6882_v32, %v6878_v40  ;;  %v1565_v37 = vmul.f32 1.442695, %v1457_v33  ;;  %v1567_v56 = vmul.f32 1.442695, %v1458_v26  ;;  %2821 = vrot.lane.b32.xlu0 %v12629_v7, %s7583_s14 }
 0x3d4   : > { %v1459_v11 = vsub.f32 %v8795_v63, %v1388_v59  ;;  %v9148_v62 = vpop.f32.mrb[126].mxu1  ;;  %v1460_v29 = vsub.f32 %v8797_v58, %v1388_v59  ;;  %v1720_v20 = vpack.c.bf16 %v6884_v18, %v6880_v17  ;;  %v9153_v39 = vadd.f32 %v6884_v18, %v6882_v32  ;;  %v12631_v58 = vld [vmem:[#allocation35_spill] sm:$0xff]  ;;  %v12632_v59 = vld [vmem:[#allocation64_spill] sm:$0xff] }
 0x3d5   : > { %v9151_v22 = vpop.f32.mrb[127].mxu1  ;;  %6893 = vpow2.f32 %v1565_v37 }
 0x3d6   : > { %12630 = vst [vmem:[#allocation41_spill] sm:$0xff] %v9153_v39  ;;  %v1569_v40 = vmul.f32 1.442695, %v1459_v11  ;;  %6895 = vpow2.f32 %v1567_v56  ;;  %v1571_v26 = vmul.f32 1.442695, %v1460_v29  ;;  %1837 = vmatprep.mubr.bf16.mxu0 %v1720_v20 }
 0x3d7   : > { %v6886_v63 = vpop.eup %6885  ;;  %6434 = vmatmul.mubr.msk.bf16.gmra.mrb[232].mxu1 %vm290_vm0, %v12626_v27 }
 0x3d8   : > { %6897 = vpow2.f32 %v1569_v40  ;;  %v6888_v60 = vpop.eup %6887  ;;  %6435 = vmatprep.mubr.msk.bf16.mxu1 %vm290_vm0, %v12631_v58  ;;  %v1391_v17 = vpop.xlane.xlu1 %1390 }
 0x3d9   : > { %6899 = vpow2.f32 %v1571_v26  ;;  %v1461_v18 = vsub.f32 %v8805_v5, %v1391_v17  ;;  %v1462_v37 = vsub.f32 %v12632_v59, %v1391_v17  ;;  %v9163_v56 = vpop.f32.mrb[128].mxu1  ;;  %v9165_v20 = vadd.f32 %v6888_v60, %v6886_v63 }
 0x3da   : > { %v6890_v32 = vpop.eup %6889  ;;  %1838 = vmatmul.mubr.bf16.gmra.mrb[100].mxu0 %v1719_v54  ;;  %v9167_v29 = vpop.f32.mrb[129].mxu1 }
 0x3db   : > { %12633 = vst [vmem:[#allocation51_spill] sm:$0xff] %v9165_v20  ;;  %v6892_v11 = vpop.eup %6891  ;;  %v1394_v27 = vpop.xlane.xlu0 %1393  ;;  %v1721_v40 = vpack.c.bf16 %v6890_v32, %v6886_v63  ;;  %v1573_v26 = vmul.f32 1.442695, %v1461_v18  ;;  %v1575_v33 = vmul.f32 1.442695, %v1462_v37 }
 0x3dc   : > { %v1463_v54 = vsub.f32 %v8815_v53, %v1394_v27  ;;  %v9172_v7 = vpop.f32.mrb[130].mxu1  ;;  %v1464_v5 = vsub.f32 %v8817_v34, %v1394_v27  ;;  %v1722_v17 = vpack.c.bf16 %v6892_v11, %v6888_v60  ;;  %v9177_v20 = vadd.f32 %v6892_v11, %v6890_v32  ;;  %v12636_v34 = vld [vmem:[#allocation36_spill] sm:$0xff]  ;;  %v12637_v27 = vld [vmem:[#allocation65_spill] sm:$0xff] }
 0x3dd   : > { %v9175_v59 = vpop.f32.mrb[131].mxu1  ;;  %6901 = vpow2.f32 %v1573_v26 }
 0x3de   : > { %12634 = vst [vmem:[#allocation52_spill] sm:$0xff] %v9175_v59  ;;  %12635 = vst [vmem:[#allocation53_spill] sm:$0xff] %v9177_v20  ;;  %v1577_v15 = vmul.f32 1.442695, %v1463_v54  ;;  %6903 = vpow2.f32 %v1575_v33  ;;  %v1579_v18 = vmul.f32 1.442695, %v1464_v5  ;;  %1845 = vmatprep.mubr.bf16.mxu0 %v1722_v17 }
 0x3df   : > { %v6894_v37 = vpop.eup %6893  ;;  %6436 = vmatmul.mubr.msk.bf16.gmra.mrb[236].mxu1 %vm290_vm0, %v12631_v58 }
 0x3e0   : > { %6905 = vpow2.f32 %v1577_v15  ;;  %v6896_v53 = vpop.eup %6895  ;;  %6437 = vmatprep.mubr.msk.bf16.mxu1 %vm290_vm0, %v12636_v34  ;;  %v1397_v60 = vpop.xlane.xlu1 %1396 }
 0x3e1   : > { %6907 = vpow2.f32 %v1579_v18  ;;  %v1465_v11 = vsub.f32 %v8825_v13, %v1397_v60  ;;  %v1466_v26 = vsub.f32 %v12637_v27, %v1397_v60  ;;  %v9187_v33 = vpop.f32.mrb[132].mxu1  ;;  %v9189_v54 = vadd.f32 %v6896_v53, %v6894_v37 }
 0x3e2   : > { %v6898_v32 = vpop.eup %6897  ;;  %1846 = vmatmul.mubr.bf16.gmra.mrb[104].mxu0 %v1721_v40  ;;  %v9191_v5 = vpop.f32.mrb[133].mxu1 }
 0x3e3   : > { %12638 = vst [vmem:[#allocation54_spill] sm:$0xff] %v9189_v54  ;;  %v6900_v15 = vpop.eup %6899  ;;  %v1400_v58 = vpop.xlane.xlu0 %1399  ;;  %v1723_v17 = vpack.c.bf16 %v6898_v32, %v6894_v37  ;;  %v1581_v18 = vmul.f32 1.442695, %v1465_v11  ;;  %v1583_v63 = vmul.f32 1.442695, %v1466_v26 }
 0x3e4   : > { %v1467_v40 = vsub.f32 %v8835_v9, %v1400_v58  ;;  %v9196_v20 = vpop.f32.mrb[134].mxu1  ;;  %v1468_v13 = vsub.f32 %v8837_v46, %v1400_v58  ;;  %v1724_v60 = vpack.c.bf16 %v6900_v15, %v6896_v53  ;;  %v9201_v54 = vadd.f32 %v6900_v15, %v6898_v32  ;;  %v12641_v46 = vld [vmem:[#allocation37_spill] sm:$0xff]  ;;  %v12642_v58 = vld [vmem:[#allocation66_spill] sm:$0xff] }
 0x3e5   : > { %v9199_v27 = vpop.f32.mrb[135].mxu1  ;;  %6909 = vpow2.f32 %v1581_v18 }
 0x3e6   : > { %12639 = vst [vmem:[#allocation55_spill] sm:$0xff] %v9199_v27  ;;  %12640 = vst [vmem:[#allocation56_spill] sm:$0xff] %v9201_v54  ;;  %v1585_v59 = vmul.f32 1.442695, %v1467_v40  ;;  %6911 = vpow2.f32 %v1583_v63  ;;  %v1587_v11 = vmul.f32 1.442695, %v1468_v13  ;;  %1853 = vmatprep.mubr.bf16.mxu0 %v1724_v60 }
 0x3e7   : > { %v6902_v26 = vpop.eup %6901  ;;  %6438 = vmatmul.mubr.msk.bf16.gmra.mrb[240].mxu1 %vm290_vm0, %v12636_v34 }
 0x3e8   : > { %6913 = vpow2.f32 %v1585_v59  ;;  %v6904_v9 = vpop.eup %6903  ;;  %6439 = vmatprep.mubr.msk.bf16.mxu1 %vm290_vm0, %v12641_v46  ;;  %v1403_v53 = vpop.xlane.xlu1 %1402 }
 0x3e9   : > { %6915 = vpow2.f32 %v1587_v11  ;;  %v1469_v15 = vsub.f32 %v8845_v28, %v1403_v53  ;;  %v1470_v18 = vsub.f32 %v12642_v58, %v1403_v53  ;;  %v9211_v63 = vpop.f32.mrb[136].mxu1  ;;  %v9213_v40 = vadd.f32 %v6904_v9, %v6902_v26 }
 0x3ea   : > { %v6906_v32 = vpop.eup %6905  ;;  %1854 = vmatmul.mubr.bf16.gmra.mrb[108].mxu0 %v1723_v17  ;;  %v9215_v13 = vpop.f32.mrb[137].mxu1 }
 0x3eb   : > { %12643 = vst [vmem:[#allocation57_spill] sm:$0xff] %v9213_v40  ;;  %v6908_v59 = vpop.eup %6907  ;;  %v1406_v34 = vpop.xlane.xlu0 %1405  ;;  %v1725_v60 = vpack.c.bf16 %v6906_v32, %v6902_v26  ;;  %v1589_v11 = vmul.f32 1.442695, %v1469_v15  ;;  %v1591_v37 = vmul.f32 1.442695, %v1470_v18  ;;  %v12649_v26 = vmax.f32 %v9081_v19, %v9085_v55 }
 0x3ec   : > { %v1471_v17 = vsub.f32 %v8855_v14, %v1406_v34  ;;  %v9220_v54 = vpop.f32.mrb[138].mxu1  ;;  %v1472_v28 = vsub.f32 %v8857_v8, %v1406_v34  ;;  %v1726_v53 = vpack.c.bf16 %v6908_v59, %v6904_v9  ;;  %v9225_v40 = vadd.f32 %v6908_v59, %v6906_v32 }
 0x3ed   : > { %v9223_v58 = vpop.f32.mrb[139].mxu1  ;;  %6917 = vpow2.f32 %v1589_v11  ;;  %v12645_v9 = vmax.f32 %v9057_v6, %v9061_v4 }
 0x3ee   : > { %12644 = vst [vmem:[#allocation28_spill] sm:$0xff] %v9225_v40  ;;  %v1593_v27 = vmul.f32 1.442695, %v1471_v17  ;;  %6919 = vpow2.f32 %v1591_v37  ;;  %v1595_v15 = vmul.f32 1.442695, %v1472_v28  ;;  %1861 = vmatprep.mubr.bf16.mxu0 %v1726_v53 }
 0x3ef   : > { %v6910_v18 = vpop.eup %6909  ;;  %6440 = vmatmul.mubr.msk.bf16.gmra.mrb[244].mxu1 %vm290_vm0, %v12641_v46  ;;  %v12647_v46 = vmax.f32 %v9066_v25, %v9069_v38 }
 0x3f0   : > { %6921 = vpow2.f32 %v1593_v27  ;;  %v6912_v14 = vpop.eup %6911  ;;  %v1409_v8 = vpop.xlane.xlu1 %1408  ;;  %2400 = vmax.xlane.f32.xlu1 %v12645_v9 }
 0x3f1   : > { %6923 = vpow2.f32 %v1595_v15  ;;  %v1473_v59 = vsub.f32 %v8865_v36, %v1409_v8  ;;  %v1474_v37 = vsub.f32 %v8871_v49, %v1409_v8  ;;  %v9236_v34 = vpop.f32.mrb[140].mxu1  ;;  %v9238_v11 = vadd.f32 %v6912_v14, %v6910_v18  ;;  %v12648_v8 = vld [vmem:[#allocation67_spill] sm:$0xff] }
 0x3f2   : > { %v6914_v32 = vpop.eup %6913  ;;  %1862 = vmatmul.mubr.bf16.gmra.mrb[112].mxu0 %v1725_v60  ;;  %2403 = vmax.xlane.f32.xlu0 %v12647_v46  ;;  %v9243_v17 = vpop.f32.mrb[141].mxu1 }
 0x3f3   : > { %12646 = vst [vmem:[#allocation58_spill] sm:$0xff] %v9238_v11  ;;  %v6916_v27 = vpop.eup %6915  ;;  %v1412_v28 = vpop.xlane.xlu0 %1411  ;;  %v1727_v53 = vpack.c.bf16 %v6914_v32, %v6910_v18  ;;  %v1597_v15 = vmul.f32 1.442695, %v1473_v59  ;;  %v1599_v9 = vmul.f32 1.442695, %v1474_v37 }
 0x3f4   : > { %v1475_v49 = vsub.f32 %v8875_v42, %v1412_v28  ;;  %v9248_v60 = vpop.f32.mrb[142].mxu1  ;;  %v1476_v39 = vsub.f32 %v12648_v8, %v1412_v28  ;;  %2406 = vmax.xlane.f32.xlu1 %v12649_v26  ;;  %v1728_v46 = vpack.c.bf16 %v6916_v27, %v6912_v14  ;;  %v9256_v40 = vadd.f32 %v6916_v27, %v6914_v32 }
 0x3f5   : > { %v9254_v11 = vpop.f32.mrb[143].mxu1  ;;  %6925 = vpow2.f32 %v1597_v15  ;;  %v12651_v26 = vmax.f32 %v9090_v0, %v9093_v51 }
 0x3f6   : > { %12650 = vst [vmem:[#allocation59_spill] sm:$0xff] %v9256_v40  ;;  %v1601_v18 = vmul.f32 1.442695, %v1475_v49  ;;  %6927 = vpow2.f32 %v1599_v9  ;;  %v1603_v42 = vmul.f32 1.442695, %v1476_v39  ;;  %1869 = vmatprep.mubr.bf16.mxu0 %v1728_v46 }
 0x3f7   : > { %v6918_v37 = vpop.eup %6917 }
 0x3f8   : > { %6929 = vpow2.f32 %v1601_v18  ;;  %v6920_v28 = vpop.eup %6919  ;;  %2409 = vmax.xlane.f32.xlu1 %v12651_v26 }
 0x3f9   : > { %6931 = vpow2.f32 %v1603_v42  ;;  %v9263_v32 = vpop.f32.mrb[144].mxu1  ;;  %v9265_v27 = vadd.f32 %v6920_v28, %v6918_v37 }
 0x3fa   : > { %v6922_v14 = vpop.eup %6921  ;;  %1870 = vmatmul.mubr.bf16.gmra.mrb[116].mxu0 %v1727_v53  ;;  %v9267_v49 = vpop.f32.mrb[145].mxu1 }
 0x3fb   : > { %12652 = vst [vmem:[#allocation60_spill] sm:$0xff] %v9265_v27  ;;  %v6924_v15 = vpop.eup %6923  ;;  %12653 = vst [vmem:[#allocation30_spill] sm:$0xff] %v9267_v49  ;;  %v1729_v9 = vpack.c.bf16 %v6922_v14, %v6918_v37  ;;  %v9271_v8 = vpop.f32.mrb[146].mxu1 }
 0x3fc   : > { %v1730_v46 = vpack.c.bf16 %v6924_v15, %v6920_v28  ;;  %v9273_v18 = vadd.f32 %v6924_v15, %v6922_v14  ;;  %v9275_v42 = vpop.f32.mrb[147].mxu1 }
 0x3fe   : > { %12654 = vst [vmem:[#allocation61_spill] sm:$0xff] %v9273_v18  ;;  %1877 = vmatprep.mubr.bf16.mxu0 %v1730_v46 }
 0x3ff   : > { %v6926_v26 = vpop.eup %6925 }
 0x400   : > { %v6928_v59 = vpop.eup %6927 }
 0x401   : > { %v9279_v27 = vpop.f32.mrb[148].mxu1  ;;  %v9281_v37 = vadd.f32 %v6928_v59, %v6926_v26 }
 0x402   : > { %v6930_v36 = vpop.eup %6929  ;;  %1878 = vmatmul.mubr.bf16.gmra.mrb[120].mxu0 %v1729_v9  ;;  %v9283_v40 = vpop.f32.mrb[149].mxu1 }
 0x403   : > { %12655 = vst [vmem:[#allocation62_spill] sm:$0xff] %v9281_v37  ;;  %v6932_v39 = vpop.eup %6931  ;;  %v1731_v28 = vpack.c.bf16 %v6930_v36, %v6926_v26  ;;  %v9287_v15 = vpop.f32.mrb[150].mxu1  ;;  %v12659_v37 = vld [vmem:[#allocation18_spill] sm:$0xff]  ;;  %v12660_v26 = vld [vmem:[#allocation21_spill] sm:$0xff] }
 0x404   : > { %12656 = vst [vmem:[#allocation15_spill] sm:$0xff] %v9287_v15  ;;  %v1732_v46 = vpack.c.bf16 %v6932_v39, %v6928_v59  ;;  %v9289_v18 = vadd.f32 %v6932_v39, %v6930_v36  ;;  %v9291_v53 = vpop.f32.mrb[151].mxu1 }
 0x405   : > { %12658 = vst [vmem:[#allocation63_spill] sm:$0xff] %v9291_v53 }
 0x406   : > { %12657 = vst [vmem:[#allocation32_spill] sm:$0xff] %v9289_v18  ;;  %1885 = vmatprep.mubr.bf16.mxu0 %v1732_v46 }
 0x408   : > { %4330 = vrot.lane.b32.xlu0 %v12659_v37, %s7582_s13 }
 0x409   : > { %4332 = vrot.lane.b32.xlu1 %v12660_v26, %s7582_s13  ;;  %v9299_v49 = vpop.f32.mrb[152].mxu1 }
 0x40a   : > { %1886 = vmatmul.mubr.bf16.gmra.mrb[124].mxu0 %v1731_v28  ;;  %12661 = vst [vmem:[#allocation35_spill] sm:$0xff] %v9299_v49  ;;  %v9301_v14 = vpop.f32.mrb[153].mxu1  ;;  %v12680_v49 = vmax.f32 %v9118_v2, %v9123_v48 }
 0x40b   : > { %12662 = vst [vmem:[#allocation64_spill] sm:$0xff] %v9301_v14  ;;  %v9305_v59 = vpop.f32.mrb[154].mxu1 }
 0x40c   : > { %12663 = vst [vmem:[#allocation36_spill] sm:$0xff] %v9305_v59  ;;  %v9307_v39 = vpop.f32.mrb[155].mxu1 }
 0x40d   : > { %12664 = vst [vmem:[#allocation65_spill] sm:$0xff] %v9307_v39 }
 0x411   : > { %v9311_v9 = vpop.f32.mrb[156].mxu1 }
 0x412   : > { %12665 = vst [vmem:[#allocation37_spill] sm:$0xff] %v9311_v9  ;;  %v9313_v37 = vpop.f32.mrb[157].mxu1 }
 0x413   : > { %12666 = vst [vmem:[#allocation66_spill] sm:$0xff] %v9313_v37  ;;  %v9317_v26 = vpop.f32.mrb[158].mxu1 }
 0x414   : > { %12667 = vst [vmem:[#allocation67_spill] sm:$0xff] %v9317_v26  ;;  %v9319_v18 = vpop.f32.mrb[159].mxu1 }
 0x415   : > { %12668 = vst [vmem:[#allocation18_spill] sm:$0xff] %v9319_v18 }
 0x419   : > { %v9323_v53 = vpop.f32.mrb[160].mxu1 }
 0x41a   : > { %12669 = vst [vmem:[#allocation21_spill] sm:$0xff] %v9323_v53  ;;  %v9325_v15 = vpop.f32.mrb[161].mxu1 }
 0x41b   : > { %12670 = vst [vmem:[#allocation72_spill] sm:$0xff] %v9325_v15  ;;  %v9329_v39 = vpop.f32.mrb[162].mxu1  ;;  %v12677_v15 = vmax.f32 %v9107_v31, %v9111_v24 }
 0x41c   : > { %12671 = vst [vmem:[#allocation73_spill] sm:$0xff] %v9329_v39  ;;  %v9331_v59 = vpop.f32.mrb[163].mxu1 }
 0x41d   : > { %12672 = vst [vmem:[#allocation74_spill] sm:$0xff] %v9331_v59 }
 0x421   : > { %v9335_v37 = vpop.f32.mrb[164].mxu1 }
 0x422   : > { %12673 = vst [vmem:[#allocation75_spill] sm:$0xff] %v9335_v37  ;;  %v9337_v9 = vpop.f32.mrb[165].mxu1 }
 0x423   : > { %12674 = vst [vmem:[#allocation76_spill] sm:$0xff] %v9337_v9  ;;  %v9341_v18 = vpop.f32.mrb[166].mxu1 }
 0x424   : > { %12675 = vst [vmem:[#allocation77_spill] sm:$0xff] %v9341_v18  ;;  %v9343_v26 = vpop.f32.mrb[167].mxu1 }
 0x425   : > { %12676 = vst [vmem:[#allocation78_spill] sm:$0xff] %v9343_v26 }
 0x427   : > { %2412 = vmax.xlane.f32.xlu0 %v12677_v15 }
 0x429   : > { %v9350_v53 = vpop.f32.mrb[168].mxu1 }
 0x42a   : > { %12678 = vst [vmem:[#allocation79_spill] sm:$0xff] %v9350_v53  ;;  %v9352_v28 = vpop.f32.mrb[169].mxu1 }
 0x42b   : > { %12679 = vst [vmem:[#allocation80_spill] sm:$0xff] %v9352_v28  ;;  %v2377_v59 = vpop.xlane.xlu1 %2376  ;;  %v9356_v36 = vpop.f32.mrb[170].mxu1 }
 0x42c   : > { %v2471_v9 = vsub.f32 %v8956_v3, %v2377_v59  ;;  %v2472_v37 = vsub.f32 %v8960_v61, %v2377_v59  ;;  %v9360_v14 = vpop.f32.mrb[171].mxu1  ;;  %v12681_v61 = vmax.f32 %v9137_v41, %v9141_v23 }
 0x42d   : > { %v2380_v46 = vpop.xlane.xlu0 %2379  ;;  %2415 = vmax.xlane.f32.xlu1 %v12680_v49 }
 0x42e   : > { %v2473_v26 = vsub.f32 %v8964_v50, %v2380_v46  ;;  %v2474_v18 = vsub.f32 %v8969_v10, %v2380_v46  ;;  %v2535_v39 = vmul.f32 1.442695, %v2471_v9  ;;  %v2537_v28 = vmul.f32 1.442695, %v2472_v37 }
 0x430   : > { %v2539_v53 = vmul.f32 1.442695, %v2473_v26  ;;  %v2541_v3 = vmul.f32 1.442695, %v2474_v18  ;;  %6933 = vpow2.f32 %v2535_v39 }
 0x431   : > { %6935 = vpow2.f32 %v2537_v28  ;;  %2418 = vmax.xlane.f32.xlu1 %v12681_v61  ;;  %v9372_v59 = vpop.f32.mrb[172].mxu1 }
 0x432   : > { %6937 = vpow2.f32 %v2539_v53  ;;  %v9374_v50 = vpop.f32.mrb[173].mxu1  ;;  %v2383_v10 = vpop.xlane.xlu0 %2382 }
 0x433   : > { %6939 = vpow2.f32 %v2541_v3  ;;  %v2475_v9 = vsub.f32 %v8984_v12, %v2383_v10  ;;  %v2476_v18 = vsub.f32 %v8988_v52, %v2383_v10  ;;  %v9380_v39 = vpop.f32.mrb[174].mxu1  ;;  %v12684_v3 = vmax.f32 %v9148_v62, %v9151_v22 }
 0x434   : > { %12682 = vst [vmem:[#allocation81_spill] sm:$0xff] %v9380_v39  ;;  %v9382_v46 = vpop.f32.mrb[175].mxu1 }
 0x435   : > { %12683 = vst [vmem:[#allocation82_spill] sm:$0xff] %v9382_v46  ;;  %v2543_v37 = vmul.f32 1.442695, %v2475_v9  ;;  %v2545_v28 = vmul.f32 1.442695, %v2476_v18  ;;  %v2386_v26 = vpop.xlane.xlu1 %2385  ;;  %2421 = vmax.xlane.f32.xlu1 %v12684_v3 }
 0x436   : > { %v2477_v61 = vsub.f32 %v8993_v45, %v2386_v26  ;;  %v2478_v12 = vsub.f32 %v8997_v44, %v2386_v26 }
 0x437   : > { %6941 = vpow2.f32 %v2543_v37 }
 0x438   : > { %6943 = vpow2.f32 %v2545_v28  ;;  %v2547_v52 = vmul.f32 1.442695, %v2477_v61  ;;  %v2549_v10 = vmul.f32 1.442695, %v2478_v12 }
 0x439   : > { %v9391_v49 = vpop.f32.mrb[176].mxu1 }
 0x43a   : > { %12685 = vst [vmem:[#allocation83_spill] sm:$0xff] %v9391_v49  ;;  %v9393_v9 = vpop.eup %6933  ;;  %6945 = vpow2.f32 %v2547_v52  ;;  %v2389_v18 = vpop.xlane.xlu1 %2388 }
 0x43b   : > { %v9395_v15 = vpop.f32.mrb[177].mxu1  ;;  %v6936_v53 = vpop.eup %6935  ;;  %6947 = vpow2.f32 %v2549_v10  ;;  %v2479_v3 = vsub.f32 %v9009_v21, %v2389_v18  ;;  %v2480_v45 = vsub.f32 %v9013_v16, %v2389_v18  ;;  %v12689_v18 = vld [vmem:[#allocation22_spill] sm:$0xff] }
 0x43c   : > { %12686 = vst [vmem:[#allocation84_spill] sm:$0xff] %v9395_v15  ;;  %v9401_v37 = vpop.f32.mrb[178].mxu1  ;;  %v9403_v28 = vpop.eup %6937  ;;  %v9408_v12 = vadd.f32 %v6936_v53, %v9393_v9 }
 0x43d   : > { %v9405_v26 = vpop.f32.mrb[179].mxu1  ;;  %v2392_v61 = vpop.xlane.xlu0 %2391  ;;  %v2551_v46 = vmul.f32 1.442695, %v2479_v3  ;;  %v2553_v10 = vmul.f32 1.442695, %v2480_v45  ;;  %4334 = vrot.lane.b32.xlu0 %v12689_v18, %s7582_s13 }
 0x43e   : > { %12687 = vst [vmem:[#allocation85_spill] sm:$0xff] %v9405_v26  ;;  %12688 = vst [vmem:[#allocation86_spill] sm:$0xff] %v9408_v12  ;;  %v6940_v52 = vpop.eup %6939  ;;  %v2481_v16 = vsub.f32 %v9018_v1, %v2392_v61  ;;  %v2482_v44 = vsub.f32 %v9021_v30, %v2392_v61 }
 0x43f   : > { %v2760_v15 = vpack.c.bf16 %v6940_v52, %v6936_v53  ;;  %v9419_v39 = vadd.f32 %v6940_v52, %v9403_v28  ;;  %6949 = vpow2.f32 %v2551_v46 }
 0x440   : > { %v2555_v3 = vmul.f32 1.442695, %v2481_v16  ;;  %6951 = vpow2.f32 %v2553_v10  ;;  %v2557_v45 = vmul.f32 1.442695, %v2482_v44 }
 0x441   : > { %12690 = vst [vmem:[#allocation22_spill] sm:$0xff] %v9419_v39  ;;  %2887 = vmatprep.mubr.bf16.mxu0 %v2760_v15  ;;  %v9421_v21 = vpop.eup %6941  ;;  %v9423_v1 = vpop.f32.mrb[180].mxu1 }
 0x442   : > { %6953 = vpow2.f32 %v2555_v3  ;;  %12691 = vst [vmem:[#allocation87_spill] sm:$0xff] %v9423_v1  ;;  %v6944_v18 = vpop.eup %6943  ;;  %v9425_v30 = vpop.f32.mrb[181].mxu1 }
 0x443   : > { %6955 = vpow2.f32 %v2557_v45  ;;  %12692 = vst [vmem:[#allocation88_spill] sm:$0xff] %v9425_v30  ;;  %v2395_v53 = vpop.xlane.xlu0 %2394  ;;  %v9431_v10 = vpop.f32.mrb[182].mxu1  ;;  %v9434_v15 = vadd.f32 %v6944_v18, %v9421_v21 }
 0x444   : > { %v2483_v52 = vsub.f32 %v9033_v57, %v2395_v53  ;;  %v2484_v46 = vsub.f32 %v9037_v47, %v2395_v53  ;;  %v6946_v44 = vpop.eup %6945  ;;  %v2398_v16 = vpop.xlane.xlu1 %2397  ;;  %v12694_v47 = vld [vmem:[#allocation23_spill] sm:$0xff] }
 0x445   : > { %12693 = vst [vmem:[#allocation89_spill] sm:$0xff] %v9434_v15  ;;  %v9436_v3 = vpop.f32.mrb[183].mxu1  ;;  %v6948_v45 = vpop.eup %6947  ;;  %v2485_v39 = vsub.f32 %v9042_v35, %v2398_v16  ;;  %v2486_v61 = vsub.f32 %v9045_v43, %v2398_v16  ;;  %v2761_v15 = vpack.c.bf16 %v6946_v44, %v9421_v21 }
 0x446   : > { %v2559_v49 = vmul.f32 1.442695, %v2483_v52  ;;  %v2561_v12 = vmul.f32 1.442695, %v2484_v46  ;;  %4336 = vrot.lane.b32.xlu1 %v12694_v47, %s7582_s13  ;;  %v2762_v30 = vpack.c.bf16 %v6948_v45, %v6944_v18  ;;  %v9445_v1 = vadd.f32 %v6948_v45, %v6946_v44 }
 0x447   : > { %v2836_v53 = vpop.permute.xlu0 %2835  ;;  %v2563_v26 = vmul.f32 1.442695, %v2485_v39  ;;  %v2565_v52 = vmul.f32 1.442695, %v2486_v61 }
 0x448   : > { %12695 = vst [vmem:[#allocation23_spill] sm:$0xff] %v9445_v1  ;;  %6957 = vpow2.f32 %v2559_v49  ;;  %6153 = vmatprep.subr.bf16.mxu0 %v2836_v53  ;;  %v2820_v35 = vpop.permute.xlu1 %2819  ;;  %v12700_v1 = vpack.c.bf16 %v9403_v28, %v9393_v9 }
 0x449   : > { %6959 = vpow2.f32 %v2561_v12  ;;  %v6950_v46 = vpop.eup %6949  ;;  %6154 = vmatpush3.bf16.msra.mxu0 %v2820_v35  ;;  %v9447_v43 = vpop.f32.mrb[184].mxu1 }
 0x44a   : > { %6961 = vpow2.f32 %v2563_v26  ;;  %12696 = vst [vmem:[#allocation90_spill] sm:$0xff] %v9447_v43  ;;  %v6952_v16 = vpop.eup %6951  ;;  %v9449_v47 = vpop.f32.mrb[185].mxu1 }
 0x44b   : > { %6963 = vpow2.f32 %v2565_v52  ;;  %12697 = vst [vmem:[#allocation91_spill] sm:$0xff] %v9449_v47  ;;  %v2838_v18 = vpop.permute.xlu0 %2837  ;;  %v9453_v49 = vpop.f32.mrb[186].mxu1  ;;  %v9455_v39 = vadd.f32 %v6952_v16, %v6950_v46 }
 0x44c   : > { %v6954_v57 = vpop.eup %6953  ;;  %6155 = vmatprep.subr.bf16.mxu0 %v2838_v18  ;;  %v4329_v61 = vpop.permute.xlu1 %4328 }
 0x44d   : > { %12698 = vst [vmem:[#allocation92_spill] sm:$0xff] %v9455_v39  ;;  %v6956_v12 = vpop.eup %6955  ;;  %v9457_v26 = vpop.f32.mrb[187].mxu1  ;;  %v2763_v44 = vpack.c.bf16 %v6954_v57, %v6950_v46  ;;  %6441 = vmatprep.mubr.msk.bf16.mxu1 %vm290_vm0, %v4329_v61 }
 0x44e   : > { %v2764_v53 = vpack.c.bf16 %v6956_v12, %v6952_v16  ;;  %v9462_v52 = vadd.f32 %v6956_v12, %v6954_v57  ;;  %6442 = vmatmul.mubr.msk.bf16.gmra.mrb[248].mxu1 %vm290_vm0, %v4329_v61 }
 0x44f   : > { %v2822_v35 = vpop.permute.xlu0 %2821 }
 0x450   : > { %12699 = vst [vmem:[#allocation93_spill] sm:$0xff] %v9462_v52  ;;  %6156 = vmatpush3.bf16.msra.mxu0 %v2822_v35 }
 0x451   : > { %v9465_v21 = vpop.f32.mrb[188].mxu1 }
 0x452   : > { %v6958_v18 = vpop.eup %6957  ;;  %v9470_v46 = vpop.f32.mrb[189].mxu1 }
 0x453   : > { %v6960_v39 = vpop.eup %6959  ;;  %2888 = vmatmul.mubr.bf16.vlgmr.msra.gmra.mrb[128].mxu0 %v12700_v1  ;;  %12701 = vst [vmem:[#allocation94_spill] sm:$0xff] %v9470_v46  ;;  %v9474_v57 = vpop.f32.mrb[190].mxu1 }
 0x454   : > { %v6962_v45 = vpop.eup %6961  ;;  %2895 = vmatprep.mubr.bf16.mxu0 %v2762_v30  ;;  %v9476_v12 = vadd.f32 %v6960_v39, %v6958_v18  ;;  %v9478_v35 = vpop.f32.mrb[191].mxu1 }
 0x455   : > { %v6964_v61 = vpop.eup %6963  ;;  %v2765_v52 = vpack.c.bf16 %v6962_v45, %v6958_v18  ;;  %v12707_v18 = vmax.f32 %v9163_v56, %v9167_v29 }
 0x456   : > { %12702 = vst [vmem:[#allocation95_spill] sm:$0xff] %v9476_v12  ;;  %v2766_v9 = vpack.c.bf16 %v6964_v61, %v6960_v39  ;;  %v9482_v28 = vadd.f32 %v6964_v61, %v6962_v45 }
 0x458   : > { %12703 = vst [vmem:[#allocation96_spill] sm:$0xff] %v9482_v28 }
 0x459   : > { %v9484_v1 = vpop.f32.mrb[192].mxu1 }
 0x45a   : > { %12704 = vst [vmem:[#allocation97_spill] sm:$0xff] %v9484_v1  ;;  %v9486_v43 = vpop.f32.mrb[193].mxu1 }
 0x45b   : > { %2896 = vmatmul.mubr.bf16.gmra.mrb[132].mxu0 %v2761_v15  ;;  %12705 = vst [vmem:[#allocation98_spill] sm:$0xff] %v9486_v43  ;;  %v9490_v16 = vpop.f32.mrb[194].mxu1 }
 0x45c   : > { %2903 = vmatprep.mubr.bf16.mxu0 %v2764_v53  ;;  %12706 = vst [vmem:[#allocation99_spill] sm:$0xff] %v9490_v16  ;;  %2424 = vmax.xlane.f32.xlu0 %v12707_v18  ;;  %v9495_v12 = vpop.f32.mrb[195].mxu1  ;;  %v12716_v16 = vld [vmem:[#allocation52_spill] sm:$0xff] }
 0x45d   : > { %12708 = vst [vmem:[#allocation100_spill] sm:$0xff] %v9495_v12  ;;  %v12717_v46 = vmax.f32 %v9172_v7, %v12716_v16 }
 0x461   : > { %v9499_v45 = vpop.f32.mrb[196].mxu1 }
 0x462   : > { %12709 = vst [vmem:[#allocation101_spill] sm:$0xff] %v9499_v45  ;;  %v5997_v15 = vpop.f32.mrb[64].mxu0  ;;  %v9501_v61 = vpop.f32.mrb[197].mxu1 }
 0x463   : > { %2904 = vmatmul.mubr.bf16.gmra.mrb[136].mxu0 %v2763_v44  ;;  %12710 = vst [vmem:[#allocation102_spill] sm:$0xff] %v9501_v61  ;;  %v5998_v47 = vpop.f32.mrb[65].mxu0  ;;  %v9505_v30 = vpop.f32.mrb[198].mxu1 }
 0x464   : > { %2911 = vmatprep.mubr.bf16.mxu0 %v2766_v9  ;;  %12711 = vst [vmem:[#allocation103_spill] sm:$0xff] %v9505_v30  ;;  %v9507_v28 = vadd.f32 %v5998_v47, %v5997_v15  ;;  %v6000_v18 = vpop.f32.mrb[66].mxu0  ;;  %v9509_v43 = vpop.f32.mrb[199].mxu1 }
 0x465   : > { %12713 = vst [vmem:[#allocation105_spill] sm:$0xff] %v9509_v43  ;;  %v6001_v1 = vpop.f32.mrb[67].mxu0 }
 0x466   : > { %12712 = vst [vmem:[#allocation104_spill] sm:$0xff] %v9507_v28  ;;  %v9513_v12 = vadd.f32 %v6001_v1, %v6000_v18 }
 0x468   : > { %12714 = vst [vmem:[#allocation106_spill] sm:$0xff] %v9513_v12 }
 0x469   : > { %v9515_v44 = vpop.f32.mrb[200].mxu1 }
 0x46a   : > { %12715 = vst [vmem:[#allocation107_spill] sm:$0xff] %v9515_v44  ;;  %2427 = vmax.xlane.f32.xlu1 %v12717_v46  ;;  %v9520_v9 = vpop.f32.mrb[201].mxu1 }
 0x46b   : > { %2912 = vmatmul.mubr.bf16.gmra.mrb[140].mxu0 %v2765_v52  ;;  %12718 = vst [vmem:[#allocation52_spill] sm:$0xff] %v9520_v9  ;;  %v9524_v15 = vpop.f32.mrb[202].mxu1  ;;  %v12722_v52 = vmax.f32 %v9187_v33, %v9191_v5  ;;  %v12725_v9 = vld [vmem:[#allocation24_spill] sm:$0xff] }
 0x46c   : > { %12719 = vst [vmem:[#allocation108_spill] sm:$0xff] %v9524_v15  ;;  %v6003_v53 = vpop.f32.mrb[68].mxu0  ;;  %v9526_v28 = vpop.f32.mrb[203].mxu1 }
 0x46d   : > { %12720 = vst [vmem:[#allocation109_spill] sm:$0xff] %v9526_v28  ;;  %v6004_v39 = vpop.f32.mrb[69].mxu0 }
 0x46e   : > { %v9530_v18 = vadd.f32 %v6004_v39, %v6003_v53  ;;  %v6006_v12 = vpop.f32.mrb[70].mxu0  ;;  %2430 = vmax.xlane.f32.xlu1 %v12722_v52 }
 0x46f   : > { %v6007_v46 = vpop.f32.mrb[71].mxu0 }
 0x470   : > { %12721 = vst [vmem:[#allocation110_spill] sm:$0xff] %v9530_v18  ;;  %v9535_v61 = vadd.f32 %v6007_v46, %v6006_v12 }
 0x472   : > { %12723 = vst [vmem:[#allocation111_spill] sm:$0xff] %v9535_v61  ;;  %v9537_v47 = vpop.f32.mrb[204].mxu1  ;;  %4338 = vrot.lane.b32.xlu0 %v12725_v9, %s7582_s13 }
 0x473   : > { %12724 = vst [vmem:[#allocation112_spill] sm:$0xff] %v9537_v47  ;;  %v9541_v44 = vpop.f32.mrb[205].mxu1 }
 0x474   : > { %12726 = vst [vmem:[#allocation24_spill] sm:$0xff] %v9541_v44  ;;  %v9545_v53 = vpop.f32.mrb[206].mxu1 }
 0x475   : > { %v6009_v45 = vpop.f32.mrb[72].mxu0  ;;  %12727 = vst [vmem:[#allocation113_spill] sm:$0xff] %v9545_v53  ;;  %v9547_v18 = vpop.f32.mrb[207].mxu1  ;;  %v12736_v53 = vld [vmem:[#allocation25_spill] sm:$0xff] }
 0x476   : > { %v6010_v1 = vpop.f32.mrb[73].mxu0  ;;  %12728 = vst [vmem:[#allocation114_spill] sm:$0xff] %v9547_v18 }
 0x477   : > { %v9549_v52 = vadd.f32 %v6010_v1, %v6009_v45  ;;  %v6012_v12 = vpop.f32.mrb[74].mxu0 }
 0x478   : > { %v6013_v61 = vpop.f32.mrb[75].mxu0 }
 0x479   : > { %12729 = vst [vmem:[#allocation115_spill] sm:$0xff] %v9549_v52  ;;  %v9553_v28 = vadd.f32 %v6013_v61, %v6012_v12 }
 0x47a   : > { %v9555_v9 = vpop.f32.mrb[208].mxu1 }
 0x47b   : > { %12730 = vst [vmem:[#allocation116_spill] sm:$0xff] %v9553_v28  ;;  %12731 = vst [vmem:[#allocation117_spill] sm:$0xff] %v9555_v9  ;;  %v9557_v15 = vpop.f32.mrb[209].mxu1 }
 0x47c   : > { %12732 = vst [vmem:[#allocation118_spill] sm:$0xff] %v9557_v15  ;;  %v9561_v44 = vpop.f32.mrb[210].mxu1 }
 0x47d   : > { %v6015_v43 = vpop.f32.mrb[76].mxu0  ;;  %12733 = vst [vmem:[#allocation119_spill] sm:$0xff] %v9561_v44  ;;  %v9563_v45 = vpop.f32.mrb[211].mxu1 }
 0x47e   : > { %v6016_v47 = vpop.f32.mrb[77].mxu0  ;;  %12734 = vst [vmem:[#allocation120_spill] sm:$0xff] %v9563_v45  ;;  %v2401_v12 = vpop.xlane.xlu1 %2400 }
 0x47f   : > { %v9565_v1 = vadd.f32 %v6016_v47, %v6015_v43  ;;  %v6018_v52 = vpop.f32.mrb[78].mxu0  ;;  %v2487_v46 = vsub.f32 %v9057_v6, %v2401_v12  ;;  %v2488_v28 = vsub.f32 %v9061_v4, %v2401_v12  ;;  %4340 = vrot.lane.b32.xlu1 %v12736_v53, %s7582_s13  ;;  %v2404_v39 = vpop.xlane.xlu0 %2403 }
 0x480   : > { %v6019_v18 = vpop.f32.mrb[79].mxu0  ;;  %v2489_v9 = vsub.f32 %v9066_v25, %v2404_v39  ;;  %v2490_v43 = vsub.f32 %v9069_v38, %v2404_v39 }
 0x481   : > { %12735 = vst [vmem:[#allocation121_spill] sm:$0xff] %v9565_v1  ;;  %v9573_v15 = vadd.f32 %v6019_v18, %v6018_v52  ;;  %v2567_v47 = vmul.f32 1.442695, %v2487_v46  ;;  %v2569_v1 = vmul.f32 1.442695, %v2488_v28 }
 0x482   : > { %v2571_v30 = vmul.f32 1.442695, %v2489_v9  ;;  %v2573_v61 = vmul.f32 1.442695, %v2490_v43  ;;  %v2407_v45 = vpop.xlane.xlu1 %2406  ;;  %v9577_v44 = vpop.f32.mrb[212].mxu1 }
 0x483   : > { %12737 = vst [vmem:[#allocation25_spill] sm:$0xff] %v9573_v15  ;;  %12738 = vst [vmem:[#allocation122_spill] sm:$0xff] %v9577_v44  ;;  %6965 = vpow2.f32 %v2567_v47  ;;  %v2491_v6 = vsub.f32 %v9081_v19, %v2407_v45  ;;  %v2492_v4 = vsub.f32 %v9085_v55, %v2407_v45  ;;  %v9581_v53 = vpop.f32.mrb[213].mxu1  ;;  %v4331_v18 = vpop.permute.xlu0 %4330  ;;  %v12749_v15 = vld [vmem:[#allocation55_spill] sm:$0xff] }
 0x484   : > { %12739 = vst [vmem:[#allocation123_spill] sm:$0xff] %v9581_v53  ;;  %6967 = vpow2.f32 %v2569_v1  ;;  %v9585_v25 = vpop.f32.mrb[214].mxu1  ;;  %6443 = vmatprep.mubr.msk.bf16.mxu1 %vm290_vm0, %v4331_v18 }
 0x485   : > { %v6021_v52 = vpop.f32.mrb[80].mxu0  ;;  %6969 = vpow2.f32 %v2571_v30  ;;  %v2575_v28 = vmul.f32 1.442695, %v2491_v6  ;;  %v2577_v39 = vmul.f32 1.442695, %v2492_v4  ;;  %v9588_v9 = vpop.f32.mrb[215].mxu1  ;;  %6444 = vmatmul.mubr.msk.bf16.gmra.mrb[252].mxu1 %vm290_vm0, %v4331_v18 }
 0x486   : > { %v6022_v46 = vpop.f32.mrb[81].mxu0  ;;  %6971 = vpow2.f32 %v2573_v61  ;;  %v2410_v1 = vpop.xlane.xlu1 %2409 }
 0x487   : > { %v9591_v19 = vadd.f32 %v6022_v46, %v6021_v52  ;;  %v6024_v55 = vpop.f32.mrb[82].mxu0  ;;  %6973 = vpow2.f32 %v2575_v28  ;;  %v2493_v12 = vsub.f32 %v9090_v0, %v2410_v1  ;;  %v2494_v30 = vsub.f32 %v9093_v51, %v2410_v1 }
 0x488   : > { %v6025_v43 = vpop.f32.mrb[83].mxu0  ;;  %6975 = vpow2.f32 %v2577_v39 }
 0x489   : > { %12740 = vst [vmem:[#allocation124_spill] sm:$0xff] %v9591_v19  ;;  %v9597_v47 = vadd.f32 %v6025_v43, %v6024_v55  ;;  %v2579_v6 = vmul.f32 1.442695, %v2493_v12  ;;  %v2581_v4 = vmul.f32 1.442695, %v2494_v30 }
 0x48a   : > { %v4333_v18 = vpop.permute.xlu1 %4332  ;;  %v9599_v61 = vpop.f32.mrb[216].mxu1 }
 0x48b   : > { %12741 = vst [vmem:[#allocation125_spill] sm:$0xff] %v9597_v47  ;;  %12742 = vst [vmem:[#allocation126_spill] sm:$0xff] %v9599_v61  ;;  %6977 = vpow2.f32 %v2579_v6  ;;  %v9601_v52 = vpop.f32.mrb[217].mxu1  ;;  %6445 = vmatprep.mubr.msk.bf16.mxu1 %vm290_vm0, %v4333_v18 }
 0x48c   : > { %12743 = vst [vmem:[#allocation127_spill] sm:$0xff] %v9601_v52  ;;  %6979 = vpow2.f32 %v2581_v4  ;;  %v9606_v51 = vpop.f32.mrb[218].mxu1  ;;  %v12750_v52 = vmax.f32 %v9196_v20, %v12749_v15 }
 0x48d   : > { %v6027_v28 = vpop.f32.mrb[84].mxu0  ;;  %12744 = vst [vmem:[#allocation128_spill] sm:$0xff] %v9606_v51  ;;  %v6966_v39 = vpop.eup %6965  ;;  %6446 = vmatmul.mubr.msk.bf16.gmra.mrb[0].mxu1 %vm290_vm0, %v4333_v18 }
 0x48e   : > { %v6028_v46 = vpop.f32.mrb[85].mxu0  ;;  %v9608_v55 = vpop.f32.mrb[219].mxu1 }
 0x48f   : > { %12745 = vst [vmem:[#allocation129_spill] sm:$0xff] %v9608_v55  ;;  %v6968_v1 = vpop.eup %6967  ;;  %v9611_v12 = vadd.f32 %v6028_v46, %v6027_v28  ;;  %v6030_v30 = vpop.f32.mrb[86].mxu0 }
 0x490   : > { %v6970_v6 = vpop.eup %6969  ;;  %v6031_v4 = vpop.f32.mrb[87].mxu0  ;;  %v9615_v38 = vadd.f32 %v6968_v1, %v6966_v39 }
 0x491   : > { %12746 = vst [vmem:[#allocation130_spill] sm:$0xff] %v9611_v12  ;;  %v6972_v0 = vpop.eup %6971  ;;  %v9617_v45 = vadd.f32 %v6031_v4, %v6030_v30  ;;  %v2767_v19 = vpack.c.bf16 %v6970_v6, %v6966_v39  ;;  %2433 = vmax.xlane.f32.xlu0 %v12750_v52 }
 0x492   : > { %12747 = vst [vmem:[#allocation131_spill] sm:$0xff] %v9615_v38  ;;  %v6974_v47 = vpop.eup %6973  ;;  %v2768_v18 = vpack.c.bf16 %v6972_v0, %v6968_v1  ;;  %v9622_v28 = vadd.f32 %v6972_v0, %v6970_v6  ;;  %v9624_v12 = vpop.f32.mrb[220].mxu1  ;;  %v12757_v0 = vmax.f32 %v9220_v54, %v9223_v58 }
 0x493   : > { %12748 = vst [vmem:[#allocation132_spill] sm:$0xff] %v9617_v45  ;;  %v6976_v46 = vpop.eup %6975  ;;  %12752 = vst [vmem:[#allocation133_spill] sm:$0xff] %v9624_v12  ;;  %v9626_v43 = vpop.f32.mrb[221].mxu1 }
 0x494   : > { %12751 = vst [vmem:[#allocation55_spill] sm:$0xff] %v9622_v28  ;;  %2919 = vmatprep.mubr.bf16.mxu0 %v2768_v18  ;;  %12753 = vst [vmem:[#allocation134_spill] sm:$0xff] %v9626_v43  ;;  %v9628_v61 = vadd.f32 %v6976_v46, %v6974_v47  ;;  %v9632_v30 = vpop.f32.mrb[222].mxu1 }
 0x495   : > { %v6033_v38 = vpop.f32.mrb[88].mxu0  ;;  %2920 = vmatmul.mubr.bf16.gmra.mrb[144].mxu0 %v2767_v19  ;;  %12755 = vst [vmem:[#allocation136_spill] sm:$0xff] %v9632_v30  ;;  %v6978_v4 = vpop.eup %6977  ;;  %2439 = vmax.xlane.f32.xlu0 %v12757_v0 }
 0x496   : > { %12754 = vst [vmem:[#allocation135_spill] sm:$0xff] %v9628_v61  ;;  %v6034_v52 = vpop.f32.mrb[89].mxu0  ;;  %v9634_v1 = vpop.f32.mrb[223].mxu1  ;;  %v2769_v61 = vpack.c.bf16 %v6978_v4, %v6974_v47 }
 0x497   : > { %12756 = vst [vmem:[#allocation137_spill] sm:$0xff] %v9634_v1  ;;  %v6980_v6 = vpop.eup %6979  ;;  %v9639_v18 = vadd.f32 %v6034_v52, %v6033_v38  ;;  %v6036_v45 = vpop.f32.mrb[90].mxu0  ;;  %v12769_v38 = vmax.f32 %v9211_v63, %v9215_v13 }
 0x498   : > { %v6037_v28 = vpop.f32.mrb[91].mxu0  ;;  %v2770_v39 = vpack.c.bf16 %v6980_v6, %v6976_v46  ;;  %v9643_v43 = vadd.f32 %v6980_v6, %v6978_v4 }
 0x499   : > { %12758 = vst [vmem:[#allocation138_spill] sm:$0xff] %v9639_v18  ;;  %v9645_v12 = vadd.f32 %v6037_v28, %v6036_v45 }
 0x49a   : > { %12759 = vst [vmem:[#allocation139_spill] sm:$0xff] %v9643_v43  ;;  %2927 = vmatprep.mubr.bf16.mxu0 %v2770_v39  ;;  %v9647_v55 = vpop.f32.mrb[224].mxu1  ;;  %v12773_v43 = vmax.f32 %v9236_v34, %v9243_v17 }
 0x49b   : > { %12760 = vst [vmem:[#allocation140_spill] sm:$0xff] %v9645_v12  ;;  %12761 = vst [vmem:[#allocation141_spill] sm:$0xff] %v9647_v55  ;;  %v9649_v51 = vpop.f32.mrb[225].mxu1 }
 0x49c   : > { %12762 = vst [vmem:[#allocation142_spill] sm:$0xff] %v9649_v51  ;;  %v9653_v52 = vpop.f32.mrb[226].mxu1 }
 0x49d   : > { %v6039_v0 = vpop.f32.mrb[92].mxu0  ;;  %2928 = vmatmul.mubr.bf16.gmra.mrb[148].mxu0 %v2769_v61  ;;  %12763 = vst [vmem:[#allocation143_spill] sm:$0xff] %v9653_v52  ;;  %v9655_v47 = vpop.f32.mrb[227].mxu1 }
 0x49e   : > { %v6040_v19 = vpop.f32.mrb[93].mxu0  ;;  %12764 = vst [vmem:[#allocation144_spill] sm:$0xff] %v9655_v47 }
 0x49f   : > { %v9657_v46 = vadd.f32 %v6040_v19, %v6039_v0  ;;  %v6042_v4 = vpop.f32.mrb[94].mxu0 }
 0x4a0   : > { %v6043_v28 = vpop.f32.mrb[95].mxu0 }
 0x4a1   : > { %12765 = vst [vmem:[#allocation145_spill] sm:$0xff] %v9657_v46  ;;  %v9661_v39 = vadd.f32 %v6043_v28, %v6042_v4 }
 0x4a2   : > { %v9663_v6 = vpop.f32.mrb[228].mxu1 }
 0x4a3   : > { %12766 = vst [vmem:[#allocation146_spill] sm:$0xff] %v9661_v39  ;;  %12767 = vst [vmem:[#allocation147_spill] sm:$0xff] %v9663_v6  ;;  %v9665_v61 = vpop.f32.mrb[229].mxu1  ;;  %2436 = vmax.xlane.f32.xlu1 %v12769_v38 }
 0x4a4   : > { %12768 = vst [vmem:[#allocation148_spill] sm:$0xff] %v9665_v61  ;;  %v9672_v0 = vpop.f32.mrb[230].mxu1  ;;  %v12777_v61 = vld [vmem:[#allocation26_spill] sm:$0xff] }
 0x4a5   : > { %v6045_v18 = vpop.f32.mrb[96].mxu0  ;;  %12770 = vst [vmem:[#allocation149_spill] sm:$0xff] %v9672_v0  ;;  %v9674_v12 = vpop.f32.mrb[231].mxu1 }
 0x4a6   : > { %v6046_v46 = vpop.f32.mrb[97].mxu0  ;;  %12771 = vst [vmem:[#allocation150_spill] sm:$0xff] %v9674_v12 }
 0x4a7   : > { %v9676_v45 = vadd.f32 %v6046_v46, %v6045_v18  ;;  %v6048_v4 = vpop.f32.mrb[98].mxu0  ;;  %2442 = vmax.xlane.f32.xlu1 %v12773_v43  ;;  %v12788_v46 = vld [vmem:[#allocation27_spill] sm:$0xff] }
 0x4a8   : > { %v6049_v39 = vpop.f32.mrb[99].mxu0 }
 0x4a9   : > { %12772 = vst [vmem:[#allocation151_spill] sm:$0xff] %v9676_v45  ;;  %v9683_v38 = vadd.f32 %v6049_v39, %v6048_v4 }
 0x4aa   : > { %v9685_v51 = vpop.f32.mrb[232].mxu1 }
 0x4ab   : > { %12774 = vst [vmem:[#allocation152_spill] sm:$0xff] %v9683_v38  ;;  %12775 = vst [vmem:[#allocation153_spill] sm:$0xff] %v9685_v51  ;;  %v9687_v19 = vpop.f32.mrb[233].mxu1  ;;  %4342 = vrot.lane.b32.xlu0 %v12777_v61, %s7582_s13 }
 0x4ac   : > { %12776 = vst [vmem:[#allocation154_spill] sm:$0xff] %v9687_v19  ;;  %v9693_v45 = vpop.f32.mrb[234].mxu1 }
 0x4ad   : > { %v6051_v18 = vpop.f32.mrb[100].mxu0  ;;  %12778 = vst [vmem:[#allocation26_spill] sm:$0xff] %v9693_v45  ;;  %v9695_v12 = vpop.f32.mrb[235].mxu1 }
 0x4ae   : > { %v6052_v28 = vpop.f32.mrb[101].mxu0  ;;  %12779 = vst [vmem:[#allocation155_spill] sm:$0xff] %v9695_v12 }
 0x4af   : > { %v9697_v0 = vadd.f32 %v6052_v28, %v6051_v18  ;;  %v6054_v43 = vpop.f32.mrb[102].mxu0 }
 0x4b0   : > { %v6055_v4 = vpop.f32.mrb[103].mxu0 }
 0x4b1   : > { %12780 = vst [vmem:[#allocation156_spill] sm:$0xff] %v9697_v0  ;;  %v9701_v38 = vadd.f32 %v6055_v4, %v6054_v43 }
 0x4b2   : > { %v9703_v6 = vpop.f32.mrb[236].mxu1 }
 0x4b3   : > { %12781 = vst [vmem:[#allocation157_spill] sm:$0xff] %v9701_v38  ;;  %12782 = vst [vmem:[#allocation158_spill] sm:$0xff] %v9703_v6  ;;  %v9705_v61 = vpop.f32.mrb[237].mxu1 }
 0x4b4   : > { %12783 = vst [vmem:[#allocation159_spill] sm:$0xff] %v9705_v61  ;;  %v9709_v19 = vpop.f32.mrb[238].mxu1  ;;  %v2413_v4 = vpop.xlane.xlu0 %2412 }
 0x4b5   : > { %v6057_v55 = vpop.f32.mrb[104].mxu0  ;;  %12784 = vst [vmem:[#allocation160_spill] sm:$0xff] %v9709_v19  ;;  %v9711_v28 = vpop.f32.mrb[239].mxu1  ;;  %v2495_v39 = vsub.f32 %v9107_v31, %v2413_v4  ;;  %v2496_v38 = vsub.f32 %v9111_v24, %v2413_v4 }
 0x4b6   : > { %v6058_v51 = vpop.f32.mrb[105].mxu0  ;;  %12785 = vst [vmem:[#allocation161_spill] sm:$0xff] %v9711_v28 }
 0x4b7   : > { %v9713_v18 = vadd.f32 %v6058_v51, %v6057_v55  ;;  %v6060_v0 = vpop.f32.mrb[106].mxu0  ;;  %v2583_v61 = vmul.f32 1.442695, %v2495_v39  ;;  %v2585_v6 = vmul.f32 1.442695, %v2496_v38 }
 0x4b8   : > { %v6061_v12 = vpop.f32.mrb[107].mxu0  ;;  %4344 = vrot.lane.b32.xlu1 %v12788_v46, %s7582_s13  ;;  %v4335_v47 = vpop.permute.xlu0 %4334 }
 0x4b9   : > { %12786 = vst [vmem:[#allocation162_spill] sm:$0xff] %v9713_v18  ;;  %v9719_v45 = vadd.f32 %v6061_v12, %v6060_v0  ;;  %6981 = vpow2.f32 %v2583_v61  ;;  %6447 = vmatprep.mubr.msk.bf16.mxu1 %vm290_vm0, %v4335_v47 }
 0x4ba   : > { %v9723_v51 = vpop.f32.mrb[240].mxu1  ;;  %v2416_v55 = vpop.xlane.xlu1 %2415  ;;  %6983 = vpow2.f32 %v2585_v6  ;;  %6448 = vmatmul.mubr.msk.bf16.gmra.mrb[4].mxu1 %vm290_vm0, %v4335_v47 }
 0x4bb   : > { %12787 = vst [vmem:[#allocation163_spill] sm:$0xff] %v9719_v45  ;;  %12789 = vst [vmem:[#allocation27_spill] sm:$0xff] %v9723_v51  ;;  %v9726_v43 = vpop.f32.mrb[241].mxu1  ;;  %v2497_v31 = vsub.f32 %v9118_v2, %v2416_v55  ;;  %v2498_v24 = vsub.f32 %v9123_v48, %v2416_v55 }
 0x4bc   : > { %12790 = vst [vmem:[#allocation164_spill] sm:$0xff] %v9726_v43  ;;  %v9733_v38 = vpop.f32.mrb[242].mxu1 }
 0x4bd   : > { %v6063_v12 = vpop.f32.mrb[108].mxu0  ;;  %12791 = vst [vmem:[#allocation165_spill] sm:$0xff] %v9733_v38  ;;  %v9735_v39 = vpop.f32.mrb[243].mxu1  ;;  %v2587_v61 = vmul.f32 1.442695, %v2497_v31 }
 0x4be   : > { %v6064_v46 = vpop.f32.mrb[109].mxu0  ;;  %12792 = vst [vmem:[#allocation166_spill] sm:$0xff] %v9735_v39  ;;  %v2589_v4 = vmul.f32 1.442695, %v2498_v24  ;;  %v2419_v55 = vpop.xlane.xlu1 %2418 }
 0x4bf   : > { %v9737_v18 = vadd.f32 %v6064_v46, %v6063_v12  ;;  %v6066_v6 = vpop.f32.mrb[110].mxu0  ;;  %6985 = vpow2.f32 %v2587_v61  ;;  %v2499_v47 = vsub.f32 %v9137_v41, %v2419_v55  ;;  %v2500_v0 = vsub.f32 %v9141_v23, %v2419_v55 }
 0x4c0   : > { %v6067_v48 = vpop.f32.mrb[111].mxu0  ;;  %6987 = vpow2.f32 %v2589_v4 }
 0x4c1   : > { %12793 = vst [vmem:[#allocation167_spill] sm:$0xff] %v9737_v18  ;;  %v9741_v45 = vadd.f32 %v6067_v48, %v6066_v6  ;;  %v2591_v43 = vmul.f32 1.442695, %v2499_v47  ;;  %v2593_v51 = vmul.f32 1.442695, %v2500_v0 }
 0x4c2   : > { %v9745_v31 = vpop.f32.mrb[244].mxu1  ;;  %v2422_v24 = vpop.xlane.xlu1 %2421 }
 0x4c3   : > { %12794 = vst [vmem:[#allocation168_spill] sm:$0xff] %v9741_v45  ;;  %12795 = vst [vmem:[#allocation169_spill] sm:$0xff] %v9745_v31  ;;  %v9747_v12 = vpop.f32.mrb[245].mxu1  ;;  %6989 = vpow2.f32 %v2591_v43  ;;  %v2501_v46 = vsub.f32 %v9148_v62, %v2422_v24  ;;  %v2502_v2 = vsub.f32 %v9151_v22, %v2422_v24  ;;  %v6982_v23 = vpop.eup %6981 }
 0x4c4   : > { %12796 = vst [vmem:[#allocation170_spill] sm:$0xff] %v9747_v12  ;;  %v9753_v41 = vpop.f32.mrb[246].mxu1  ;;  %6991 = vpow2.f32 %v2593_v51  ;;  %v6984_v48 = vpop.eup %6983 }
 0x4c5   : > { %v6069_v61 = vpop.f32.mrb[112].mxu0  ;;  %12797 = vst [vmem:[#allocation171_spill] sm:$0xff] %v9753_v41  ;;  %v9755_v0 = vpop.f32.mrb[247].mxu1  ;;  %v2595_v55 = vmul.f32 1.442695, %v2501_v46  ;;  %v9761_v18 = vadd.f32 %v6984_v48, %v6982_v23 }
 0x4c6   : > { %v6070_v4 = vpop.f32.mrb[113].mxu0  ;;  %12798 = vst [vmem:[#allocation172_spill] sm:$0xff] %v9755_v0  ;;  %v2597_v47 = vmul.f32 1.442695, %v2502_v2  ;;  %v4337_v24 = vpop.permute.xlu1 %4336  ;;  %v12802_v2 = vmax.f32 %v9248_v60, %v9254_v11  ;;  %v12833_v0 = vld [vmem:[#allocation74_spill] sm:$0xff] }
 0x4c7   : > { %v9757_v45 = vadd.f32 %v6070_v4, %v6069_v61  ;;  %v6072_v43 = vpop.f32.mrb[114].mxu0  ;;  %12800 = vst [vmem:[#allocation174_spill] sm:$0xff] %v9761_v18  ;;  %6993 = vpow2.f32 %v2595_v55  ;;  %6449 = vmatprep.mubr.msk.bf16.mxu1 %vm290_vm0, %v4337_v24 }
 0x4c8   : > { %v6073_v62 = vpop.f32.mrb[115].mxu0  ;;  %6995 = vpow2.f32 %v2597_v47  ;;  %6450 = vmatmul.mubr.msk.bf16.gmra.mrb[8].mxu1 %vm290_vm0, %v4337_v24  ;;  %v12805_v47 = vmax.f32 %v9271_v8, %v9275_v42 }
 0x4c9   : > { %12799 = vst [vmem:[#allocation173_spill] sm:$0xff] %v9757_v45  ;;  %v9763_v6 = vadd.f32 %v6073_v62, %v6072_v43  ;;  %v6986_v51 = vpop.eup %6985 }
 0x4ca   : > { %2445 = vmax.xlane.f32.xlu0 %v12802_v2  ;;  %v6988_v46 = vpop.eup %6987  ;;  %v2771_v61 = vpack.c.bf16 %v6986_v51, %v6982_v23 }
 0x4cb   : > { %12801 = vst [vmem:[#allocation175_spill] sm:$0xff] %v9763_v6  ;;  %v2772_v22 = vpack.c.bf16 %v6988_v46, %v6984_v48  ;;  %v9770_v45 = vadd.f32 %v6988_v46, %v6986_v51 }
 0x4cd   : > { %v6075_v4 = vpop.f32.mrb[116].mxu0  ;;  %12803 = vst [vmem:[#allocation176_spill] sm:$0xff] %v9770_v45  ;;  %v6990_v55 = vpop.eup %6989  ;;  %2935 = vmatprep.mubr.bf16.mxu0 %v2772_v22 }
 0x4ce   : > { %v6076_v18 = vpop.f32.mrb[117].mxu0  ;;  %2451 = vmax.xlane.f32.xlu0 %v12805_v47  ;;  %v6992_v24 = vpop.eup %6991  ;;  %2936 = vmatmul.mubr.bf16.gmra.mrb[152].mxu0 %v2771_v61  ;;  %v12811_v61 = vld [vmem:[#allocation30_spill] sm:$0xff] }
 0x4cf   : > { %v9772_v43 = vadd.f32 %v6076_v18, %v6075_v4  ;;  %v6078_v62 = vpop.f32.mrb[118].mxu0  ;;  %v9779_v23 = vadd.f32 %v6992_v24, %v6990_v55 }
 0x4d0   : > { %v6079_v6 = vpop.f32.mrb[119].mxu0 }
 0x4d1   : > { %12804 = vst [vmem:[#allocation177_spill] sm:$0xff] %v9772_v43  ;;  %v9777_v2 = vadd.f32 %v6079_v6, %v6078_v62  ;;  %12807 = vst [vmem:[#allocation179_spill] sm:$0xff] %v9779_v23  ;;  %v6994_v48 = vpop.eup %6993  ;;  %v12812_v62 = vmax.f32 %v9263_v32, %v12811_v61 }
 0x4d2   : > { %v6996_v51 = vpop.eup %6995  ;;  %v2773_v46 = vpack.c.bf16 %v6994_v48, %v6990_v55 }
 0x4d3   : > { %12806 = vst [vmem:[#allocation178_spill] sm:$0xff] %v9777_v2  ;;  %v2774_v12 = vpack.c.bf16 %v6996_v51, %v6992_v24  ;;  %v9781_v18 = vadd.f32 %v6996_v51, %v6994_v48 }
 0x4d5   : > { %v6081_v45 = vpop.f32.mrb[120].mxu0  ;;  %12808 = vst [vmem:[#allocation180_spill] sm:$0xff] %v9781_v18  ;;  %2943 = vmatprep.mubr.bf16.mxu0 %v2774_v12  ;;  %v12816_v12 = vld [vmem:[#allocation29_spill] sm:$0xff]  ;;  %v12830_v18 = vld [vmem:[#allocation72_spill] sm:$0xff] }
 0x4d6   : > { %v6082_v4 = vpop.f32.mrb[121].mxu0  ;;  %2944 = vmatmul.mubr.bf16.gmra.mrb[156].mxu0 %v2773_v46  ;;  %v12818_v46 = vld [vmem:[#allocation64_spill] sm:$0xff] }
 0x4d7   : > { %v9783_v22 = vadd.f32 %v6082_v4, %v6081_v45  ;;  %v6084_v43 = vpop.f32.mrb[122].mxu0  ;;  %v12815_v45 = vmax.f32 %v9279_v27, %v9283_v40 }
 0x4d8   : > { %v6085_v47 = vpop.f32.mrb[123].mxu0 }
 0x4d9   : > { %12809 = vst [vmem:[#allocation181_spill] sm:$0xff] %v9783_v22  ;;  %v9785_v31 = vadd.f32 %v6085_v47, %v6084_v43  ;;  %v12817_v43 = vld [vmem:[#allocation35_spill] sm:$0xff]  ;;  %v12820_v47 = vld [vmem:[#allocation36_spill] sm:$0xff] }
 0x4da   : > { %v12819_v4 = vmax.f32 %v12817_v43, %v12818_v46 }
 0x4db   : > { %12810 = vst [vmem:[#allocation182_spill] sm:$0xff] %v9785_v31 }
 0x4dc   : > { %2448 = vmax.xlane.f32.xlu1 %v12812_v62  ;;  %v12821_v62 = vld [vmem:[#allocation65_spill] sm:$0xff] }
 0x4dd   : > { %v6087_v6 = vpop.f32.mrb[124].mxu0  ;;  %v12822_v22 = vmax.f32 %v12820_v47, %v12821_v62 }
 0x4de   : > { %v6088_v2 = vpop.f32.mrb[125].mxu0 }
 0x4df   : > { %v9790_v55 = vadd.f32 %v6088_v2, %v6087_v6  ;;  %v6090_v24 = vpop.f32.mrb[126].mxu0 }
 0x4e0   : > { %v6091_v48 = vpop.f32.mrb[127].mxu0  ;;  %2454 = vmax.xlane.f32.xlu1 %v12815_v45  ;;  %v12824_v45 = vld [vmem:[#allocation66_spill] sm:$0xff] }
 0x4e1   : > { %12813 = vst [vmem:[#allocation30_spill] sm:$0xff] %v9790_v55  ;;  %v9792_v51 = vadd.f32 %v6091_v48, %v6090_v24  ;;  %v12823_v55 = vld [vmem:[#allocation37_spill] sm:$0xff] }
 0x4e2   : > { %v12825_v31 = vmax.f32 %v12823_v55, %v12824_v45 }
 0x4e3   : > { %12814 = vst [vmem:[#allocation183_spill] sm:$0xff] %v9792_v51 }
 0x4e4   : > { %4346 = vrot.lane.b32.xlu0 %v12816_v12, %s7582_s13  ;;  %2460 = vmax.xlane.f32.xlu1 %v12819_v4  ;;  %v12826_v4 = vld [vmem:[#allocation67_spill] sm:$0xff] }
 0x4e8   : > { %2463 = vmax.xlane.f32.xlu1 %v12822_v22  ;;  %v12827_v22 = vld [vmem:[#allocation18_spill] sm:$0xff] }
 0x4e9   : > { %v2425_v2 = vpop.xlane.xlu0 %2424  ;;  %v12828_v23 = vmax.f32 %v12826_v4, %v12827_v22 }
 0x4ea   : > { %v2503_v6 = vsub.f32 %v9163_v56, %v2425_v2  ;;  %v2504_v24 = vsub.f32 %v9167_v29, %v2425_v2  ;;  %v12829_v56 = vld [vmem:[#allocation21_spill] sm:$0xff] }
 0x4eb   : > { %v12831_v29 = vmax.f32 %v12829_v56, %v12830_v18 }
 0x4ec   : > { %v2599_v48 = vmul.f32 1.442695, %v2503_v6  ;;  %v2601_v51 = vmul.f32 1.442695, %v2504_v24  ;;  %2466 = vmax.xlane.f32.xlu1 %v12825_v31 }
 0x4ed   : > { %v4339_v12 = vpop.permute.xlu0 %4338 }
 0x4ee   : > { %6997 = vpow2.f32 %v2599_v48  ;;  %6451 = vmatprep.mubr.msk.bf16.mxu1 %vm290_vm0, %v4339_v12  ;;  %v12832_v48 = vld [vmem:[#allocation73_spill] sm:$0xff] }
 0x4ef   : > { %6999 = vpow2.f32 %v2601_v51  ;;  %6452 = vmatmul.mubr.msk.bf16.gmra.mrb[12].mxu1 %vm290_vm0, %v4339_v12  ;;  %v12834_v41 = vmax.f32 %v12832_v48, %v12833_v0 }
 0x4f0   : > { %2469 = vmax.xlane.f32.xlu1 %v12828_v23 }
 0x4f4   : > { %3531 = vmax.xlane.f32.xlu1 %v12831_v29 }
 0x4f7   : > { %v2428_v2 = vpop.xlane.xlu1 %2427 }
 0x4f8   : > { %v6998_v6 = vpop.eup %6997  ;;  %v2505_v24 = vsub.f32 %v9172_v7, %v2428_v2  ;;  %v2506_v31 = vsub.f32 %v12716_v16, %v2428_v2  ;;  %3534 = vmax.xlane.f32.xlu1 %v12834_v41  ;;  %v12836_v16 = vld [vmem:[#allocation15_spill] sm:$0xff] }
 0x4f9   : > { %v7000_v51 = vpop.eup %6999  ;;  %v12837_v41 = vld [vmem:[#allocation63_spill] sm:$0xff] }
 0x4fa   : > { %v2603_v12 = vmul.f32 1.442695, %v2505_v24  ;;  %v2605_v39 = vmul.f32 1.442695, %v2506_v31  ;;  %v9823_v38 = vadd.f32 %v7000_v51, %v6998_v6  ;;  %v12838_v2 = vmax.f32 %v12836_v16, %v12837_v41 }
 0x4fb   : > { %v2431_v23 = vpop.xlane.xlu1 %2430 }
 0x4fc   : > { %12835 = vst [vmem:[#allocation29_spill] sm:$0xff] %v9823_v38  ;;  %7001 = vpow2.f32 %v2603_v12  ;;  %v2507_v28 = vsub.f32 %v9187_v33, %v2431_v23  ;;  %v2508_v29 = vsub.f32 %v9191_v5, %v2431_v23  ;;  %v12840_v5 = vld [vmem:[#allocation12_spill] sm:$0xff]  ;;  %v12843_v23 = vld [vmem:[#allocation3_spill] sm:$0xff] }
 0x4fd   : > { %7003 = vpow2.f32 %v2605_v39 }
 0x4fe   : > { %v2607_v19 = vmul.f32 1.442695, %v2507_v28  ;;  %v2609_v7 = vmul.f32 1.442695, %v2508_v29 }
 0x4ff   : > { %v4341_v52 = vpop.permute.xlu1 %4340 }
 0x500   : > { %7005 = vpow2.f32 %v2607_v19  ;;  %6453 = vmatprep.mubr.msk.bf16.mxu1 %vm290_vm0, %v4341_v52 }
 0x501   : > { %7007 = vpow2.f32 %v2609_v7  ;;  %6454 = vmatmul.mubr.msk.bf16.gmra.mrb[16].mxu1 %vm290_vm0, %v4341_v52  ;;  %v12842_v52 = vld [vmem:[#allocation11_spill] sm:$0xff] }
 0x503   : > { %2457 = vmax.xlane.f32.xlu0 %v12838_v2 }
 0x506   : > { %v7002_v24 = vpop.eup %7001 }
 0x507   : > { %v7004_v31 = vpop.eup %7003  ;;  %v2775_v12 = vpack.c.bf16 %v7002_v24, %v6998_v6  ;;  %v12844_v6 = vld [vmem:[#allocation4_spill] sm:$0xff] }
 0x508   : > { %v2776_v33 = vpack.c.bf16 %v7004_v31, %v7000_v51  ;;  %v9832_v38 = vadd.f32 %v7004_v31, %v7002_v24 }
 0x509   : > { %3962 = vrot.lane.b32.xlu1 %v12840_v5, %s7584_s15 }
 0x50a   : > { %12839 = vst [vmem:[#allocation35_spill] sm:$0xff] %v9832_v38  ;;  %v7006_v28 = vpop.eup %7005  ;;  %2951 = vmatprep.mubr.bf16.mxu0 %v2776_v33 }
 0x50b   : > { %v7008_v19 = vpop.eup %7007  ;;  %2952 = vmatmul.mubr.bf16.gmra.mrb[160].mxu0 %v2775_v12 }
 0x50c   : > { %v9836_v39 = vadd.f32 %v7008_v19, %v7006_v28 }
 0x50d   : > { %3964 = vrot.lane.b32.xlu1 %v12842_v52, %s7584_s15 }
 0x50e   : > { %12841 = vst [vmem:[#allocation64_spill] sm:$0xff] %v9836_v39 }
 0x511   : > { %3948 = vrot.lane.b32.xlu1 %v12843_v23, %s7584_s15 }
 0x519   : > { %3946 = vrot.lane.b32.xlu0 %v12844_v6, %s7584_s15 }
 0x51e   : > { %v2434_v51 = vpop.xlane.xlu0 %2433 }
 0x51f   : > { %v2509_v29 = vsub.f32 %v9196_v20, %v2434_v51  ;;  %v2510_v7 = vsub.f32 %v12749_v15, %v2434_v51 }
 0x521   : > { %v2611_v2 = vmul.f32 1.442695, %v2509_v29  ;;  %v2613_v24 = vmul.f32 1.442695, %v2510_v7  ;;  %v9846_v31 = vpop.f32.mrb[248].mxu1 }
 0x522   : > { %12845 = vst [vmem:[#allocation36_spill] sm:$0xff] %v9846_v31  ;;  %v9848_v12 = vpop.f32.mrb[249].mxu1  ;;  %v2440_v33 = vpop.xlane.xlu0 %2439 }
 0x523   : > { %12846 = vst [vmem:[#allocation65_spill] sm:$0xff] %v9848_v12  ;;  %7009 = vpow2.f32 %v2611_v2  ;;  %v2513_v38 = vsub.f32 %v9220_v54, %v2440_v33  ;;  %v2514_v23 = vsub.f32 %v9223_v58, %v2440_v33  ;;  %v9854_v5 = vpop.f32.mrb[250].mxu1 }
 0x524   : > { %12847 = vst [vmem:[#allocation37_spill] sm:$0xff] %v9854_v5  ;;  %7011 = vpow2.f32 %v2613_v24  ;;  %v9856_v20 = vpop.f32.mrb[251].mxu1 }
 0x525   : > { %12848 = vst [vmem:[#allocation66_spill] sm:$0xff] %v9856_v20  ;;  %v2619_v15 = vmul.f32 1.442695, %v2513_v38  ;;  %v2621_v51 = vmul.f32 1.442695, %v2514_v23 }
 0x526   : > { %v6157_v7 = vpop.f32.mrb[128].mxu0  ;;  %v4343_v2 = vpop.permute.xlu0 %4342 }
 0x527   : > { %v6158_v52 = vpop.f32.mrb[129].mxu0  ;;  %7013 = vpow2.f32 %v2619_v15  ;;  %6455 = vmatprep.mubr.msk.bf16.mxu1 %vm290_vm0, %v4343_v2 }
 0x528   : > { %v9860_v6 = vadd.f32 %v6158_v52, %v6157_v7  ;;  %v6160_v39 = vpop.f32.mrb[130].mxu0  ;;  %7015 = vpow2.f32 %v2621_v51  ;;  %6456 = vmatmul.mubr.msk.bf16.gmra.mrb[20].mxu1 %vm290_vm0, %v4343_v2 }
 0x529   : > { %v6161_v54 = vpop.f32.mrb[131].mxu0 }
 0x52a   : > { %12849 = vst [vmem:[#allocation67_spill] sm:$0xff] %v9860_v6  ;;  %v9864_v58 = vadd.f32 %v6161_v54, %v6160_v39 }
 0x52c   : > { %12850 = vst [vmem:[#allocation18_spill] sm:$0xff] %v9864_v58 }
 0x52d   : > { %v7010_v38 = vpop.eup %7009 }
 0x52e   : > { %v6163_v23 = vpop.f32.mrb[132].mxu0  ;;  %v7012_v24 = vpop.eup %7011  ;;  %v2777_v29 = vpack.c.bf16 %v7010_v38, %v7006_v28 }
 0x52f   : > { %v6164_v33 = vpop.f32.mrb[133].mxu0  ;;  %v2778_v15 = vpack.c.bf16 %v7012_v24, %v7008_v19  ;;  %v9868_v52 = vadd.f32 %v7012_v24, %v7010_v38  ;;  %v12855_v24 = vld [vmem:[#allocation75_spill] sm:$0xff] }
 0x530   : > { %v9866_v12 = vadd.f32 %v6164_v33, %v6163_v23  ;;  %v6166_v31 = vpop.f32.mrb[134].mxu0  ;;  %v2437_v7 = vpop.xlane.xlu1 %2436 }
 0x531   : > { %12852 = vst [vmem:[#allocation72_spill] sm:$0xff] %v9868_v52  ;;  %v6167_v6 = vpop.f32.mrb[135].mxu0  ;;  %v7014_v20 = vpop.eup %7013  ;;  %v2511_v51 = vsub.f32 %v9211_v63, %v2437_v7  ;;  %v2512_v2 = vsub.f32 %v9215_v13, %v2437_v7  ;;  %2959 = vmatprep.mubr.bf16.mxu0 %v2778_v15 }
 0x532   : > { %12851 = vst [vmem:[#allocation21_spill] sm:$0xff] %v9866_v12  ;;  %v9872_v39 = vadd.f32 %v6167_v6, %v6166_v31  ;;  %v7016_v54 = vpop.eup %7015  ;;  %2960 = vmatmul.mubr.bf16.gmra.mrb[164].mxu0 %v2777_v29  ;;  %v12856_v12 = vld [vmem:[#allocation76_spill] sm:$0xff] }
 0x533   : > { %v2615_v58 = vmul.f32 1.442695, %v2511_v51  ;;  %v2617_v28 = vmul.f32 1.442695, %v2512_v2  ;;  %v9874_v23 = vadd.f32 %v7016_v54, %v7014_v20  ;;  %v12857_v63 = vmax.f32 %v12855_v24, %v12856_v12  ;;  %v12859_v2 = vld [vmem:[#allocation77_spill] sm:$0xff] }
 0x534   : > { %12853 = vst [vmem:[#allocation73_spill] sm:$0xff] %v9872_v39  ;;  %v2443_v33 = vpop.xlane.xlu1 %2442 }
 0x535   : > { %12854 = vst [vmem:[#allocation74_spill] sm:$0xff] %v9874_v23  ;;  %7017 = vpow2.f32 %v2615_v58  ;;  %v2515_v19 = vsub.f32 %v9236_v34, %v2443_v33  ;;  %v2516_v38 = vsub.f32 %v9243_v17, %v2443_v33  ;;  %3537 = vmax.xlane.f32.xlu1 %v12857_v63  ;;  %v12860_v23 = vld [vmem:[#allocation78_spill] sm:$0xff] }
 0x536   : > { %v6169_v13 = vpop.f32.mrb[136].mxu0  ;;  %7019 = vpow2.f32 %v2617_v28  ;;  %v12861_v58 = vmax.f32 %v12859_v2, %v12860_v23 }
 0x537   : > { %v6170_v6 = vpop.f32.mrb[137].mxu0  ;;  %v2623_v31 = vmul.f32 1.442695, %v2515_v19  ;;  %v2625_v15 = vmul.f32 1.442695, %v2516_v38 }
 0x538   : > { %v9881_v29 = vadd.f32 %v6170_v6, %v6169_v13  ;;  %v6172_v7 = vpop.f32.mrb[138].mxu0  ;;  %v4345_v51 = vpop.permute.xlu1 %4344  ;;  %3540 = vmax.xlane.f32.xlu0 %v12861_v58 }
 0x539   : > { %v6173_v34 = vpop.f32.mrb[139].mxu0  ;;  %7021 = vpow2.f32 %v2623_v31  ;;  %6457 = vmatprep.mubr.msk.bf16.mxu1 %vm290_vm0, %v4345_v51 }
 0x53a   : > { %12858 = vst [vmem:[#allocation15_spill] sm:$0xff] %v9881_v29  ;;  %v9886_v17 = vadd.f32 %v6173_v34, %v6172_v7  ;;  %7023 = vpow2.f32 %v2625_v15  ;;  %6458 = vmatmul.mubr.msk.bf16.gmra.mrb[24].mxu1 %vm290_vm0, %v4345_v51  ;;  %v12867_v51 = vld [vmem:[#allocation6_spill] sm:$0xff] }
 0x53c   : > { %12862 = vst [vmem:[#allocation63_spill] sm:$0xff] %v9886_v17 }
 0x53e   : > { %v6175_v28 = vpop.f32.mrb[140].mxu0 }
 0x53f   : > { %v6176_v33 = vpop.f32.mrb[141].mxu0  ;;  %v7018_v19 = vpop.eup %7017 }
 0x540   : > { %v9890_v38 = vadd.f32 %v6176_v33, %v6175_v28  ;;  %v6178_v63 = vpop.f32.mrb[142].mxu0  ;;  %v7020_v13 = vpop.eup %7019  ;;  %v2779_v29 = vpack.c.bf16 %v7014_v20, %v7018_v19  ;;  %v12868_v28 = vld [vmem:[#allocation13_spill] sm:$0xff]  ;;  %v12869_v33 = vld [vmem:[#allocation14_spill] sm:$0xff] }
 0x541   : > { %v6179_v6 = vpop.f32.mrb[143].mxu0  ;;  %v2780_v58 = vpack.c.bf16 %v7016_v54, %v7020_v13  ;;  %v9894_v31 = vadd.f32 %v7020_v13, %v7018_v19  ;;  %v12870_v20 = vld [vmem:[#allocation5_spill] sm:$0xff] }
 0x542   : > { %12863 = vst [vmem:[#allocation75_spill] sm:$0xff] %v9890_v38  ;;  %v9892_v39 = vadd.f32 %v6179_v6, %v6178_v63 }
 0x543   : > { %12865 = vst [vmem:[#allocation77_spill] sm:$0xff] %v9894_v31  ;;  %v7022_v7 = vpop.eup %7021  ;;  %2967 = vmatprep.mubr.bf16.mxu0 %v2780_v58 }
 0x544   : > { %12864 = vst [vmem:[#allocation76_spill] sm:$0xff] %v9892_v39  ;;  %v7024_v34 = vpop.eup %7023  ;;  %2968 = vmatmul.mubr.bf16.gmra.mrb[168].mxu0 %v2779_v29 }
 0x545   : > { %v9896_v15 = vadd.f32 %v7024_v34, %v7022_v7 }
 0x546   : > { %3950 = vrot.lane.b32.xlu1 %v12867_v51, %s7584_s15 }
 0x547   : > { %12866 = vst [vmem:[#allocation78_spill] sm:$0xff] %v9896_v15 }
 0x54a   : > { %3968 = vrot.lane.b32.xlu1 %v12868_v28, %s7584_s15 }
 0x54e   : > { %3966 = vrot.lane.b32.xlu0 %v12869_v33, %s7584_s15 }
 0x552   : > { %3952 = vrot.lane.b32.xlu0 %v12870_v20, %s7584_s15 }
 0x557   : > { %v2446_v54 = vpop.xlane.xlu0 %2445 }
 0x558   : > { %v2517_v19 = vsub.f32 %v9248_v60, %v2446_v54  ;;  %v2518_v63 = vsub.f32 %v9254_v11, %v2446_v54  ;;  %v9908_v29 = vpop.f32.mrb[252].mxu1 }
 0x559   : > { %12871 = vst [vmem:[#allocation6_spill] sm:$0xff] %v9908_v29  ;;  %v9910_v13 = vpop.f32.mrb[253].mxu1 }
 0x55a   : > { %12872 = vst [vmem:[#allocation13_spill] sm:$0xff] %v9910_v13  ;;  %v2627_v6 = vmul.f32 1.442695, %v2517_v19  ;;  %v2629_v58 = vmul.f32 1.442695, %v2518_v63  ;;  %v9914_v38 = vpop.f32.mrb[254].mxu1 }
 0x55b   : > { %12873 = vst [vmem:[#allocation14_spill] sm:$0xff] %v9914_v38  ;;  %v9916_v17 = vpop.f32.mrb[255].mxu1  ;;  %v2452_v15 = vpop.xlane.xlu0 %2451 }
 0x55c   : > { %12874 = vst [vmem:[#allocation5_spill] sm:$0xff] %v9916_v17  ;;  %7025 = vpow2.f32 %v2627_v6  ;;  %v2521_v11 = vsub.f32 %v9271_v8, %v2452_v15  ;;  %v2522_v54 = vsub.f32 %v9275_v42, %v2452_v15 }
 0x55d   : > { %7027 = vpow2.f32 %v2629_v58 }
 0x55e   : > { %v2635_v31 = vmul.f32 1.442695, %v2521_v11  ;;  %v2637_v19 = vmul.f32 1.442695, %v2522_v54 }
 0x55f   : > { %v4347_v63 = vpop.permute.xlu0 %4346 }
 0x560   : > { %7029 = vpow2.f32 %v2635_v31  ;;  %v9922_v52 = vpop.f32.mrb[0].mxu1  ;;  %6459 = vmatprep.mubr.msk.bf16.mxu1 %vm290_vm0, %v4347_v63 }
 0x561   : > { %12875 = vst [vmem:[#allocation184_spill] sm:$0xff] %v9922_v52  ;;  %7031 = vpow2.f32 %v2637_v19  ;;  %v9925_v39 = vpop.f32.mrb[1].mxu1  ;;  %6460 = vmatmul.mubr.msk.bf16.gmra.mrb[28].mxu1 %vm290_vm0, %v4347_v63 }
 0x562   : > { %12876 = vst [vmem:[#allocation185_spill] sm:$0xff] %v9925_v39  ;;  %v9930_v8 = vpop.f32.mrb[2].mxu1 }
 0x563   : > { %12877 = vst [vmem:[#allocation186_spill] sm:$0xff] %v9930_v8  ;;  %v9932_v42 = vpop.f32.mrb[3].mxu1 }
 0x564   : > { %12878 = vst [vmem:[#allocation187_spill] sm:$0xff] %v9932_v42 }
 0x566   : > { %v7026_v31 = vpop.eup %7025 }
 0x567   : > { %v7028_v58 = vpop.eup %7027  ;;  %v2781_v54 = vpack.c.bf16 %v7026_v31, %v7022_v7 }
 0x568   : > { %v6181_v11 = vpop.f32.mrb[144].mxu0  ;;  %v2782_v19 = vpack.c.bf16 %v7028_v58, %v7024_v34  ;;  %v9936_v13 = vadd.f32 %v7028_v58, %v7026_v31 }
 0x569   : > { %v6182_v60 = vpop.f32.mrb[145].mxu0  ;;  %v2449_v17 = vpop.xlane.xlu1 %2448 }
 0x56a   : > { %12879 = vst [vmem:[#allocation188_spill] sm:$0xff] %v9936_v13  ;;  %v9938_v29 = vadd.f32 %v6182_v60, %v6181_v11  ;;  %v6184_v63 = vpop.f32.mrb[146].mxu0  ;;  %v7030_v6 = vpop.eup %7029  ;;  %v2519_v52 = vsub.f32 %v9263_v32, %v2449_v17  ;;  %v2520_v38 = vsub.f32 %v12811_v61, %v2449_v17  ;;  %2975 = vmatprep.mubr.bf16.mxu0 %v2782_v19  ;;  %v12883_v11 = vld [vmem:[#allocation79_spill] sm:$0xff] }
 0x56b   : > { %v6185_v39 = vpop.f32.mrb[147].mxu0  ;;  %v7032_v15 = vpop.eup %7031  ;;  %2976 = vmatmul.mubr.bf16.gmra.mrb[172].mxu0 %v2781_v54 }
 0x56c   : > { %12880 = vst [vmem:[#allocation189_spill] sm:$0xff] %v9938_v29  ;;  %v9942_v42 = vadd.f32 %v6185_v39, %v6184_v63  ;;  %v2631_v7 = vmul.f32 1.442695, %v2519_v52  ;;  %v2633_v8 = vmul.f32 1.442695, %v2520_v38  ;;  %v9944_v34 = vadd.f32 %v7032_v15, %v7030_v6  ;;  %v12884_v29 = vld [vmem:[#allocation80_spill] sm:$0xff] }
 0x56d   : > { %v2455_v31 = vpop.xlane.xlu1 %2454  ;;  %v12885_v32 = vmax.f32 %v12883_v11, %v12884_v29  ;;  %v12887_v63 = vmax.f32 %v9356_v36, %v9360_v14 }
 0x56e   : > { %12881 = vst [vmem:[#allocation190_spill] sm:$0xff] %v9942_v42  ;;  %12882 = vst [vmem:[#allocation191_spill] sm:$0xff] %v9944_v34  ;;  %7033 = vpow2.f32 %v2631_v7  ;;  %v2523_v60 = vsub.f32 %v9279_v27, %v2455_v31  ;;  %v2524_v58 = vsub.f32 %v9283_v40, %v2455_v31 }
 0x56f   : > { %3543 = vmax.xlane.f32.xlu1 %v12885_v32  ;;  %7035 = vpow2.f32 %v2633_v8 }
 0x570   : > { %v6187_v61 = vpop.f32.mrb[148].mxu0  ;;  %v2639_v17 = vmul.f32 1.442695, %v2523_v60  ;;  %v2641_v39 = vmul.f32 1.442695, %v2524_v58 }
 0x571   : > { %v6188_v19 = vpop.f32.mrb[149].mxu0  ;;  %v2461_v38 = vpop.xlane.xlu1 %2460  ;;  %3546 = vmax.xlane.f32.xlu0 %v12887_v63 }
 0x572   : > { %v9951_v54 = vadd.f32 %v6188_v19, %v6187_v61  ;;  %v6190_v52 = vpop.f32.mrb[150].mxu0  ;;  %7037 = vpow2.f32 %v2639_v17  ;;  %v2527_v40 = vsub.f32 %v12817_v43, %v2461_v38  ;;  %v2528_v7 = vsub.f32 %v12818_v46, %v2461_v38 }
 0x573   : > { %v6191_v27 = vpop.f32.mrb[151].mxu0  ;;  %7039 = vpow2.f32 %v2641_v39 }
 0x574   : > { %12886 = vst [vmem:[#allocation79_spill] sm:$0xff] %v9951_v54  ;;  %v9958_v8 = vadd.f32 %v6191_v27, %v6190_v52  ;;  %v2647_v31 = vmul.f32 1.442695, %v2527_v40  ;;  %v2649_v60 = vmul.f32 1.442695, %v2528_v7 }
 0x575   : > { %v2464_v58 = vpop.xlane.xlu1 %2463 }
 0x576   : > { %12888 = vst [vmem:[#allocation80_spill] sm:$0xff] %v9958_v8  ;;  %7041 = vpow2.f32 %v2647_v31  ;;  %v2529_v32 = vsub.f32 %v12820_v47, %v2464_v58  ;;  %v2530_v61 = vsub.f32 %v12821_v62, %v2464_v58 }
 0x577   : > { %7043 = vpow2.f32 %v2649_v60 }
 0x578   : > { %v7034_v19 = vpop.eup %7033  ;;  %v2651_v63 = vmul.f32 1.442695, %v2529_v32  ;;  %v2653_v17 = vmul.f32 1.442695, %v2530_v61  ;;  %v12893_v61 = vld [vmem:[#allocation16_spill] sm:$0xff] }
 0x579   : > { %v7036_v54 = vpop.eup %7035  ;;  %v2467_v42 = vpop.xlane.xlu1 %2466  ;;  %v2783_v43 = vpack.c.bf16 %v7030_v6, %v7034_v19 }
 0x57a   : > { %7045 = vpow2.f32 %v2651_v63  ;;  %v2531_v46 = vsub.f32 %v12823_v55, %v2467_v42  ;;  %v2532_v39 = vsub.f32 %v12824_v45, %v2467_v42  ;;  %v2784_v52 = vpack.c.bf16 %v7032_v15, %v7036_v54  ;;  %v12891_v42 = vld [vmem:[#allocation8_spill] sm:$0xff] }
 0x57b   : > { %7047 = vpow2.f32 %v2653_v17  ;;  %v9964_v38 = vadd.f32 %v7036_v54, %v7034_v19 }
 0x57c   : > { %v9966_v27 = vpop.eup %7037  ;;  %v2655_v47 = vmul.f32 1.442695, %v2531_v46  ;;  %v2657_v62 = vmul.f32 1.442695, %v2532_v39  ;;  %2983 = vmatprep.mubr.bf16.mxu0 %v2784_v52 }
 0x57d   : > { %12889 = vst [vmem:[#allocation192_spill] sm:$0xff] %v9964_v38  ;;  %v9968_v40 = vpop.eup %7039  ;;  %2984 = vmatmul.mubr.bf16.gmra.mrb[176].mxu0 %v2783_v43  ;;  %v2470_v7 = vpop.xlane.xlu1 %2469 }
 0x57e   : > { %7049 = vpow2.f32 %v2655_v47  ;;  %v2533_v6 = vsub.f32 %v12826_v4, %v2470_v7  ;;  %v2534_v55 = vsub.f32 %v12827_v22, %v2470_v7  ;;  %v9974_v45 = vadd.f32 %v9968_v40, %v9966_v27  ;;  %v12894_v47 = vld [vmem:[#allocation17_spill] sm:$0xff] }
 0x57f   : > { %7051 = vpow2.f32 %v2657_v62 }
 0x580   : > { %12890 = vst [vmem:[#allocation193_spill] sm:$0xff] %v9974_v45  ;;  %3954 = vrot.lane.b32.xlu1 %v12891_v42, %s7584_s15  ;;  %v9978_v15 = vpop.eup %7041  ;;  %v2659_v54 = vmul.f32 1.442695, %v2533_v6  ;;  %v2661_v31 = vmul.f32 1.442695, %v2534_v55 }
 0x581   : > { %v9980_v60 = vpop.eup %7043  ;;  %v3532_v58 = vpop.xlane.xlu1 %3531 }
 0x582   : > { %7053 = vpow2.f32 %v2659_v54  ;;  %v3626_v4 = vsub.f32 %v12829_v56, %v3532_v58  ;;  %v3627_v22 = vsub.f32 %v12830_v18, %v3532_v58  ;;  %v9986_v32 = vadd.f32 %v9980_v60, %v9978_v15 }
 0x583   : > { %7055 = vpow2.f32 %v2661_v31  ;;  %v12897_v31 = vld [vmem:[#allocation7_spill] sm:$0xff] }
 0x584   : > { %12892 = vst [vmem:[#allocation194_spill] sm:$0xff] %v9986_v32  ;;  %3972 = vrot.lane.b32.xlu1 %v12893_v61, %s7584_s15  ;;  %v9990_v19 = vpop.eup %7045  ;;  %v3690_v63 = vmul.f32 1.442695, %v3626_v4  ;;  %v3692_v17 = vmul.f32 1.442695, %v3627_v22 }
 0x585   : > { %v9992_v43 = vpop.eup %7047  ;;  %v3535_v46 = vpop.xlane.xlu1 %3534 }
 0x586   : > { %7057 = vpow2.f32 %v3690_v63  ;;  %v3628_v18 = vsub.f32 %v12832_v48, %v3535_v46  ;;  %v3629_v39 = vsub.f32 %v12833_v0, %v3535_v46  ;;  %v10004_v62 = vadd.f32 %v9992_v43, %v9990_v19 }
 0x587   : > { %7059 = vpow2.f32 %v3692_v17  ;;  %3970 = vrot.lane.b32.xlu0 %v12894_v47, %s7584_s15 }
 0x588   : > { %12895 = vst [vmem:[#allocation195_spill] sm:$0xff] %v10004_v62  ;;  %v10006_v7 = vpop.eup %7049  ;;  %v3694_v6 = vmul.f32 1.442695, %v3628_v18  ;;  %v3696_v55 = vmul.f32 1.442695, %v3629_v39 }
 0x589   : > { %v10008_v54 = vpop.eup %7051  ;;  %v3963_v48 = vpop.permute.xlu1 %3962 }
 0x58a   : > { %7061 = vpow2.f32 %v3694_v6  ;;  %6301 = vmatprep.subr.bf16.mxu0 %v3963_v48  ;;  %v10012_v0 = vadd.f32 %v10008_v54, %v10006_v7 }
 0x58b   : > { %7063 = vpow2.f32 %v3696_v55  ;;  %3956 = vrot.lane.b32.xlu0 %v12897_v31, %s7584_s15  ;;  %v12972_v31 = vld [vmem:[#allocation114_spill] sm:$0xff] }
 0x58c   : > { %12896 = vst [vmem:[#allocation196_spill] sm:$0xff] %v10012_v0  ;;  %v7054_v58 = vpop.eup %7053 }
 0x58d   : > { %v7056_v4 = vpop.eup %7055  ;;  %v2789_v22 = vpack.c.bf16 %v7054_v58, %v10006_v7  ;;  %v10020_v46 = vpop.f32.mrb[4].mxu1 }
 0x58e   : > { %v2790_v63 = vpack.c.bf16 %v7056_v4, %v10008_v54  ;;  %v10018_v17 = vadd.f32 %v7056_v4, %v7054_v58  ;;  %12899 = vst [vmem:[#allocation198_spill] sm:$0xff] %v10020_v46  ;;  %v10024_v39 = vpop.f32.mrb[5].mxu1  ;;  %v3965_v54 = vpop.permute.xlu1 %3964  ;;  %v12962_v46 = vld [vmem:[#allocation102_spill] sm:$0xff] }
 0x58f   : > { %12900 = vst [vmem:[#allocation199_spill] sm:$0xff] %v10024_v39  ;;  %v10028_v56 = vpop.f32.mrb[6].mxu1 }
 0x590   : > { %12898 = vst [vmem:[#allocation197_spill] sm:$0xff] %v10018_v17  ;;  %v10022_v18 = vpop.eup %7057  ;;  %v2458_v6 = vpop.xlane.xlu0 %2457  ;;  %12901 = vst [vmem:[#allocation200_spill] sm:$0xff] %v10028_v56  ;;  %v12965_v56 = vld [vmem:[#allocation109_spill] sm:$0xff] }
 0x591   : > { %v7060_v48 = vpop.eup %7059  ;;  %v2525_v52 = vsub.f32 %v12836_v16, %v2458_v6  ;;  %v2526_v7 = vsub.f32 %v12837_v41, %v2458_v6  ;;  %v10032_v58 = vpop.f32.mrb[7].mxu1 }
 0x592   : > { %12902 = vst [vmem:[#allocation201_spill] sm:$0xff] %v10032_v58  ;;  %v10035_v4 = vadd.f32 %v7060_v48, %v10022_v18  ;;  %v3949_v45 = vpop.permute.xlu1 %3948 }
 0x593   : > { %v2643_v17 = vmul.f32 1.442695, %v2525_v52  ;;  %v2645_v32 = vmul.f32 1.442695, %v2526_v7 }
 0x594   : > { %12903 = vst [vmem:[#allocation202_spill] sm:$0xff] %v10035_v4  ;;  %v10039_v62 = vpop.eup %7061  ;;  %v3947_v55 = vpop.permute.xlu0 %3946 }
 0x595   : > { %v7064_v8 = vpop.eup %7063  ;;  %7065 = vpow2.f32 %v2643_v17  ;;  %6302 = vmatpush3.bf16.msra.mxu0 %v3947_v55 }
 0x596   : > { %7067 = vpow2.f32 %v2645_v32  ;;  %6303 = vmatprep.subr.bf16.mxu0 %v3965_v54  ;;  %v3915_v41 = vpack.c.bf16 %v7064_v8, %v7060_v48  ;;  %v10044_v6 = vadd.f32 %v7064_v8, %v10039_v62 }
 0x598   : > { %12904 = vst [vmem:[#allocation203_spill] sm:$0xff] %v10044_v6  ;;  %v12911_v6 = vpack.c.bf16 %v9992_v43, %v9980_v60 }
 0x599   : > { %6304 = vmatpush3.bf16.msra.mxu0 %v3949_v45 }
 0x59b   : > { %v10046_v0 = vpop.f32.mrb[8].mxu1 }
 0x59c   : > { %12905 = vst [vmem:[#allocation204_spill] sm:$0xff] %v10046_v0  ;;  %v10048_v52 = vpop.f32.mrb[9].mxu1  ;;  %v12956_v0 = vld [vmem:[#allocation98_spill] sm:$0xff] }
 0x59d   : > { %12906 = vst [vmem:[#allocation205_spill] sm:$0xff] %v10048_v52  ;;  %v10052_v17 = vpop.f32.mrb[10].mxu1 }
 0x59e   : > { %12907 = vst [vmem:[#allocation206_spill] sm:$0xff] %v10052_v17  ;;  %v10054_v38 = vpop.f32.mrb[11].mxu1  ;;  %v12959_v17 = vld [vmem:[#allocation105_spill] sm:$0xff] }
 0x59f   : > { %v7066_v55 = vpop.eup %7065  ;;  %12908 = vst [vmem:[#allocation207_spill] sm:$0xff] %v10054_v38 }
 0x5a0   : > { %v7068_v32 = vpop.eup %7067  ;;  %v2785_v8 = vpack.c.bf16 %v7066_v55, %v9966_v27  ;;  %v12913_v27 = vmax.f32 %v9372_v59, %v9374_v50 }
 0x5a1   : > { %v2786_v45 = vpack.c.bf16 %v7068_v32, %v9968_v40  ;;  %v10060_v54 = vadd.f32 %v7068_v32, %v7066_v55  ;;  %v6193_v16 = vpop.f32.mrb[152].mxu0  ;;  %v12914_v55 = vld [vmem:[#allocation81_spill] sm:$0xff]  ;;  %v12915_v32 = vld [vmem:[#allocation82_spill] sm:$0xff] }
 0x5a2   : > { %v6194_v34 = vpop.f32.mrb[153].mxu0  ;;  %v12916_v48 = vmax.f32 %v12914_v55, %v12915_v32 }
 0x5a3   : > { %12909 = vst [vmem:[#allocation208_spill] sm:$0xff] %v10060_v54  ;;  %2991 = vmatprep.mubr.bf16.mxu0 %v2786_v45  ;;  %v10062_v13 = vadd.f32 %v6194_v34, %v6193_v16  ;;  %v6196_v7 = vpop.f32.mrb[154].mxu0  ;;  %v12918_v45 = vpack.c.bf16 %v9990_v19, %v9978_v15 }
 0x5a4   : > { %2992 = vmatmul.mubr.bf16.gmra.mrb[180].mxu0 %v2785_v8  ;;  %v6197_v4 = vpop.f32.mrb[155].mxu0 }
 0x5a5   : > { %12910 = vst [vmem:[#allocation209_spill] sm:$0xff] %v10062_v13  ;;  %2999 = vmatprep.mubr.bf16.mxu0 %v12911_v6  ;;  %v10067_v52 = vadd.f32 %v6197_v4, %v6196_v7  ;;  %v12920_v4 = vld [vmem:[#allocation10_spill] sm:$0xff]  ;;  %v12921_v6 = vld [vmem:[#allocation19_spill] sm:$0xff]  ;;  %v12922_v7 = vld [vmem:[#allocation20_spill] sm:$0xff] }
 0x5a7   : > { %12912 = vst [vmem:[#allocation210_spill] sm:$0xff] %v10067_v52 }
 0x5a8   : > { %3549 = vmax.xlane.f32.xlu1 %v12913_v27 }
 0x5a9   : > { %v6199_v40 = vpop.f32.mrb[156].mxu0 }
 0x5aa   : > { %3552 = vmax.xlane.f32.xlu0 %v12916_v48  ;;  %v6200_v34 = vpop.f32.mrb[157].mxu0 }
 0x5ab   : > { %v10075_v16 = vadd.f32 %v6200_v34, %v6199_v40  ;;  %v6202_v8 = vpop.f32.mrb[158].mxu0 }
 0x5ac   : > { %3000 = vmatmul.mubr.bf16.gmra.mrb[184].mxu0 %v12918_v45  ;;  %v6203_v60 = vpop.f32.mrb[159].mxu0 }
 0x5ad   : > { %12917 = vst [vmem:[#allocation81_spill] sm:$0xff] %v10075_v16  ;;  %3007 = vmatprep.mubr.bf16.mxu0 %v2790_v63  ;;  %v10080_v43 = vadd.f32 %v6203_v60, %v6202_v8 }
 0x5af   : > { %12919 = vst [vmem:[#allocation82_spill] sm:$0xff] %v10080_v43 }
 0x5b4   : > { %3008 = vmatmul.mubr.bf16.gmra.mrb[188].mxu0 %v2789_v22 }
 0x5b5   : > { %4026 = vmatprep.mubr.bf16.mxu0 %v3915_v41  ;;  %v12925_v41 = vld [vmem:[#allocation9_spill] sm:$0xff] }
 0x5b9   : > { %3958 = vrot.lane.b32.xlu1 %v12920_v4, %s7584_s15 }
 0x5bd   : > { %3976 = vrot.lane.b32.xlu1 %v12921_v6, %s7584_s15 }
 0x5c0   : > { %3974 = vrot.lane.b32.xlu0 %v12922_v7, %s7584_s15  ;;  %v12968_v7 = vld [vmem:[#allocation52_spill] sm:$0xff] }
 0x5c2   : > { %v3538_v48 = vpop.xlane.xlu1 %3537  ;;  %v10088_v27 = vpop.f32.mrb[12].mxu1 }
 0x5c3   : > { %12923 = vst [vmem:[#allocation211_spill] sm:$0xff] %v10088_v27  ;;  %v3630_v15 = vsub.f32 %v12855_v24, %v3538_v48  ;;  %v3631_v19 = vsub.f32 %v12856_v12, %v3538_v48  ;;  %v10092_v63 = vpop.f32.mrb[13].mxu1  ;;  %v12939_v27 = vld [vmem:[#allocation85_spill] sm:$0xff] }
 0x5c4   : > { %12924 = vst [vmem:[#allocation212_spill] sm:$0xff] %v10092_v63  ;;  %3960 = vrot.lane.b32.xlu0 %v12925_v41, %s7584_s15  ;;  %v10098_v40 = vpop.f32.mrb[14].mxu1  ;;  %v12967_v41 = vld [vmem:[#allocation107_spill] sm:$0xff] }
 0x5c5   : > { %12926 = vst [vmem:[#allocation213_spill] sm:$0xff] %v10098_v40  ;;  %v3698_v34 = vmul.f32 1.442695, %v3630_v15  ;;  %v3700_v8 = vmul.f32 1.442695, %v3631_v19  ;;  %v10100_v45 = vpop.f32.mrb[15].mxu1  ;;  %v3541_v60 = vpop.xlane.xlu0 %3540 }
 0x5c6   : > { %12927 = vst [vmem:[#allocation214_spill] sm:$0xff] %v10100_v45  ;;  %v3632_v12 = vsub.f32 %v12859_v2, %v3541_v60  ;;  %v3633_v48 = vsub.f32 %v12860_v23, %v3541_v60  ;;  %v3951_v16 = vpop.permute.xlu1 %3950  ;;  %v12941_v45 = vmax.f32 %v9431_v10, %v9436_v3 }
 0x5c7   : > { %7069 = vpow2.f32 %v3698_v34 }
 0x5c8   : > { %7071 = vpow2.f32 %v3700_v8  ;;  %v3702_v22 = vmul.f32 1.442695, %v3632_v12  ;;  %v3704_v43 = vmul.f32 1.442695, %v3633_v48  ;;  %v12942_v48 = vld [vmem:[#allocation87_spill] sm:$0xff] }
 0x5c9   : > { %v3967_v13 = vpop.permute.xlu0 %3966 }
 0x5ca   : > { %7073 = vpow2.f32 %v3702_v22  ;;  %v3969_v52 = vpop.permute.xlu1 %3968  ;;  %6305 = vmatprep.subr.bf16.mxu0 %v3967_v13 }
 0x5cb   : > { %7075 = vpow2.f32 %v3704_v43  ;;  %6306 = vmatpush3.bf16.msra.mxu0 %v3951_v16  ;;  %v12935_v16 = vld [vmem:[#allocation83_spill] sm:$0xff] }
 0x5cc   : > { %6307 = vmatprep.subr.bf16.mxu0 %v3969_v52 }
 0x5cd   : > { %v3953_v15 = vpop.permute.xlu0 %3952 }
 0x5cf   : > { %6308 = vmatpush3.bf16.msra.mxu0 %v3953_v15 }
 0x5d1   : > { %v10106_v19 = vpop.eup %7069 }
 0x5d2   : > { %v10108_v24 = vpop.eup %7071 }
 0x5d3   : > { %v10112_v23 = vadd.f32 %v10108_v24, %v10106_v19 }
 0x5d4   : > { %v10114_v2 = vpop.eup %7073  ;;  %v10116_v34 = vpop.f32.mrb[16].mxu1 }
 0x5d5   : > { %12928 = vst [vmem:[#allocation215_spill] sm:$0xff] %v10112_v23  ;;  %12929 = vst [vmem:[#allocation216_spill] sm:$0xff] %v10116_v34  ;;  %v10118_v22 = vpop.eup %7075  ;;  %v10120_v13 = vpop.f32.mrb[17].mxu1 }
 0x5d6   : > { %12930 = vst [vmem:[#allocation217_spill] sm:$0xff] %v10120_v13  ;;  %v10126_v43 = vpop.f32.mrb[18].mxu1  ;;  %v10132_v60 = vadd.f32 %v10118_v22, %v10114_v2  ;;  %v12936_v13 = vld [vmem:[#allocation84_spill] sm:$0xff] }
 0x5d7   : > { %12931 = vst [vmem:[#allocation218_spill] sm:$0xff] %v10126_v43  ;;  %v10134_v12 = vpop.f32.mrb[19].mxu1  ;;  %v12937_v34 = vmax.f32 %v12935_v16, %v12936_v13  ;;  %v12953_v43 = vld [vmem:[#allocation100_spill] sm:$0xff] }
 0x5d8   : > { %12932 = vst [vmem:[#allocation219_spill] sm:$0xff] %v10132_v60  ;;  %12933 = vst [vmem:[#allocation220_spill] sm:$0xff] %v10134_v12  ;;  %v12940_v60 = vmax.f32 %v9401_v37, %v12939_v27  ;;  %v12943_v12 = vld [vmem:[#allocation88_spill] sm:$0xff] }
 0x5de   : > { %v6205_v15 = vpop.f32.mrb[160].mxu0 }
 0x5df   : > { %v6206_v54 = vpop.f32.mrb[161].mxu0 }
 0x5e0   : > { %v10138_v52 = vadd.f32 %v6206_v54, %v6205_v15  ;;  %v6208_v23 = vpop.f32.mrb[162].mxu0  ;;  %v12944_v54 = vmax.f32 %v12942_v48, %v12943_v12  ;;  %v12945_v15 = vmax.f32 %v9453_v49, %v9457_v26 }
 0x5e1   : > { %3555 = vmax.xlane.f32.xlu1 %v12937_v34  ;;  %v6209_v63 = vpop.f32.mrb[163].mxu0  ;;  %v12946_v34 = vld [vmem:[#allocation90_spill] sm:$0xff] }
 0x5e2   : > { %12934 = vst [vmem:[#allocation221_spill] sm:$0xff] %v10138_v52  ;;  %v10143_v8 = vadd.f32 %v6209_v63, %v6208_v23  ;;  %v12947_v52 = vld [vmem:[#allocation91_spill] sm:$0xff]  ;;  %v12949_v23 = vmax.f32 %v9474_v57, %v9478_v35 }
 0x5e3   : > { %3558 = vmax.xlane.f32.xlu0 %v12940_v60  ;;  %v12948_v63 = vmax.f32 %v12946_v34, %v12947_v52  ;;  %v12950_v60 = vld [vmem:[#allocation94_spill] sm:$0xff] }
 0x5e4   : > { %12938 = vst [vmem:[#allocation83_spill] sm:$0xff] %v10143_v8  ;;  %v12951_v8 = vmax.f32 %v9465_v21, %v12950_v60 }
 0x5e5   : > { %3564 = vmax.xlane.f32.xlu1 %v12941_v45  ;;  %v12952_v45 = vld [vmem:[#allocation99_spill] sm:$0xff] }
 0x5e6   : > { %v12954_v40 = vmax.f32 %v12952_v45, %v12953_v43 }
 0x5e7   : > { %3561 = vmax.xlane.f32.xlu0 %v12944_v54  ;;  %v12955_v54 = vld [vmem:[#allocation97_spill] sm:$0xff] }
 0x5e8   : > { %v12957_v38 = vmax.f32 %v12955_v54, %v12956_v0 }
 0x5e9   : > { %3570 = vmax.xlane.f32.xlu1 %v12945_v15  ;;  %v12958_v15 = vld [vmem:[#allocation103_spill] sm:$0xff] }
 0x5ea   : > { %v12960_v39 = vmax.f32 %v12958_v15, %v12959_v17 }
 0x5eb   : > { %3567 = vmax.xlane.f32.xlu0 %v12948_v63  ;;  %v12961_v63 = vld [vmem:[#allocation101_spill] sm:$0xff] }
 0x5ec   : > { %v12963_v58 = vmax.f32 %v12961_v63, %v12962_v46 }
 0x5ed   : > { %3576 = vmax.xlane.f32.xlu1 %v12949_v23  ;;  %v12964_v23 = vld [vmem:[#allocation108_spill] sm:$0xff] }
 0x5ee   : > { %v12966_v5 = vmax.f32 %v12964_v23, %v12965_v56 }
 0x5ef   : > { %3573 = vmax.xlane.f32.xlu0 %v12951_v8 }
 0x5f1   : > { %3582 = vmax.xlane.f32.xlu1 %v12954_v40  ;;  %v12969_v40 = vmax.f32 %v12967_v41, %v12968_v7 }
 0x5f3   : > { %3579 = vmax.xlane.f32.xlu0 %v12957_v38 }
 0x5f5   : > { %3588 = vmax.xlane.f32.xlu1 %v12960_v39  ;;  %v12971_v39 = vld [vmem:[#allocation113_spill] sm:$0xff] }
 0x5f6   : > { %v12973_v47 = vmax.f32 %v12971_v39, %v12972_v31  ;;  %v12977_v31 = vld [vmem:[#allocation112_spill] sm:$0xff] }
 0x5f7   : > { %3585 = vmax.xlane.f32.xlu0 %v12963_v58  ;;  %v12978_v39 = vld [vmem:[#allocation24_spill] sm:$0xff] }
 0x5f8   : > { %v12979_v56 = vmax.f32 %v12977_v31, %v12978_v39 }
 0x5f9   : > { %3594 = vmax.xlane.f32.xlu1 %v12966_v5  ;;  %v12980_v5 = vld [vmem:[#allocation119_spill] sm:$0xff] }
 0x5fb   : > { %3591 = vmax.xlane.f32.xlu0 %v12969_v40  ;;  %v10184_v6 = vpop.f32.mrb[20].mxu1 }
 0x5fc   : > { %v3544_v8 = vpop.xlane.xlu1 %3543  ;;  %12970 = vst [vmem:[#allocation84_spill] sm:$0xff] %v10184_v6  ;;  %v10191_v58 = vpop.f32.mrb[21].mxu1 }
 0x5fd   : > { %v3634_v38 = vsub.f32 %v12883_v11, %v3544_v8  ;;  %v3635_v4 = vsub.f32 %v12884_v29, %v3544_v8  ;;  %3600 = vmax.xlane.f32.xlu1 %v12973_v47  ;;  %12974 = vst [vmem:[#allocation85_spill] sm:$0xff] %v10191_v58  ;;  %v10195_v61 = vpop.f32.mrb[22].mxu1  ;;  %v12981_v58 = vld [vmem:[#allocation120_spill] sm:$0xff] }
 0x5fe   : > { %12975 = vst [vmem:[#allocation87_spill] sm:$0xff] %v10195_v61  ;;  %v10197_v40 = vpop.f32.mrb[23].mxu1  ;;  %v3547_v41 = vpop.xlane.xlu0 %3546 }
 0x5ff   : > { %v3706_v42 = vmul.f32 1.442695, %v3634_v38  ;;  %v3708_v7 = vmul.f32 1.442695, %v3635_v4  ;;  %12976 = vst [vmem:[#allocation88_spill] sm:$0xff] %v10197_v40  ;;  %v3636_v29 = vsub.f32 %v9356_v36, %v3547_v41  ;;  %v3637_v8 = vsub.f32 %v9360_v14, %v3547_v41  ;;  %3597 = vmax.xlane.f32.xlu0 %v12979_v56  ;;  %v12983_v40 = vld [vmem:[#allocation117_spill] sm:$0xff] }
 0x600   : > { %v3955_v47 = vpop.permute.xlu1 %3954  ;;  %v12982_v38 = vmax.f32 %v12980_v5, %v12981_v58  ;;  %v12984_v36 = vld [vmem:[#allocation118_spill] sm:$0xff]  ;;  %v12986_v14 = vmax.f32 %v9585_v25, %v9588_v9 }
 0x601   : > { %7077 = vpow2.f32 %v3706_v42  ;;  %v3710_v4 = vmul.f32 1.442695, %v3636_v29  ;;  %v3712_v6 = vmul.f32 1.442695, %v3637_v8  ;;  %v12985_v61 = vmax.f32 %v12983_v40, %v12984_v36 }
 0x602   : > { %3606 = vmax.xlane.f32.xlu1 %v12982_v38  ;;  %7079 = vpow2.f32 %v3708_v7  ;;  %v3971_v23 = vpop.permute.xlu0 %3970  ;;  %v12988_v8 = vmax.f32 %v9577_v44, %v9581_v53 }
 0x603   : > { %7081 = vpow2.f32 %v3710_v4  ;;  %3603 = vmax.xlane.f32.xlu0 %v12985_v61  ;;  %6309 = vmatprep.subr.bf16.mxu0 %v3971_v23  ;;  %v12989_v61 = vld [vmem:[#allocation128_spill] sm:$0xff]  ;;  %v12990_v23 = vld [vmem:[#allocation129_spill] sm:$0xff] }
 0x604   : > { %v3973_v11 = vpop.permute.xlu1 %3972  ;;  %7083 = vpow2.f32 %v3712_v6  ;;  %6310 = vmatpush3.bf16.msra.mxu0 %v3955_v47  ;;  %v12991_v6 = vmax.f32 %v12989_v61, %v12990_v23  ;;  %v13005_v23 = vld [vmem:[#allocation143_spill] sm:$0xff]  ;;  %v13006_v61 = vld [vmem:[#allocation144_spill] sm:$0xff] }
 0x605   : > { %v6211_v42 = vpop.f32.mrb[164].mxu0  ;;  %6311 = vmatprep.subr.bf16.mxu0 %v3973_v11  ;;  %v13007_v53 = vmax.f32 %v13005_v23, %v13006_v61  ;;  %v13014_v61 = vld [vmem:[#allocation4_spill] sm:$0xff] }
 0x606   : > { %3612 = vmax.xlane.f32.xlu1 %v12986_v14  ;;  %v6212_v56 = vpop.f32.mrb[165].mxu0  ;;  %v3957_v7 = vpop.permute.xlu0 %3956  ;;  %v12993_v14 = vld [vmem:[#allocation126_spill] sm:$0xff] }
 0x607   : > { %v10215_v41 = vadd.f32 %v6212_v56, %v6211_v42  ;;  %v6214_v29 = vpop.f32.mrb[166].mxu0  ;;  %3609 = vmax.xlane.f32.xlu0 %v12988_v8  ;;  %v12994_v42 = vld [vmem:[#allocation127_spill] sm:$0xff] }
 0x608   : > { %v6215_v38 = vpop.f32.mrb[167].mxu0  ;;  %6312 = vmatpush3.bf16.msra.mxu0 %v3957_v7  ;;  %v12995_v56 = vmax.f32 %v12993_v14, %v12994_v42 }
 0x609   : > { %12987 = vst [vmem:[#allocation90_spill] sm:$0xff] %v10215_v41  ;;  %v10223_v4 = vadd.f32 %v6215_v38, %v6214_v29  ;;  %v12996_v41 = vmax.f32 %v9632_v30, %v9634_v1  ;;  %v13000_v1 = vld [vmem:[#allocation133_spill] sm:$0xff] }
 0x60a   : > { %3618 = vmax.xlane.f32.xlu1 %v12991_v6 }
 0x60b   : > { %12992 = vst [vmem:[#allocation91_spill] sm:$0xff] %v10223_v4  ;;  %v10225_v47 = vpop.eup %7077  ;;  %3615 = vmax.xlane.f32.xlu0 %v12995_v56  ;;  %v13016_v56 = vld [vmem:[#allocation12_spill] sm:$0xff] }
 0x60c   : > { %v10227_v11 = vpop.eup %7079 }
 0x60d   : > { %v10237_v8 = vadd.f32 %v10227_v11, %v10225_v47  ;;  %v10239_v6 = vpop.eup %7081  ;;  %v10241_v7 = vpop.f32.mrb[24].mxu1 }
 0x60e   : > { %3624 = vmax.xlane.f32.xlu1 %v12996_v41  ;;  %12998 = vst [vmem:[#allocation99_spill] sm:$0xff] %v10241_v7  ;;  %v10243_v29 = vpop.eup %7083  ;;  %v10245_v38 = vpop.f32.mrb[25].mxu1  ;;  %v13001_v41 = vld [vmem:[#allocation134_spill] sm:$0xff] }
 0x60f   : > { %12997 = vst [vmem:[#allocation94_spill] sm:$0xff] %v10237_v8  ;;  %12999 = vst [vmem:[#allocation100_spill] sm:$0xff] %v10245_v38  ;;  %v13002_v30 = vmax.f32 %v13000_v1, %v13001_v41  ;;  %v10254_v42 = vpop.f32.mrb[26].mxu1  ;;  %v3919_v8 = vpack.c.bf16 %v10243_v29, %v10227_v11  ;;  %v10260_v14 = vadd.f32 %v10243_v29, %v10239_v6  ;;  %v13009_v38 = vld [vmem:[#allocation141_spill] sm:$0xff] }
 0x610   : > { %13003 = vst [vmem:[#allocation97_spill] sm:$0xff] %v10254_v42  ;;  %v10265_v4 = vpop.f32.mrb[27].mxu1 }
 0x611   : > { %3621 = vmax.xlane.f32.xlu0 %v13002_v30  ;;  %13004 = vst [vmem:[#allocation98_spill] sm:$0xff] %v10260_v14  ;;  %13008 = vst [vmem:[#allocation103_spill] sm:$0xff] %v10265_v4  ;;  %v13010_v30 = vld [vmem:[#allocation142_spill] sm:$0xff]  ;;  %v13017_v4 = vld [vmem:[#allocation3_spill] sm:$0xff] }
 0x612   : > { %4673 = vmax.xlane.f32.xlu1 %v13007_v53  ;;  %v13011_v7 = vmax.f32 %v13009_v38, %v13010_v30  ;;  %v13015_v53 = vld [vmem:[#allocation11_spill] sm:$0xff] }
 0x615   : > { %4670 = vmax.xlane.f32.xlu0 %v13011_v7 }
 0x617   : > { %v6217_v41 = vpop.f32.mrb[168].mxu0 }
 0x618   : > { %v6218_v1 = vpop.f32.mrb[169].mxu0 }
 0x619   : > { %v10272_v11 = vadd.f32 %v6218_v1, %v6217_v41  ;;  %v6220_v44 = vpop.f32.mrb[170].mxu0 }
 0x61a   : > { %v6221_v29 = vpop.f32.mrb[171].mxu0 }
 0x61b   : > { %13012 = vst [vmem:[#allocation105_spill] sm:$0xff] %v10272_v11  ;;  %v10274_v14 = vadd.f32 %v6221_v29, %v6220_v44 }
 0x61d   : > { %13013 = vst [vmem:[#allocation101_spill] sm:$0xff] %v10274_v14 }
 0x623   : > { %5085 = vrot.lane.b32.xlu1 %v13014_v61, %s7582_s13 }
 0x627   : > { %5103 = vrot.lane.b32.xlu1 %v13015_v53, %s7582_s13 }
 0x62b   : > { %5101 = vrot.lane.b32.xlu0 %v13016_v56, %s7582_s13 }
 0x62f   : > { %5087 = vrot.lane.b32.xlu0 %v13017_v4, %s7582_s13 }
 0x634   : > { %v10284_v42 = vpop.f32.mrb[28].mxu1 }
 0x635   : > { %v3550_v7 = vpop.xlane.xlu1 %3549  ;;  %13018 = vst [vmem:[#allocation102_spill] sm:$0xff] %v10284_v42  ;;  %v10288_v41 = vpop.f32.mrb[29].mxu1 }
 0x636   : > { %v3638_v1 = vsub.f32 %v9372_v59, %v3550_v7  ;;  %v3639_v44 = vsub.f32 %v9374_v50, %v3550_v7  ;;  %13019 = vst [vmem:[#allocation112_spill] sm:$0xff] %v10288_v41  ;;  %v10292_v29 = vpop.f32.mrb[30].mxu1 }
 0x637   : > { %13020 = vst [vmem:[#allocation24_spill] sm:$0xff] %v10292_v29  ;;  %v10294_v56 = vpop.f32.mrb[31].mxu1  ;;  %v3553_v14 = vpop.xlane.xlu0 %3552 }
 0x638   : > { %v3714_v53 = vmul.f32 1.442695, %v3638_v1  ;;  %v3716_v11 = vmul.f32 1.442695, %v3639_v44  ;;  %13021 = vst [vmem:[#allocation119_spill] sm:$0xff] %v10294_v56  ;;  %v3640_v30 = vsub.f32 %v12914_v55, %v3553_v14  ;;  %v3641_v59 = vsub.f32 %v12915_v32, %v3553_v14 }
 0x639   : > { %v3959_v50 = vpop.permute.xlu1 %3958 }
 0x63a   : > { %7085 = vpow2.f32 %v3714_v53  ;;  %v3718_v7 = vmul.f32 1.442695, %v3640_v30  ;;  %v3720_v38 = vmul.f32 1.442695, %v3641_v59 }
 0x63b   : > { %7087 = vpow2.f32 %v3716_v11  ;;  %v3975_v61 = vpop.permute.xlu0 %3974  ;;  %v13024_v11 = vpack.c.bf16 %v10039_v62, %v10022_v18  ;;  %v13032_v18 = vpack.c.bf16 %v10114_v2, %v10106_v19 }
 0x63c   : > { %7089 = vpow2.f32 %v3718_v7  ;;  %6313 = vmatprep.subr.bf16.mxu0 %v3975_v61 }
 0x63d   : > { %v3977_v41 = vpop.permute.xlu1 %3976  ;;  %7091 = vpow2.f32 %v3720_v38  ;;  %6314 = vmatpush3.bf16.msra.mxu0 %v3959_v50  ;;  %v13025_v38 = vpack.c.bf16 %v10118_v22, %v10108_v24 }
 0x63e   : > { %v6223_v1 = vpop.f32.mrb[172].mxu0  ;;  %6315 = vmatprep.subr.bf16.mxu0 %v3977_v41 }
 0x63f   : > { %v6224_v44 = vpop.f32.mrb[173].mxu0  ;;  %v3961_v42 = vpop.permute.xlu0 %3960 }
 0x640   : > { %v10300_v4 = vadd.f32 %v6224_v44, %v6223_v1  ;;  %v6226_v55 = vpop.f32.mrb[174].mxu0  ;;  %v13029_v44 = vld [vmem:[#allocation149_spill] sm:$0xff] }
 0x641   : > { %v6227_v56 = vpop.f32.mrb[175].mxu0  ;;  %6316 = vmatpush3.bf16.msra.mxu0 %v3961_v42  ;;  %v13026_v42 = vld [vmem:[#allocation147_spill] sm:$0xff] }
 0x642   : > { %13022 = vst [vmem:[#allocation120_spill] sm:$0xff] %v10300_v4  ;;  %v10302_v32 = vadd.f32 %v6227_v56, %v6226_v55  ;;  %v13027_v56 = vld [vmem:[#allocation148_spill] sm:$0xff]  ;;  %v13030_v55 = vld [vmem:[#allocation150_spill] sm:$0xff] }
 0x643   : > { %v13028_v1 = vmax.f32 %v13026_v42, %v13027_v56  ;;  %v13031_v62 = vmax.f32 %v13029_v44, %v13030_v55 }
 0x644   : > { %13023 = vst [vmem:[#allocation117_spill] sm:$0xff] %v10302_v32  ;;  %v7086_v14 = vpop.eup %7085  ;;  %4027 = vmatmul.mubr.bf16.vlgmr.msra.gmra.mrb[192].mxu0 %v13024_v11 }
 0x645   : > { %v7088_v30 = vpop.eup %7087  ;;  %4034 = vmatprep.mubr.bf16.mxu0 %v13025_v38 }
 0x646   : > { %v10310_v41 = vadd.f32 %v7088_v30, %v7086_v14  ;;  %v7090_v61 = vpop.eup %7089 }
 0x647   : > { %v7092_v53 = vpop.eup %7091  ;;  %v3920_v59 = vpack.c.bf16 %v7090_v61, %v7086_v14 }
 0x648   : > { %v3921_v50 = vpack.c.bf16 %v7092_v53, %v7088_v30  ;;  %v10312_v7 = vadd.f32 %v7092_v53, %v7090_v61  ;;  %v13035_v61 = vpack.c.bf16 %v10239_v6, %v10225_v47 }
 0x64b   : > { %4676 = vmax.xlane.f32.xlu1 %v13028_v1 }
 0x64c   : > { %4035 = vmatmul.mubr.bf16.gmra.mrb[196].mxu0 %v13032_v18 }
 0x64d   : > { %4042 = vmatprep.mubr.bf16.mxu0 %v3919_v8 }
 0x64e   : > { %4679 = vmax.xlane.f32.xlu0 %v13031_v62 }
 0x650   : > { %v6229_v24 = vpop.f32.mrb[176].mxu0 }
 0x651   : > { %v6230_v22 = vpop.f32.mrb[177].mxu0 }
 0x652   : > { %v10323_v11 = vadd.f32 %v6230_v22, %v6229_v24  ;;  %v6232_v14 = vpop.f32.mrb[178].mxu0 }
 0x653   : > { %v6233_v30 = vpop.f32.mrb[179].mxu0 }
 0x654   : > { %13033 = vst [vmem:[#allocation118_spill] sm:$0xff] %v10323_v11  ;;  %v10325_v38 = vadd.f32 %v6233_v30, %v6232_v14  ;;  %4043 = vmatmul.mubr.bf16.gmra.mrb[200].mxu0 %v13035_v61 }
 0x655   : > { %4050 = vmatprep.mubr.bf16.mxu0 %v3921_v50 }
 0x656   : > { %13034 = vst [vmem:[#allocation143_spill] sm:$0xff] %v10325_v38 }
 0x65c   : > { %5089 = vrot.lane.b32.xlu1 %v12867_v51, %s7582_s13  ;;  %4051 = vmatmul.mubr.bf16.gmra.mrb[204].mxu0 %v3920_v59 }
 0x660   : > { %5107 = vrot.lane.b32.xlu1 %v12868_v28, %s7582_s13 }
 0x664   : > { %5105 = vrot.lane.b32.xlu0 %v12869_v33, %s7582_s13 }
 0x668   : > { %5091 = vrot.lane.b32.xlu0 %v12870_v20, %s7582_s13 }
 0x66e   : > { %v3556_v19 = vpop.xlane.xlu1 %3555 }
 0x66f   : > { %v3642_v2 = vsub.f32 %v12935_v16, %v3556_v19  ;;  %v3643_v47 = vsub.f32 %v12936_v13, %v3556_v19 }
 0x670   : > { %v3559_v53 = vpop.xlane.xlu0 %3558 }
 0x671   : > { %v3722_v8 = vmul.f32 1.442695, %v3642_v2  ;;  %v3724_v6 = vmul.f32 1.442695, %v3643_v47  ;;  %v3644_v51 = vsub.f32 %v9401_v37, %v3559_v53  ;;  %v3645_v59 = vsub.f32 %v12939_v27, %v3559_v53 }
 0x672   : > { %v3565_v50 = vpop.xlane.xlu1 %3564 }
 0x673   : > { %7093 = vpow2.f32 %v3722_v8  ;;  %v3648_v28 = vsub.f32 %v9431_v10, %v3565_v50  ;;  %v3649_v33 = vsub.f32 %v9436_v3, %v3565_v50  ;;  %v3726_v20 = vmul.f32 1.442695, %v3644_v51 }
 0x674   : > { %7095 = vpow2.f32 %v3724_v6  ;;  %v3728_v1 = vmul.f32 1.442695, %v3645_v59  ;;  %v3562_v18 = vpop.xlane.xlu0 %3561 }
 0x675   : > { %v3734_v62 = vmul.f32 1.442695, %v3648_v28  ;;  %v3736_v16 = vmul.f32 1.442695, %v3649_v33  ;;  %7097 = vpow2.f32 %v3726_v20  ;;  %v3646_v13 = vsub.f32 %v12942_v48, %v3562_v18 }
 0x676   : > { %v3647_v24 = vsub.f32 %v12943_v12, %v3562_v18  ;;  %v3571_v37 = vpop.xlane.xlu1 %3570  ;;  %7099 = vpow2.f32 %v3728_v1 }
 0x677   : > { %v3652_v27 = vsub.f32 %v9453_v49, %v3571_v37  ;;  %v3653_v22 = vsub.f32 %v9457_v26, %v3571_v37  ;;  %7101 = vpow2.f32 %v3734_v62  ;;  %v3730_v10 = vmul.f32 1.442695, %v3646_v13  ;;  %v6235_v14 = vpop.f32.mrb[180].mxu0 }
 0x678   : > { %v3732_v3 = vmul.f32 1.442695, %v3647_v24  ;;  %7103 = vpow2.f32 %v3736_v16  ;;  %v6236_v19 = vpop.f32.mrb[181].mxu0  ;;  %v3568_v2 = vpop.xlane.xlu0 %3567 }
 0x679   : > { %v3742_v30 = vmul.f32 1.442695, %v3652_v27  ;;  %v3744_v61 = vmul.f32 1.442695, %v3653_v22  ;;  %7105 = vpow2.f32 %v3730_v10  ;;  %v10348_v47 = vadd.f32 %v6236_v19, %v6235_v14  ;;  %v6238_v48 = vpop.f32.mrb[182].mxu0 }
 0x67a   : > { %v3650_v12 = vsub.f32 %v12946_v34, %v3568_v2  ;;  %v3651_v8 = vsub.f32 %v12947_v52, %v3568_v2  ;;  %v3577_v49 = vpop.xlane.xlu1 %3576  ;;  %7107 = vpow2.f32 %v3732_v3  ;;  %v6239_v53 = vpop.f32.mrb[183].mxu0 }
 0x67b   : > { %13036 = vst [vmem:[#allocation4_spill] sm:$0xff] %v10348_v47  ;;  %v3656_v26 = vsub.f32 %v9474_v57, %v3577_v49  ;;  %v3657_v6 = vsub.f32 %v9478_v35, %v3577_v49  ;;  %7109 = vpow2.f32 %v3742_v30  ;;  %v10354_v50 = vadd.f32 %v6239_v53, %v6238_v48 }
 0x67c   : > { %v3738_v51 = vmul.f32 1.442695, %v3650_v12  ;;  %v3740_v59 = vmul.f32 1.442695, %v3651_v8  ;;  %7111 = vpow2.f32 %v3744_v61  ;;  %v3574_v1 = vpop.xlane.xlu0 %3573 }
 0x67d   : > { %13037 = vst [vmem:[#allocation11_spill] sm:$0xff] %v10354_v50  ;;  %v7094_v28 = vpop.eup %7093  ;;  %v3750_v33 = vmul.f32 1.442695, %v3656_v26  ;;  %v3752_v20 = vmul.f32 1.442695, %v3657_v6  ;;  %v3654_v52 = vsub.f32 %v9465_v21, %v3574_v1  ;;  %v3655_v62 = vsub.f32 %v12950_v60, %v3574_v1  ;;  %v13039_v26 = vld [vmem:[#allocation153_spill] sm:$0xff] }
 0x67e   : > { %v7096_v34 = vpop.eup %7095  ;;  %7113 = vpow2.f32 %v3738_v51  ;;  %v3583_v57 = vpop.xlane.xlu1 %3582  ;;  %v13040_v6 = vld [vmem:[#allocation154_spill] sm:$0xff] }
 0x67f   : > { %7115 = vpow2.f32 %v3740_v59  ;;  %v3660_v35 = vsub.f32 %v12952_v45, %v3583_v57  ;;  %v3661_v16 = vsub.f32 %v12953_v43, %v3583_v57  ;;  %v10360_v18 = vadd.f32 %v7096_v34, %v7094_v28  ;;  %v7098_v13 = vpop.eup %7097  ;;  %v6241_v27 = vpop.f32.mrb[184].mxu0 }
 0x680   : > { %7117 = vpow2.f32 %v3750_v33  ;;  %v3746_v24 = vmul.f32 1.442695, %v3654_v52  ;;  %v3748_v37 = vmul.f32 1.442695, %v3655_v62  ;;  %v7100_v22 = vpop.eup %7099  ;;  %v6242_v21 = vpop.f32.mrb[185].mxu0  ;;  %v3922_v60 = vpack.c.bf16 %v7098_v13, %v7094_v28 }
 0x681   : > { %7119 = vpow2.f32 %v3752_v20  ;;  %v3758_v10 = vmul.f32 1.442695, %v3660_v35  ;;  %v3760_v3 = vmul.f32 1.442695, %v3661_v16  ;;  %v3580_v14 = vpop.xlane.xlu0 %3579  ;;  %v10362_v30 = vpop.eup %7101  ;;  %v10364_v45 = vadd.f32 %v6242_v21, %v6241_v27  ;;  %v13043_v35 = vld [vmem:[#allocation26_spill] sm:$0xff]  ;;  %v13044_v16 = vld [vmem:[#allocation155_spill] sm:$0xff] }
 0x682   : > { %7121 = vpow2.f32 %v3746_v24  ;;  %v6244_v43 = vpop.f32.mrb[186].mxu0  ;;  %v3658_v61 = vsub.f32 %v12955_v54, %v3580_v14  ;;  %v3659_v19 = vsub.f32 %v12956_v0, %v3580_v14  ;;  %v3589_v2 = vpop.xlane.xlu1 %3588  ;;  %v13041_v53 = vmax.f32 %v13039_v26, %v13040_v6  ;;  %v13047_v21 = vld [vmem:[#allocation109_spill] sm:$0xff] }
 0x683   : > { %13038 = vst [vmem:[#allocation12_spill] sm:$0xff] %v10364_v45  ;;  %v10368_v48 = vpop.eup %7103  ;;  %7123 = vpow2.f32 %v3748_v37  ;;  %v3664_v12 = vsub.f32 %v12958_v15, %v3589_v2  ;;  %v3665_v8 = vsub.f32 %v12959_v17, %v3589_v2  ;;  %v6245_v49 = vpop.f32.mrb[187].mxu0  ;;  %v3923_v51 = vpack.c.bf16 %v7100_v22, %v7096_v34 }
 0x684   : > { %4682 = vmax.xlane.f32.xlu1 %v13041_v53  ;;  %v10375_v59 = vpop.eup %7105  ;;  %7125 = vpow2.f32 %v3758_v10  ;;  %v3754_v54 = vmul.f32 1.442695, %v3658_v61  ;;  %v3756_v28 = vmul.f32 1.442695, %v3659_v19  ;;  %v10377_v0 = vadd.f32 %v6245_v49, %v6244_v43  ;;  %v13046_v10 = vld [vmem:[#allocation108_spill] sm:$0xff] }
 0x685   : > { %v7108_v33 = vpop.eup %7107  ;;  %7127 = vpow2.f32 %v3760_v3  ;;  %v3766_v20 = vmul.f32 1.442695, %v3664_v12  ;;  %v3768_v1 = vmul.f32 1.442695, %v3665_v8  ;;  %4058 = vmatprep.mubr.bf16.mxu0 %v3923_v51  ;;  %v3586_v15 = vpop.xlane.xlu0 %3585  ;;  %v3924_v17 = vpack.c.bf16 %v10362_v30, %v10375_v59 }
 0x686   : > { %13042 = vst [vmem:[#allocation3_spill] sm:$0xff] %v10377_v0  ;;  %v10381_v52 = vpop.eup %7109  ;;  %7129 = vpow2.f32 %v3754_v54  ;;  %4059 = vmatmul.mubr.bf16.gmra.mrb[208].mxu0 %v3922_v60  ;;  %v3662_v34 = vsub.f32 %v12961_v63, %v3586_v15  ;;  %v3663_v62 = vsub.f32 %v12962_v46, %v3586_v15  ;;  %v3595_v57 = vpop.xlane.xlu1 %3594  ;;  %v13045_v24 = vmax.f32 %v13043_v35, %v13044_v16 }
 0x687   : > { %v3925_v37 = vpack.c.bf16 %v10368_v48, %v7108_v33  ;;  %v7112_v27 = vpop.eup %7111  ;;  %7131 = vpow2.f32 %v3756_v28  ;;  %v3668_v3 = vsub.f32 %v13046_v10, %v3595_v57  ;;  %v3669_v14 = vsub.f32 %v13047_v21, %v3595_v57  ;;  %v6247_v61 = vpop.f32.mrb[188].mxu0  ;;  %v13049_v28 = vld [vmem:[#allocation107_spill] sm:$0xff]  ;;  %v13052_v57 = vld [vmem:[#allocation114_spill] sm:$0xff] }
 0x688   : > { %4685 = vmax.xlane.f32.xlu0 %v13045_v24  ;;  %v10391_v43 = vadd.f32 %v7100_v22, %v7098_v13  ;;  %v10393_v60 = vpop.eup %7113  ;;  %7133 = vpow2.f32 %v3766_v20  ;;  %v3762_v63 = vmul.f32 1.442695, %v3662_v34  ;;  %v3764_v46 = vmul.f32 1.442695, %v3663_v62  ;;  %v6248_v49 = vpop.f32.mrb[189].mxu0 }
 0x689   : > { %4066 = vmatprep.mubr.bf16.mxu0 %v3925_v37  ;;  %v10396_v19 = vadd.f32 %v7108_v33, %v10375_v59  ;;  %v10398_v2 = vpop.eup %7115  ;;  %7135 = vpow2.f32 %v3768_v1  ;;  %v3774_v12 = vmul.f32 1.442695, %v3668_v3  ;;  %v3776_v8 = vmul.f32 1.442695, %v3669_v14  ;;  %v3592_v53 = vpop.xlane.xlu0 %3591  ;;  %v13050_v59 = vld [vmem:[#allocation52_spill] sm:$0xff]  ;;  %v13051_v1 = vld [vmem:[#allocation113_spill] sm:$0xff] }
 0x68a   : > { %v3926_v13 = vpack.c.bf16 %v10381_v52, %v10393_v60  ;;  %v10402_v22 = vpop.eup %7117  ;;  %7137 = vpow2.f32 %v3762_v63  ;;  %v10404_v51 = vadd.f32 %v6248_v49, %v6247_v61  ;;  %v6250_v54 = vpop.f32.mrb[190].mxu0  ;;  %v3666_v20 = vsub.f32 %v13049_v28, %v3592_v53  ;;  %v13076_v28 = vld [vmem:[#allocation144_spill] sm:$0xff] }
 0x68b   : > { %v3667_v33 = vsub.f32 %v13050_v59, %v3592_v53  ;;  %v3601_v15 = vpop.xlane.xlu1 %3600  ;;  %v10408_v34 = vpop.eup %7119  ;;  %7139 = vpow2.f32 %v3764_v46  ;;  %v3927_v10 = vpack.c.bf16 %v7112_v27, %v10398_v2 }
 0x68c   : > { %13048 = vst [vmem:[#allocation147_spill] sm:$0xff] %v10404_v51  ;;  %v3672_v62 = vsub.f32 %v13051_v1, %v3601_v15  ;;  %v3673_v24 = vsub.f32 %v13052_v57, %v3601_v15  ;;  %v6251_v37 = vpop.f32.mrb[191].mxu0  ;;  %v10413_v3 = vpop.eup %7121  ;;  %7141 = vpow2.f32 %v3774_v12  ;;  %v3770_v21 = vmul.f32 1.442695, %v3666_v20 }
 0x68d   : > { %v3772_v14 = vmul.f32 1.442695, %v3667_v33  ;;  %v10415_v63 = vadd.f32 %v6251_v37, %v6250_v54  ;;  %v10417_v61 = vpop.eup %7123  ;;  %7143 = vpow2.f32 %v3776_v8  ;;  %v3598_v46 = vpop.xlane.xlu0 %3597  ;;  %v10438_v57 = vadd.f32 %v7112_v27, %v10381_v52 }
 0x68e   : > { %v3782_v49 = vmul.f32 1.442695, %v3672_v62  ;;  %v3784_v53 = vmul.f32 1.442695, %v3673_v24  ;;  %v10421_v59 = vpop.eup %7125  ;;  %7145 = vpow2.f32 %v3770_v21  ;;  %4067 = vmatmul.mubr.bf16.gmra.mrb[212].mxu0 %v3924_v17  ;;  %v3670_v15 = vsub.f32 %v12977_v31, %v3598_v46 }
 0x68f   : > { %13053 = vst [vmem:[#allocation148_spill] sm:$0xff] %v10415_v63  ;;  %v3671_v12 = vsub.f32 %v12978_v39, %v3598_v46  ;;  %v3607_v20 = vpop.xlane.xlu1 %3606  ;;  %v3929_v54 = vpack.c.bf16 %v10408_v34, %v10417_v61  ;;  %v10427_v33 = vpop.eup %7127  ;;  %7147 = vpow2.f32 %v3772_v14  ;;  %4074 = vmatprep.mubr.bf16.mxu0 %v3927_v10  ;;  %v10433_v62 = vadd.f32 %v10368_v48, %v10362_v30 }
 0x690   : > { %v3676_v8 = vsub.f32 %v12980_v5, %v3607_v20  ;;  %v3677_v1 = vsub.f32 %v12981_v58, %v3607_v20  ;;  %v10435_v17 = vpop.eup %7129  ;;  %7149 = vpow2.f32 %v3782_v49  ;;  %v3778_v31 = vmul.f32 1.442695, %v3670_v15  ;;  %13054 = vst [vmem:[#allocation149_spill] sm:$0xff] %v10438_v57  ;;  %v13056_v20 = vld [vmem:[#allocation8_spill] sm:$0xff] }
 0x691   : > { %v3780_v39 = vmul.f32 1.442695, %v3671_v12  ;;  %v10440_v24 = vpop.eup %7131  ;;  %7151 = vpow2.f32 %v3784_v53  ;;  %v3604_v5 = vpop.xlane.xlu0 %3603  ;;  %v10456_v15 = vadd.f32 %v10398_v2, %v10393_v60  ;;  %v10485_v52 = vadd.f32 %v10417_v61, %v10413_v3 }
 0x692   : > { %v3790_v37 = vmul.f32 1.442695, %v3676_v8  ;;  %v3792_v10 = vmul.f32 1.442695, %v3677_v1  ;;  %v10444_v21 = vpop.eup %7133  ;;  %7153 = vpow2.f32 %v3778_v31  ;;  %v3674_v30 = vsub.f32 %v12983_v40, %v3604_v5 }
 0x693   : > { %v3675_v48 = vsub.f32 %v12984_v36, %v3604_v5  ;;  %v3613_v14 = vpop.xlane.xlu1 %3612  ;;  %v10450_v49 = vpop.eup %7135  ;;  %7155 = vpow2.f32 %v3780_v39  ;;  %13055 = vst [vmem:[#allocation150_spill] sm:$0xff] %v10456_v15  ;;  %v10464_v8 = vadd.f32 %v10408_v34, %v10402_v22  ;;  %v13059_v34 = vld [vmem:[#allocation123_spill] sm:$0xff]  ;;  %13062 = vst [vmem:[#allocation154_spill] sm:$0xff] %v10485_v52  ;;  %v10511_v61 = vadd.f32 %v10440_v24, %v10435_v17  ;;  %v13153_v52 = vld [vmem:[#allocation213_spill] sm:$0xff] }
 0x694   : > { %v3680_v53 = vsub.f32 %v9585_v25, %v3613_v14  ;;  %v3681_v46 = vsub.f32 %v9588_v9, %v3613_v14  ;;  %v10458_v12 = vpop.eup %7137  ;;  %7157 = vpow2.f32 %v3790_v37  ;;  %v3786_v40 = vmul.f32 1.442695, %v3674_v30  ;;  %v13058_v37 = vld [vmem:[#allocation122_spill] sm:$0xff] }
 0x695   : > { %v3788_v36 = vmul.f32 1.442695, %v3675_v48  ;;  %5093 = vrot.lane.b32.xlu1 %v13056_v20, %s7582_s13  ;;  %13057 = vst [vmem:[#allocation153_spill] sm:$0xff] %v10464_v8  ;;  %v10466_v1 = vpop.eup %7139  ;;  %7159 = vpow2.f32 %v3792_v10  ;;  %v3610_v31 = vpop.xlane.xlu0 %3609  ;;  %v13061_v20 = vld [vmem:[#allocation129_spill] sm:$0xff]  ;;  %13069 = vst [vmem:[#allocation155_spill] sm:$0xff] %v10511_v61  ;;  %v10519_v10 = vadd.f32 %v10450_v49, %v10444_v21  ;;  %v13154_v8 = vld [vmem:[#allocation214_spill] sm:$0xff] }
 0x696   : > { %v3798_v25 = vmul.f32 1.442695, %v3680_v53  ;;  %v3800_v9 = vmul.f32 1.442695, %v3681_v46  ;;  %v10470_v39 = vpop.eup %7141  ;;  %7161 = vpow2.f32 %v3786_v40  ;;  %4075 = vmatmul.mubr.bf16.gmra.mrb[216].mxu0 %v3926_v13  ;;  %v3678_v5 = vsub.f32 %v13058_v37, %v3610_v31  ;;  %v13060_v53 = vld [vmem:[#allocation128_spill] sm:$0xff]  ;;  %v13151_v61 = vld [vmem:[#allocation205_spill] sm:$0xff] }
 0x697   : > { %v3679_v30 = vsub.f32 %v13059_v34, %v3610_v31  ;;  %v3619_v48 = vpop.xlane.xlu1 %3618  ;;  %v10479_v14 = vpop.eup %7143  ;;  %7163 = vpow2.f32 %v3788_v36  ;;  %4082 = vmatprep.mubr.bf16.mxu0 %v3929_v54  ;;  %v13063_v37 = vld [vmem:[#allocation16_spill] sm:$0xff]  ;;  %v10493_v36 = vadd.f32 %v10427_v33, %v10421_v59  ;;  %13071 = vst [vmem:[#allocation108_spill] sm:$0xff] %v10519_v10 }
 0x698   : > { %v3684_v46 = vsub.f32 %v13060_v53, %v3619_v48  ;;  %v3685_v40 = vsub.f32 %v13061_v20, %v3619_v48  ;;  %v10487_v60 = vpop.eup %7145  ;;  %7165 = vpow2.f32 %v3798_v25  ;;  %v3794_v13 = vmul.f32 1.442695, %v3678_v5  ;;  %v13065_v25 = vld [vmem:[#allocation126_spill] sm:$0xff]  ;;  %v13150_v10 = vld [vmem:[#allocation204_spill] sm:$0xff] }
 0x699   : > { %v3796_v31 = vmul.f32 1.442695, %v3679_v30  ;;  %5111 = vrot.lane.b32.xlu1 %v13063_v37, %s7582_s13  ;;  %13064 = vst [vmem:[#allocation26_spill] sm:$0xff] %v10493_v36  ;;  %v10495_v54 = vpop.eup %7147  ;;  %7167 = vpow2.f32 %v3800_v9  ;;  %v3616_v53 = vpop.xlane.xlu0 %3615  ;;  %v13066_v30 = vld [vmem:[#allocation127_spill] sm:$0xff]  ;;  %v13067_v9 = vld [vmem:[#allocation136_spill] sm:$0xff] }
 0x69a   : > { %v3806_v34 = vmul.f32 1.442695, %v3684_v46  ;;  %v3808_v48 = vmul.f32 1.442695, %v3685_v40  ;;  %v10499_v20 = vpop.eup %7149  ;;  %7169 = vpow2.f32 %v3794_v13  ;;  %v3682_v5 = vsub.f32 %v13065_v25, %v3616_v53  ;;  %v13068_v40 = vld [vmem:[#allocation137_spill] sm:$0xff] }
 0x69b   : > { %v3683_v37 = vsub.f32 %v13066_v30, %v3616_v53  ;;  %v3625_v2 = vpop.xlane.xlu1 %3624  ;;  %v10505_v58 = vpop.eup %7151  ;;  %7171 = vpow2.f32 %v3796_v31  ;;  %v13070_v30 = vld [vmem:[#allocation17_spill] sm:$0xff] }
 0x69c   : > { %v3688_v46 = vsub.f32 %v13067_v9, %v3625_v2  ;;  %v3689_v27 = vsub.f32 %v13068_v40, %v3625_v2  ;;  %v10513_v13 = vpop.eup %7153  ;;  %7173 = vpow2.f32 %v3806_v34  ;;  %v3802_v25 = vmul.f32 1.442695, %v3682_v5  ;;  %v13073_v5 = vld [vmem:[#allocation133_spill] sm:$0xff] }
 0x69d   : > { %v3804_v53 = vmul.f32 1.442695, %v3683_v37  ;;  %v10521_v31 = vpop.eup %7155  ;;  %7175 = vpow2.f32 %v3808_v48  ;;  %v13072_v34 = vpack.c.bf16 %v10402_v22, %v10413_v3  ;;  %v10543_v3 = vadd.f32 %v10466_v1, %v10458_v12 }
 0x69e   : > { %5109 = vrot.lane.b32.xlu0 %v13070_v30, %s7582_s13  ;;  %v3814_v2 = vmul.f32 1.442695, %v3688_v46  ;;  %v3816_v9 = vmul.f32 1.442695, %v3689_v27  ;;  %v3622_v40 = vpop.xlane.xlu0 %3621  ;;  %v10525_v51 = vpop.eup %7157  ;;  %7177 = vpow2.f32 %v3802_v25  ;;  %v13074_v30 = vld [vmem:[#allocation134_spill] sm:$0xff]  ;;  %v13075_v46 = vpack.c.bf16 %v10427_v33, %v10440_v24 }
 0x69f   : > { %4083 = vmatmul.mubr.bf16.gmra.mrb[220].mxu0 %v13072_v34  ;;  %v3686_v37 = vsub.f32 %v13073_v5, %v3622_v40  ;;  %v3687_v63 = vsub.f32 %v13074_v30, %v3622_v40  ;;  %v4674_v45 = vpop.xlane.xlu1 %4673  ;;  %v10534_v27 = vpop.eup %7159  ;;  %7179 = vpow2.f32 %v3804_v53  ;;  %13077 = vst [vmem:[#allocation109_spill] sm:$0xff] %v10543_v3  ;;  %v13078_v30 = vld [vmem:[#allocation7_spill] sm:$0xff]  ;;  %v10551_v33 = vadd.f32 %v10479_v14, %v10470_v39 }
 0x6a0   : > { %4090 = vmatprep.mubr.bf16.mxu0 %v13075_v46  ;;  %v4767_v25 = vsub.f32 %v13005_v23, %v4674_v45  ;;  %v4768_v22 = vsub.f32 %v13076_v28, %v4674_v45  ;;  %v10545_v40 = vpop.eup %7161  ;;  %7181 = vpow2.f32 %v3814_v2 }
 0x6a1   : > { %v3810_v34 = vmul.f32 1.442695, %v3686_v37  ;;  %v3812_v5 = vmul.f32 1.442695, %v3687_v63  ;;  %13079 = vst [vmem:[#allocation107_spill] sm:$0xff] %v10551_v33  ;;  %v10553_v24 = vpop.eup %7163  ;;  %7183 = vpow2.f32 %v3816_v9  ;;  %v13080_v63 = vld [vmem:[#allocation141_spill] sm:$0xff]  ;;  %v10565_v9 = vadd.f32 %v10495_v54, %v10487_v60 }
 0x6a2   : > { %5095 = vrot.lane.b32.xlu0 %v13078_v30, %s7582_s13  ;;  %v4833_v23 = vmul.f32 1.442695, %v4767_v25  ;;  %v4835_v45 = vmul.f32 1.442695, %v4768_v22  ;;  %v4671_v28 = vpop.xlane.xlu0 %4670  ;;  %v10557_v46 = vpop.eup %7165  ;;  %v13081_v37 = vld [vmem:[#allocation142_spill] sm:$0xff]  ;;  %v3939_v0 = vpack.c.bf16 %v10534_v27, %v10553_v24  ;;  %v10569_v25 = vadd.f32 %v10505_v58, %v10499_v20  ;;  %v13148_v33 = vld [vmem:[#allocation207_spill] sm:$0xff] }
 0x6a3   : > { %7185 = vpow2.f32 %v3810_v34  ;;  %v4765_v2 = vsub.f32 %v13080_v63, %v4671_v28  ;;  %v4766_v30 = vsub.f32 %v13081_v37, %v4671_v28  ;;  %v5086_v48 = vpop.permute.xlu1 %5085  ;;  %v7168_v47 = vpop.eup %7167  ;;  %13082 = vst [vmem:[#allocation52_spill] sm:$0xff] %v10565_v9  ;;  %v10573_v22 = vadd.f32 %v10521_v31, %v10513_v13 }
 0x6a4   : > { %7187 = vpow2.f32 %v3812_v5  ;;  %13083 = vst [vmem:[#allocation113_spill] sm:$0xff] %v10569_v25  ;;  %v7170_v34 = vpop.eup %7169  ;;  %v10577_v37 = vadd.f32 %v10534_v27, %v10525_v51  ;;  %v10582_v11 = vadd.f32 %v10553_v24, %v10545_v40  ;;  %v10585_v38 = vadd.f32 %v7168_v47, %v10557_v46  ;;  %v13145_v25 = vld [vmem:[#allocation199_spill] sm:$0xff] }
 0x6a5   : > { %13084 = vst [vmem:[#allocation114_spill] sm:$0xff] %v10573_v22  ;;  %7189 = vpow2.f32 %v4833_v23  ;;  %v4829_v28 = vmul.f32 1.442695, %v4765_v2  ;;  %v4831_v63 = vmul.f32 1.442695, %v4766_v30  ;;  %v7172_v5 = vpop.eup %7171  ;;  %v3940_v50 = vpack.c.bf16 %v10557_v46, %v7170_v34 }
 0x6a6   : > { %13085 = vst [vmem:[#allocation8_spill] sm:$0xff] %v10577_v37  ;;  %7191 = vpow2.f32 %v4835_v45  ;;  %v5102_v53 = vpop.permute.xlu0 %5101  ;;  %13086 = vst [vmem:[#allocation122_spill] sm:$0xff] %v10582_v11  ;;  %v7174_v4 = vpop.eup %7173  ;;  %v13088_v23 = vpack.c.bf16 %v10421_v59, %v10435_v17  ;;  %v3941_v2 = vpack.c.bf16 %v7168_v47, %v7172_v5  ;;  %v10590_v45 = vadd.f32 %v7172_v5, %v7170_v34  ;;  %v13142_v37 = vld [vmem:[#allocation201_spill] sm:$0xff] }
 0x6a7   : > { %13087 = vst [vmem:[#allocation123_spill] sm:$0xff] %v10585_v38  ;;  %7193 = vpow2.f32 %v4829_v28  ;;  %v5104_v27 = vpop.permute.xlu1 %5103  ;;  %6461 = vmatprep.subr.bf16.mxu0 %v5102_v53  ;;  %v7176_v30 = vpop.eup %7175  ;;  %v13090_v24 = vpack.c.bf16 %v10450_v49, %v10466_v1 }
 0x6a8   : > { %4091 = vmatmul.mubr.bf16.gmra.mrb[224].mxu0 %v13088_v23  ;;  %13089 = vst [vmem:[#allocation128_spill] sm:$0xff] %v10590_v45  ;;  %7195 = vpow2.f32 %v4831_v63  ;;  %v7178_v46 = vpop.eup %7177  ;;  %v10595_v32 = vadd.f32 %v7176_v30, %v7174_v4  ;;  %v13139_v45 = vld [vmem:[#allocation185_spill] sm:$0xff] }
 0x6a9   : > { %4098 = vmatprep.mubr.bf16.mxu0 %v13090_v24  ;;  %6462 = vmatpush3.bf16.msra.mxu0 %v5086_v48  ;;  %v7180_v28 = vpop.eup %7179  ;;  %v3942_v59 = vpack.c.bf16 %v7174_v4, %v7178_v46  ;;  %v13094_v48 = vpack.c.bf16 %v10444_v21, %v10458_v12  ;;  %v13097_v12 = vpack.c.bf16 %v10470_v39, %v10487_v60  ;;  %v13108_v60 = vld [vmem:[#allocation19_spill] sm:$0xff] }
 0x6aa   : > { %6463 = vmatprep.subr.bf16.mxu0 %v5104_v27  ;;  %13091 = vst [vmem:[#allocation129_spill] sm:$0xff] %v10595_v32  ;;  %v5088_v38 = vpop.permute.xlu0 %5087  ;;  %v7182_v17 = vpop.eup %7181  ;;  %v3943_v23 = vpack.c.bf16 %v7176_v30, %v7180_v28  ;;  %v10597_v53 = vadd.f32 %v7180_v28, %v7178_v46  ;;  %v13096_v30 = vpack.c.bf16 %v10479_v14, %v10495_v54  ;;  %v13099_v54 = vld [vmem:[#allocation158_spill] sm:$0xff] }
 0x6ab   : > { %v7184_v47 = vpop.eup %7183  ;;  %v13098_v14 = vpack.c.bf16 %v10505_v58, %v10521_v31  ;;  %v13106_v39 = vpack.c.bf16 %v10525_v51, %v10545_v40  ;;  %v13107_v58 = vld [vmem:[#allocation10_spill] sm:$0xff]  ;;  %v13110_v31 = vld [vmem:[#allocation9_spill] sm:$0xff] }
 0x6ac   : > { %13092 = vst [vmem:[#allocation16_spill] sm:$0xff] %v10597_v53  ;;  %v10599_v63 = vadd.f32 %v7184_v47, %v7182_v17  ;;  %v13136_v53 = vld [vmem:[#allocation187_spill] sm:$0xff] }
 0x6ad   : > { %6464 = vmatpush3.bf16.msra.mxu0 %v5088_v38  ;;  %v7186_v34 = vpop.eup %7185 }
 0x6ae   : > { %13093 = vst [vmem:[#allocation126_spill] sm:$0xff] %v10599_v63  ;;  %v7188_v5 = vpop.eup %7187  ;;  %v3944_v49 = vpack.c.bf16 %v7182_v17, %v7186_v34  ;;  %v13133_v17 = vld [vmem:[#allocation13_spill] sm:$0xff] }
 0x6af   : > { %v10601_v1 = vpop.eup %7189  ;;  %v3945_v27 = vpack.c.bf16 %v7184_v47, %v7188_v5  ;;  %v10606_v24 = vadd.f32 %v7188_v5, %v7186_v34  ;;  %v13100_v47 = vld [vmem:[#allocation159_spill] sm:$0xff]  ;;  %v13102_v5 = vpack.c.bf16 %v10499_v20, %v10513_v13  ;;  %v13109_v20 = vld [vmem:[#allocation20_spill] sm:$0xff] }
 0x6b0   : > { %4099 = vmatmul.mubr.bf16.gmra.mrb[228].mxu0 %v13094_v48  ;;  %v7192_v4 = vpop.eup %7191  ;;  %v13101_v34 = vmax.f32 %v13099_v54, %v13100_v47  ;;  %v13103_v48 = vld [vmem:[#allocation160_spill] sm:$0xff] }
 0x6b1   : > { %13095 = vst [vmem:[#allocation127_spill] sm:$0xff] %v10606_v24  ;;  %4106 = vmatprep.mubr.bf16.mxu0 %v13096_v30  ;;  %v10611_v38 = vpop.eup %7193  ;;  %v10614_v46 = vadd.f32 %v7192_v4, %v10601_v1 }
 0x6b2   : > { %v7196_v28 = vpop.eup %7195 }
 0x6b3   : > { %v5054_v63 = vpack.c.bf16 %v7192_v4, %v7196_v28  ;;  %v10619_v21 = vadd.f32 %v7196_v28, %v10611_v38  ;;  %v13104_v4 = vld [vmem:[#allocation161_spill] sm:$0xff] }
 0x6b4   : > { %v13105_v30 = vmax.f32 %v13103_v48, %v13104_v4 }
 0x6b8   : > { %4107 = vmatmul.mubr.bf16.gmra.mrb[232].mxu0 %v13097_v12 }
 0x6b9   : > { %4114 = vmatprep.mubr.bf16.mxu0 %v13098_v14 }
 0x6bd   : > { %4688 = vmax.xlane.f32.xlu1 %v13101_v34 }
 0x6c0   : > { %4115 = vmatmul.mubr.bf16.gmra.mrb[236].mxu0 %v13102_v5 }
 0x6c1   : > { %4122 = vmatprep.mubr.bf16.mxu0 %v3939_v0  ;;  %4691 = vmax.xlane.f32.xlu0 %v13105_v30 }
 0x6c8   : > { %4123 = vmatmul.mubr.bf16.gmra.mrb[240].mxu0 %v13106_v39 }
 0x6c9   : > { %4130 = vmatprep.mubr.bf16.mxu0 %v3941_v2 }
 0x6ce   : > { %5097 = vrot.lane.b32.xlu1 %v13107_v58, %s7582_s13  ;;  %v13111_v58 = vld [vmem:[#allocation27_spill] sm:$0xff] }
 0x6d0   : > { %4131 = vmatmul.mubr.bf16.gmra.mrb[244].mxu0 %v3940_v50 }
 0x6d1   : > { %4138 = vmatprep.mubr.bf16.mxu0 %v3943_v23 }
 0x6d2   : > { %5115 = vrot.lane.b32.xlu1 %v13108_v60, %s7582_s13  ;;  %v13112_v60 = vld [vmem:[#allocation164_spill] sm:$0xff] }
 0x6d7   : > { %5113 = vrot.lane.b32.xlu0 %v13109_v20, %s7582_s13  ;;  %v13113_v20 = vmax.f32 %v13111_v58, %v13112_v60 }
 0x6d8   : > { %4139 = vmatmul.mubr.bf16.gmra.mrb[248].mxu0 %v3942_v59  ;;  %v4677_v0 = vpop.xlane.xlu1 %4676 }
 0x6d9   : > { %4146 = vmatprep.mubr.bf16.mxu0 %v3945_v27  ;;  %v4769_v13 = vsub.f32 %v13026_v42, %v4677_v0  ;;  %v4770_v51 = vsub.f32 %v13027_v56, %v4677_v0  ;;  %v13114_v0 = vld [vmem:[#allocation165_spill] sm:$0xff] }
 0x6db   : > { %5099 = vrot.lane.b32.xlu0 %v13110_v31, %s7582_s13  ;;  %v4837_v40 = vmul.f32 1.442695, %v4769_v13  ;;  %v4839_v2 = vmul.f32 1.442695, %v4770_v51  ;;  %v4680_v50 = vpop.xlane.xlu0 %4679  ;;  %v13115_v13 = vld [vmem:[#allocation166_spill] sm:$0xff]  ;;  %v13117_v31 = vld [vmem:[#allocation171_spill] sm:$0xff] }
 0x6dc   : > { %v4771_v23 = vsub.f32 %v13029_v44, %v4680_v50  ;;  %v4772_v28 = vsub.f32 %v13030_v55, %v4680_v50  ;;  %v5090_v12 = vpop.permute.xlu1 %5089  ;;  %v13116_v51 = vmax.f32 %v13114_v0, %v13115_v13  ;;  %v13120_v50 = vld [vmem:[#allocation169_spill] sm:$0xff] }
 0x6dd   : > { %7197 = vpow2.f32 %v4837_v40  ;;  %v13118_v40 = vld [vmem:[#allocation172_spill] sm:$0xff] }
 0x6de   : > { %7199 = vpow2.f32 %v4839_v2  ;;  %v4841_v59 = vmul.f32 1.442695, %v4771_v23  ;;  %v4843_v27 = vmul.f32 1.442695, %v4772_v28  ;;  %v13119_v2 = vmax.f32 %v13117_v31, %v13118_v40  ;;  %v13121_v23 = vld [vmem:[#allocation170_spill] sm:$0xff] }
 0x6df   : > { %v5106_v14 = vpop.permute.xlu0 %5105  ;;  %v13122_v28 = vmax.f32 %v13120_v50, %v13121_v23 }
 0x6e0   : > { %4147 = vmatmul.mubr.bf16.gmra.mrb[252].mxu0 %v3944_v49  ;;  %7201 = vpow2.f32 %v4841_v59  ;;  %v5108_v42 = vpop.permute.xlu1 %5107  ;;  %6465 = vmatprep.subr.bf16.mxu0 %v5106_v14  ;;  %v13124_v59 = vld [vmem:[#allocation66_spill] sm:$0xff]  ;;  %v13126_v14 = vld [vmem:[#allocation36_spill] sm:$0xff] }
 0x6e1   : > { %5165 = vmatprep.mubr.bf16.mxu0 %v5054_v63  ;;  %7203 = vpow2.f32 %v4843_v27  ;;  %6466 = vmatpush3.bf16.msra.mxu0 %v5090_v12  ;;  %v13123_v12 = vld [vmem:[#allocation37_spill] sm:$0xff] }
 0x6e2   : > { %6467 = vmatprep.subr.bf16.mxu0 %v5108_v42  ;;  %v13125_v27 = vmax.f32 %v13123_v12, %v13124_v59  ;;  %v13127_v42 = vld [vmem:[#allocation65_spill] sm:$0xff] }
 0x6e3   : > { %v5092_v56 = vpop.permute.xlu0 %5091  ;;  %v13130_v63 = vld [vmem:[#allocation5_spill] sm:$0xff] }
 0x6e5   : > { %6468 = vmatpush3.bf16.msra.mxu0 %v5092_v56  ;;  %v13128_v56 = vmax.f32 %v13126_v14, %v13127_v42 }
 0x6e7   : > { %v10651_v34 = vpop.eup %7197 }
 0x6e8   : > { %v10653_v44 = vpop.eup %7199 }
 0x6e9   : > { %v10657_v55 = vadd.f32 %v10653_v44, %v10651_v34 }
 0x6ea   : > { %v10659_v5 = vpop.eup %7201 }
 0x6eb   : > { %v10661_v49 = vpop.eup %7203 }
 0x6ec   : > { %v10667_v30 = vadd.f32 %v10661_v49, %v10659_v5 }
 0x6f6   : > { %4694 = vmax.xlane.f32.xlu1 %v13113_v20  ;;  %v13129_v20 = vld [vmem:[#allocation14_spill] sm:$0xff] }
 0x6f7   : > { %v13131_v39 = vmax.f32 %v13129_v20, %v13130_v63 }
 0x6fa   : > { %4697 = vmax.xlane.f32.xlu0 %v13116_v51  ;;  %4703 = vmax.xlane.f32.xlu1 %v13119_v2  ;;  %v13132_v51 = vld [vmem:[#allocation6_spill] sm:$0xff] }
 0x6fb   : > { %v13134_v24 = vmax.f32 %v13132_v51, %v13133_v17  ;;  %v13135_v2 = vld [vmem:[#allocation186_spill] sm:$0xff] }
 0x6fc   : > { %v13137_v32 = vmax.f32 %v13135_v2, %v13136_v53 }
 0x6fe   : > { %4700 = vmax.xlane.f32.xlu0 %v13122_v28  ;;  %4709 = vmax.xlane.f32.xlu1 %v13125_v27  ;;  %v13138_v28 = vld [vmem:[#allocation184_spill] sm:$0xff] }
 0x6ff   : > { %v13140_v11 = vmax.f32 %v13138_v28, %v13139_v45  ;;  %v13141_v27 = vld [vmem:[#allocation200_spill] sm:$0xff] }
 0x700   : > { %v13143_v22 = vmax.f32 %v13141_v27, %v13142_v37 }
 0x702   : > { %4706 = vmax.xlane.f32.xlu0 %v13128_v56  ;;  %4715 = vmax.xlane.f32.xlu1 %v13131_v39  ;;  %v13144_v56 = vld [vmem:[#allocation198_spill] sm:$0xff] }
 0x703   : > { %v13146_v9 = vmax.f32 %v13144_v56, %v13145_v25  ;;  %v13147_v39 = vld [vmem:[#allocation206_spill] sm:$0xff]  ;;  %v13157_v56 = vld [vmem:[#allocation212_spill] sm:$0xff] }
 0x704   : > { %v13149_v3 = vmax.f32 %v13147_v39, %v13148_v33  ;;  %v13156_v39 = vld [vmem:[#allocation211_spill] sm:$0xff] }
 0x706   : > { %4712 = vmax.xlane.f32.xlu0 %v13134_v24  ;;  %4721 = vmax.xlane.f32.xlu1 %v13137_v32  ;;  %v13152_v32 = vmax.f32 %v13150_v10, %v13151_v61  ;;  %v13158_v61 = vmax.f32 %v13156_v39, %v13157_v56 }
 0x70a   : > { %4718 = vmax.xlane.f32.xlu0 %v13140_v11  ;;  %4727 = vmax.xlane.f32.xlu1 %v13143_v22  ;;  %v13155_v22 = vmax.f32 %v13153_v52, %v13154_v8  ;;  %v13162_v8 = vld [vmem:[#allocation216_spill] sm:$0xff] }
 0x70e   : > { %4724 = vmax.xlane.f32.xlu0 %v13146_v9  ;;  %4733 = vmax.xlane.f32.xlu1 %v13149_v3 }
 0x711   : > { %v4683_v24 = vpop.xlane.xlu1 %4682 }
 0x712   : > { %4730 = vmax.xlane.f32.xlu0 %v13152_v32  ;;  %v4773_v36 = vsub.f32 %v13039_v26, %v4683_v24  ;;  %v4774_v11 = vsub.f32 %v13040_v6, %v4683_v24  ;;  %4739 = vmax.xlane.f32.xlu1 %v13155_v22  ;;  %v13159_v26 = vld [vmem:[#allocation218_spill] sm:$0xff]  ;;  %v13160_v32 = vld [vmem:[#allocation220_spill] sm:$0xff] }
 0x713   : > { %v13161_v6 = vmax.f32 %v13159_v26, %v13160_v32  ;;  %v13170_v32 = vld [vmem:[#allocation84_spill] sm:$0xff] }
 0x714   : > { %v4845_v15 = vmul.f32 1.442695, %v4773_v36  ;;  %v4847_v57 = vmul.f32 1.442695, %v4774_v11 }
 0x715   : > { %v4686_v9 = vpop.xlane.xlu0 %4685  ;;  %v5094_v33 = vpop.permute.xlu1 %5093 }
 0x716   : > { %v4775_v25 = vsub.f32 %v13043_v35, %v4686_v9  ;;  %v4776_v3 = vsub.f32 %v13044_v16, %v4686_v9  ;;  %4736 = vmax.xlane.f32.xlu0 %v13158_v61  ;;  %7205 = vpow2.f32 %v4845_v15  ;;  %4745 = vmax.xlane.f32.xlu1 %v13161_v6  ;;  %v13163_v35 = vld [vmem:[#allocation217_spill] sm:$0xff]  ;;  %v13165_v9 = vld [vmem:[#allocation87_spill] sm:$0xff]  ;;  %v13166_v61 = vld [vmem:[#allocation88_spill] sm:$0xff] }
 0x717   : > { %7207 = vpow2.f32 %v4847_v57  ;;  %v13164_v52 = vmax.f32 %v13162_v8, %v13163_v35  ;;  %v6317_v16 = vpop.f32.mrb[192].mxu0  ;;  %v13167_v15 = vmax.f32 %v13165_v9, %v13166_v61  ;;  %v13171_v35 = vld [vmem:[#allocation85_spill] sm:$0xff]  ;;  %v13188_v61 = vld [vmem:[#allocation23_spill] sm:$0xff]  ;;  %v13191_v9 = vld [vmem:[#allocation202_spill] sm:$0xff] }
 0x718   : > { %v4849_v24 = vmul.f32 1.442695, %v4775_v25  ;;  %v4851_v22 = vmul.f32 1.442695, %v4776_v3  ;;  %v6318_v56 = vpop.f32.mrb[193].mxu0 }
 0x719   : > { %v5110_v36 = vpop.permute.xlu0 %5109  ;;  %v5112_v11 = vpop.permute.xlu1 %5111  ;;  %v10732_v6 = vadd.f32 %v6318_v56, %v6317_v16  ;;  %v13176_v56 = vld [vmem:[#allocation99_spill] sm:$0xff]  ;;  %v13177_v16 = vld [vmem:[#allocation100_spill] sm:$0xff] }
 0x71a   : > { %7209 = vpow2.f32 %v4849_v24  ;;  %4742 = vmax.xlane.f32.xlu0 %v13164_v52  ;;  %6469 = vmatprep.subr.bf16.mxu0 %v5110_v36  ;;  %v6320_v57 = vpop.f32.mrb[194].mxu0  ;;  %v13172_v52 = vmax.f32 %v13170_v32, %v13171_v35  ;;  %v13173_v36 = vld [vmem:[#allocation97_spill] sm:$0xff]  ;;  %v13183_v35 = vld [vmem:[#allocation102_spill] sm:$0xff] }
 0x71b   : > { %7211 = vpow2.f32 %v4851_v22  ;;  %4751 = vmax.xlane.f32.xlu1 %v13167_v15  ;;  %6470 = vmatpush3.bf16.msra.mxu0 %v5094_v33  ;;  %13168 = vst [vmem:[#allocation136_spill] sm:$0xff] %v10732_v6  ;;  %v6321_v25 = vpop.f32.mrb[195].mxu0  ;;  %v13174_v22 = vld [vmem:[#allocation103_spill] sm:$0xff] }
 0x71c   : > { %6471 = vmatprep.subr.bf16.mxu0 %v5112_v11  ;;  %v10734_v24 = vadd.f32 %v6321_v25, %v6320_v57  ;;  %v13175_v8 = vmax.f32 %v13173_v36, %v13174_v22  ;;  %v13178_v11 = vmax.f32 %v13176_v56, %v13177_v16  ;;  %v13179_v57 = vld [vmem:[#allocation119_spill] sm:$0xff] }
 0x71d   : > { %v5096_v3 = vpop.permute.xlu0 %5095  ;;  %v13180_v25 = vmax.f32 %v10292_v29, %v13179_v57  ;;  %v13184_v57 = vld [vmem:[#allocation112_spill] sm:$0xff] }
 0x71e   : > { %13169 = vst [vmem:[#allocation137_spill] sm:$0xff] %v10734_v24  ;;  %4748 = vmax.xlane.f32.xlu0 %v13172_v52 }
 0x71f   : > { %4757 = vmax.xlane.f32.xlu1 %v13175_v8  ;;  %6472 = vmatpush3.bf16.msra.mxu0 %v5096_v3  ;;  %v6323_v6 = vpop.f32.mrb[196].mxu0 }
 0x720   : > { %v10742_v15 = vpop.eup %7205  ;;  %v6324_v24 = vpop.f32.mrb[197].mxu0 }
 0x721   : > { %v10744_v33 = vpop.eup %7207  ;;  %v10756_v8 = vadd.f32 %v6324_v24, %v6323_v6  ;;  %v6326_v3 = vpop.f32.mrb[198].mxu0  ;;  %v13186_v24 = vld [vmem:[#allocation22_spill] sm:$0xff] }
 0x722   : > { %4754 = vmax.xlane.f32.xlu0 %v13178_v11  ;;  %v4969_v52 = vadd.f32 %v10744_v33, %v10742_v15  ;;  %v6327_v11 = vpop.f32.mrb[199].mxu0 }
 0x723   : > { %4763 = vmax.xlane.f32.xlu1 %v13180_v25  ;;  %13181 = vst [vmem:[#allocation17_spill] sm:$0xff] %v10756_v8  ;;  %v10762_v56 = vadd.f32 %v6327_v11, %v6326_v3  ;;  %v13185_v25 = vmax.f32 %v13183_v35, %v13184_v57  ;;  %v13187_v8 = vld [vmem:[#allocation86_spill] sm:$0xff]  ;;  %v13190_v35 = vld [vmem:[#allocation203_spill] sm:$0xff] }
 0x724   : > { %v10754_v22 = vpop.eup %7209 }
 0x725   : > { %v10758_v36 = vpop.eup %7211  ;;  %13182 = vst [vmem:[#allocation133_spill] sm:$0xff] %v10762_v56 }
 0x726   : > { %4760 = vmax.xlane.f32.xlu0 %v13185_v25  ;;  %v4972_v29 = vadd.f32 %v10758_v36, %v10754_v22  ;;  %v13189_v25 = vld [vmem:[#allocation89_spill] sm:$0xff] }
 0x727   : > { %2667 = vadd.xlane.f32.xlu1 %v13186_v24  ;;  %v6329_v32 = vpop.f32.mrb[200].mxu0  ;;  %v13192_v24 = vld [vmem:[#allocation219_spill] sm:$0xff] }
 0x728   : > { %v6330_v16 = vpop.f32.mrb[201].mxu0 }
 0x729   : > { %v10774_v3 = vadd.f32 %v6330_v16, %v6329_v32  ;;  %v6332_v11 = vpop.f32.mrb[202].mxu0  ;;  %v13193_v16 = vld [vmem:[#allocation215_spill] sm:$0xff] }
 0x72a   : > { %2664 = vadd.xlane.f32.xlu0 %v13187_v8  ;;  %v6333_v56 = vpop.f32.mrb[203].mxu0 }
 0x72b   : > { %2673 = vadd.xlane.f32.xlu1 %v13188_v61  ;;  %v10776_v57 = vadd.f32 %v6333_v56, %v6332_v11  ;;  %v13196_v56 = vld [vmem:[#allocation96_spill] sm:$0xff]  ;;  %v13199_v11 = vld [vmem:[#allocation94_spill] sm:$0xff] }
 0x72e   : > { %2670 = vadd.xlane.f32.xlu0 %v13189_v25 }
 0x72f   : > { %3822 = vadd.xlane.f32.xlu1 %v13190_v35  ;;  %v6335_v6 = vpop.f32.mrb[204].mxu0  ;;  %v13194_v35 = vld [vmem:[#allocation93_spill] sm:$0xff] }
 0x730   : > { %v6336_v8 = vpop.f32.mrb[205].mxu0 }
 0x731   : > { %v10782_v26 = vadd.f32 %v6336_v8, %v6335_v6  ;;  %v6338_v61 = vpop.f32.mrb[206].mxu0  ;;  %v13197_v6 = vld [vmem:[#allocation95_spill] sm:$0xff] }
 0x732   : > { %3819 = vadd.xlane.f32.xlu0 %v13191_v9  ;;  %v6339_v39 = vpop.f32.mrb[207].mxu0  ;;  %v13195_v9 = vld [vmem:[#allocation92_spill] sm:$0xff] }
 0x733   : > { %3828 = vadd.xlane.f32.xlu1 %v13192_v24  ;;  %v10784_v32 = vadd.f32 %v6339_v39, %v6338_v61  ;;  %v13198_v39 = vld [vmem:[#allocation98_spill] sm:$0xff] }
 0x736   : > { %3825 = vadd.xlane.f32.xlu0 %v13193_v16 }
 0x737   : > { %4961 = vadd.xlane.f32.xlu1 %v10614_v46 }
 0x73a   : > { %4958 = vadd.xlane.f32.xlu0 %v10619_v21 }
 0x73b   : > { %4967 = vadd.xlane.f32.xlu1 %v10667_v30 }
 0x73e   : > { %4964 = vadd.xlane.f32.xlu0 %v10657_v55 }
 0x73f   : > { %2679 = vadd.xlane.f32.xlu1 %v13194_v35 }
 0x742   : > { %2676 = vadd.xlane.f32.xlu0 %v13195_v9 }
 0x743   : > { %2685 = vadd.xlane.f32.xlu1 %v13196_v56 }
 0x746   : > { %2682 = vadd.xlane.f32.xlu0 %v13197_v6 }
 0x747   : > { %3834 = vadd.xlane.f32.xlu1 %v13198_v39 }
 0x74a   : > { %3831 = vadd.xlane.f32.xlu0 %v13199_v11  ;;  %v4689_v25 = vpop.xlane.xlu1 %4688 }
 0x74b   : > { %3840 = vadd.xlane.f32.xlu1 %v10312_v7  ;;  %v4777_v46 = vsub.f32 %v13099_v54, %v4689_v25  ;;  %v4778_v21 = vsub.f32 %v13100_v47, %v4689_v25 }
 0x74d   : > { %v4853_v55 = vmul.f32 1.442695, %v4777_v46  ;;  %v4855_v30 = vmul.f32 1.442695, %v4778_v21 }
 0x74e   : > { %3837 = vadd.xlane.f32.xlu0 %v10310_v41  ;;  %v4692_v24 = vpop.xlane.xlu0 %4691  ;;  %v5098_v16 = vpop.permute.xlu1 %5097 }
 0x74f   : > { %v4779_v8 = vsub.f32 %v13103_v48, %v4692_v24  ;;  %v4780_v61 = vsub.f32 %v13104_v4, %v4692_v24  ;;  %4973 = vadd.xlane.f32.xlu1 %v4972_v29  ;;  %7213 = vpow2.f32 %v4853_v55  ;;  %v13200_v29 = vpack.c.bf16 %v10601_v1, %v10611_v38  ;;  %v13202_v1 = vld [vmem:[#allocation131_spill] sm:$0xff] }
 0x750   : > { %7215 = vpow2.f32 %v4855_v30 }
 0x751   : > { %v4857_v35 = vmul.f32 1.442695, %v4779_v8  ;;  %v4859_v9 = vmul.f32 1.442695, %v4780_v61  ;;  %v13204_v61 = vpack.c.bf16 %v10758_v36, %v10744_v33 }
 0x752   : > { %4970 = vadd.xlane.f32.xlu0 %v4969_v52  ;;  %v5114_v7 = vpop.permute.xlu0 %5113  ;;  %v5116_v54 = vpop.permute.xlu1 %5115  ;;  %v13201_v52 = vpack.c.bf16 %v10661_v49, %v10653_v44  ;;  %v13203_v44 = vpack.c.bf16 %v10659_v5, %v10651_v34  ;;  %v13208_v5 = vpack.c.bf16 %v10754_v22, %v10742_v15 }
 0x753   : > { %7217 = vpow2.f32 %v4857_v35  ;;  %6473 = vmatprep.subr.bf16.mxu0 %v5114_v7 }
 0x754   : > { %7219 = vpow2.f32 %v4859_v9  ;;  %6474 = vmatpush3.bf16.msra.mxu0 %v5098_v16  ;;  %v13205_v9 = vld [vmem:[#allocation55_spill] sm:$0xff] }
 0x755   : > { %6475 = vmatprep.subr.bf16.mxu0 %v5116_v54  ;;  %v13206_v54 = vld [vmem:[#allocation135_spill] sm:$0xff] }
 0x756   : > { %v5100_v41 = vpop.permute.xlu0 %5099 }
 0x758   : > { %6476 = vmatpush3.bf16.msra.mxu0 %v5100_v41 }
 0x759   : > { %v7214_v47 = vpop.eup %7213  ;;  %v6341_v56 = vpop.f32.mrb[208].mxu0 }
 0x75a   : > { %v7216_v48 = vpop.eup %7215  ;;  %v6342_v4 = vpop.f32.mrb[209].mxu0 }
 0x75b   : > { %5166 = vmatmul.mubr.bf16.vlgmr.msra.gmra.mrb[0].mxu0 %v13200_v29  ;;  %v4975_v6 = vadd.f32 %v7216_v48, %v7214_v47  ;;  %v10809_v11 = vadd.f32 %v6342_v4, %v6341_v56  ;;  %v6344_v25 = vpop.f32.mrb[210].mxu0 }
 0x75c   : > { %5173 = vmatprep.mubr.bf16.mxu0 %v13201_v52  ;;  %v6345_v55 = vpop.f32.mrb[211].mxu0 }
 0x75d   : > { %v7218_v39 = vpop.eup %7217  ;;  %4976 = vadd.xlane.f32.xlu0 %v4975_v6  ;;  %v10811_v30 = vadd.f32 %v6345_v55, %v6344_v25 }
 0x75e   : > { %v7220_v46 = vpop.eup %7219  ;;  %v5059_v21 = vpack.c.bf16 %v7218_v39, %v7214_v47  ;;  %v13207_v47 = vld [vmem:[#allocation139_spill] sm:$0xff] }
 0x75f   : > { %v4978_v24 = vadd.f32 %v7220_v46, %v7218_v39  ;;  %v5060_v8 = vpack.c.bf16 %v7220_v46, %v7216_v48 }
 0x761   : > { %4979 = vadd.xlane.f32.xlu1 %v4978_v24  ;;  %2688 = vadd.xlane.f32.xlu0 %v13202_v1  ;;  %v6347_v38 = vpop.f32.mrb[212].mxu0 }
 0x762   : > { %v6348_v49 = vpop.f32.mrb[213].mxu0 }
 0x763   : > { %5174 = vmatmul.mubr.bf16.gmra.mrb[4].mxu0 %v13203_v44  ;;  %v10820_v16 = vadd.f32 %v6348_v49, %v6347_v38  ;;  %v6350_v35 = vpop.f32.mrb[214].mxu0 }
 0x764   : > { %5181 = vmatprep.mubr.bf16.mxu0 %v13204_v61  ;;  %v6351_v7 = vpop.f32.mrb[215].mxu0 }
 0x765   : > { %2691 = vadd.xlane.f32.xlu1 %v13205_v9  ;;  %2694 = vadd.xlane.f32.xlu0 %v13206_v54  ;;  %v10824_v41 = vadd.f32 %v6351_v7, %v6350_v35 }
 0x769   : > { %2697 = vadd.xlane.f32.xlu1 %v13207_v47  ;;  %3843 = vadd.xlane.f32.xlu0 %v10360_v18  ;;  %v6353_v34 = vpop.f32.mrb[216].mxu0 }
 0x76a   : > { %v6354_v36 = vpop.f32.mrb[217].mxu0 }
 0x76b   : > { %5182 = vmatmul.mubr.bf16.gmra.mrb[8].mxu0 %v13208_v5  ;;  %v10831_v33 = vadd.f32 %v6354_v36, %v6353_v34  ;;  %v6356_v48 = vpop.f32.mrb[218].mxu0 }
 0x76c   : > { %5189 = vmatprep.mubr.bf16.mxu0 %v5060_v8  ;;  %v6357_v56 = vpop.f32.mrb[219].mxu0 }
 0x76d   : > { %13209 = vst [vmem:[#allocation134_spill] sm:$0xff] %v10831_v33  ;;  %3846 = vadd.xlane.f32.xlu1 %v10391_v43  ;;  %3849 = vadd.xlane.f32.xlu0 %v10396_v19  ;;  %v10835_v29 = vadd.f32 %v6357_v56, %v6356_v48 }
 0x76f   : > { %13210 = vst [vmem:[#allocation144_spill] sm:$0xff] %v10835_v29  ;;  %v13279_v29 = vld [vmem:[#allocation21_spill] sm:$0xff] }
 0x771   : > { %3852 = vadd.xlane.f32.xlu1 %v10433_v62 }
 0x772   : > { %v6359_v18 = vpop.f32.mrb[220].mxu0 }
 0x773   : > { %5190 = vmatmul.mubr.bf16.gmra.mrb[12].mxu0 %v5059_v21  ;;  %v6360_v4 = vpop.f32.mrb[221].mxu0 }
 0x774   : > { %v10838_v52 = vadd.f32 %v6360_v4, %v6359_v18  ;;  %v6362_v22 = vpop.f32.mrb[222].mxu0 }
 0x775   : > { %v6363_v15 = vpop.f32.mrb[223].mxu0 }
 0x776   : > { %13211 = vst [vmem:[#allocation7_spill] sm:$0xff] %v10838_v52  ;;  %v10840_v6 = vadd.f32 %v6363_v15, %v6362_v22 }
 0x778   : > { %13212 = vst [vmem:[#allocation141_spill] sm:$0xff] %v10840_v6  ;;  %v13277_v6 = vld [vmem:[#allocation108_spill] sm:$0xff] }
 0x77b   : > { %v6365_v39 = vpop.f32.mrb[224].mxu0 }
 0x77c   : > { %v6366_v25 = vpop.f32.mrb[225].mxu0 }
 0x77d   : > { %v10842_v46 = vadd.f32 %v6366_v25, %v6365_v39  ;;  %v6368_v43 = vpop.f32.mrb[226].mxu0 }
 0x77e   : > { %v6369_v55 = vpop.f32.mrb[227].mxu0 }
 0x77f   : > { %13213 = vst [vmem:[#allocation142_spill] sm:$0xff] %v10842_v46  ;;  %v10844_v19 = vadd.f32 %v6369_v55, %v6368_v43  ;;  %v13273_v46 = vld [vmem:[#allocation155_spill] sm:$0xff] }
 0x781   : > { %13214 = vst [vmem:[#allocation158_spill] sm:$0xff] %v10844_v19 }
 0x783   : > { %v6371_v24 = vpop.f32.mrb[228].mxu0  ;;  %v4695_v62 = vpop.xlane.xlu1 %4694 }
 0x784   : > { %v6372_v8 = vpop.f32.mrb[229].mxu0  ;;  %v4781_v38 = vsub.f32 %v13111_v58, %v4695_v62  ;;  %v4782_v44 = vsub.f32 %v13112_v60, %v4695_v62 }
 0x785   : > { %v10846_v1 = vadd.f32 %v6372_v8, %v6371_v24  ;;  %v6374_v21 = vpop.f32.mrb[230].mxu0 }
 0x786   : > { %v6375_v49 = vpop.f32.mrb[231].mxu0  ;;  %v4861_v61 = vmul.f32 1.442695, %v4781_v38  ;;  %v4863_v35 = vmul.f32 1.442695, %v4782_v44 }
 0x787   : > { %13215 = vst [vmem:[#allocation159_spill] sm:$0xff] %v10846_v1  ;;  %v10850_v9 = vadd.f32 %v6375_v49, %v6374_v21  ;;  %v4698_v7 = vpop.xlane.xlu0 %4697  ;;  %v4704_v34 = vpop.xlane.xlu1 %4703 }
 0x788   : > { %v4783_v54 = vsub.f32 %v13114_v0, %v4698_v7  ;;  %v4784_v47 = vsub.f32 %v13115_v13, %v4698_v7  ;;  %7221 = vpow2.f32 %v4861_v61  ;;  %v4787_v5 = vsub.f32 %v13117_v31, %v4704_v34 }
 0x789   : > { %13216 = vst [vmem:[#allocation160_spill] sm:$0xff] %v10850_v9  ;;  %v4788_v36 = vsub.f32 %v13118_v40, %v4704_v34  ;;  %7223 = vpow2.f32 %v4863_v35 }
 0x78a   : > { %v4865_v58 = vmul.f32 1.442695, %v4783_v54  ;;  %v4867_v48 = vmul.f32 1.442695, %v4784_v47  ;;  %v4873_v60 = vmul.f32 1.442695, %v4787_v5 }
 0x78b   : > { %v4875_v56 = vmul.f32 1.442695, %v4788_v36  ;;  %v6377_v18 = vpop.f32.mrb[232].mxu0  ;;  %v4701_v4 = vpop.xlane.xlu0 %4700 }
 0x78c   : > { %7225 = vpow2.f32 %v4865_v58  ;;  %v6378_v22 = vpop.f32.mrb[233].mxu0  ;;  %v4785_v15 = vsub.f32 %v13120_v50, %v4701_v4  ;;  %v4786_v0 = vsub.f32 %v13121_v23, %v4701_v4  ;;  %v4710_v13 = vpop.xlane.xlu1 %4709 }
 0x78d   : > { %7227 = vpow2.f32 %v4867_v48  ;;  %v10858_v39 = vadd.f32 %v6378_v22, %v6377_v18  ;;  %v6380_v31 = vpop.f32.mrb[234].mxu0  ;;  %v4791_v40 = vsub.f32 %v13123_v12, %v4710_v13  ;;  %v4792_v25 = vsub.f32 %v13124_v59, %v4710_v13 }
 0x78e   : > { %7229 = vpow2.f32 %v4873_v60  ;;  %v4869_v43 = vmul.f32 1.442695, %v4785_v15  ;;  %v4871_v55 = vmul.f32 1.442695, %v4786_v0  ;;  %v6381_v24 = vpop.f32.mrb[235].mxu0 }
 0x78f   : > { %13217 = vst [vmem:[#allocation161_spill] sm:$0xff] %v10858_v39  ;;  %7231 = vpow2.f32 %v4875_v56  ;;  %v4881_v8 = vmul.f32 1.442695, %v4791_v40  ;;  %v4883_v62 = vmul.f32 1.442695, %v4792_v25  ;;  %v10862_v21 = vadd.f32 %v6381_v24, %v6380_v31  ;;  %v4707_v50 = vpop.xlane.xlu0 %4706  ;;  %v13270_v39 = vld [vmem:[#allocation26_spill] sm:$0xff] }
 0x790   : > { %7233 = vpow2.f32 %v4869_v43  ;;  %v4789_v23 = vsub.f32 %v13126_v14, %v4707_v50  ;;  %v4790_v38 = vsub.f32 %v13127_v42, %v4707_v50  ;;  %v4716_v44 = vpop.xlane.xlu1 %4715 }
 0x791   : > { %13218 = vst [vmem:[#allocation10_spill] sm:$0xff] %v10862_v21  ;;  %7235 = vpow2.f32 %v4871_v55  ;;  %v4795_v12 = vsub.f32 %v13129_v20, %v4716_v44  ;;  %v4796_v59 = vsub.f32 %v13130_v63, %v4716_v44 }
 0x792   : > { %7237 = vpow2.f32 %v4881_v8  ;;  %v4877_v49 = vmul.f32 1.442695, %v4789_v23  ;;  %v4879_v61 = vmul.f32 1.442695, %v4790_v38  ;;  %v7222_v35 = vpop.eup %7221 }
 0x793   : > { %7239 = vpow2.f32 %v4883_v62  ;;  %v4889_v7 = vmul.f32 1.442695, %v4795_v12  ;;  %v4891_v54 = vmul.f32 1.442695, %v4796_v59  ;;  %v6383_v47 = vpop.f32.mrb[236].mxu0  ;;  %v4713_v34 = vpop.xlane.xlu0 %4712 }
 0x794   : > { %v7224_v5 = vpop.eup %7223  ;;  %7241 = vpow2.f32 %v4877_v49  ;;  %v6384_v14 = vpop.f32.mrb[237].mxu0  ;;  %v4793_v42 = vsub.f32 %v13132_v51, %v4713_v34  ;;  %v4794_v36 = vsub.f32 %v13133_v17, %v4713_v34 }
 0x795   : > { %v4722_v58 = vpop.xlane.xlu1 %4721  ;;  %7243 = vpow2.f32 %v4879_v61  ;;  %v10870_v20 = vadd.f32 %v6384_v14, %v6383_v47  ;;  %v6386_v63 = vpop.f32.mrb[238].mxu0  ;;  %v4981_v15 = vadd.f32 %v7224_v5, %v7222_v35 }
 0x796   : > { %v4799_v48 = vsub.f32 %v13135_v2, %v4722_v58  ;;  %v4800_v60 = vsub.f32 %v13136_v53, %v4722_v58  ;;  %v7226_v56 = vpop.eup %7225  ;;  %7245 = vpow2.f32 %v4889_v7  ;;  %v4885_v18 = vmul.f32 1.442695, %v4793_v42  ;;  %v6387_v22 = vpop.f32.mrb[239].mxu0  ;;  %v13224_v58 = vld [vmem:[#allocation206_spill] sm:$0xff] }
 0x797   : > { %13219 = vst [vmem:[#allocation19_spill] sm:$0xff] %v10870_v20  ;;  %v4887_v4 = vmul.f32 1.442695, %v4794_v36  ;;  %v7228_v0 = vpop.eup %7227  ;;  %v5061_v13 = vpack.c.bf16 %v7226_v56, %v7222_v35  ;;  %7247 = vpow2.f32 %v4891_v54  ;;  %v4719_v31 = vpop.xlane.xlu0 %4718  ;;  %v10876_v25 = vadd.f32 %v6387_v22, %v6386_v63  ;;  %4982 = vadd.xlane.f32.xlu0 %v4981_v15  ;;  %v13221_v35 = vld [vmem:[#allocation198_spill] sm:$0xff]  ;;  %v13222_v54 = vld [vmem:[#allocation199_spill] sm:$0xff]  ;;  %v13269_v20 = vld [vmem:[#allocation64_spill] sm:$0xff] }
 0x798   : > { %v4897_v51 = vmul.f32 1.442695, %v4799_v48  ;;  %v4899_v17 = vmul.f32 1.442695, %v4800_v60  ;;  %v10874_v40 = vpop.eup %7229  ;;  %7249 = vpow2.f32 %v4885_v18  ;;  %v4797_v53 = vsub.f32 %v13138_v28, %v4719_v31  ;;  %v13225_v48 = vld [vmem:[#allocation207_spill] sm:$0xff] }
 0x799   : > { %13220 = vst [vmem:[#allocation20_spill] sm:$0xff] %v10876_v25  ;;  %v4798_v2 = vsub.f32 %v13139_v45, %v4719_v31  ;;  %v4728_v43 = vpop.xlane.xlu1 %4727  ;;  %v7232_v55 = vpop.eup %7231  ;;  %7251 = vpow2.f32 %v4887_v4  ;;  %v5062_v62 = vpack.c.bf16 %v7228_v0, %v7224_v5  ;;  %v4984_v44 = vadd.f32 %v7228_v0, %v7226_v56 }
 0x79a   : > { %v4803_v24 = vsub.f32 %v13141_v27, %v4728_v43  ;;  %v4804_v8 = vsub.f32 %v13142_v37, %v4728_v43  ;;  %v10882_v50 = vpop.eup %7233  ;;  %7253 = vpow2.f32 %v4897_v51  ;;  %v4893_v23 = vmul.f32 1.442695, %v4797_v53 }
 0x79b   : > { %v4895_v38 = vmul.f32 1.442695, %v4798_v2  ;;  %v7236_v12 = vpop.eup %7235  ;;  %v5063_v28 = vpack.c.bf16 %v10874_v40, %v10882_v50  ;;  %7255 = vpow2.f32 %v4899_v17  ;;  %v6389_v49 = vpop.f32.mrb[240].mxu0  ;;  %5197 = vmatprep.mubr.bf16.mxu0 %v5062_v62  ;;  %4985 = vadd.xlane.f32.xlu1 %v4984_v44  ;;  %v4990_v5 = vadd.f32 %v7232_v55, %v10874_v40  ;;  %v13227_v62 = vld [vmem:[#allocation205_spill] sm:$0xff]  ;;  %v13236_v40 = vld [vmem:[#allocation174_spill] sm:$0xff] }
 0x79c   : > { %v4905_v45 = vmul.f32 1.442695, %v4803_v24  ;;  %v4907_v59 = vmul.f32 1.442695, %v4804_v8  ;;  %v4725_v61 = vpop.xlane.xlu0 %4724  ;;  %v10886_v27 = vpop.eup %7237  ;;  %7257 = vpow2.f32 %v4893_v23  ;;  %5198 = vmatmul.mubr.bf16.gmra.mrb[16].mxu0 %v5061_v13  ;;  %v5064_v15 = vpack.c.bf16 %v7232_v55, %v7236_v12 }
 0x79d   : > { %v6390_v37 = vpop.f32.mrb[241].mxu0  ;;  %v4801_v7 = vsub.f32 %v13221_v35, %v4725_v61  ;;  %v4802_v47 = vsub.f32 %v13222_v54, %v4725_v61  ;;  %v4734_v34 = vpop.xlane.xlu1 %4733  ;;  %7259 = vpow2.f32 %v4895_v38  ;;  %v4987_v43 = vadd.f32 %v7236_v12, %v10882_v50  ;;  %v13228_v38 = vld [vmem:[#allocation213_spill] sm:$0xff] }
 0x79e   : > { %v7240_v14 = vpop.eup %7239  ;;  %v10891_v42 = vadd.f32 %v6390_v37, %v6389_v49  ;;  %v6392_v36 = vpop.f32.mrb[242].mxu0  ;;  %v4807_v63 = vsub.f32 %v13224_v58, %v4734_v34  ;;  %v4808_v60 = vsub.f32 %v13225_v48, %v4734_v34  ;;  %7261 = vpow2.f32 %v4905_v45  ;;  %5205 = vmatprep.mubr.bf16.mxu0 %v5064_v15  ;;  %v13229_v45 = vld [vmem:[#allocation214_spill] sm:$0xff]  ;;  %v13230_v58 = vld [vmem:[#allocation176_spill] sm:$0xff] }
 0x79f   : > { %v10895_v56 = vpop.eup %7241  ;;  %v4901_v18 = vmul.f32 1.442695, %v4801_v7  ;;  %v4903_v4 = vmul.f32 1.442695, %v4802_v47  ;;  %v6393_v22 = vpop.f32.mrb[243].mxu0  ;;  %7263 = vpow2.f32 %v4907_v59  ;;  %4991 = vadd.xlane.f32.xlu1 %v4990_v5  ;;  %4988 = vadd.xlane.f32.xlu0 %v4987_v43  ;;  %v10916_v12 = vadd.f32 %v7240_v14, %v10886_v27  ;;  %v13235_v43 = vld [vmem:[#allocation220_spill] sm:$0xff] }
 0x7a0   : > { %13223 = vst [vmem:[#allocation9_spill] sm:$0xff] %v10891_v42  ;;  %v10897_v0 = vpop.eup %7243  ;;  %v5065_v13 = vpack.c.bf16 %v10886_v27, %v10895_v56  ;;  %v4913_v51 = vmul.f32 1.442695, %v4807_v63  ;;  %v4915_v17 = vmul.f32 1.442695, %v4808_v60  ;;  %v4731_v31 = vpop.xlane.xlu0 %4730  ;;  %v10903_v2 = vadd.f32 %v6393_v22, %v6392_v36  ;;  %v13232_v60 = vld [vmem:[#allocation212_spill] sm:$0xff] }
 0x7a1   : > { %v10901_v53 = vpop.eup %7245  ;;  %7265 = vpow2.f32 %v4901_v18  ;;  %v4805_v55 = vsub.f32 %v13150_v10, %v4731_v31  ;;  %v4740_v24 = vpop.xlane.xlu1 %4739  ;;  %v4806_v23 = vsub.f32 %v13227_v62, %v4731_v31  ;;  %v5066_v37 = vpack.c.bf16 %v7240_v14, %v10897_v0  ;;  %v13231_v14 = vld [vmem:[#allocation211_spill] sm:$0xff] }
 0x7a2   : > { %13226 = vst [vmem:[#allocation27_spill] sm:$0xff] %v10903_v2  ;;  %v10907_v8 = vpop.eup %7247  ;;  %7267 = vpow2.f32 %v4903_v4  ;;  %v4811_v44 = vsub.f32 %v13228_v38, %v4740_v24  ;;  %v4812_v59 = vsub.f32 %v13229_v45, %v4740_v24  ;;  %v13249_v27 = vld [vmem:[#allocation103_spill] sm:$0xff] }
 0x7a3   : > { %v10912_v49 = vpop.eup %7249  ;;  %7269 = vpow2.f32 %v4913_v51  ;;  %v4909_v61 = vmul.f32 1.442695, %v4805_v55  ;;  %v4911_v7 = vmul.f32 1.442695, %v4806_v23  ;;  %v6395_v47 = vpop.f32.mrb[244].mxu0  ;;  %2703 = vadd.xlane.f32.xlu1 %v13230_v58  ;;  %2700 = vadd.xlane.f32.xlu0 %v13236_v40  ;;  %v13240_v58 = vld [vmem:[#allocation217_spill] sm:$0xff] }
 0x7a4   : > { %v10918_v10 = vpop.eup %7251  ;;  %7271 = vpow2.f32 %v4915_v17  ;;  %v4921_v54 = vmul.f32 1.442695, %v4811_v44  ;;  %v4737_v34 = vpop.xlane.xlu0 %4736  ;;  %v4923_v36 = vmul.f32 1.442695, %v4812_v59  ;;  %5206 = vmatmul.mubr.bf16.gmra.mrb[20].mxu0 %v5063_v28  ;;  %v13234_v17 = vld [vmem:[#allocation218_spill] sm:$0xff] }
 0x7a5   : > { %v10922_v5 = vpop.eup %7253  ;;  %7273 = vpow2.f32 %v4909_v61  ;;  %v6396_v63 = vpop.f32.mrb[245].mxu0  ;;  %v4809_v48 = vsub.f32 %v13231_v14, %v4737_v34  ;;  %v4810_v18 = vsub.f32 %v13232_v60, %v4737_v34  ;;  %5213 = vmatprep.mubr.bf16.mxu0 %v5066_v37  ;;  %v5068_v23 = vpack.c.bf16 %v10907_v8, %v10918_v10  ;;  %v13241_v60 = vld [vmem:[#allocation87_spill] sm:$0xff] }
 0x7a6   : > { %v4746_v4 = vpop.xlane.xlu1 %4745  ;;  %v10930_v22 = vpop.eup %7255  ;;  %7275 = vpow2.f32 %v4911_v7  ;;  %v10932_v15 = vadd.f32 %v6396_v63, %v6395_v47  ;;  %v13239_v47 = vld [vmem:[#allocation216_spill] sm:$0xff] }
 0x7a7   : > { %v6398_v51 = vpop.f32.mrb[246].mxu0  ;;  %v4815_v31 = vsub.f32 %v13234_v17, %v4746_v4  ;;  %v4816_v55 = vsub.f32 %v13235_v43, %v4746_v4  ;;  %v10936_v24 = vpop.eup %7257  ;;  %7277 = vpow2.f32 %v4921_v54  ;;  %v4917_v50 = vmul.f32 1.442695, %v4809_v48  ;;  %v13238_v54 = vld [vmem:[#allocation180_spill] sm:$0xff] }
 0x7a8   : > { %13233 = vst [vmem:[#allocation164_spill] sm:$0xff] %v10932_v15  ;;  %v4919_v28 = vmul.f32 1.442695, %v4810_v18  ;;  %v6399_v62 = vpop.f32.mrb[247].mxu0  ;;  %v10941_v38 = vpop.eup %7259  ;;  %7279 = vpow2.f32 %v4923_v36  ;;  %2709 = vadd.xlane.f32.xlu1 %v13238_v54  ;;  %v13242_v18 = vld [vmem:[#allocation88_spill] sm:$0xff]  ;;  %v10958_v17 = vadd.f32 %v10897_v0, %v10895_v56 }
 0x7a9   : > { %v4929_v45 = vmul.f32 1.442695, %v4815_v31  ;;  %v4931_v59 = vmul.f32 1.442695, %v4816_v55  ;;  %v4743_v61 = vpop.xlane.xlu0 %4742  ;;  %v10945_v37 = vpop.eup %7261  ;;  %7281 = vpow2.f32 %v4917_v50  ;;  %v10947_v7 = vadd.f32 %v6399_v62, %v6398_v51  ;;  %v13243_v31 = vld [vmem:[#allocation179_spill] sm:$0xff] }
 0x7aa   : > { %v4813_v34 = vsub.f32 %v13239_v47, %v4743_v61  ;;  %v4814_v63 = vsub.f32 %v13240_v58, %v4743_v61  ;;  %v4752_v14 = vpop.xlane.xlu1 %4751  ;;  %v10952_v48 = vpop.eup %7263  ;;  %7283 = vpow2.f32 %v4919_v28  ;;  %2706 = vadd.xlane.f32.xlu0 %v13243_v31  ;;  %v13245_v58 = vld [vmem:[#allocation84_spill] sm:$0xff]  ;;  %v10992_v28 = vadd.f32 %v10918_v10, %v10912_v49 }
 0x7ab   : > { %13237 = vst [vmem:[#allocation165_spill] sm:$0xff] %v10947_v7  ;;  %v4819_v36 = vsub.f32 %v13241_v60, %v4752_v14  ;;  %v4820_v4 = vsub.f32 %v13242_v18, %v4752_v14  ;;  %v10960_v51 = vpop.eup %7265  ;;  %7285 = vpow2.f32 %v4929_v45  ;;  %v6401_v0 = vpop.f32.mrb[248].mxu0  ;;  %v13244_v45 = vld [vmem:[#allocation149_spill] sm:$0xff]  ;;  %v13254_v10 = vld [vmem:[#allocation100_spill] sm:$0xff] }
 0x7ac   : > { %v4925_v43 = vmul.f32 1.442695, %v4813_v34  ;;  %v4927_v55 = vmul.f32 1.442695, %v4814_v63  ;;  %v10965_v50 = vpop.eup %7267  ;;  %7287 = vpow2.f32 %v4931_v59  ;;  %3858 = vadd.xlane.f32.xlu1 %v13244_v45  ;;  %v6402_v34 = vpop.f32.mrb[249].mxu0  ;;  %5214 = vmatmul.mubr.bf16.gmra.mrb[24].mxu0 %v5065_v13  ;;  %v13246_v14 = vld [vmem:[#allocation85_spill] sm:$0xff]  ;;  %v10979_v59 = vadd.f32 %v10907_v8, %v10901_v53 }
 0x7ad   : > { %v4937_v62 = vmul.f32 1.442695, %v4819_v36  ;;  %v4939_v61 = vmul.f32 1.442695, %v4820_v4  ;;  %v4749_v54 = vpop.xlane.xlu0 %4748  ;;  %v10969_v47 = vpop.eup %7269  ;;  %v10983_v4 = vadd.f32 %v6402_v34, %v6401_v0  ;;  %5221 = vmatprep.mubr.bf16.mxu0 %v5068_v23  ;;  %v13255_v23 = vld [vmem:[#allocation24_spill] sm:$0xff]  ;;  %v13271_v21 = vpack.c.bf16 %v10945_v37, %v10960_v51 }
 0x7ae   : > { %7289 = vpow2.f32 %v4925_v43  ;;  %v4817_v63 = vsub.f32 %v13245_v58, %v4749_v54  ;;  %v4818_v60 = vsub.f32 %v13246_v14, %v4749_v54  ;;  %v4758_v18 = vpop.xlane.xlu1 %4757  ;;  %v10981_v36 = vpop.eup %7271  ;;  %v13248_v43 = vld [vmem:[#allocation97_spill] sm:$0xff]  ;;  %v13250_v54 = vld [vmem:[#allocation150_spill] sm:$0xff] }
 0x7af   : > { %7291 = vpow2.f32 %v4927_v55  ;;  %13247 = vst [vmem:[#allocation166_spill] sm:$0xff] %v10983_v4  ;;  %v6404_v31 = vpop.f32.mrb[250].mxu0  ;;  %v4823_v45 = vsub.f32 %v13248_v43, %v4758_v18  ;;  %v4824_v56 = vsub.f32 %v13249_v27, %v4758_v18  ;;  %v10987_v13 = vpop.eup %7273  ;;  %3855 = vadd.xlane.f32.xlu0 %v13250_v54 }
 0x7b0   : > { %7293 = vpow2.f32 %v4937_v62  ;;  %v4933_v58 = vmul.f32 1.442695, %v4817_v63  ;;  %v4935_v14 = vmul.f32 1.442695, %v4818_v60  ;;  %v6405_v8 = vpop.f32.mrb[251].mxu0  ;;  %v10994_v55 = vpop.eup %7275  ;;  %v13252_v63 = vld [vmem:[#allocation153_spill] sm:$0xff] }
 0x7b1   : > { %7295 = vpow2.f32 %v4939_v61  ;;  %v4945_v0 = vmul.f32 1.442695, %v4823_v45  ;;  %v4947_v34 = vmul.f32 1.442695, %v4824_v56  ;;  %v4755_v18 = vpop.xlane.xlu0 %4754  ;;  %v10998_v43 = vpop.eup %7277  ;;  %v11000_v62 = vadd.f32 %v6405_v8, %v6404_v31  ;;  %3864 = vadd.xlane.f32.xlu1 %v13252_v63  ;;  %v13253_v60 = vld [vmem:[#allocation99_spill] sm:$0xff]  ;;  %v13257_v31 = vld [vmem:[#allocation154_spill] sm:$0xff] }
 0x7b2   : > { %7297 = vpow2.f32 %v4933_v58  ;;  %v4821_v27 = vsub.f32 %v13253_v60, %v4755_v18  ;;  %v4822_v54 = vsub.f32 %v13254_v10, %v4755_v18  ;;  %v4764_v44 = vpop.xlane.xlu1 %4763  ;;  %v11005_v40 = vpop.eup %7279  ;;  %v13256_v45 = vld [vmem:[#allocation119_spill] sm:$0xff]  ;;  %v13260_v18 = vld [vmem:[#allocation112_spill] sm:$0xff] }
 0x7b3   : > { %13251 = vst [vmem:[#allocation171_spill] sm:$0xff] %v11000_v62  ;;  %7299 = vpow2.f32 %v4935_v14  ;;  %v4827_v61 = vsub.f32 %v13255_v23, %v4764_v44  ;;  %v4828_v56 = vsub.f32 %v13256_v45, %v4764_v44  ;;  %v11011_v58 = vpop.eup %7281  ;;  %3861 = vadd.xlane.f32.xlu0 %v13257_v31  ;;  %v6407_v10 = vpop.f32.mrb[252].mxu0 }
 0x7b4   : > { %7301 = vpow2.f32 %v4945_v0  ;;  %v4941_v8 = vmul.f32 1.442695, %v4821_v27  ;;  %v4943_v63 = vmul.f32 1.442695, %v4822_v54  ;;  %v11016_v60 = vpop.eup %7283  ;;  %v6408_v0 = vpop.f32.mrb[253].mxu0  ;;  %v13258_v27 = vpack.c.bf16 %v10901_v53, %v10912_v49  ;;  %v13259_v54 = vld [vmem:[#allocation102_spill] sm:$0xff] }
 0x7b5   : > { %7303 = vpow2.f32 %v4947_v34  ;;  %v4953_v44 = vmul.f32 1.442695, %v4827_v61  ;;  %v4955_v23 = vmul.f32 1.442695, %v4828_v56  ;;  %v4761_v45 = vpop.xlane.xlu0 %4760  ;;  %v11020_v35 = vpop.eup %7285  ;;  %4997 = vadd.xlane.f32.xlu1 %v10916_v12  ;;  %v11030_v34 = vadd.f32 %v10930_v22, %v10922_v5 }
 0x7b6   : > { %7305 = vpow2.f32 %v4941_v8  ;;  %5222 = vmatmul.mubr.bf16.gmra.mrb[28].mxu0 %v13258_v27  ;;  %v4825_v31 = vsub.f32 %v13259_v54, %v4761_v45  ;;  %v4826_v4 = vsub.f32 %v13260_v18, %v4761_v45  ;;  %v2668_v14 = vpop.xlane.xlu1 %2667  ;;  %v11032_v61 = vpop.eup %7287  ;;  %v11034_v56 = vadd.f32 %v6408_v0, %v6407_v10 }
 0x7b7   : > { %7307 = vpow2.f32 %v4943_v63  ;;  %v6410_v12 = vpop.f32.mrb[254].mxu0  ;;  %v13262_v8 = vpack.c.bf16 %v10930_v22, %v10941_v38  ;;  %v11041_v53 = vadd.f32 %v10941_v38, %v10936_v24  ;;  %4994 = vadd.xlane.f32.xlu0 %v10958_v17  ;;  %v11050_v0 = vadd.f32 %v10952_v48, %v10945_v37  ;;  %v13274_v37 = vld [vmem:[#allocation67_spill] sm:$0xff] }
 0x7b8   : > { %13261 = vst [vmem:[#allocation172_spill] sm:$0xff] %v11034_v56  ;;  %v11045_v18 = vpop.eup %7289  ;;  %7309 = vpow2.f32 %v4953_v44  ;;  %v4949_v63 = vmul.f32 1.442695, %v4825_v31  ;;  %v4951_v10 = vmul.f32 1.442695, %v4826_v4  ;;  %v6411_v45 = vpop.f32.mrb[255].mxu0  ;;  %v11060_v44 = vadd.f32 %v10965_v50, %v10960_v51 }
 0x7b9   : > { %5229 = vmatprep.mubr.bf16.mxu0 %v13262_v8  ;;  %v11052_v22 = vpop.eup %7291  ;;  %7311 = vpow2.f32 %v4955_v23  ;;  %v11056_v27 = vadd.f32 %v6411_v45, %v6410_v12  ;;  %v2665_v54 = vpop.xlane.xlu0 %2664  ;;  %5003 = vadd.xlane.f32.xlu1 %v10979_v59  ;;  %v11069_v8 = vadd.f32 %v10981_v36, %v10969_v47  ;;  %v11073_v23 = vadd.f32 %v10994_v55, %v10987_v13  ;;  %v13275_v51 = vld [vmem:[#allocation18_spill] sm:$0xff] }
 0x7ba   : > { %v11062_v17 = vpop.eup %7293  ;;  %7313 = vpow2.f32 %v4949_v63  ;;  %v2674_v4 = vpop.xlane.xlu1 %2673  ;;  %v11079_v63 = vadd.f32 %v11005_v40, %v10998_v43  ;;  %v11083_v59 = vadd.f32 %v11016_v60, %v11011_v58  ;;  %v11087_v45 = vadd.f32 %v11032_v61, %v11020_v35 }
 0x7bb   : > { %13263 = vst [vmem:[#allocation169_spill] sm:$0xff] %v11056_v27  ;;  %v11075_v12 = vpop.eup %7295  ;;  %7315 = vpow2.f32 %v4951_v10  ;;  %5000 = vadd.xlane.f32.xlu0 %v10992_v28  ;;  %v11094_v10 = vadd.f32 %v11052_v22, %v11045_v18  ;;  %v13265_v28 = vpack.c.bf16 %v10922_v5, %v10936_v24 }
 0x7bc   : > { %v11089_v38 = vpop.eup %7297  ;;  %7317 = vrcp.f32 %v2668_v14  ;;  %v11098_v31 = vadd.f32 %v11075_v12, %v11062_v17  ;;  %v13264_v14 = vld [vmem:[#allocation35_spill] sm:$0xff] }
 0x7bd   : > { %v11100_v49 = vpop.eup %7299  ;;  %7319 = vrcp.f32 %v2665_v54  ;;  %v2671_v27 = vpop.xlane.xlu0 %2670  ;;  %2715 = vadd.xlane.f32.xlu1 %v13264_v14  ;;  %v13266_v54 = vpack.c.bf16 %v10952_v48, %v10965_v50  ;;  %v13267_v14 = vld [vmem:[#allocation29_spill] sm:$0xff]  ;;  %v13268_v48 = vld [vmem:[#allocation72_spill] sm:$0xff] }
 0x7be   : > { %v11104_v62 = vpop.eup %7301  ;;  %7321 = vrcp.f32 %v2674_v4  ;;  %5230 = vmatmul.mubr.bf16.gmra.mrb[32].mxu0 %v13265_v28  ;;  %v3823_v15 = vpop.xlane.xlu1 %3822  ;;  %v11114_v42 = vadd.f32 %v11100_v49, %v11089_v38 }
 0x7bf   : > { %v11116_v56 = vpop.eup %7303  ;;  %5237 = vmatprep.mubr.bf16.mxu0 %v13266_v54  ;;  %7323 = vrcp.f32 %v2671_v27  ;;  %2712 = vadd.xlane.f32.xlu0 %v13267_v14 }
 0x7c0   : > { %v11121_v4 = vpop.eup %7305  ;;  %7325 = vrcp.f32 %v3823_v15  ;;  %v11126_v5 = vadd.f32 %v11116_v56, %v11104_v62 }
 0x7c1   : > { %v11128_v24 = vpop.eup %7307  ;;  %v3820_v7 = vpop.xlane.xlu0 %3819  ;;  %2721 = vadd.xlane.f32.xlu1 %v13268_v48  ;;  %v13272_v48 = vpack.c.bf16 %v10981_v36, %v10994_v55  ;;  %v13280_v55 = vld [vmem:[#allocation73_spill] sm:$0xff] }
 0x7c2   : > { %v11132_v2 = vpop.eup %7309  ;;  %7327 = vrcp.f32 %v3820_v7  ;;  %v3829_v50 = vpop.xlane.xlu1 %3828  ;;  %v11139_v15 = vadd.f32 %v11128_v24, %v11121_v4 }
 0x7c3   : > { %v11141_v54 = vpop.eup %7311  ;;  %2718 = vadd.xlane.f32.xlu0 %v13269_v20  ;;  %7329 = vrcp.f32 %v3829_v50 }
 0x7c4   : > { %v11143_v14 = vpop.eup %7313  ;;  %v11148_v28 = vadd.f32 %v11141_v54, %v11132_v2 }
 0x7c5   : > { %v11150_v7 = vpop.eup %7315  ;;  %v3826_v27 = vpop.xlane.xlu0 %3825  ;;  %3870 = vadd.xlane.f32.xlu1 %v13270_v39 }
 0x7c6   : > { %v7318_v25 = vpop.eup %7317  ;;  %5238 = vmatmul.mubr.bf16.gmra.mrb[36].mxu0 %v13271_v21  ;;  %7331 = vrcp.f32 %v3826_v27  ;;  %v11158_v20 = vpop.xlane.xlu1 %4961  ;;  %v11164_v1 = vadd.f32 %v11150_v7, %v11143_v14 }
 0x7c7   : > { %v7320_v9 = vpop.eup %7319  ;;  %5245 = vmatprep.mubr.bf16.mxu0 %v13272_v48  ;;  %3867 = vadd.xlane.f32.xlu0 %v13273_v46  ;;  %v11174_v27 = vmul.f32 %v7318_v25, %v13275_v51  ;;  %v13281_v25 = vld [vmem:[#allocation109_spill] sm:$0xff] }
 0x7c8   : > { %v7322_v39 = vpop.eup %7321  ;;  %v11171_v21 = vmul.f32 %v7320_v9, %v13274_v37 }
 0x7c9   : > { %v7324_v19 = vpop.eup %7323  ;;  %v11176_v50 = vpop.xlane.xlu0 %4958  ;;  %3876 = vadd.xlane.f32.xlu1 %v13277_v6  ;;  %v11185_v48 = vmul.f32 %v7322_v39, %v13280_v55  ;;  %v13282_v6 = vld [vmem:[#allocation136_spill] sm:$0xff]  ;;  %v13284_v39 = vpack.c.bf16 %v10969_v47, %v10987_v13 }
 0x7ca   : > { %13276 = vst [vmem:[#allocation170_spill] sm:$0xff] %v11176_v50  ;;  %v7326_v52 = vpop.eup %7325  ;;  %v11179_v33 = vpop.xlane.xlu1 %4967  ;;  %v11182_v36 = vmul.f32 %v7324_v19, %v13279_v29 }
 0x7cb   : > { %13278 = vst [vmem:[#allocation37_spill] sm:$0xff] %v11179_v33  ;;  %3873 = vadd.xlane.f32.xlu0 %v13281_v25  ;;  %v13283_v33 = vld [vmem:[#allocation137_spill] sm:$0xff]  ;;  %v13285_v25 = vpack.c.bf16 %v11005_v40, %v11016_v60  ;;  %v13288_v60 = vld [vmem:[#allocation74_spill] sm:$0xff] }
 0x7cc   : > { %v7328_v9 = vpop.eup %7327  ;;  %v11198_v29 = vmul.f32 %v7326_v52, %v13283_v33  ;;  %v13286_v52 = vld [vmem:[#allocation17_spill] sm:$0xff] }
 0x7cd   : > { %v11192_v51 = vpop.xlane.xlu0 %4964  ;;  %v11195_v50 = vmul.f32 %v7328_v9, %v13282_v6  ;;  %v7330_v19 = vpop.eup %7329  ;;  %5009 = vadd.xlane.f32.xlu1 %v11030_v34  ;;  %v13287_v34 = vld [vmem:[#allocation133_spill] sm:$0xff] }
 0x7ce   : > { %5246 = vmatmul.mubr.bf16.gmra.mrb[40].mxu0 %v13284_v39  ;;  %v2680_v55 = vpop.xlane.xlu1 %2679  ;;  %v11214_v37 = vmul.f32 %v7330_v19, %v13287_v34  ;;  %v13291_v39 = vld [vmem:[#allocation77_spill] sm:$0xff] }
 0x7cf   : > { %5253 = vmatprep.mubr.bf16.mxu0 %v13285_v25  ;;  %v4219_v46 = vpack.c.bf16 %v11198_v29, %v11195_v50  ;;  %5006 = vadd.xlane.f32.xlu0 %v11041_v53  ;;  %7333 = vrcp.f32 %v2680_v55  ;;  %v13289_v53 = vpack.c.bf16 %v10998_v43, %v11011_v58  ;;  %v13294_v58 = vld [vmem:[#allocation15_spill] sm:$0xff] }
 0x7d0   : > { %v7332_v9 = vpop.eup %7331 }
 0x7d1   : > { %v2677_v33 = vpop.xlane.xlu0 %2676  ;;  %v11211_v6 = vmul.f32 %v7332_v9, %v13286_v52  ;;  %5015 = vadd.xlane.f32.xlu1 %v11050_v0  ;;  %v13290_v0 = vpack.c.bf16 %v11032_v61, %v11052_v22  ;;  %v13293_v52 = vld [vmem:[#allocation78_spill] sm:$0xff] }
 0x7d2   : > { %7335 = vrcp.f32 %v2677_v33  ;;  %v2686_v47 = vpop.xlane.xlu1 %2685 }
 0x7d3   : > { %5012 = vadd.xlane.f32.xlu0 %v11060_v44  ;;  %7337 = vrcp.f32 %v2686_v47  ;;  %v13292_v44 = vld [vmem:[#allocation188_spill] sm:$0xff]  ;;  %v13295_v47 = vld [vmem:[#allocation63_spill] sm:$0xff] }
 0x7d5   : > { %v2683_v13 = vpop.xlane.xlu0 %2682  ;;  %2727 = vadd.xlane.f32.xlu1 %v13288_v60  ;;  %v13297_v60 = vpack.c.bf16 %v11020_v35, %v11045_v18  ;;  %v13302_v35 = vld [vmem:[#allocation113_spill] sm:$0xff] }
 0x7d6   : > { %5254 = vmatmul.mubr.bf16.gmra.mrb[44].mxu0 %v13289_v53  ;;  %7339 = vrcp.f32 %v2683_v13  ;;  %v3835_v19 = vpop.xlane.xlu1 %3834  ;;  %v13296_v13 = vld [vmem:[#allocation107_spill] sm:$0xff]  ;;  %v13298_v53 = vpack.c.bf16 %v11075_v12, %v11100_v49  ;;  %v13303_v12 = vld [vmem:[#allocation114_spill] sm:$0xff] }
 0x7d7   : > { %5261 = vmatprep.mubr.bf16.mxu0 %v13290_v0  ;;  %2724 = vadd.xlane.f32.xlu0 %v13291_v39  ;;  %7341 = vrcp.f32 %v3835_v19  ;;  %v13299_v39 = vld [vmem:[#allocation52_spill] sm:$0xff] }
 0x7d9   : > { %v3832_v55 = vpop.xlane.xlu0 %3831  ;;  %v7334_v25 = vpop.eup %7333  ;;  %2733 = vadd.xlane.f32.xlu1 %v13292_v44  ;;  %v13301_v44 = vld [vmem:[#allocation76_spill] sm:$0xff] }
 0x7da   : > { %7343 = vrcp.f32 %v3832_v55  ;;  %v3841_v9 = vpop.xlane.xlu1 %3840  ;;  %v11234_v61 = vmul.f32 %v7334_v25, %v13295_v47  ;;  %v13300_v55 = vld [vmem:[#allocation75_spill] sm:$0xff]  ;;  %v13304_v47 = vpack.c.bf16 %v11062_v17, %v11089_v38 }
 0x7db   : > { %2730 = vadd.xlane.f32.xlu0 %v13293_v52  ;;  %7345 = vrcp.f32 %v3841_v9 }
 0x7dc   : > { %v7336_v33 = vpop.eup %7335 }
 0x7dd   : > { %v3838_v43 = vpop.xlane.xlu0 %3837  ;;  %v11231_v34 = vmul.f32 %v7336_v33, %v13294_v58  ;;  %v7338_v22 = vpop.eup %7337  ;;  %3882 = vadd.xlane.f32.xlu1 %v13296_v13 }
 0x7de   : > { %5262 = vmatmul.mubr.bf16.gmra.mrb[48].mxu0 %v13297_v60  ;;  %7347 = vrcp.f32 %v3838_v43  ;;  %v11250_v9 = vmul.f32 %v7338_v22, %v13301_v44  ;;  %v13305_v22 = vpack.c.bf16 %v11116_v56, %v11128_v24  ;;  %v11283_v38 = vpop.xlane.xlu1 %4973  ;;  %v13312_v44 = vld [vmem:[#allocation8_spill] sm:$0xff] }
 0x7df   : > { %5269 = vmatprep.mubr.bf16.mxu0 %v13298_v53  ;;  %3879 = vadd.xlane.f32.xlu0 %v13299_v39 }
 0x7e0   : > { %v7340_v0 = vpop.eup %7339 }
 0x7e1   : > { %v11247_v25 = vmul.f32 %v7340_v0, %v13300_v55  ;;  %v7342_v33 = vpop.eup %7341  ;;  %3888 = vadd.xlane.f32.xlu1 %v13302_v35  ;;  %v13310_v0 = vld [vmem:[#allocation208_spill] sm:$0xff] }
 0x7e2   : > { %v11260_v43 = vmul.f32 %v7342_v33, %v10776_v57  ;;  %v13315_v33 = vld [vmem:[#allocation123_spill] sm:$0xff]  ;;  %v13316_v35 = vld [vmem:[#allocation128_spill] sm:$0xff] }
 0x7e3   : > { %3885 = vadd.xlane.f32.xlu0 %v13303_v12 }
 0x7e4   : > { %v7344_v49 = vpop.eup %7343 }
 0x7e5   : > { %v11257_v52 = vmul.f32 %v7344_v49, %v10774_v3  ;;  %v7346_v58 = vpop.eup %7345  ;;  %5021 = vadd.xlane.f32.xlu1 %v11069_v8  ;;  %v11272_v3 = vpop.xlane.xlu0 %4970 }
 0x7e6   : > { %5270 = vmatmul.mubr.bf16.gmra.mrb[52].mxu0 %v13304_v47  ;;  %v11278_v8 = vmul.f32 %v7346_v58, %v10784_v32  ;;  %v13308_v32 = vpack.c.bf16 %v11141_v54, %v11150_v7 }
 0x7e7   : > { %5277 = vmatprep.mubr.bf16.mxu0 %v13305_v22  ;;  %5018 = vadd.xlane.f32.xlu0 %v11073_v23  ;;  %v13306_v23 = vld [vmem:[#allocation191_spill] sm:$0xff] }
 0x7e8   : > { %v7348_v60 = vpop.eup %7347 }
 0x7e9   : > { %v11275_v57 = vmul.f32 %v7348_v60, %v10782_v26  ;;  %5027 = vadd.xlane.f32.xlu1 %v11079_v63  ;;  %v13307_v26 = vpack.c.bf16 %v11104_v62, %v11121_v4  ;;  %v13309_v63 = vld [vmem:[#allocation192_spill] sm:$0xff]  ;;  %v13313_v62 = vpack.c.bf16 %v11132_v2, %v11143_v14  ;;  %v13314_v4 = vld [vmem:[#allocation122_spill] sm:$0xff]  ;;  %v13317_v14 = vld [vmem:[#allocation189_spill] sm:$0xff] }
 0x7ea   : > { %v11286_v17 = vpop.xlane.xlu0 %4976  ;;  %v13318_v60 = vld [vmem:[#allocation190_spill] sm:$0xff] }
 0x7eb   : > { %5024 = vadd.xlane.f32.xlu0 %v11083_v59  ;;  %v13311_v59 = vld [vmem:[#allocation193_spill] sm:$0xff] }
 0x7ed   : > { %2739 = vadd.xlane.f32.xlu1 %v13306_v23 }
 0x7ee   : > { %5278 = vmatmul.mubr.bf16.gmra.mrb[56].mxu0 %v13307_v26  ;;  %v11296_v24 = vpop.xlane.xlu1 %4979  ;;  %v2689_v53 = vpop.xlane.xlu0 %2688 }
 0x7ef   : > { %5285 = vmatprep.mubr.bf16.mxu0 %v13308_v32  ;;  %2736 = vadd.xlane.f32.xlu0 %v13309_v63  ;;  %7349 = vrcp.f32 %v2689_v53 }
 0x7f1   : > { %2745 = vadd.xlane.f32.xlu1 %v13310_v0 }
 0x7f2   : > { %v2692_v39 = vpop.xlane.xlu1 %2691  ;;  %v2695_v55 = vpop.xlane.xlu0 %2694 }
 0x7f3   : > { %2742 = vadd.xlane.f32.xlu0 %v13311_v59  ;;  %7351 = vrcp.f32 %v2692_v39  ;;  %v13321_v39 = vld [vmem:[#allocation195_spill] sm:$0xff] }
 0x7f4   : > { %7353 = vrcp.f32 %v2695_v55  ;;  %v13351_v55 = vld [vmem:[#allocation144_spill] sm:$0xff] }
 0x7f5   : > { %3894 = vadd.xlane.f32.xlu1 %v13312_v44 }
 0x7f6   : > { %5286 = vmatmul.mubr.bf16.gmra.mrb[60].mxu0 %v13313_v62  ;;  %v2698_v54 = vpop.xlane.xlu1 %2697  ;;  %v3844_v7 = vpop.xlane.xlu0 %3843 }
 0x7f7   : > { %3891 = vadd.xlane.f32.xlu0 %v13314_v4  ;;  %7355 = vrcp.f32 %v2698_v54  ;;  %v13323_v54 = vld [vmem:[#allocation69_spill] sm:$0xff] }
 0x7f8   : > { %7357 = vrcp.f32 %v3844_v7 }
 0x7f9   : > { %3900 = vadd.xlane.f32.xlu1 %v13315_v33  ;;  %v7350_v12 = vpop.eup %7349 }
 0x7fa   : > { %v3847_v49 = vpop.xlane.xlu1 %3846  ;;  %v3850_v58 = vpop.xlane.xlu0 %3849  ;;  %v11310_v22 = vmul.f32 %v7350_v12, %v13317_v14  ;;  %v13329_v14 = vld [vmem:[#allocation71_spill] sm:$0xff] }
 0x7fb   : > { %3897 = vadd.xlane.f32.xlu0 %v13316_v35  ;;  %7359 = vrcp.f32 %v3847_v49  ;;  %v13324_v35 = vld [vmem:[#allocation68_spill] sm:$0xff] }
 0x7fc   : > { %7361 = vrcp.f32 %v3850_v58  ;;  %v13326_v58 = vld [vmem:[#allocation196_spill] sm:$0xff] }
 0x7fd   : > { %5033 = vadd.xlane.f32.xlu1 %v11087_v45  ;;  %v7352_v47 = vpop.eup %7351  ;;  %v13319_v45 = vld [vmem:[#allocation79_spill] sm:$0xff] }
 0x7fe   : > { %v3853_v2 = vpop.xlane.xlu1 %3852  ;;  %v11313_v23 = vmul.f32 %v7352_v47, %v13318_v60  ;;  %v7354_v26 = vpop.eup %7353  ;;  %v13327_v47 = vld [vmem:[#allocation129_spill] sm:$0xff]  ;;  %v13330_v60 = vld [vmem:[#allocation70_spill] sm:$0xff] }
 0x7ff   : > { %5030 = vadd.xlane.f32.xlu0 %v11094_v10  ;;  %7363 = vrcp.f32 %v3853_v2  ;;  %v11320_v53 = vmul.f32 %v7354_v26, %v13319_v45  ;;  %v13320_v10 = vld [vmem:[#allocation80_spill] sm:$0xff]  ;;  %v13332_v26 = vld [vmem:[#allocation127_spill] sm:$0xff] }
 0x800   : > { %v13328_v2 = vld [vmem:[#allocation16_spill] sm:$0xff]  ;;  %7365 = vrcp.f32 %v11158_v20  ;;  %v13335_v45 = vld [vmem:[#allocation31_spill] sm:$0xff] }
 0x801   : > { %5039 = vadd.xlane.f32.xlu1 %v11098_v31  ;;  %v7356_v63 = vpop.eup %7355  ;;  %v13322_v31 = vld [vmem:[#allocation194_spill] sm:$0xff] }
 0x802   : > { %v11323_v0 = vmul.f32 %v7356_v63, %v13320_v10  ;;  %v7358_v59 = vpop.eup %7357  ;;  %v13334_v63 = vld [vmem:[#allocation43_spill] sm:$0xff]  ;;  %v13336_v10 = vld [vmem:[#allocation170_spill] sm:$0xff] }
 0x803   : > { %5036 = vadd.xlane.f32.xlu0 %v11114_v42  ;;  %v11330_v62 = vmul.f32 %v7358_v59, %v10809_v11  ;;  %v13325_v11 = vld [vmem:[#allocation197_spill] sm:$0xff]  ;;  %7367 = vrcp.f32 %v13336_v10  ;;  %v13344_v10 = vld [vmem:[#allocation46_spill] sm:$0xff] }
 0x805   : > { %2751 = vadd.xlane.f32.xlu1 %v13321_v39  ;;  %v7360_v44 = vpop.eup %7359  ;;  %v13337_v39 = vld [vmem:[#allocation45_spill] sm:$0xff] }
 0x806   : > { %v11333_v42 = vmul.f32 %v7360_v44, %v10811_v30  ;;  %v7362_v4 = vpop.eup %7361 }
 0x807   : > { %2748 = vadd.xlane.f32.xlu0 %v13322_v31  ;;  %v11340_v49 = vmul.f32 %v7362_v4, %v10820_v16  ;;  %v13331_v16 = vld [vmem:[#allocation126_spill] sm:$0xff]  ;;  %v13340_v4 = vld [vmem:[#allocation37_spill] sm:$0xff] }
 0x808   : > { %7369 = vrcp.f32 %v13340_v4 }
 0x809   : > { %1609 = vadd.xlane.f32.xlu1 %v13323_v54  ;;  %v7364_v33 = vpop.eup %7363  ;;  %v13341_v54 = vld [vmem:[#allocation38_spill] sm:$0xff]  ;;  %7371 = vrcp.f32 %v11192_v51 }
 0x80a   : > { %v11343_v12 = vmul.f32 %v7364_v33, %v10824_v41  ;;  %v13333_v41 = vld [vmem:[#allocation44_spill] sm:$0xff] }
 0x80b   : > { %1606 = vadd.xlane.f32.xlu0 %v13324_v35 }
 0x80d   : > { %2757 = vadd.xlane.f32.xlu1 %v13325_v11 }
 0x80f   : > { %2754 = vadd.xlane.f32.xlu0 %v13326_v58 }
 0x811   : > { %3906 = vadd.xlane.f32.xlu1 %v13327_v47  ;;  %v7366_v47 = vpop.eup %7365 }
 0x813   : > { %3903 = vadd.xlane.f32.xlu0 %v13328_v2  ;;  %v13342_v2 = vld [vmem:[#allocation40_spill] sm:$0xff] }
 0x815   : > { %1615 = vadd.xlane.f32.xlu1 %v13329_v14 }
 0x817   : > { %1612 = vadd.xlane.f32.xlu0 %v13330_v60  ;;  %v7368_v60 = vpop.eup %7367 }
 0x819   : > { %3912 = vadd.xlane.f32.xlu1 %v13331_v16 }
 0x81b   : > { %3909 = vadd.xlane.f32.xlu0 %v13332_v26 }
 0x81d   : > { %5045 = vadd.xlane.f32.xlu1 %v11126_v5 }
 0x81f   : > { %5042 = vadd.xlane.f32.xlu0 %v11139_v15  ;;  %v13338_v15 = vld [vmem:[#allocation34_spill] sm:$0xff] }
 0x821   : > { %5051 = vadd.xlane.f32.xlu1 %v11148_v28 }
 0x823   : > { %5048 = vadd.xlane.f32.xlu0 %v11164_v1  ;;  %v13339_v1 = vld [vmem:[#allocation39_spill] sm:$0xff] }
 0x824   : > { %v11367_v5 = vpop.xlane.xlu0 %4982 }
 0x825   : > { %1621 = vadd.xlane.f32.xlu1 %v13333_v41 }
 0x827   : > { %1618 = vadd.xlane.f32.xlu0 %v13334_v63  ;;  %v13343_v63 = vld [vmem:[#allocation47_spill] sm:$0xff] }
 0x828   : > { %v11364_v59 = vpop.xlane.xlu1 %4985 }
 0x829   : > { %1627 = vadd.xlane.f32.xlu1 %v13335_v45 }
 0x82b   : > { %1624 = vadd.xlane.f32.xlu0 %v13337_v39 }
 0x82c   : > { %v11370_v28 = vpop.xlane.xlu1 %4991  ;;  %v11373_v31 = vpop.xlane.xlu0 %4988 }
 0x82d   : > { %1633 = vadd.xlane.f32.xlu1 %v13338_v15 }
 0x82e   : > { %v6477_v44 = vpop.f32.mrb[0].mxu0 }
 0x82f   : > { %1630 = vadd.xlane.f32.xlu0 %v13339_v1  ;;  %v6478_v20 = vpop.f32.mrb[1].mxu0 }
 0x830   : > { %v6479_v33 = vadd.f32 %v6478_v20, %v6477_v44  ;;  %v6480_v35 = vpop.f32.mrb[2].mxu0  ;;  %v2704_v11 = vpop.xlane.xlu1 %2703  ;;  %v13345_v44 = vld [vmem:[#allocation48_spill] sm:$0xff] }
 0x831   : > { %1639 = vadd.xlane.f32.xlu1 %v13341_v54  ;;  %v6481_v58 = vpop.f32.mrb[3].mxu0  ;;  %7373 = vrcp.f32 %v2704_v11  ;;  %v2701_v16 = vpop.xlane.xlu0 %2700  ;;  %v13346_v11 = vld [vmem:[#allocation33_spill] sm:$0xff] }
 0x832   : > { %v6482_v14 = vadd.f32 %v6481_v58, %v6480_v35  ;;  %7375 = vrcp.f32 %v2701_v16  ;;  %v11379_v26 = vmul.f32 %v7368_v60, %v6479_v33  ;;  %v7370_v35 = vpop.eup %7369 }
 0x833   : > { %1636 = vadd.xlane.f32.xlu0 %v13342_v2 }
 0x834   : > { %v11381_v41 = vmul.f32 %v7366_v47, %v6482_v14  ;;  %v7372_v47 = vpop.eup %7371 }
 0x835   : > { %1645 = vadd.xlane.f32.xlu1 %v13343_v63  ;;  %v2710_v45 = vpop.xlane.xlu1 %2709  ;;  %v13347_v63 = vld [vmem:[#allocation210_spill] sm:$0xff] }
 0x836   : > { %7377 = vrcp.f32 %v2710_v45  ;;  %v6483_v39 = vpop.f32.mrb[4].mxu0 }
 0x837   : > { %1642 = vadd.xlane.f32.xlu0 %v13344_v10  ;;  %7379 = vrcp.f32 %v11283_v38  ;;  %v2707_v15 = vpop.xlane.xlu0 %2706  ;;  %v6484_v1 = vpop.f32.mrb[5].mxu0 }
 0x838   : > { %7381 = vrcp.f32 %v2707_v15  ;;  %v6485_v20 = vadd.f32 %v6484_v1, %v6483_v39  ;;  %v6486_v4 = vpop.f32.mrb[6].mxu0 }
 0x839   : > { %1651 = vadd.xlane.f32.xlu1 %v13345_v44  ;;  %7383 = vrcp.f32 %v11272_v3  ;;  %v3859_v54 = vpop.xlane.xlu1 %3858  ;;  %v6487_v33 = vpop.f32.mrb[7].mxu0  ;;  %v13348_v44 = vld [vmem:[#allocation209_spill] sm:$0xff] }
 0x83a   : > { %7385 = vrcp.f32 %v3859_v54  ;;  %v6488_v58 = vadd.f32 %v6487_v33, %v6486_v4  ;;  %v11391_v38 = vmul.f32 %v7372_v47, %v6485_v20 }
 0x83b   : > { %1648 = vadd.xlane.f32.xlu0 %v13346_v11  ;;  %v7374_v14 = vpop.eup %7373 }
 0x83c   : > { %v3856_v2 = vpop.xlane.xlu0 %3855  ;;  %v11393_v60 = vmul.f32 %v7370_v35, %v6488_v58  ;;  %v11396_v45 = vmul.f32 %v7374_v14, %v13347_v63  ;;  %v7376_v3 = vpop.eup %7375 }
 0x83d   : > { %7387 = vrcp.f32 %v3856_v2  ;;  %v11402_v4 = vmul.f32 %v7376_v3, %v13348_v44  ;;  %v13349_v2 = vld [vmem:[#allocation82_spill] sm:$0xff] }
 0x83e   : > { %v3865_v16 = vpop.xlane.xlu1 %3864  ;;  %v6489_v39 = vpop.f32.mrb[8].mxu0 }
 0x83f   : > { %7389 = vrcp.f32 %v3865_v16  ;;  %v6490_v1 = vpop.f32.mrb[9].mxu0 }
 0x840   : > { %7391 = vrcp.f32 %v11286_v17  ;;  %v3862_v15 = vpop.xlane.xlu0 %3861  ;;  %v7378_v20 = vpop.eup %7377  ;;  %v6491_v54 = vadd.f32 %v6490_v1, %v6489_v39 }
 0x841   : > { %7393 = vrcp.f32 %v3862_v15  ;;  %v6492_v33 = vpop.f32.mrb[10].mxu0  ;;  %v7380_v35 = vpop.eup %7379  ;;  %v11410_v17 = vmul.f32 %v7378_v20, %v13349_v2  ;;  %v13350_v15 = vld [vmem:[#allocation81_spill] sm:$0xff] }
 0x842   : > { %7395 = vrcp.f32 %v11296_v24  ;;  %v11405_v11 = vpop.xlane.xlu1 %4997  ;;  %v6493_v58 = vpop.f32.mrb[11].mxu0 }
 0x843   : > { %v7382_v14 = vpop.eup %7381  ;;  %v6494_v16 = vadd.f32 %v6493_v58, %v6492_v33  ;;  %v13354_v58 = vld [vmem:[#allocation141_spill] sm:$0xff] }
 0x844   : > { %v7384_v63 = vpop.eup %7383  ;;  %v11412_v3 = vpop.xlane.xlu0 %4994  ;;  %v11415_v39 = vmul.f32 %v7382_v14, %v13350_v15 }
 0x845   : > { %v7386_v1 = vpop.eup %7385  ;;  %v11417_v44 = vmul.f32 %v7384_v63, %v6491_v54  ;;  %v11419_v24 = vmul.f32 %v7380_v35, %v6494_v16  ;;  %v13352_v54 = vld [vmem:[#allocation134_spill] sm:$0xff] }
 0x846   : > { %v11421_v30 = vpop.xlane.xlu1 %5003  ;;  %v11424_v47 = vmul.f32 %v7386_v1, %v13351_v55  ;;  %v6495_v2 = vpop.f32.mrb[12].mxu0  ;;  %v13353_v1 = vpack.c.bf16 %v11185_v48, %v11182_v36 }
 0x847   : > { %v7388_v33 = vpop.eup %7387  ;;  %v6496_v15 = vpop.f32.mrb[13].mxu0 }
 0x848   : > { %v11430_v14 = vpop.xlane.xlu0 %5000  ;;  %v11433_v63 = vmul.f32 %v7388_v33, %v13352_v54  ;;  %v6497_v16 = vadd.f32 %v6496_v15, %v6495_v2  ;;  %v6498_v7 = vpop.f32.mrb[14].mxu0  ;;  %v13356_v15 = vld [vmem:[#allocation7_spill] sm:$0xff] }
 0x849   : > { %v7390_v35 = vpop.eup %7389  ;;  %v6499_v20 = vpop.f32.mrb[15].mxu0 }
 0x84a   : > { %v7392_v32 = vpop.eup %7391  ;;  %v2716_v55 = vpop.xlane.xlu1 %2715  ;;  %3114 = vrot.lane.b32.xlu1 %v13353_v1, %s7582_s13  ;;  %v11442_v18 = vmul.f32 %v7390_v35, %v13354_v58  ;;  %v6500_v33 = vadd.f32 %v6499_v20, %v6498_v7 }
 0x84b   : > { %v7394_v13 = vpop.eup %7393  ;;  %7397 = vrcp.f32 %v2716_v55  ;;  %v11447_v19 = vmul.f32 %v7392_v32, %v6497_v16  ;;  %v13358_v32 = vpack.c.bf16 %v11174_v27, %v11171_v21  ;;  %v13363_v27 = vld [vmem:[#allocation91_spill] sm:$0xff] }
 0x84c   : > { %13355 = vst [vmem:[#allocation66_spill] sm:$0xff] %v11442_v18  ;;  %v7396_v54 = vpop.eup %7395  ;;  %v2713_v2 = vpop.xlane.xlu0 %2712  ;;  %v11445_v10 = vmul.f32 %v7394_v13, %v13356_v15 }
 0x84d   : > { %7399 = vrcp.f32 %v2713_v2  ;;  %v11449_v36 = vmul.f32 %v7396_v54, %v6500_v33  ;;  %v13361_v33 = vld [vmem:[#allocation221_spill] sm:$0xff] }
 0x84e   : > { %13357 = vst [vmem:[#allocation36_spill] sm:$0xff] %v11445_v10  ;;  %v2722_v48 = vpop.xlane.xlu1 %2721  ;;  %4251 = vrot.lane.b32.xlu1 %v4219_v46, %s7584_s15  ;;  %v13359_v46 = vld [vmem:[#allocation83_spill] sm:$0xff] }
 0x84f   : > { %7401 = vrcp.f32 %v2722_v48  ;;  %v13391_v10 = vld [vmem:[#allocation19_spill] sm:$0xff] }
 0x850   : > { %v2719_v13 = vpop.xlane.xlu0 %2718 }
 0x851   : > { %7403 = vrcp.f32 %v2719_v13  ;;  %3112 = vrot.lane.b32.xlu0 %v13358_v32, %s7582_s13 }
 0x852   : > { %v3871_v20 = vpop.xlane.xlu1 %3870 }
 0x853   : > { %7405 = vrcp.f32 %v3871_v20  ;;  %v13365_v20 = vld [vmem:[#allocation90_spill] sm:$0xff] }
 0x854   : > { %v3868_v35 = vpop.xlane.xlu0 %3867 }
 0x855   : > { %v7398_v16 = vpop.eup %7397  ;;  %7407 = vrcp.f32 %v3868_v35 }
 0x856   : > { %v3877_v50 = vpop.xlane.xlu1 %3876  ;;  %v11464_v29 = vmul.f32 %v7398_v16, %v13359_v46  ;;  %v13367_v46 = vld [vmem:[#allocation158_spill] sm:$0xff] }
 0x857   : > { %v7400_v55 = vpop.eup %7399  ;;  %7409 = vrcp.f32 %v3877_v50 }
 0x858   : > { %13360 = vst [vmem:[#allocation65_spill] sm:$0xff] %v11464_v29  ;;  %v3874_v1 = vpop.xlane.xlu0 %3873  ;;  %v11467_v54 = vmul.f32 %v7400_v55, %v13361_v33 }
 0x859   : > { %v7402_v2 = vpop.eup %7401  ;;  %7411 = vrcp.f32 %v3874_v1 }
 0x85a   : > { %13362 = vst [vmem:[#allocation14_spill] sm:$0xff] %v11467_v54  ;;  %v11469_v15 = vpop.xlane.xlu1 %5009  ;;  %v11474_v48 = vmul.f32 %v7402_v2, %v13363_v27  ;;  %v13369_v2 = vld [vmem:[#allocation142_spill] sm:$0xff] }
 0x85b   : > { %v7404_v13 = vpop.eup %7403 }
 0x85c   : > { %13364 = vst [vmem:[#allocation5_spill] sm:$0xff] %v11474_v48  ;;  %v11476_v32 = vpop.xlane.xlu0 %5006  ;;  %v11479_v35 = vmul.f32 %v7404_v13, %v13365_v20  ;;  %v13371_v20 = vld [vmem:[#allocation160_spill] sm:$0xff] }
 0x85d   : > { %v7406_v16 = vpop.eup %7405 }
 0x85e   : > { %13366 = vst [vmem:[#allocation6_spill] sm:$0xff] %v11479_v35  ;;  %v11481_v50 = vpop.xlane.xlu1 %5015  ;;  %v11484_v55 = vmul.f32 %v7406_v16, %v13367_v46  ;;  %v13373_v46 = vld [vmem:[#allocation159_spill] sm:$0xff]  ;;  %v13377_v35 = vld [vmem:[#allocation42_spill] sm:$0xff] }
 0x85f   : > { %v7408_v33 = vpop.eup %7407 }
 0x860   : > { %13368 = vst [vmem:[#allocation13_spill] sm:$0xff] %v11484_v55  ;;  %v11488_v21 = vpop.xlane.xlu0 %5012  ;;  %v11491_v27 = vmul.f32 %v7408_v33, %v13369_v2 }
 0x861   : > { %v7410_v58 = vpop.eup %7409 }
 0x862   : > { %13370 = vst [vmem:[#allocation186_spill] sm:$0xff] %v11491_v27  ;;  %v2728_v56 = vpop.xlane.xlu1 %2727  ;;  %v11496_v7 = vmul.f32 %v7410_v58, %v13371_v20 }
 0x863   : > { %v7412_v40 = vpop.eup %7411  ;;  %7413 = vrcp.f32 %v2728_v56 }
 0x864   : > { %13372 = vst [vmem:[#allocation187_spill] sm:$0xff] %v11496_v7  ;;  %v2725_v16 = vpop.xlane.xlu0 %2724  ;;  %v11499_v51 = vmul.f32 %v7412_v40, %v13373_v46  ;;  %v13375_v40 = vld [vmem:[#allocation101_spill] sm:$0xff] }
 0x865   : > { %7415 = vrcp.f32 %v2725_v16 }
 0x866   : > { %13374 = vst [vmem:[#allocation184_spill] sm:$0xff] %v11499_v51  ;;  %v2734_v1 = vpop.xlane.xlu1 %2733 }
 0x867   : > { %7417 = vrcp.f32 %v2734_v1 }
 0x868   : > { %7419 = vrcp.f32 %v11367_v5  ;;  %v2731_v2 = vpop.xlane.xlu0 %2730  ;;  %v13378_v5 = vld [vmem:[#allocation105_spill] sm:$0xff] }
 0x869   : > { %7421 = vrcp.f32 %v2731_v2 }
 0x86a   : > { %7423 = vrcp.f32 %v11364_v59  ;;  %v3883_v58 = vpop.xlane.xlu1 %3882 }
 0x86b   : > { %7425 = vrcp.f32 %v3883_v58 }
 0x86c   : > { %v3880_v20 = vpop.xlane.xlu0 %3879 }
 0x86d   : > { %v7414_v56 = vpop.eup %7413  ;;  %7427 = vrcp.f32 %v3880_v20 }
 0x86e   : > { %v3889_v13 = vpop.xlane.xlu1 %3888  ;;  %v11506_v46 = vmul.f32 %v7414_v56, %v13375_v40  ;;  %v13380_v56 = vld [vmem:[#allocation49_spill] sm:$0xff] }
 0x86f   : > { %v7416_v16 = vpop.eup %7415  ;;  %7429 = vrcp.f32 %v3889_v13  ;;  %v6501_v33 = vpop.f32.mrb[16].mxu0  ;;  %v13381_v13 = vld [vmem:[#allocation117_spill] sm:$0xff] }
 0x870   : > { %13376 = vst [vmem:[#allocation185_spill] sm:$0xff] %v11506_v46  ;;  %1654 = vadd.xlane.f32.xlu0 %v13377_v35  ;;  %v3886_v1 = vpop.xlane.xlu0 %3885  ;;  %v11510_v51 = vmul.f32 %v7416_v16, %v13378_v5  ;;  %v6502_v59 = vpop.f32.mrb[17].mxu0 }
 0x871   : > { %v7418_v2 = vpop.eup %7417  ;;  %7431 = vrcp.f32 %v3886_v1  ;;  %v6503_v20 = vadd.f32 %v6502_v59, %v6501_v33  ;;  %v6504_v40 = vpop.f32.mrb[18].mxu0  ;;  %v13383_v33 = vld [vmem:[#allocation120_spill] sm:$0xff] }
 0x872   : > { %13379 = vst [vmem:[#allocation200_spill] sm:$0xff] %v11510_v51  ;;  %v7420_v58 = vpop.eup %7419  ;;  %7433 = vrcp.f32 %v11370_v28  ;;  %v11513_v7 = vpop.xlane.xlu1 %5021  ;;  %1657 = vadd.xlane.f32.xlu1 %v13380_v56  ;;  %v11519_v48 = vmul.f32 %v7418_v2, %v13381_v13  ;;  %v13385_v2 = vld [vmem:[#allocation10_spill] sm:$0xff] }
 0x873   : > { %v7422_v16 = vpop.eup %7421  ;;  %7435 = vrcp.f32 %v11373_v31  ;;  %v6505_v1 = vpop.f32.mrb[19].mxu0  ;;  %v11527_v56 = vmul.f32 %v7420_v58, %v6503_v20 }
 0x874   : > { %13382 = vst [vmem:[#allocation201_spill] sm:$0xff] %v11519_v48  ;;  %v7424_v5 = vpop.eup %7423  ;;  %v11522_v27 = vpop.xlane.xlu0 %5018  ;;  %v6506_v28 = vadd.f32 %v6505_v1, %v6504_v40  ;;  %v11525_v59 = vmul.f32 %v7422_v16, %v13383_v33  ;;  %v13387_v33 = vld [vmem:[#allocation161_spill] sm:$0xff]  ;;  %7437 = vrcp.f32 %v11405_v11 }
 0x875   : > { %v7426_v55 = vpop.eup %7425  ;;  %7439 = vrcp.f32 %v11412_v3 }
 0x876   : > { %13384 = vst [vmem:[#allocation204_spill] sm:$0xff] %v11525_v59  ;;  %v11529_v54 = vmul.f32 %v7424_v5, %v6506_v28  ;;  %v11531_v35 = vpop.xlane.xlu1 %5027  ;;  %v11534_v13 = vmul.f32 %v7426_v55, %v13385_v2  ;;  %v13389_v59 = vld [vmem:[#allocation20_spill] sm:$0xff] }
 0x877   : > { %v7428_v51 = vpop.eup %7427  ;;  %v6507_v16 = vpop.f32.mrb[20].mxu0 }
 0x878   : > { %13386 = vst [vmem:[#allocation22_spill] sm:$0xff] %v11534_v13  ;;  %v11540_v1 = vpop.xlane.xlu0 %5024  ;;  %v11543_v58 = vmul.f32 %v7428_v51, %v13387_v33  ;;  %v6508_v5 = vpop.f32.mrb[21].mxu0 }
 0x879   : > { %v7430_v20 = vpop.eup %7429  ;;  %v6509_v28 = vadd.f32 %v6508_v5, %v6507_v16  ;;  %v6510_v2 = vpop.f32.mrb[22].mxu0 }
 0x87a   : > { %13388 = vst [vmem:[#allocation86_spill] sm:$0xff] %v11543_v58  ;;  %v2740_v55 = vpop.xlane.xlu1 %2739  ;;  %v11550_v40 = vmul.f32 %v7430_v20, %v13389_v59  ;;  %v6511_v46 = vpop.f32.mrb[23].mxu0  ;;  %v13401_v20 = vld [vmem:[#allocation4_spill] sm:$0xff] }
 0x87b   : > { %v7432_v48 = vpop.eup %7431  ;;  %7441 = vrcp.f32 %v2740_v55  ;;  %v6512_v29 = vadd.f32 %v6511_v46, %v6510_v2  ;;  %v13393_v2 = vpack.c.bf16 %v11381_v41, %v11379_v26  ;;  %v13409_v58 = vld [vmem:[#allocation164_spill] sm:$0xff] }
 0x87c   : > { %13390 = vst [vmem:[#allocation23_spill] sm:$0xff] %v11550_v40  ;;  %v7434_v51 = vpop.eup %7433  ;;  %v2737_v33 = vpop.xlane.xlu0 %2736  ;;  %v11553_v11 = vmul.f32 %v7432_v48, %v13391_v10 }
 0x87d   : > { %v7436_v18 = vpop.eup %7435  ;;  %7443 = vrcp.f32 %v2737_v33  ;;  %v11557_v16 = vmul.f32 %v7434_v51, %v6512_v29 }
 0x87e   : > { %13392 = vst [vmem:[#allocation89_spill] sm:$0xff] %v11553_v11  ;;  %v11555_v3 = vmul.f32 %v7436_v18, %v6509_v28  ;;  %v2746_v5 = vpop.xlane.xlu1 %2745  ;;  %v7438_v28 = vpop.eup %7437 }
 0x87f   : > { %7445 = vrcp.f32 %v2746_v5  ;;  %v6513_v55 = vpop.f32.mrb[24].mxu0  ;;  %v7440_v51 = vpop.eup %7439 }
 0x880   : > { %7447 = vrcp.f32 %v11421_v30  ;;  %v2743_v46 = vpop.xlane.xlu0 %2742  ;;  %v6514_v10 = vpop.f32.mrb[25].mxu0 }
 0x881   : > { %7449 = vrcp.f32 %v2743_v46  ;;  %v6515_v48 = vadd.f32 %v6514_v10, %v6513_v55  ;;  %v6516_v29 = vpop.f32.mrb[26].mxu0  ;;  %v13395_v10 = vld [vmem:[#allocation143_spill] sm:$0xff] }
 0x882   : > { %7451 = vrcp.f32 %v11430_v14  ;;  %v3895_v18 = vpop.xlane.xlu1 %3894  ;;  %v6517_v30 = vpop.f32.mrb[27].mxu0  ;;  %v13394_v14 = vpack.c.bf16 %v11214_v37, %v11211_v6 }
 0x883   : > { %7453 = vrcp.f32 %v3895_v18  ;;  %5390 = vrot.lane.b32.xlu1 %v13393_v2, %s7583_s14  ;;  %v6518_v5 = vadd.f32 %v6517_v30, %v6516_v29  ;;  %v11569_v46 = vmul.f32 %v7440_v51, %v6515_v48  ;;  %v13397_v48 = vld [vmem:[#allocation118_spill] sm:$0xff] }
 0x884   : > { %v3892_v33 = vpop.xlane.xlu0 %3891 }
 0x885   : > { %v7442_v59 = vpop.eup %7441  ;;  %7455 = vrcp.f32 %v3892_v33  ;;  %v11571_v31 = vmul.f32 %v7438_v28, %v6518_v5 }
 0x886   : > { %4253 = vrot.lane.b32.xlu0 %v13394_v14, %s7584_s15  ;;  %v3901_v55 = vpop.xlane.xlu1 %3900  ;;  %v11578_v18 = vmul.f32 %v7442_v59, %v13395_v10  ;;  %v13399_v14 = vld [vmem:[#allocation11_spill] sm:$0xff] }
 0x887   : > { %v7444_v26 = vpop.eup %7443  ;;  %7457 = vrcp.f32 %v3901_v55 }
 0x888   : > { %13396 = vst [vmem:[#allocation203_spill] sm:$0xff] %v11578_v18  ;;  %v3898_v29 = vpop.xlane.xlu0 %3897  ;;  %v11583_v30 = vmul.f32 %v7444_v26, %v13397_v48 }
 0x889   : > { %v6519_v2 = vpop.f32.mrb[28].mxu0  ;;  %v7446_v28 = vpop.eup %7445  ;;  %7459 = vrcp.f32 %v3898_v29 }
 0x88a   : > { %13398 = vst [vmem:[#allocation202_spill] sm:$0xff] %v11583_v30  ;;  %v6520_v51 = vpop.f32.mrb[29].mxu0  ;;  %v7448_v33 = vpop.eup %7447  ;;  %7461 = vrcp.f32 %v11469_v15  ;;  %v11591_v55 = vmul.f32 %v7446_v28, %v13399_v14  ;;  %v13403_v28 = vld [vmem:[#allocation27_spill] sm:$0xff] }
 0x88b   : > { %v11586_v37 = vpop.xlane.xlu1 %5033  ;;  %v6521_v6 = vadd.f32 %v6520_v51, %v6519_v2  ;;  %v6522_v59 = vpop.f32.mrb[30].mxu0  ;;  %7463 = vrcp.f32 %v11476_v32 }
 0x88c   : > { %13400 = vst [vmem:[#allocation219_spill] sm:$0xff] %v11591_v55  ;;  %v7450_v10 = vpop.eup %7449  ;;  %v6523_v26 = vpop.f32.mrb[31].mxu0  ;;  %7465 = vrcp.f32 %v11481_v50 }
 0x88d   : > { %v7452_v48 = vpop.eup %7451  ;;  %v11594_v29 = vpop.xlane.xlu0 %5030  ;;  %v6524_v41 = vadd.f32 %v6523_v26, %v6522_v59  ;;  %v11597_v15 = vmul.f32 %v7450_v10, %v13401_v20  ;;  %v13405_v10 = vld [vmem:[#allocation9_spill] sm:$0xff]  ;;  %7467 = vrcp.f32 %v11488_v21  ;;  %v6733_v21 = vld [vmem:[%s12146_s3] sm:$0xff]  }
 0x88e   : > { %v7454_v11 = vpop.eup %7453  ;;  %v11599_v2 = vmul.f32 %v7452_v48, %v6521_v6  ;;  %6633 = vmatprep.subr.bf16.mxu1 %v6733_v21 }
 0x88f   : > { %13402 = vst [vmem:[#allocation215_spill] sm:$0xff] %v11597_v15  ;;  %v11601_v51 = vmul.f32 %v7448_v33, %v6524_v41  ;;  %v11603_v5 = vpop.xlane.xlu1 %5039  ;;  %v11606_v14 = vmul.f32 %v7454_v11, %v13403_v28  ;;  %v7456_v30 = vpop.eup %7455  ;;  %v13407_v15 = vld [vmem:[#allocation165_spill] sm:$0xff]  ;;  %6634 = vmatpush3.bf16.msra.mxu1 %v6733_v21 }
 0x890   : > { %v11615_v6 = vmul.f32 %v7456_v30, %v13405_v10 }
 0x891   : > { %13404 = vst [vmem:[#allocation93_spill] sm:$0xff] %v11606_v14  ;;  %v11612_v26 = vpop.xlane.xlu0 %5036  ;;  %v6525_v20 = vpop.f32.mrb[32].mxu0  ;;  %v13418_v14 = vld [vmem:[#allocation104_spill] sm:$0xff] }
 0x892   : > { %13406 = vst [vmem:[#allocation92_spill] sm:$0xff] %v11615_v6  ;;  %v7458_v41 = vpop.eup %7457  ;;  %v6526_v33 = vpop.f32.mrb[33].mxu0 }
 0x893   : > { %v2752_v11 = vpop.xlane.xlu1 %2751  ;;  %v6527_v48 = vadd.f32 %v6526_v33, %v6525_v20  ;;  %v6528_v28 = vpop.f32.mrb[34].mxu0  ;;  %v11622_v59 = vmul.f32 %v7458_v41, %v13407_v15  ;;  %v6734_v15 = vld [vmem:[%s12146_s3 + $0x8] sm:$0xff]  }
 0x894   : > { %v7460_v55 = vpop.eup %7459  ;;  %7469 = vrcp.f32 %v2752_v11  ;;  %v6529_v18 = vpop.f32.mrb[35].mxu0  ;;  %6635 = vmatprep.subr.bf16.mxu1 %v6734_v15 }
 0x895   : > { %13408 = vst [vmem:[#allocation96_spill] sm:$0xff] %v11622_v59  ;;  %v7462_v30 = vpop.eup %7461  ;;  %v2749_v10 = vpop.xlane.xlu0 %2748  ;;  %v6530_v40 = vadd.f32 %v6529_v18, %v6528_v28  ;;  %v11625_v50 = vmul.f32 %v7460_v55, %v13409_v58  ;;  %6636 = vmatpush3.bf16.msra.mxu1 %v6734_v15  ;;  %v13413_v59 = vld [vmem:[#allocation3_spill] sm:$0xff] }
 0x896   : > { %v7464_v13 = vpop.eup %7463  ;;  %7471 = vrcp.f32 %v2749_v10 }
 0x897   : > { %13410 = vst [vmem:[#allocation95_spill] sm:$0xff] %v11625_v50  ;;  %v11633_v20 = vmul.f32 %v7464_v13, %v6527_v48  ;;  %v11635_v41 = vmul.f32 %v7462_v30, %v6530_v40  ;;  %v1610_v33 = vpop.xlane.xlu1 %1609  ;;  %v6735_v13 = vld [vmem:[%s12146_s3 + $0x10] sm:$0xff]   ;;  %v7466_v10 = vpop.eup %7465 }
 0x898   : > { %7473 = vrcp.f32 %v1610_v33  ;;  %v7468_v33 = vpop.eup %7467  ;;  %6637 = vmatprep.subr.bf16.mxu1 %v6735_v13 }
 0x899   : > { %7475 = vrcp.f32 %v11513_v7  ;;  %v1607_v55 = vpop.xlane.xlu0 %1606  ;;  %v6531_v11 = vpop.f32.mrb[36].mxu0  ;;  %6638 = vmatpush3.bf16.msra.mxu1 %v6735_v13 }
 0x89a   : > { %7477 = vrcp.f32 %v1607_v55  ;;  %v6532_v28 = vpop.f32.mrb[37].mxu0 }
 0x89b   : > { %7479 = vrcp.f32 %v11522_v27  ;;  %v2758_v40 = vpop.xlane.xlu1 %2757  ;;  %v6533_v48 = vadd.f32 %v6532_v28, %v6531_v11  ;;  %v6534_v30 = vpop.f32.mrb[38].mxu0 }
 0x89c   : > { %7481 = vrcp.f32 %v2758_v40  ;;  %v6535_v7 = vpop.f32.mrb[39].mxu0 }
 0x89d   : > { %v2755_v18 = vpop.xlane.xlu0 %2754  ;;  %v6536_v32 = vadd.f32 %v6535_v7, %v6534_v30  ;;  %v11646_v55 = vmul.f32 %v7468_v33, %v6533_v48  ;;  %v13417_v33 = vld [vmem:[#allocation106_spill] sm:$0xff] }
 0x89e   : > { %v7470_v21 = vpop.eup %7469  ;;  %7483 = vrcp.f32 %v2755_v18  ;;  %v13415_v18 = vld [vmem:[#allocation12_spill] sm:$0xff] }
 0x89f   : > { %13411 = vst [vmem:[#allocation98_spill] sm:$0xff] %v11646_v55  ;;  %v11648_v58 = vmul.f32 %v7466_v10, %v6536_v32  ;;  %v3907_v50 = vpop.xlane.xlu1 %3906  ;;  %v11651_v27 = vmul.f32 %v7470_v21, %v13413_v59 }
 0x8a0   : > { %v7472_v11 = vpop.eup %7471  ;;  %7485 = vrcp.f32 %v3907_v50 }
 0x8a1   : > { %13412 = vst [vmem:[#allocation94_spill] sm:$0xff] %v11648_v58  ;;  %13414 = vst [vmem:[#allocation131_spill] sm:$0xff] %v11651_v27  ;;  %7487 = vrcp.f32 %v11531_v35  ;;  %v3904_v40 = vpop.xlane.xlu0 %3903  ;;  %v6537_v15 = vpop.f32.mrb[40].mxu0  ;;  %v11657_v30 = vmul.f32 %v7472_v11, %v13415_v18  ;;  %v13419_v58 = vld [vmem:[#allocation50_spill] sm:$0xff] }
 0x8a2   : > { %v7474_v48 = vpop.eup %7473  ;;  %7489 = vrcp.f32 %v3904_v40  ;;  %v6538_v32 = vpop.f32.mrb[41].mxu0 }
 0x8a3   : > { %13416 = vst [vmem:[#allocation55_spill] sm:$0xff] %v11657_v30  ;;  %v7476_v10 = vpop.eup %7475  ;;  %7491 = vrcp.f32 %v11540_v1  ;;  %v1616_v59 = vpop.xlane.xlu1 %1615  ;;  %v6539_v7 = vadd.f32 %v6538_v32, %v6537_v15  ;;  %v1927_v35 = vmul.f32 %v7474_v48, %v13417_v33  ;;  %v13420_v33 = vld [vmem:[#allocation148_spill] sm:$0xff]  ;;  %v13422_v30 = vld [vmem:[#allocation41_spill] sm:$0xff] }
 0x8a4   : > { %v6540_v50 = vpop.f32.mrb[42].mxu0  ;;  %v7478_v28 = vpop.eup %7477  ;;  %7493 = vrcp.f32 %v1616_v59 }
 0x8a5   : > { %v6541_v13 = vpop.f32.mrb[43].mxu0  ;;  %v7480_v6 = vpop.eup %7479  ;;  %v1926_v40 = vmul.f32 %v7478_v28, %v13418_v14  ;;  %1660 = vadd.xlane.f32.xlu0 %v13419_v58 }
 0x8a6   : > { %v1613_v11 = vpop.xlane.xlu0 %1612  ;;  %v6542_v18 = vadd.f32 %v6541_v13, %v6540_v50  ;;  %v7482_v55 = vpop.eup %7481  ;;  %v11665_v1 = vmul.f32 %v7480_v6, %v6539_v7  ;;  %v13423_v6 = vld [vmem:[#allocation147_spill] sm:$0xff]  ;;  %v6736_v50 = vld [vmem:[%s12146_s3 + $0x18] sm:$0xff]  }
 0x8a7   : > { %7495 = vrcp.f32 %v1613_v11  ;;  %v3913_v48 = vpop.xlane.xlu1 %3912  ;;  %v1958_v32 = vpack.c.bf16 %v1927_v35, %v1926_v40  ;;  %v11670_v21 = vmul.f32 %v7482_v55, %v13420_v33  ;;  %1663 = vadd.xlane.f32.xlu1 %v13422_v30  ;;  %v13425_v11 = vld [vmem:[#allocation171_spill] sm:$0xff]  ;;  %6639 = vmatprep.subr.bf16.mxu1 %v6736_v50 }
 0x8a8   : > { %v11667_v15 = vmul.f32 %v7476_v10, %v6542_v18  ;;  %v7484_v59 = vpop.eup %7483  ;;  %7497 = vrcp.f32 %v3913_v48  ;;  %6640 = vmatpush3.bf16.msra.mxu1 %v6736_v50 }
 0x8a9   : > { %13421 = vst [vmem:[#allocation135_spill] sm:$0xff] %v11670_v21  ;;  %7499 = vrcp.f32 %v11594_v29  ;;  %v6543_v58 = vpop.f32.mrb[44].mxu0  ;;  %1974 = vst.msk [vmem:[#allocation2] sm:$0xff] %vm290_vm0, %v1958_v32  ;;  %v11678_v10 = vmul.f32 %v7484_v59, %v13423_v6  ;;  %v13427_v6 = vld [vmem:[#allocation166_spill] sm:$0xff] }
 0x8aa   : > { %v3910_v28 = vpop.xlane.xlu0 %3909  ;;  %v7486_v7 = vpop.eup %7485  ;;  %v13431_v21 = vld [vmem:[#allocation110_spill] sm:$0xff] }
 0x8ab   : > { %13424 = vst [vmem:[#allocation139_spill] sm:$0xff] %v11678_v10  ;;  %7501 = vrcp.f32 %v3910_v28  ;;  %v6544_v55 = vpop.f32.mrb[45].mxu0  ;;  %v7488_v30 = vpop.eup %7487  ;;  %v11686_v18 = vmul.f32 %v7486_v7, %v13425_v11  ;;  %v6737_v7 = vld [vmem:[%s12146_s3 + $0x20] sm:$0xff]  }
 0x8ac   : > { %v11683_v35 = vpop.xlane.xlu1 %5045  ;;  %v6545_v29 = vadd.f32 %v6544_v55, %v6543_v58  ;;  %v6546_v13 = vpop.f32.mrb[46].mxu0  ;;  %7503 = vrcp.f32 %v11586_v37  ;;  %v13430_v37 = vld [vmem:[#allocation111_spill] sm:$0xff]  ;;  %6641 = vmatprep.subr.bf16.mxu1 %v6737_v7 }
 0x8ad   : > { %13426 = vst [vmem:[#allocation198_spill] sm:$0xff] %v11686_v18  ;;  %v7490_v48 = vpop.eup %7489  ;;  %v6547_v32 = vpop.f32.mrb[47].mxu0  ;;  %6642 = vmatpush3.bf16.msra.mxu1 %v6737_v7  ;;  %7505 = vrcp.f32 %v11612_v26  ;;  %v13432_v18 = vld [vmem:[#allocation169_spill] sm:$0xff] }
 0x8ae   : > { %v7492_v33 = vpop.eup %7491  ;;  %v5043_v59 = vpop.xlane.xlu0 %5042  ;;  %v6548_v28 = vadd.f32 %v6547_v32, %v6546_v13  ;;  %v11692_v14 = vmul.f32 %v7490_v48, %v13427_v6  ;;  %7507 = vrcp.f32 %v11603_v5  ;;  %v13433_v5 = vld [vmem:[#allocation172_spill] sm:$0xff] }
 0x8af   : > { %v7494_v58 = vpop.eup %7493  ;;  %v11697_v55 = vmul.f32 %v7492_v33, %v6545_v29 }
 0x8b0   : > { %13428 = vst [vmem:[#allocation199_spill] sm:$0xff] %v11692_v14  ;;  %v11699_v11 = vmul.f32 %v7488_v30, %v6548_v28  ;;  %v11701_v40 = vpop.xlane.xlu1 %5051  ;;  %v1929_v10 = vmul.f32 %v7494_v58, %v13430_v37 }
 0x8b1   : > { %13429 = vst [vmem:[#allocation206_spill] sm:$0xff] %v11697_v55  ;;  %v7496_v50 = vpop.eup %7495  ;;  %v6549_v6 = vpop.f32.mrb[48].mxu0 }
 0x8b2   : > { %v11708_v32 = vpop.xlane.xlu0 %5048  ;;  %v1928_v29 = vmul.f32 %v7496_v50, %v13431_v21  ;;  %v7498_v30 = vpop.eup %7497  ;;  %v6738_v21 = vld [vmem:[%s12146_s3 + $0x28] sm:$0xff]  }
 0x8b3   : > { %v6550_v33 = vpop.f32.mrb[49].mxu0  ;;  %v7500_v28 = vpop.eup %7499  ;;  %v11714_v27 = vmul.f32 %v7498_v30, %v13432_v18  ;;  %6643 = vmatprep.subr.bf16.mxu1 %v6738_v21 }
 0x8b4   : > { %v1622_v58 = vpop.xlane.xlu1 %1621  ;;  %v6551_v37 = vadd.f32 %v6550_v33, %v6549_v6  ;;  %v6552_v13 = vpop.f32.mrb[50].mxu0  ;;  %v1959_v14 = vpack.c.bf16 %v1929_v10, %v1928_v29  ;;  %6644 = vmatpush3.bf16.msra.mxu1 %v6738_v21 }
 0x8b5   : > { %v7502_v48 = vpop.eup %7501  ;;  %7509 = vrcp.f32 %v1622_v58  ;;  %v6553_v55 = vpop.f32.mrb[51].mxu0 }
 0x8b6   : > { %v11719_v7 = vmul.f32 %v7500_v28, %v6551_v37  ;;  %v1619_v26 = vpop.xlane.xlu0 %1618  ;;  %v6554_v50 = vadd.f32 %v6553_v55, %v6552_v13  ;;  %1975 = vst.msk [vmem:[#allocation2 + $0x8] sm:$0xff] %vm290_vm0, %v1959_v14  ;;  %v11723_v6 = vmul.f32 %v7502_v48, %v13433_v5  ;;  %v7504_v10 = vpop.eup %7503  ;;  %v6739_v55 = vld [vmem:[%s12146_s3 + $0x30] sm:$0xff]   ;;  %v13434_v48 = vpack.c.bf16 %v11234_v61, %v11231_v34  ;;  %v6740_v34 = vld [vmem:[%s12146_s3 + $0x38] sm:$0xff]  }
 0x8b7   : > { %7511 = vrcp.f32 %v1619_v26  ;;  %6645 = vmatprep.subr.bf16.mxu1 %v6739_v55  ;;  %v13435_v26 = vpack.c.bf16 %v11393_v60, %v11391_v38 }
 0x8b8   : > { %v11725_v18 = vmul.f32 %v7504_v10, %v6554_v50  ;;  %v1628_v29 = vpop.xlane.xlu1 %1627  ;;  %3116 = vrot.lane.b32.xlu1 %v13434_v48, %s7582_s13  ;;  %6646 = vmatpush3.bf16.msra.mxu1 %v6739_v55 }
 0x8b9   : > { %7513 = vrcp.f32 %v1628_v29  ;;  %v6555_v33 = vpop.f32.mrb[52].mxu0  ;;  %v13436_v29 = vpack.c.bf16 %v11260_v43, %v11257_v52  ;;  %6647 = vmatprep.subr.bf16.mxu1 %v6740_v34 }
 0x8ba   : > { %7515 = vrcp.f32 %v5043_v59  ;;  %v5370_v14 = vpack.c.bf16 %v11725_v18, %v11719_v7  ;;  %v1625_v13 = vpop.xlane.xlu0 %1624  ;;  %v6556_v28 = vpop.f32.mrb[53].mxu0  ;;  %v13540_v18 = vld [vmem:[#allocation135_spill] sm:$0xff] }
 0x8bb   : > { %7517 = vrcp.f32 %v1625_v13  ;;  %v6557_v37 = vadd.f32 %v6556_v28, %v6555_v33  ;;  %v6558_v21 = vpop.f32.mrb[54].mxu0  ;;  %v7506_v59 = vpop.eup %7505  ;;  %5392 = vrot.lane.b32.xlu0 %v13435_v26, %s7583_s14  ;;  %v13437_v13 = vld [vmem:[#allocation116_spill] sm:$0xff]  ;;  %v13438_v28 = vpack.c.bf16 %v11250_v9, %v11247_v25 }
 0x8bc   : > { %7519 = vrcp.f32 %v11683_v35  ;;  %v1634_v58 = vpop.xlane.xlu1 %1633  ;;  %v6559_v50 = vpop.f32.mrb[55].mxu0  ;;  %4255 = vrot.lane.b32.xlu1 %v13436_v29, %s7584_s15  ;;  %6648 = vmatpush3.bf16.msra.mxu1 %v6740_v34 }
 0x8bd   : > { %7521 = vrcp.f32 %v1634_v58  ;;  %v7508_v61 = vpop.eup %7507  ;;  %v11746_v5 = vmul.f32 %v7506_v59, %v6557_v37  ;;  %v6560_v10 = vadd.f32 %v6559_v50, %v6558_v21  ;;  %v13439_v37 = vld [vmem:[#allocation115_spill] sm:$0xff] }
 0x8be   : > { %v1631_v35 = vpop.xlane.xlu0 %1630 }
 0x8bf   : > { %v7510_v55 = vpop.eup %7509  ;;  %7523 = vrcp.f32 %v1631_v35  ;;  %v11752_v38 = vmul.f32 %v7508_v61, %v6560_v10  ;;  %3118 = vrot.lane.b32.xlu0 %v13438_v28, %s7582_s13  ;;  %v13440_v35 = vld [vmem:[#allocation25_spill] sm:$0xff] }
 0x8c0   : > { %v1640_v60 = vpop.xlane.xlu1 %1639  ;;  %v1931_v48 = vmul.f32 %v7510_v55, %v13437_v13  ;;  %v13441_v28 = vld [vmem:[#allocation121_spill] sm:$0xff] }
 0x8c1   : > { %v7512_v33 = vpop.eup %7511  ;;  %7525 = vrcp.f32 %v1640_v60  ;;  %v5371_v52 = vpack.c.bf16 %v11752_v38, %v11746_v5  ;;  %v6561_v58 = vpop.f32.mrb[56].mxu0  ;;  %v13544_v5 = vpack.c.bf16 %v11714_v27, %v11723_v6  ;;  %v13545_v27 = vld [vmem:[#allocation182_spill] sm:$0xff] }
 0x8c2   : > { %7527 = vrcp.f32 %v11708_v32  ;;  %v1637_v43 = vpop.xlane.xlu0 %1636  ;;  %v1930_v21 = vmul.f32 %v7512_v33, %v13439_v37  ;;  %v6562_v26 = vpop.f32.mrb[57].mxu0 }
 0x8c3   : > { %v7514_v59 = vpop.eup %7513  ;;  %7529 = vrcp.f32 %v1637_v43  ;;  %v6563_v61 = vadd.f32 %v6562_v26, %v6561_v58  ;;  %v6564_v25 = vpop.f32.mrb[58].mxu0 }
 0x8c4   : > { %v7516_v50 = vpop.eup %7515  ;;  %7531 = vrcp.f32 %v11701_v40  ;;  %v1646_v34 = vpop.xlane.xlu1 %1645  ;;  %v1960_v9 = vpack.c.bf16 %v1931_v48, %v1930_v21  ;;  %v1933_v10 = vmul.f32 %v7514_v59, %v13440_v35  ;;  %v13442_v21 = vld [vmem:[#allocation125_spill] sm:$0xff] }
 0x8c5   : > { %v7518_v32 = vpop.eup %7517  ;;  %7533 = vrcp.f32 %v1646_v34  ;;  %v6565_v29 = vpop.f32.mrb[59].mxu0  ;;  %v11765_v60 = vmul.f32 %v7516_v50, %v6563_v61 }
 0x8c6   : > { %v7520_v55 = vpop.eup %7519  ;;  %v1643_v13 = vpop.xlane.xlu0 %1642  ;;  %v6566_v33 = vadd.f32 %v6565_v29, %v6564_v25  ;;  %1976 = vst.msk [vmem:[#allocation2 + $0x10] sm:$0xff] %vm290_vm0, %v1960_v9  ;;  %v1932_v43 = vmul.f32 %v7518_v32, %v13441_v28  ;;  %v13443_v25 = vld [vmem:[#allocation124_spill] sm:$0xff] }
 0x8c7   : > { %v7522_v37 = vpop.eup %7521  ;;  %7535 = vrcp.f32 %v1643_v13  ;;  %v13444_v28 = vld [vmem:[#allocation132_spill] sm:$0xff] }
 0x8c8   : > { %v11769_v40 = vmul.f32 %v7520_v55, %v6566_v33  ;;  %v1652_v58 = vpop.xlane.xlu1 %1651  ;;  %v1961_v48 = vpack.c.bf16 %v1933_v10, %v1932_v43  ;;  %v1935_v59 = vmul.f32 %v7522_v37, %v13442_v21 }
 0x8c9   : > { %v7524_v26 = vpop.eup %7523  ;;  %7537 = vrcp.f32 %v1652_v58  ;;  %v6567_v61 = vpop.f32.mrb[60].mxu0 }
 0x8ca   : > { %v1649_v34 = vpop.xlane.xlu0 %1648  ;;  %1977 = vst.msk [vmem:[#allocation2 + $0x18] sm:$0xff] %vm290_vm0, %v1961_v48  ;;  %v1934_v9 = vmul.f32 %v7524_v26, %v13443_v25  ;;  %v6568_v32 = vpop.f32.mrb[61].mxu0  ;;  %v13445_v26 = vld [vmem:[#allocation130_spill] sm:$0xff] }
 0x8cb   : > { %v7526_v35 = vpop.eup %7525  ;;  %7539 = vrcp.f32 %v1649_v34  ;;  %v6569_v55 = vadd.f32 %v6568_v32, %v6567_v61  ;;  %v6570_v13 = vpop.f32.mrb[62].mxu0 }
 0x8cc   : > { %v7528_v29 = vpop.eup %7527  ;;  %v3115_v10 = vpop.permute.xlu1 %3114  ;;  %v1962_v33 = vpack.c.bf16 %v1935_v59, %v1934_v9  ;;  %v1937_v43 = vmul.f32 %v7526_v35, %v13444_v28  ;;  %v13446_v35 = vld [vmem:[#allocation140_spill] sm:$0xff] }
 0x8cd   : > { %v7530_v37 = vpop.eup %7529  ;;  %3162 = vst.msk [vmem:[#allocation2 + $0x8] sm:$0xff] %vm3160_vm1, %v3115_v10  ;;  %v6571_v58 = vpop.f32.mrb[63].mxu0  ;;  %v11778_v30 = vmul.f32 %v7528_v29, %v6569_v55  ;;  %v13447_v55 = vld [vmem:[#allocation138_spill] sm:$0xff] }
 0x8ce   : > { %v7532_v21 = vpop.eup %7531  ;;  %v3113_v48 = vpop.permute.xlu0 %3112  ;;  %v6572_v50 = vadd.f32 %v6571_v58, %v6570_v13  ;;  %1978 = vst.msk [vmem:[#allocation2 + $0x20] sm:$0xff] %vm290_vm0, %v1962_v33  ;;  %v1936_v34 = vmul.f32 %v7530_v37, %v13445_v26  ;;  %v13448_v37 = vld [vmem:[#allocation146_spill] sm:$0xff]  ;;  %v13450_v26 = vld [vmem:[#allocation51_spill] sm:$0xff] }
 0x8cf   : > { %v7534_v61 = vpop.eup %7533  ;;  %3161 = vst.msk [vmem:[#allocation2] sm:$0xff] %vm3160_vm1, %v3113_v48 }
 0x8d0   : > { %v11783_v59 = vmul.f32 %v7532_v21, %v6572_v50  ;;  %v4252_v25 = vpop.permute.xlu1 %4251  ;;  %v1963_v9 = vpack.c.bf16 %v1937_v43, %v1936_v34  ;;  %v1939_v32 = vmul.f32 %v7534_v61, %v13446_v35  ;;  %v13449_v43 = vld [vmem:[#allocation145_spill] sm:$0xff]  ;;  %v13452_v61 = vpack.c.bf16 %v11419_v24, %v11417_v44  ;;  %v13454_v24 = vld [vmem:[#allocation152_spill] sm:$0xff] }
 0x8d1   : > { %v7536_v10 = vpop.eup %7535  ;;  %4300 = vst.msk [vmem:[#allocation2] sm:$0xff] %vm4299_vm2, %v4252_v25  ;;  %v13451_v34 = vld [vmem:[#allocation53_spill] sm:$0xff]  ;;  %v13453_v25 = vpack.c.bf16 %v11278_v8, %v11275_v57  ;;  %v13456_v8 = vld [vmem:[#allocation54_spill] sm:$0xff] }
 0x8d2   : > { %v5373_v29 = vpack.c.bf16 %v11783_v59, %v11778_v30  ;;  %1979 = vst.msk [vmem:[#allocation2 + $0x28] sm:$0xff] %vm290_vm0, %v1963_v9  ;;  %v1938_v13 = vmul.f32 %v7536_v10, %v13447_v55 }
 0x8d3   : > { %v7538_v33 = vpop.eup %7537 }
 0x8d4   : > { %v1964_v28 = vpack.c.bf16 %v1939_v32, %v1938_v13  ;;  %v1941_v58 = vmul.f32 %v7538_v33, %v13448_v37 }
 0x8d5   : > { %v7540_v50 = vpop.eup %7539 }
 0x8d6   : > { %1980 = vst.msk [vmem:[#allocation2 + $0x30] sm:$0xff] %vm290_vm0, %v1964_v28  ;;  %v1940_v21 = vmul.f32 %v7540_v50, %v13449_v43  ;;  %v13455_v28 = vld [vmem:[#allocation151_spill] sm:$0xff]  ;;  %v13458_v50 = vpack.c.bf16 %v11313_v23, %v11310_v22  ;;  %v13459_v43 = vpack.c.bf16 %v11449_v36, %v11447_v19 }
 0x8d8   : > { %v1965_v48 = vpack.c.bf16 %v1941_v58, %v1940_v21  ;;  %v13457_v58 = vld [vmem:[#allocation56_spill] sm:$0xff]  ;;  %v13460_v21 = vpack.c.bf16 %v11333_v42, %v11330_v62 }
 0x8da   : > { %1981 = vst.msk [vmem:[#allocation2 + $0x38] sm:$0xff] %vm290_vm0, %v1965_v48  ;;  %v13461_v48 = vpack.c.bf16 %v11323_v0, %v11320_v53  ;;  %v13462_v0 = vld [vmem:[#allocation156_spill] sm:$0xff] }
 0x8de   : > { %1666 = vadd.xlane.f32.xlu0 %v13450_v26 }
 0x8e0   : > { %1669 = vadd.xlane.f32.xlu1 %v13451_v34 }
 0x8f1   : > { %5394 = vrot.lane.b32.xlu1 %v13452_v61, %s7583_s14 }
 0x8f4   : > { %4257 = vrot.lane.b32.xlu0 %v13453_v25, %s7584_s15  ;;  %v13463_v25 = vld [vmem:[#allocation157_spill] sm:$0xff] }
 0x8fd   : > { %v1655_v9 = vpop.xlane.xlu0 %1654 }
 0x8fe   : > { %7541 = vrcp.f32 %v1655_v9 }
 0x8ff   : > { %v1658_v35 = vpop.xlane.xlu1 %1657 }
 0x900   : > { %7543 = vrcp.f32 %v1658_v35 }
 0x901   : > { %v4254_v32 = vpop.permute.xlu0 %4253 }
 0x902   : > { %4301 = vst.msk [vmem:[#allocation2 + $0x8] sm:$0xff] %vm4299_vm2, %v4254_v32  ;;  %v13464_v32 = vld [vmem:[#allocation57_spill] sm:$0xff] }
 0x903   : > { %v5391_v10 = vpop.permute.xlu1 %5390 }
 0x904   : > { %5439 = vst.msk [vmem:[#allocation2] sm:$0xff] %vm5438_vm3, %v5391_v10  ;;  %v13465_v10 = vld [vmem:[#allocation28_spill] sm:$0xff] }
 0x908   : > { %v7542_v55 = vpop.eup %7541 }
 0x909   : > { %v1942_v37 = vmul.f32 %v7542_v55, %v13455_v28  ;;  %v13466_v55 = vpack.c.bf16 %v11529_v54, %v11527_v56  ;;  %v13468_v54 = vld [vmem:[#allocation163_spill] sm:$0xff] }
 0x90a   : > { %v7544_v13 = vpop.eup %7543 }
 0x90b   : > { %v5455_v44 = vld [vmem:[#allocation2] sm:$0xff]  ;;  %v1943_v33 = vmul.f32 %v7544_v13, %v13454_v24  ;;  %v13467_v13 = vpack.c.bf16 %v11343_v12, %v11340_v49  ;;  %v13470_v12 = vld [vmem:[#allocation58_spill] sm:$0xff] }
 0x90c   : > { %6649 = vmatprep.mubr.bf16.mxu1 %v5455_v44 }
 0x90d   : > { %v1966_v57 = vpack.c.bf16 %v1943_v33, %v1942_v37 }
 0x90f   : > { %1982 = vst.msk [vmem:[#allocation2 + $0x40] sm:$0xff] %vm290_vm0, %v1966_v57 }
 0x913   : > { %1672 = vadd.xlane.f32.xlu0 %v13456_v8 }
 0x915   : > { %1675 = vadd.xlane.f32.xlu1 %v13457_v58  ;;  %v13469_v58 = vld [vmem:[#allocation162_spill] sm:$0xff] }
 0x926   : > { %3120 = vrot.lane.b32.xlu1 %v13458_v50, %s7582_s13 }
 0x929   : > { %5396 = vrot.lane.b32.xlu0 %v13459_v43, %s7583_s14  ;;  %v13471_v43 = vld [vmem:[#allocation59_spill] sm:$0xff] }
 0x92a   : > { %4259 = vrot.lane.b32.xlu1 %v13460_v21, %s7584_s15  ;;  %v13472_v21 = vpack.c.bf16 %v11396_v45, %v11402_v4 }
 0x92d   : > { %3122 = vrot.lane.b32.xlu0 %v13461_v48, %s7582_s13  ;;  %v13473_v48 = vpack.c.bf16 %v11557_v16, %v11555_v3 }
 0x932   : > { %v1661_v26 = vpop.xlane.xlu0 %1660 }
 0x933   : > { %7545 = vrcp.f32 %v1661_v26  ;;  %v13474_v26 = vpack.c.bf16 %v11424_v47, %v11433_v63 }
 0x934   : > { %v1664_v34 = vpop.xlane.xlu1 %1663 }
 0x935   : > { %7547 = vrcp.f32 %v1664_v34  ;;  %v13475_v34 = vpack.c.bf16 %v11410_v17, %v11415_v39  ;;  %v13476_v39 = vld [vmem:[#allocation167_spill] sm:$0xff] }
 0x936   : > { %v5393_v22 = vpop.permute.xlu0 %5392 }
 0x937   : > { %5440 = vst.msk [vmem:[#allocation2 + $0x8] sm:$0xff] %vm5438_vm3, %v5393_v22 }
 0x938   : > { %v3117_v23 = vpop.permute.xlu1 %3116 }
 0x939   : > { %3163 = vst.msk [vmem:[#allocation2 + $0x10] sm:$0xff] %vm3160_vm1, %v3117_v23 }
 0x93a   : > { %v3119_v19 = vpop.permute.xlu0 %3118 }
 0x93b   : > { %3164 = vst.msk [vmem:[#allocation2 + $0x18] sm:$0xff] %vm3160_vm1, %v3119_v19 }
 0x93c   : > { %v4256_v62 = vpop.permute.xlu1 %4255 }
 0x93d   : > { %v7546_v42 = vpop.eup %7545  ;;  %4302 = vst.msk [vmem:[#allocation2 + $0x10] sm:$0xff] %vm4299_vm2, %v4256_v62  ;;  %v13477_v62 = vld [vmem:[#allocation168_spill] sm:$0xff] }
 0x93e   : > { %v5456_v36 = vld [vmem:[#allocation2 + $0x8] sm:$0xff]  ;;  %v1944_v61 = vmul.f32 %v7546_v42, %v13462_v0  ;;  %v13479_v0 = vld [vmem:[#allocation61_spill] sm:$0xff] }
 0x93f   : > { %v7548_v53 = vpop.eup %7547  ;;  %6650 = vmatmul.mubr.bf16.vlgmr.msra.gmra.mrb[32].mxu1 %v5456_v36 }
 0x940   : > { %v1945_v9 = vmul.f32 %v7548_v53, %v13463_v25  ;;  %v13478_v53 = vld [vmem:[#allocation60_spill] sm:$0xff]  ;;  %v13481_v25 = vld [vmem:[#allocation66_spill] sm:$0xff] }
 0x942   : > { %v1967_v35 = vpack.c.bf16 %v1945_v9, %v1944_v61  ;;  %v13480_v61 = vpack.c.bf16 %v11571_v31, %v11569_v46  ;;  %v13482_v9 = vld [vmem:[#allocation36_spill] sm:$0xff]  ;;  %v13484_v31 = vld [vmem:[#allocation175_spill] sm:$0xff] }
 0x944   : > { %1983 = vst.msk [vmem:[#allocation2 + $0x48] sm:$0xff] %vm290_vm0, %v1967_v35  ;;  %v13483_v35 = vpack.c.bf16 %v13481_v25, %v13482_v9 }
 0x94c   : > { %1678 = vadd.xlane.f32.xlu0 %v13464_v32 }
 0x94e   : > { %1681 = vadd.xlane.f32.xlu1 %v13465_v10 }
 0x95f   : > { %5398 = vrot.lane.b32.xlu1 %v13466_v55, %s7583_s14 }
 0x962   : > { %4261 = vrot.lane.b32.xlu0 %v13467_v13, %s7584_s15 }
 0x96b   : > { %v1667_v44 = vpop.xlane.xlu0 %1666 }
 0x96c   : > { %7549 = vrcp.f32 %v1667_v44 }
 0x96d   : > { %v1670_v24 = vpop.xlane.xlu1 %1669 }
 0x96e   : > { %7551 = vrcp.f32 %v1670_v24 }
 0x96f   : > { %v4258_v33 = vpop.permute.xlu0 %4257 }
 0x970   : > { %4303 = vst.msk [vmem:[#allocation2 + $0x18] sm:$0xff] %vm4299_vm2, %v4258_v33 }
 0x971   : > { %v5395_v28 = vpop.permute.xlu1 %5394 }
 0x972   : > { %5441 = vst.msk [vmem:[#allocation2 + $0x10] sm:$0xff] %vm5438_vm3, %v5395_v28  ;;  %v13485_v28 = vld [vmem:[#allocation173_spill] sm:$0xff] }
 0x976   : > { %v7550_v37 = vpop.eup %7549 }
 0x977   : > { %v1946_v50 = vmul.f32 %v7550_v37, %v13469_v58  ;;  %v13489_v58 = vld [vmem:[#allocation14_spill] sm:$0xff] }
 0x978   : > { %v7552_v57 = vpop.eup %7551 }
 0x979   : > { %v5457_v8 = vld [vmem:[#allocation2 + $0x10] sm:$0xff]  ;;  %v1947_v56 = vmul.f32 %v7552_v57, %v13468_v54  ;;  %v13487_v54 = vld [vmem:[#allocation32_spill] sm:$0xff] }
 0x97a   : > { %6653 = vmatprep.mubr.bf16.mxu1 %v5457_v8  ;;  %v13486_v8 = vld [vmem:[#allocation62_spill] sm:$0xff] }
 0x97b   : > { %v1968_v49 = vpack.c.bf16 %v1947_v56, %v1946_v50  ;;  %v13488_v56 = vld [vmem:[#allocation65_spill] sm:$0xff] }
 0x97c   : > { %v13490_v50 = vpack.c.bf16 %v13488_v56, %v13489_v58  ;;  %v13521_v58 = vld [vmem:[#allocation177_spill] sm:$0xff] }
 0x97d   : > { %1984 = vst.msk [vmem:[#allocation2 + $0x50] sm:$0xff] %vm290_vm0, %v1968_v49  ;;  %v13491_v49 = vpack.c.bf16 %v11601_v51, %v11599_v2 }
 0x981   : > { %1684 = vadd.xlane.f32.xlu0 %v13470_v12  ;;  %v13492_v12 = vld [vmem:[#allocation13_spill] sm:$0xff] }
 0x983   : > { %1687 = vadd.xlane.f32.xlu1 %v13471_v43  ;;  %v13493_v43 = vld [vmem:[#allocation186_spill] sm:$0xff] }
 0x994   : > { %3124 = vrot.lane.b32.xlu1 %v13472_v21, %s7582_s13  ;;  %v13494_v21 = vpack.c.bf16 %v13492_v12, %v13493_v43  ;;  %v13523_v43 = vld [vmem:[#allocation206_spill] sm:$0xff] }
 0x997   : > { %5400 = vrot.lane.b32.xlu0 %v13473_v48, %s7583_s14  ;;  %v13495_v48 = vld [vmem:[#allocation5_spill] sm:$0xff] }
 0x998   : > { %4263 = vrot.lane.b32.xlu1 %v13474_v26, %s7584_s15  ;;  %v13496_v26 = vld [vmem:[#allocation6_spill] sm:$0xff] }
 0x99b   : > { %3126 = vrot.lane.b32.xlu0 %v13475_v34, %s7582_s13  ;;  %v13497_v34 = vpack.c.bf16 %v13495_v48, %v13496_v26  ;;  %v13525_v48 = vld [vmem:[#allocation93_spill] sm:$0xff]  ;;  %v13526_v26 = vld [vmem:[#allocation92_spill] sm:$0xff] }
 0x9a0   : > { %v1673_v22 = vpop.xlane.xlu0 %1672 }
 0x9a1   : > { %7553 = vrcp.f32 %v1673_v22  ;;  %v13498_v22 = vpack.c.bf16 %v11635_v41, %v11633_v20  ;;  %v13505_v20 = vld [vmem:[#allocation94_spill] sm:$0xff] }
 0x9a2   : > { %v1676_v23 = vpop.xlane.xlu1 %1675  ;;  %v13506_v41 = vld [vmem:[#allocation98_spill] sm:$0xff] }
 0x9a3   : > { %7555 = vrcp.f32 %v1676_v23  ;;  %v13499_v23 = vld [vmem:[#allocation187_spill] sm:$0xff] }
 0x9a4   : > { %v5397_v45 = vpop.permute.xlu0 %5396 }
 0x9a5   : > { %5442 = vst.msk [vmem:[#allocation2 + $0x18] sm:$0xff] %vm5438_vm3, %v5397_v45  ;;  %v13500_v45 = vld [vmem:[#allocation184_spill] sm:$0xff] }
 0x9a6   : > { %v3121_v4 = vpop.permute.xlu1 %3120  ;;  %v13501_v2 = vpack.c.bf16 %v13499_v23, %v13500_v45  ;;  %v13528_v23 = vld [vmem:[#allocation219_spill] sm:$0xff] }
 0x9a7   : > { %3165 = vst.msk [vmem:[#allocation2 + $0x20] sm:$0xff] %vm3160_vm1, %v3121_v4  ;;  %v13502_v4 = vld [vmem:[#allocation185_spill] sm:$0xff]  ;;  %v13529_v45 = vld [vmem:[#allocation215_spill] sm:$0xff] }
 0x9a8   : > { %v3123_v3 = vpop.permute.xlu0 %3122 }
 0x9a9   : > { %3166 = vst.msk [vmem:[#allocation2 + $0x28] sm:$0xff] %vm3160_vm1, %v3123_v3  ;;  %v13503_v3 = vld [vmem:[#allocation200_spill] sm:$0xff] }
 0x9aa   : > { %v4260_v47 = vpop.permute.xlu1 %4259 }
 0x9ab   : > { %v7554_v63 = vpop.eup %7553  ;;  %4304 = vst.msk [vmem:[#allocation2 + $0x20] sm:$0xff] %vm4299_vm2, %v4260_v47  ;;  %v13504_v47 = vpack.c.bf16 %v13502_v4, %v13503_v3  ;;  %v13534_v3 = vld [vmem:[#allocation131_spill] sm:$0xff] }
 0x9ac   : > { %v5458_v16 = vld [vmem:[#allocation2 + $0x18] sm:$0xff]  ;;  %v1948_v19 = vmul.f32 %v7554_v63, %v13476_v39 }
 0x9ad   : > { %v7556_v17 = vpop.eup %7555  ;;  %6654 = vmatmul.mubr.bf16.gmra.mrb[36].mxu1 %v5458_v16  ;;  %v11923_v16 = vld [vmem:[%s12147_s4] ss:$0 sm:$0xff] }
 0x9ae   : > { %v1949_v42 = vmul.f32 %v7556_v17, %v13477_v62  ;;  %v13507_v17 = vpack.c.bf16 %v13505_v20, %v13506_v41  ;;  %v13508_v62 = vld [vmem:[#allocation22_spill] sm:$0xff]  ;;  %v13538_v41 = vld [vmem:[#allocation199_spill] sm:$0xff] }
 0x9af   : > { %v13537_v20 = vld [vmem:[#allocation198_spill] sm:$0xff] }
 0x9b0   : > { %v1969_v36 = vpack.c.bf16 %v1949_v42, %v1948_v19  ;;  %v13509_v42 = vld [vmem:[#allocation86_spill] sm:$0xff]  ;;  %v13539_v7 = vpack.c.bf16 %v13537_v20, %v13538_v41 }
 0x9b2   : > { %1985 = vst.msk [vmem:[#allocation2 + $0x58] sm:$0xff] %vm290_vm0, %v1969_v36  ;;  %v13510_v36 = vpack.c.bf16 %v13508_v62, %v13509_v42 }
 0x9ba   : > { %1690 = vadd.xlane.f32.xlu0 %v13478_v53 }
 0x9bc   : > { %1693 = vadd.xlane.f32.xlu1 %v13479_v0 }
 0x9cd   : > { %5402 = vrot.lane.b32.xlu1 %v13480_v61, %s7583_s14 }
 0x9d0   : > { %4265 = vrot.lane.b32.xlu0 %v13483_v35, %s7584_s15 }
 0x9d9   : > { %v1679_v32 = vpop.xlane.xlu0 %1678 }
 0x9da   : > { %7557 = vrcp.f32 %v1679_v32  ;;  %v13511_v32 = vld [vmem:[#allocation201_spill] sm:$0xff] }
 0x9db   : > { %v1682_v10 = vpop.xlane.xlu1 %1681 }
 0x9dc   : > { %7559 = vrcp.f32 %v1682_v10  ;;  %v13512_v10 = vld [vmem:[#allocation204_spill] sm:$0xff] }
 0x9dd   : > { %v4262_v55 = vpop.permute.xlu0 %4261 }
 0x9de   : > { %4305 = vst.msk [vmem:[#allocation2 + $0x28] sm:$0xff] %vm4299_vm2, %v4262_v55  ;;  %v13513_v55 = vpack.c.bf16 %v13511_v32, %v13512_v10 }
 0x9df   : > { %v5399_v13 = vpop.permute.xlu1 %5398 }
 0x9e0   : > { %5443 = vst.msk [vmem:[#allocation2 + $0x20] sm:$0xff] %vm5438_vm3, %v5399_v13 }
 0x9e4   : > { %v7558_v44 = vpop.eup %7557 }
 0x9e5   : > { %v1950_v37 = vmul.f32 %v7558_v44, %v13485_v28  ;;  %v13515_v28 = vld [vmem:[#allocation23_spill] sm:$0xff] }
 0x9e6   : > { %v7560_v24 = vpop.eup %7559 }
 0x9e7   : > { %v5459_v33 = vld [vmem:[#allocation2 + $0x20] sm:$0xff]  ;;  %v1951_v46 = vmul.f32 %v7560_v24, %v13484_v31 }
 0x9e8   : > { %6657 = vmatprep.mubr.bf16.mxu1 %v5459_v33  ;;  %v13514_v33 = vpack.c.bf16 %v11667_v15, %v11665_v1  ;;  %v13519_v1 = vld [vmem:[#allocation202_spill] sm:$0xff] }
 0x9e9   : > { %v1970_v57 = vpack.c.bf16 %v1951_v46, %v1950_v37  ;;  %v13516_v37 = vld [vmem:[#allocation89_spill] sm:$0xff] }
 0x9eb   : > { %1986 = vst.msk [vmem:[#allocation2 + $0x60] sm:$0xff] %vm290_vm0, %v1970_v57  ;;  %v13517_v57 = vpack.c.bf16 %v13515_v28, %v13516_v37 }
 0x9ef   : > { %1696 = vadd.xlane.f32.xlu0 %v13486_v8 }
 0x9f1   : > { %1699 = vadd.xlane.f32.xlu1 %v13487_v54  ;;  %v13518_v54 = vld [vmem:[#allocation203_spill] sm:$0xff] }
 0x9f2   : > { %v13520_v15 = vpack.c.bf16 %v13518_v54, %v13519_v1  ;;  %v13548_v1 = vld [vmem:[#allocation183_spill] sm:$0xff] }
 0xa02   : > { %3128 = vrot.lane.b32.xlu1 %v13490_v50, %s7582_s13 }
 0xa05   : > { %5404 = vrot.lane.b32.xlu0 %v13491_v49, %s7583_s14  ;;  %v13522_v49 = vld [vmem:[#allocation178_spill] sm:$0xff] }
 0xa06   : > { %4267 = vrot.lane.b32.xlu1 %v13494_v21, %s7584_s15  ;;  %v13524_v21 = vpack.c.bf16 %v11699_v11, %v13523_v43  ;;  %v13531_v11 = vld [vmem:[#allocation96_spill] sm:$0xff] }
 0xa09   : > { %3130 = vrot.lane.b32.xlu0 %v13497_v34, %s7582_s13  ;;  %v13527_v34 = vpack.c.bf16 %v13525_v48, %v13526_v26 }
 0xa0a   : > { %5406 = vrot.lane.b32.xlu1 %v13498_v22, %s7583_s14 }
 0xa0d   : > { %4269 = vrot.lane.b32.xlu0 %v13501_v2, %s7584_s15  ;;  %v13530_v2 = vpack.c.bf16 %v13528_v23, %v13529_v45 }
 0xa0e   : > { %v1685_v51 = vpop.xlane.xlu0 %1684  ;;  %3132 = vrot.lane.b32.xlu1 %v13504_v47, %s7582_s13  ;;  %v13535_v47 = vld [vmem:[#allocation55_spill] sm:$0xff] }
 0xa0f   : > { %7561 = vrcp.f32 %v1685_v51  ;;  %v13532_v51 = vld [vmem:[#allocation95_spill] sm:$0xff] }
 0xa10   : > { %v1688_v63 = vpop.xlane.xlu1 %1687  ;;  %v13533_v4 = vpack.c.bf16 %v13531_v11, %v13532_v51 }
 0xa11   : > { %5408 = vrot.lane.b32.xlu0 %v13507_v17, %s7583_s14  ;;  %7563 = vrcp.f32 %v1688_v63  ;;  %v13536_v63 = vpack.c.bf16 %v13534_v3, %v13535_v47 }
 0xa12   : > { %v6651_v39 = vpop.f32.mrb[32].mxu1  ;;  %v5401_v19 = vpop.permute.xlu0 %5400  ;;  %4271 = vrot.lane.b32.xlu1 %v13510_v36, %s7584_s15  ;;  %v13546_v36 = vld [vmem:[#allocation181_spill] sm:$0xff] }
 0xa13   : > { %v5585_v53 = vadd.f32 %v6651_v39, %v11923_v16  ;;  %5444 = vst.msk [vmem:[#allocation2 + $0x28] sm:$0xff] %vm5438_vm3, %v5401_v19  ;;  %v5576_v0 = vpop.f32.mrb[33].mxu1  ;;  %v13543_v39 = vpack.c.bf16 %v11769_v40, %v11765_v60 }
 0xa14   : > { %v5577_v61 = vadd.f32 %v11923_v16, %v5576_v0  ;;  %v6652_v25 = vpop.f32.mrb[34].mxu1  ;;  %v3125_v9 = vpop.permute.xlu1 %3124 }
 0xa15   : > { %5705 = vst.msk [vmem:[%s11934_s17 + $0x10] sm:$0xff] %vm290_vm0, %v5585_v53  ;;  %v5588_v35 = vadd.f32 %v6652_v25, %v11923_v16  ;;  %3134 = vrot.lane.b32.xlu0 %v13513_v55, %s7582_s13  ;;  %v5579_v13 = vpop.f32.mrb[35].mxu1 }
 0xa16   : > { %3167 = vst.msk [vmem:[#allocation2 + $0x30] sm:$0xff] %vm3160_vm1, %v3125_v9  ;;  %v5580_v44 = vadd.f32 %v11923_v16, %v5579_v13  ;;  %v3127_v24 = vpop.permute.xlu0 %3126  ;;  %5410 = vrot.lane.b32.xlu1 %v13514_v33, %s7583_s14 }
 0xa17   : > { %5703 = vst.msk [vmem:[%s11934_s17] sm:$0xff] %vm290_vm0, %v5577_v61  ;;  %5706 = vst.msk [vmem:[%s11934_s17 + $0x18] sm:$0xff] %vm290_vm0, %v5588_v35 }
 0xa18   : > { %3168 = vst.msk [vmem:[#allocation2 + $0x38] sm:$0xff] %vm3160_vm1, %v3127_v24  ;;  %v4264_v31 = vpop.permute.xlu1 %4263 }
 0xa19   : > { %5704 = vst.msk [vmem:[%s11934_s17 + $0x8] sm:$0xff] %vm290_vm0, %v5580_v44  ;;  %v7562_v46 = vpop.eup %7561  ;;  %4273 = vrot.lane.b32.xlu0 %v13517_v57, %s7584_s15 }
 0xa1a   : > { %4306 = vst.msk [vmem:[#allocation2 + $0x30] sm:$0xff] %vm4299_vm2, %v4264_v31  ;;  %v5460_v8 = vld [vmem:[#allocation2 + $0x28] sm:$0xff]  ;;  %3136 = vrot.lane.b32.xlu1 %v13520_v15, %s7582_s13  ;;  %v1952_v50 = vmul.f32 %v7562_v46, %v13521_v58 }
 0xa1b   : > { %v7564_v56 = vpop.eup %7563  ;;  %6658 = vmatmul.mubr.bf16.gmra.mrb[40].mxu1 %v5460_v8  ;;  %v13547_v8 = vld [vmem:[#allocation30_spill] sm:$0xff] }
 0xa1c   : > { %v1953_v12 = vmul.f32 %v7564_v56, %v13522_v49 }
 0xa1d   : > { %5412 = vrot.lane.b32.xlu0 %v13524_v21, %s7583_s14 }
 0xa1e   : > { %4275 = vrot.lane.b32.xlu1 %v13527_v34, %s7584_s15  ;;  %v1971_v22 = vpack.c.bf16 %v1953_v12, %v1952_v50 }
 0xa20   : > { %1987 = vst.msk [vmem:[#allocation2 + $0x68] sm:$0xff] %vm290_vm0, %v1971_v22 }
 0xa21   : > { %3138 = vrot.lane.b32.xlu0 %v13530_v2, %s7582_s13 }
 0xa22   : > { %5414 = vrot.lane.b32.xlu1 %v5370_v14, %s7583_s14  ;;  %v13541_v14 = vld [vmem:[#allocation139_spill] sm:$0xff] }
 0xa23   : > { %v13542_v17 = vpack.c.bf16 %v13540_v18, %v13541_v14 }
 0xa25   : > { %4277 = vrot.lane.b32.xlu0 %v13533_v4, %s7584_s15 }
 0xa26   : > { %3140 = vrot.lane.b32.xlu1 %v13536_v63, %s7582_s13 }
 0xa29   : > { %5416 = vrot.lane.b32.xlu0 %v5371_v52, %s7583_s14 }
 0xa2a   : > { %4279 = vrot.lane.b32.xlu1 %v13539_v7, %s7584_s15 }
 0xa2d   : > { %3142 = vrot.lane.b32.xlu0 %v13542_v17, %s7582_s13 }
 0xa2e   : > { %5418 = vrot.lane.b32.xlu1 %v13543_v39, %s7583_s14 }
 0xa31   : > { %4281 = vrot.lane.b32.xlu0 %v13544_v5, %s7584_s15 }
 0xa35   : > { %5420 = vrot.lane.b32.xlu0 %v5373_v29, %s7583_s14 }
 0xa47   : > { %v1691_v38 = vpop.xlane.xlu0 %1690 }
 0xa48   : > { %7565 = vrcp.f32 %v1691_v38 }
 0xa49   : > { %v1694_v52 = vpop.xlane.xlu1 %1693 }
 0xa4a   : > { %7567 = vrcp.f32 %v1694_v52 }
 0xa4b   : > { %v4266_v19 = vpop.permute.xlu0 %4265 }
 0xa4c   : > { %4307 = vst.msk [vmem:[#allocation2 + $0x38] sm:$0xff] %vm4299_vm2, %v4266_v19 }
 0xa4d   : > { %v5403_v62 = vpop.permute.xlu1 %5402 }
 0xa4e   : > { %5445 = vst.msk [vmem:[#allocation2 + $0x30] sm:$0xff] %vm5438_vm3, %v5403_v62 }
 0xa52   : > { %v7566_v60 = vpop.eup %7565 }
 0xa53   : > { %v1954_v53 = vmul.f32 %v7566_v60, %v13546_v36 }
 0xa54   : > { %v7568_v40 = vpop.eup %7567 }
 0xa55   : > { %v5461_v42 = vld [vmem:[#allocation2 + $0x30] sm:$0xff]  ;;  %v1955_v6 = vmul.f32 %v7568_v40, %v13545_v27 }
 0xa56   : > { %6661 = vmatprep.mubr.bf16.mxu1 %v5461_v42 }
 0xa57   : > { %v1972_v30 = vpack.c.bf16 %v1955_v6, %v1954_v53 }
 0xa59   : > { %1988 = vst.msk [vmem:[#allocation2 + $0x70] sm:$0xff] %vm290_vm0, %v1972_v30 }
 0xa7c   : > { %v1697_v59 = vpop.xlane.xlu0 %1696 }
 0xa7d   : > { %7569 = vrcp.f32 %v1697_v59 }
 0xa7e   : > { %v1700_v29 = vpop.xlane.xlu1 %1699 }
 0xa7f   : > { %7571 = vrcp.f32 %v1700_v29 }
 0xa80   : > { %v6655_v0 = vpop.f32.mrb[36].mxu1  ;;  %v5405_v61 = vpop.permute.xlu0 %5404 }
 0xa81   : > { %v5601_v25 = vadd.f32 %v6655_v0, %v11923_v16  ;;  %5446 = vst.msk [vmem:[#allocation2 + $0x38] sm:$0xff] %vm5438_vm3, %v5405_v61  ;;  %v5592_v9 = vpop.f32.mrb[37].mxu1 }
 0xa82   : > { %v5593_v35 = vadd.f32 %v11923_v16, %v5592_v9  ;;  %v6656_v32 = vpop.f32.mrb[38].mxu1  ;;  %v3129_v10 = vpop.permute.xlu1 %3128 }
 0xa83   : > { %5709 = vst.msk [vmem:[%s11934_s17 + $0x30] sm:$0xff] %vm290_vm0, %v5601_v25  ;;  %v5604_v55 = vadd.f32 %v6656_v32, %v11923_v16  ;;  %v5595_v13 = vpop.f32.mrb[39].mxu1 }
 0xa84   : > { %3169 = vst.msk [vmem:[#allocation2 + $0x40] sm:$0xff] %vm3160_vm1, %v3129_v10  ;;  %v5596_v44 = vadd.f32 %v11923_v16, %v5595_v13  ;;  %v3131_v24 = vpop.permute.xlu0 %3130 }
 0xa85   : > { %5707 = vst.msk [vmem:[%s11934_s17 + $0x20] sm:$0xff] %vm290_vm0, %v5593_v35  ;;  %5710 = vst.msk [vmem:[%s11934_s17 + $0x38] sm:$0xff] %vm290_vm0, %v5604_v55 }
 0xa86   : > { %3170 = vst.msk [vmem:[#allocation2 + $0x48] sm:$0xff] %vm3160_vm1, %v3131_v24  ;;  %v4268_v33 = vpop.permute.xlu1 %4267 }
 0xa87   : > { %5708 = vst.msk [vmem:[%s11934_s17 + $0x28] sm:$0xff] %vm290_vm0, %v5596_v44  ;;  %v7570_v31 = vpop.eup %7569 }
 0xa88   : > { %4308 = vst.msk [vmem:[#allocation2 + $0x40] sm:$0xff] %vm4299_vm2, %v4268_v33  ;;  %v4270_v46 = vpop.permute.xlu0 %4269  ;;  %v5462_v28 = vld [vmem:[#allocation2 + $0x38] sm:$0xff]  ;;  %v1956_v54 = vmul.f32 %v7570_v31, %v13547_v8 }
 0xa89   : > { %v7572_v37 = vpop.eup %7571  ;;  %4309 = vst.msk [vmem:[#allocation2 + $0x48] sm:$0xff] %vm4299_vm2, %v4270_v46  ;;  %6662 = vmatmul.mubr.bf16.gmra.mrb[44].mxu1 %v5462_v28 }
 0xa8a   : > { %v5407_v57 = vpop.permute.xlu1 %5406  ;;  %v1957_v15 = vmul.f32 %v7572_v37, %v13548_v1 }
 0xa8b   : > { %5447 = vst.msk [vmem:[#allocation2 + $0x40] sm:$0xff] %vm5438_vm3, %v5407_v57 }
 0xa8c   : > { %v5409_v56 = vpop.permute.xlu0 %5408  ;;  %v1973_v58 = vpack.c.bf16 %v1957_v15, %v1956_v54 }
 0xa8d   : > { %5448 = vst.msk [vmem:[#allocation2 + $0x48] sm:$0xff] %vm5438_vm3, %v5409_v56 }
 0xa8e   : > { %v3133_v50 = vpop.permute.xlu1 %3132  ;;  %1989 = vst.msk [vmem:[#allocation2 + $0x78] sm:$0xff] %vm290_vm0, %v1973_v58 }
 0xa8f   : > { %3171 = vst.msk [vmem:[#allocation2 + $0x50] sm:$0xff] %vm3160_vm1, %v3133_v50 }
 0xa90   : > { %v3135_v49 = vpop.permute.xlu0 %3134 }
 0xa91   : > { %3172 = vst.msk [vmem:[#allocation2 + $0x58] sm:$0xff] %vm3160_vm1, %v3135_v49 }
 0xa92   : > { %v4272_v12 = vpop.permute.xlu1 %4271  ;;  %v5463_v43 = vld [vmem:[#allocation2 + $0x40] sm:$0xff] }
 0xa93   : > { %4310 = vst.msk [vmem:[#allocation2 + $0x50] sm:$0xff] %vm4299_vm2, %v4272_v12  ;;  %6665 = vmatprep.mubr.bf16.mxu1 %v5463_v43 }
 0xa94   : > { %v4274_v21 = vpop.permute.xlu0 %4273  ;;  %v5464_v48 = vld [vmem:[#allocation2 + $0x48] sm:$0xff] }
 0xa95   : > { %4311 = vst.msk [vmem:[#allocation2 + $0x58] sm:$0xff] %vm4299_vm2, %v4274_v21  ;;  %6666 = vmatmul.mubr.bf16.gmra.mrb[48].mxu1 %v5464_v48 }
 0xa96   : > { %v5411_v26 = vpop.permute.xlu1 %5410 }
 0xa97   : > { %5449 = vst.msk [vmem:[#allocation2 + $0x50] sm:$0xff] %vm5438_vm3, %v5411_v26 }
 0xa98   : > { %v5413_v34 = vpop.permute.xlu0 %5412 }
 0xa99   : > { %5450 = vst.msk [vmem:[#allocation2 + $0x58] sm:$0xff] %vm5438_vm3, %v5413_v34 }
 0xa9a   : > { %v3137_v22 = vpop.permute.xlu1 %3136 }
 0xa9b   : > { %3173 = vst.msk [vmem:[#allocation2 + $0x60] sm:$0xff] %vm3160_vm1, %v3137_v22 }
 0xa9c   : > { %v3139_v23 = vpop.permute.xlu0 %3138 }
 0xa9d   : > { %3174 = vst.msk [vmem:[#allocation2 + $0x68] sm:$0xff] %vm3160_vm1, %v3139_v23 }
 0xa9e   : > { %v4276_v45 = vpop.permute.xlu1 %4275  ;;  %v5465_v2 = vld [vmem:[#allocation2 + $0x50] sm:$0xff] }
 0xa9f   : > { %4312 = vst.msk [vmem:[#allocation2 + $0x60] sm:$0xff] %vm4299_vm2, %v4276_v45  ;;  %6669 = vmatprep.mubr.bf16.mxu1 %v5465_v2 }
 0xaa0   : > { %v4278_v11 = vpop.permute.xlu0 %4277  ;;  %v5466_v51 = vld [vmem:[#allocation2 + $0x58] sm:$0xff] }
 0xaa1   : > { %4313 = vst.msk [vmem:[#allocation2 + $0x68] sm:$0xff] %vm4299_vm2, %v4278_v11  ;;  %6670 = vmatmul.mubr.bf16.gmra.mrb[52].mxu1 %v5466_v51 }
 0xaa2   : > { %v5415_v4 = vpop.permute.xlu1 %5414 }
 0xaa3   : > { %5451 = vst.msk [vmem:[#allocation2 + $0x60] sm:$0xff] %vm5438_vm3, %v5415_v4 }
 0xaa4   : > { %v5417_v3 = vpop.permute.xlu0 %5416 }
 0xaa5   : > { %5452 = vst.msk [vmem:[#allocation2 + $0x68] sm:$0xff] %vm5438_vm3, %v5417_v3 }
 0xaa6   : > { %v3141_v47 = vpop.permute.xlu1 %3140 }
 0xaa7   : > { %3175 = vst.msk [vmem:[#allocation2 + $0x70] sm:$0xff] %vm3160_vm1, %v3141_v47 }
 0xaa8   : > { %v3143_v63 = vpop.permute.xlu0 %3142 }
 0xaa9   : > { %3176 = vst.msk [vmem:[#allocation2 + $0x78] sm:$0xff] %vm3160_vm1, %v3143_v63 }
 0xaaa   : > { %v4280_v20 = vpop.permute.xlu1 %4279  ;;  %v5467_v41 = vld [vmem:[#allocation2 + $0x60] sm:$0xff] }
 0xaab   : > { %4314 = vst.msk [vmem:[#allocation2 + $0x70] sm:$0xff] %vm4299_vm2, %v4280_v20  ;;  %6673 = vmatprep.mubr.bf16.mxu1 %v5467_v41 }
 0xaac   : > { %v4282_v7 = vpop.permute.xlu0 %4281  ;;  %v5468_v18 = vld [vmem:[#allocation2 + $0x68] sm:$0xff] }
 0xaad   : > { %4315 = vst.msk [vmem:[#allocation2 + $0x78] sm:$0xff] %vm4299_vm2, %v4282_v7  ;;  %6674 = vmatmul.mubr.bf16.gmra.mrb[56].mxu1 %v5468_v18 }
 0xaae   : > { %v5419_v14 = vpop.permute.xlu1 %5418 }
 0xaaf   : > { %5453 = vst.msk [vmem:[#allocation2 + $0x70] sm:$0xff] %vm5438_vm3, %v5419_v14 }
 0xab0   : > { %v5421_v17 = vpop.permute.xlu0 %5420 }
 0xab1   : > { %5454 = vst.msk [vmem:[#allocation2 + $0x78] sm:$0xff] %vm5438_vm3, %v5421_v17 }
 0xab6   : > { %v5469_v39 = vld [vmem:[#allocation2 + $0x70] sm:$0xff] }
 0xab7   : > { %6677 = vmatprep.mubr.bf16.mxu1 %v5469_v39 }
 0xab8   : > { %v5470_v5 = vld [vmem:[#allocation2 + $0x78] sm:$0xff] }
 0xab9   : > { %6678 = vmatmul.mubr.bf16.gmra.mrb[60].mxu1 %v5470_v5 }
 0xaee   : > { %v6659_v38 = vpop.f32.mrb[40].mxu1 }
 0xaef   : > { %v5617_v52 = vadd.f32 %v6659_v38, %v11923_v16  ;;  %v5608_v19 = vpop.f32.mrb[41].mxu1 }
 0xaf0   : > { %v5609_v62 = vadd.f32 %v11923_v16, %v5608_v19  ;;  %v6660_v60 = vpop.f32.mrb[42].mxu1 }
 0xaf1   : > { %5713 = vst.msk [vmem:[%s11934_s17 + $0x50] sm:$0xff] %vm290_vm0, %v5617_v52  ;;  %v5620_v40 = vadd.f32 %v6660_v60, %v11923_v16  ;;  %v5611_v42 = vpop.f32.mrb[43].mxu1 }
 0xaf2   : > { %5711 = vst.msk [vmem:[%s11934_s17 + $0x40] sm:$0xff] %vm290_vm0, %v5609_v62  ;;  %v5612_v27 = vadd.f32 %v11923_v16, %v5611_v42 }
 0xaf3   : > { %5714 = vst.msk [vmem:[%s11934_s17 + $0x58] sm:$0xff] %vm290_vm0, %v5620_v40 }
 0xaf4   : > { %5712 = vst.msk [vmem:[%s11934_s17 + $0x48] sm:$0xff] %vm290_vm0, %v5612_v27 }
 0xb5c   : > { %v6663_v6 = vpop.f32.mrb[44].mxu1 }
 0xb5d   : > { %v5633_v36 = vadd.f32 %v6663_v6, %v11923_v16  ;;  %v5624_v53 = vpop.f32.mrb[45].mxu1 }
 0xb5e   : > { %v5625_v30 = vadd.f32 %v11923_v16, %v5624_v53  ;;  %v6664_v59 = vpop.f32.mrb[46].mxu1 }
 0xb5f   : > { %5717 = vst.msk [vmem:[%s11934_s17 + $0x70] sm:$0xff] %vm290_vm0, %v5633_v36  ;;  %v5636_v29 = vadd.f32 %v6664_v59, %v11923_v16  ;;  %v5627_v0 = vpop.f32.mrb[47].mxu1 }
 0xb60   : > { %5715 = vst.msk [vmem:[%s11934_s17 + $0x60] sm:$0xff] %vm290_vm0, %v5625_v30  ;;  %v5628_v61 = vadd.f32 %v11923_v16, %v5627_v0 }
 0xb61   : > { %5718 = vst.msk [vmem:[%s11934_s17 + $0x78] sm:$0xff] %vm290_vm0, %v5636_v29 }
 0xb62   : > { %5716 = vst.msk [vmem:[%s11934_s17 + $0x68] sm:$0xff] %vm290_vm0, %v5628_v61 }
 0xb68   : > { %v6667_v25 = vpop.f32.mrb[48].mxu1 }
 0xb69   : > { %v5649_v9 = vadd.f32 %v6667_v25, %v11923_v16  ;;  %v5640_v35 = vpop.f32.mrb[49].mxu1 }
 0xb6a   : > { %v5641_v32 = vadd.f32 %v11923_v16, %v5640_v35  ;;  %v6668_v10 = vpop.f32.mrb[50].mxu1 }
 0xb6b   : > { %5721 = vst.msk [vmem:[%s11934_s17 + $0x90] sm:$0xff] %vm290_vm0, %v5649_v9  ;;  %v5652_v55 = vadd.f32 %v6668_v10, %v11923_v16  ;;  %v5643_v13 = vpop.f32.mrb[51].mxu1 }
 0xb6c   : > { %5719 = vst.msk [vmem:[%s11934_s17 + $0x80] sm:$0xff] %vm290_vm0, %v5641_v32  ;;  %v5644_v44 = vadd.f32 %v11923_v16, %v5643_v13 }
 0xb6d   : > { %5722 = vst.msk [vmem:[%s11934_s17 + $0x98] sm:$0xff] %vm290_vm0, %v5652_v55 }
 0xb6e   : > { %5720 = vst.msk [vmem:[%s11934_s17 + $0x88] sm:$0xff] %vm290_vm0, %v5644_v44 }
 0xb74   : > { %v6671_v24 = vpop.f32.mrb[52].mxu1 }
 0xb75   : > { %v5665_v33 = vadd.f32 %v6671_v24, %v11923_v16  ;;  %v5656_v31 = vpop.f32.mrb[53].mxu1 }
 0xb76   : > { %v5657_v46 = vadd.f32 %v11923_v16, %v5656_v31  ;;  %v6672_v28 = vpop.f32.mrb[54].mxu1 }
 0xb77   : > { %5725 = vst.msk [vmem:[%s11934_s17 + $0xb0] sm:$0xff] %vm290_vm0, %v5665_v33  ;;  %v5668_v37 = vadd.f32 %v6672_v28, %v11923_v16  ;;  %v5659_v57 = vpop.f32.mrb[55].mxu1 }
 0xb78   : > { %5723 = vst.msk [vmem:[%s11934_s17 + $0xa0] sm:$0xff] %vm290_vm0, %v5657_v46  ;;  %v5660_v8 = vadd.f32 %v11923_v16, %v5659_v57 }
 0xb79   : > { %5726 = vst.msk [vmem:[%s11934_s17 + $0xb8] sm:$0xff] %vm290_vm0, %v5668_v37 }
 0xb7a   : > { %5724 = vst.msk [vmem:[%s11934_s17 + $0xa8] sm:$0xff] %vm290_vm0, %v5660_v8 }
 0xb80   : > { %v6675_v54 = vpop.f32.mrb[56].mxu1 }
 0xb81   : > { %v5681_v1 = vadd.f32 %v6675_v54, %v11923_v16  ;;  %v5672_v15 = vpop.f32.mrb[57].mxu1 }
 0xb82   : > { %v5673_v56 = vadd.f32 %v11923_v16, %v5672_v15  ;;  %v6676_v58 = vpop.f32.mrb[58].mxu1 }
 0xb83   : > { %5729 = vst.msk [vmem:[%s11934_s17 + $0xd0] sm:$0xff] %vm290_vm0, %v5681_v1  ;;  %v5684_v50 = vadd.f32 %v6676_v58, %v11923_v16  ;;  %v5675_v49 = vpop.f32.mrb[59].mxu1 }
 0xb84   : > { %5727 = vst.msk [vmem:[%s11934_s17 + $0xc0] sm:$0xff] %vm290_vm0, %v5673_v56  ;;  %v5676_v12 = vadd.f32 %v11923_v16, %v5675_v49 }
 0xb85   : > { %5730 = vst.msk [vmem:[%s11934_s17 + $0xd8] sm:$0xff] %vm290_vm0, %v5684_v50 }
 0xb86   : > { %5728 = vst.msk [vmem:[%s11934_s17 + $0xc8] sm:$0xff] %vm290_vm0, %v5676_v12 }
 0xb8c   : > { %v6679_v43 = vpop.f32.mrb[60].mxu1 }
 0xb8d   : > { %v5697_v21 = vadd.f32 %v6679_v43, %v11923_v16  ;;  %v5688_v48 = vpop.f32.mrb[61].mxu1 }
 0xb8e   : > { %v5689_v26 = vadd.f32 %v11923_v16, %v5688_v48  ;;  %v6680_v34 = vpop.f32.mrb[62].mxu1 }
 0xb8f   : > { %5733 = vst.msk [vmem:[%s11934_s17 + $0xf0] sm:$0xff] %vm290_vm0, %v5697_v21  ;;  %v5700_v22 = vadd.f32 %v6680_v34, %v11923_v16  ;;  %v5691_v23 = vpop.f32.mrb[63].mxu1 }
 0xb90   : > { %5731 = vst.msk [vmem:[%s11934_s17 + $0xe0] sm:$0xff] %vm290_vm0, %v5689_v26  ;;  %v5692_v45 = vadd.f32 %v11923_v16, %v5691_v23 }
 0xb91   : > { %5734 = vst.msk [vmem:[%s11934_s17 + $0xf8] sm:$0xff] %vm290_vm0, %v5700_v22 }
 0xb92   : > { %5732 = vst.msk [vmem:[%s11934_s17 + $0xe8] sm:$0xff] %vm290_vm0, %v5692_v45 }
 0xb93 PF: > { %s15_s18 = sadd.s32 1, %s7579_s18  }
 0xb94   : > { %p12_p4 = scmp.ge.s32.totalorder %s15_s18, 4  }
 0xb96   :  { %14 = sbr.rel (!%p12_p4) target bundleno = 1 (0x1), region = 70 }

</bundles_post_ra>
